<compile_context>
chip_gen: v6e
topology: v6e:2x2x1
jax: 0.10.0
libtpu: 0.0.40
codegen_flags: <defaults>
</compile_context>

<pallas_src>
import numpy as np
import jax
import jax.numpy as jnp
from jax.experimental import pallas as pl
from jax.experimental.pallas import tpu as pltpu

VOXEL_SIZE = (3.0, 3.0, 1.0)
PC_RANGE = (346.0, 260.0, 200.0)

# Tile sizes.  TP = point tile (MXU contraction dim), TV = voxel tile.
# 512x512 keeps the materialized one-hot at 1 MiB f32 and amortizes the ~0.35 us
# per-grid-step overhead; raise TP to 1024 for very large clouds if desired.
TP = 512
TV = 512
VMEM_LIMIT_BYTES = 32 * 1024 * 1024
_HIGHEST = jax.lax.Precision.HIGHEST  # pin full-f32 MXU passes (coords up to ~346)


def _ceil_to(x, m):
    return -(-x // m) * m


# --------------------------------------------------------------------------- #
# Kernel 1: per-voxel scatter of (x, y, z, 1) -> lane-dense sums [4, v_pad]
#           rows = (sum_x, sum_y, sum_z, count)
# --------------------------------------------------------------------------- #
def _scatter_kernel(lo_ref, hi_ref, inv_col_ref, xyzi_ref, sums_ref):
    """lo/hi_ref: SMEM [n_point_tiles] int32 (min/max voxel id per point tile)
       inv_col_ref: [TP, 1] int32 (points on sublanes)
       xyzi_ref:    [4, TP] f32   (rows x, y, z, intensity; lane-dense)
       sums_ref:    [4, TV] f32   output accumulator (lane-dense)."""
    vi = pl.program_id(0)
    pi = pl.program_id(1)

    @pl.when(pi == 0)
    def _():
        sums_ref[...] = jnp.zeros_like(sums_ref)

    tp = inv_col_ref.shape[0]
    tv = sums_ref.shape[1]
    v_base = vi * tv

    # Band-diagonal skip: sorted points => this point tile only touches voxel ids
    # in [lo, hi]; skip the whole step unless it intersects [v_base, v_base + tv).
    @pl.when((hi_ref[pi] >= v_base) & (lo_ref[pi] < v_base + tv))
    def _():
        lane = jax.lax.broadcasted_iota(jnp.int32, (tp, tv), 1)
        onehot = ((inv_col_ref[...] - v_base) == lane).astype(jnp.float32)  # [TP, TV]
        row = jax.lax.broadcasted_iota(jnp.int32, (4, tp), 0)
        lhs = jnp.where(row == 3, 1.0, xyzi_ref[...])                       # (x, y, z, 1)
        sums_ref[...] += jnp.dot(lhs, onehot,
                                 preferred_element_type=jnp.float32,
                                 precision=_HIGHEST)                        # [4, TV]


def _scatter_sums_pallas(lo, hi, inv_col, xyzi_t, v_pad):
    n_pad = xyzi_t.shape[1]
    grid = (v_pad // TV, n_pad // TP)
    return pl.pallas_call(
        _scatter_kernel,
        out_shape=jax.ShapeDtypeStruct((4, v_pad), jnp.float32),
        grid_spec=pltpu.PrefetchScalarGridSpec(
            num_scalar_prefetch=2,
            grid=grid,
            in_specs=[pl.BlockSpec((TP, 1), lambda vi, pi, lo, hi: (pi, 0)),
                      pl.BlockSpec((4, TP), lambda vi, pi, lo, hi: (0, pi))],
            out_specs=pl.BlockSpec((4, TV), lambda vi, pi, lo, hi: (0, vi))),
        compiler_params=pltpu.CompilerParams(
            dimension_semantics=("parallel", "arbitrary"),
            vmem_limit_bytes=VMEM_LIMIT_BYTES),
    )(lo, hi, inv_col, xyzi_t)


# --------------------------------------------------------------------------- #
# Kernel 2: gather raw sums+counts back per point, normalize, assemble features
# --------------------------------------------------------------------------- #
def _gather_feature_kernel(lo_ref, hi_ref, inv_row_ref, xyzi_ref, sums_ref,
                           feat_ref, acc_ref):
    """inv_row_ref: [1, TP] int32 (lane-dense)
       xyzi_ref:    [4, TP] f32  (rows x, y, z, intensity)
       sums_ref:    [4, TV] f32  per-voxel (sum_x, sum_y, sum_z, count)
       feat_ref:    [9, TP] f32  lane-dense output (transposed features)
       acc_ref:     [4, TP] f32  scratch (gathered sums+count per point)."""
    pi = pl.program_id(0)
    vi = pl.program_id(1)

    @pl.when(vi == 0)
    def _():
        acc_ref[...] = jnp.zeros_like(acc_ref)

    tp = inv_row_ref.shape[1]
    tv = sums_ref.shape[1]
    v_base = vi * tv

    @pl.when((hi_ref[pi] >= v_base) & (lo_ref[pi] < v_base + tv))
    def _():
        sub = jax.lax.broadcasted_iota(jnp.int32, (tv, tp), 0)
        onehot_t = ((inv_row_ref[...] - v_base) == sub).astype(jnp.float32)  # [TV, TP]
        acc_ref[...] += jnp.dot(sums_ref[...], onehot_t,
                                preferred_element_type=jnp.float32,
                                precision=_HIGHEST)                          # [4, TP]

    @pl.when(vi == pl.num_programs(1) - 1)
    def _():
        vx, vy = float(VOXEL_SIZE[0]), float(VOXEL_SIZE[1])
        prx, pry, prz = (float(PC_RANGE[0]), float(PC_RANGE[1]),
                         float(PC_RANGE[2]))
        r_vx, r_vy = 1.0 / vx, 1.0 / vy
        r_prx, r_pry, r_prz = 1.0 / prx, 1.0 / pry, 1.0 / prz

        xyzi = xyzi_ref[...]                                 # [4, TP]
        x, y, z, inten = xyzi[0:1], xyzi[1:2], xyzi[2:3], xyzi[3:4]
        g = acc_ref[...]                                     # gathered sums + count
        inv_cnt = 1.0 / jnp.maximum(g[3:4], 1.0)             # exact divide (count exact)
        # f_center: offset from pillar center (torch float `//` == floor(x / v)).
        fcx = x - (jnp.floor(x / vx) * vx + (vx - 1.0) * 0.5)
        fcy = y - (jnp.floor(y / vy) * vy + (vy - 1.0) * 0.5)
        # Direct per-row stores (no [9, TP] concat temp), constant reciprocals.
        feat_ref[0:1, :] = x * r_prx
        feat_ref[1:2, :] = y * r_pry
        feat_ref[2:3, :] = z * r_prz
        feat_ref[3:4, :] = inten
        feat_ref[4:5, :] = (x - g[0:1] * inv_cnt) * r_vx
        feat_ref[5:6, :] = (y - g[1:2] * inv_cnt) * r_vy
        feat_ref[6:7, :] = (z - g[2:3] * inv_cnt) * r_prz
        feat_ref[7:8, :] = fcx * r_vx
        feat_ref[8:9, :] = fcy * r_vy


def _gather_features_pallas(lo, hi, inv_row, xyzi_t, sums_t):
    n_pad = xyzi_t.shape[1]
    v_pad = sums_t.shape[1]
    grid = (n_pad // TP, v_pad // TV)
    return pl.pallas_call(
        _gather_feature_kernel,
        out_shape=jax.ShapeDtypeStruct((9, n_pad), jnp.float32),
        grid_spec=pltpu.PrefetchScalarGridSpec(
            num_scalar_prefetch=2,
            grid=grid,
            in_specs=[pl.BlockSpec((1, TP), lambda pi, vi, lo, hi: (0, pi)),
                      pl.BlockSpec((4, TP), lambda pi, vi, lo, hi: (0, pi)),
                      pl.BlockSpec((4, TV), lambda pi, vi, lo, hi: (0, vi))],
            out_specs=pl.BlockSpec((9, TP), lambda pi, vi, lo, hi: (0, pi)),
            scratch_shapes=[pltpu.VMEM((4, TP), jnp.float32)]),
        compiler_params=pltpu.CompilerParams(
            dimension_semantics=("parallel", "arbitrary"),
            vmem_limit_bytes=VMEM_LIMIT_BYTES),
    )(lo, hi, inv_row, xyzi_t, sums_t)


# --------------------------------------------------------------------------- #
# Wrappers
# --------------------------------------------------------------------------- #
def _pillar_features(xyzi, unq_inv, num_voxels):
    """Full 9-d per-point features.  xyzi: [N, 4] (x,y,z,i), unq_inv: [N] int32."""
    xyzi = jnp.asarray(xyzi, jnp.float32)
    inv = jnp.asarray(unq_inv, jnp.int32).reshape(-1)
    n = xyzi.shape[0]
    n_pad = _ceil_to(n, TP)
    v_pad = _ceil_to(max(int(num_voxels), 1), TV)
    pad_n = n_pad - n

    # Sort points by voxel id -> band-diagonal tile structure (unsorted at the end).
    order = jnp.argsort(inv)
    inv_s = inv[order]
    xyzi_s = xyzi[order]

    # Per point-tile [min, max] voxel id (scalar prefetch) for tile skipping.
    n_pt = n_pad // TP
    starts = jnp.arange(n_pt, dtype=jnp.int32) * TP
    ends = jnp.minimum(starts + TP - 1, n - 1)
    lo = inv_s[starts]
    hi = inv_s[ends]

    inv_pad = jnp.pad(inv_s, (0, pad_n), constant_values=-1)   # pads match no voxel
    inv_col = inv_pad.reshape(n_pad, 1)                        # sublane-major (kernel 1)
    inv_row = inv_pad.reshape(1, n_pad)                        # lane-dense   (kernel 2)
    xyzi_t = jnp.pad(xyzi_s, ((0, pad_n), (0, 0))).T           # [4, n_pad], shared

    sums_t = _scatter_sums_pallas(lo, hi, inv_col, xyzi_t, v_pad)        # [4, v_pad]
    feat_t = _gather_features_pallas(lo, hi, inv_row, xyzi_t, sums_t)    # [9, n_pad]
    feat_s = feat_t.T[:n]                                                # sorted order
    # Undo the sort so features line up with the original point order.
    return jnp.zeros((n, 9), jnp.float32).at[order].set(feat_s)


def pillar_net_forward(points):
    """JAX/Pallas equivalent of PillarNet.forward.  points: [N, 5] float32."""
    points = jnp.asarray(points, jnp.float32)
    vs = np.asarray(VOXEL_SIZE, np.float64)
    pr = np.asarray(PC_RANGE, np.float64)
    grid_size = np.ceil(pr / vs).astype(np.int64)                     # (116, 87, 200)

    # Glue: voxelization + unique.  torch.unique has a dynamic output size, so it
    # is done eagerly in JAX (sorted order matches torch for non-negative coords).
    # TODO(synk): jnp.unique (dynamic output size) has no Pallas equivalent; stays eager.
    coords = jnp.floor(points[:, 1:4] / jnp.asarray(vs, jnp.float32)).astype(jnp.int32)
    batch_idx = points[:, 0:1].astype(jnp.int32)
    gx, gy = int(grid_size[0]), int(grid_size[1])
    keys = batch_idx[:, 0] * (gx * gy) + coords[:, 0] * gy + coords[:, 1]
    unq_keys, unq_inv = jnp.unique(keys, return_inverse=True)
    unq_inv = unq_inv.reshape(-1).astype(jnp.int32)
    b = unq_keys // (gx * gy)
    rem = unq_keys % (gx * gy)
    unq = jnp.stack([b, rem // gy, rem % gy], axis=1).astype(jnp.int32)  # (b, x, y)

    # Hot path in Pallas: scatter-mean + gather-back + feature assembly/normalize.
    features = _pillar_features(points[:, 1:5], unq_inv, int(unq.shape[0]))

    return (features[:, :4], unq[:, [0, 2, 1]], unq_inv,
            grid_size[[1, 0]], batch_idx)


# --------------------------------------------------------------------------- #
if __name__ == "__main__":
    key = jax.random.PRNGKey(0)
    kb, kx, ky, kz, ki = jax.random.split(key, 5)
    N = 200
    batch = jax.random.randint(kb, (N, 1), 0, 2).astype(jnp.float32)
    x = jax.random.uniform(kx, (N, 1), minval=0.0, maxval=30.0)
    y = jax.random.uniform(ky, (N, 1), minval=0.0, maxval=30.0)
    z = jax.random.uniform(kz, (N, 1), minval=0.0, maxval=200.0)
    inten = jax.random.uniform(ki, (N, 1))
    points = jnp.concatenate([batch, x, y, z, inten], axis=1)

    out = jax.block_until_ready(pillar_net_forward(points))
    feats4, unq, unq_inv, grid_sz, batch_idx = out

    # ---- numpy reference check of the Pallas feature pipeline ----
    pts = np.asarray(points, np.float64)
    inv = np.asarray(unq_inv)
    u = int(inv.max()) + 1
    sums = np.zeros((u, 3)); np.add.at(sums, inv, pts[:, 1:4])
    cnt = np.zeros((u, 1)); np.add.at(cnt, inv, 1.0)
    means = sums / cnt
    f_cluster = pts[:, 1:4] - means[inv]
    vs = np.asarray(VOXEL_SIZE); pr = np.asarray(PC_RANGE)
    coords = np.floor(pts[:, 1:4] / vs)
    f_center = pts[:, 1:3] - (coords[:, :2] * vs[:2] + (vs[:2] - 1.0) / 2.0)
    ref = np.concatenate([pts[:, 1:5], f_cluster, f_center], axis=1)
    ref /= np.array([pr[0], pr[1], pr[2], 1.0, vs[0], vs[1], pr[2], vs[0], vs[1]])

    feat_full = _pillar_features(points[:, 1:5], unq_inv, u)
    feat_full = np.asarray(jax.block_until_ready(feat_full))
    np.testing.assert_allclose(feat_full, ref, rtol=1e-4, atol=1e-4)
    np.testing.assert_allclose(np.asarray(feats4), ref[:, :4], rtol=1e-4, atol=1e-4)
    assert unq.shape[1] == 3 and batch_idx.shape == (N, 1)
    assert np.asarray(grid_sz).tolist() == [87, 116]
    print("KERNEL_OK")
</pallas_src>

<mosaic_0001>
module attributes {stable_mosaic.version = 11 : i64} {
  func.func @_scatter_kernel(%arg0: i32, %arg1: i32, %arg2: memref<1xi32, #tpu.memory_space<smem>>, %arg3: memref<1xi32, #tpu.memory_space<smem>>, %arg4: memref<512x1xi32, #tpu.memory_space<vmem>>, %arg5: memref<4x512xf32, #tpu.memory_space<vmem>>, %arg6: memref<4x512xf32, #tpu.memory_space<vmem>>) attributes {dimension_semantics = [#tpu.dimension_semantics<parallel>, #tpu.dimension_semantics<arbitrary>], iteration_bounds = array<i64: 1, 1>, scalar_prefetch = 2 : i64, scratch_operands = 0 : i64, tpu.core_type = #tpu.core_type<tc>, window_params = [{transform_indices = @transform_0, window_bounds = array<i64: 512, 1>}, {transform_indices = @transform_1, window_bounds = array<i64: 4, 512>}, {transform_indices = @transform_2, window_bounds = array<i64: 4, 512>}]} {
    %c0_i32 = arith.constant 0 : i32
    %0 = arith.cmpi eq, %arg1, %c0_i32 : i32
    %1 = arith.extui %0 : i1 to i32
    %c0_i32_0 = arith.constant 0 : i32
    %2 = arith.cmpi ne, %1, %c0_i32_0 : i32
    scf.if %2 {
      %cst = arith.constant 0.000000e+00 : f32
      %14 = vector.broadcast %cst : f32 to vector<4x512xf32>
      %c0 = arith.constant 0 : index
      %c0_3 = arith.constant 0 : index
      %15 = vector.load %arg6[%c0, %c0_3] : memref<4x512xf32, #tpu.memory_space<vmem>>, vector<4x512xf32>
      tpu.vector_store %arg6[%c0, %c0_3], %14 {strides = array<i32>} : memref<4x512xf32, #tpu.memory_space<vmem>>, vector<4x512xf32>,
    } else {
    }
    %c512_i32 = arith.constant 512 : i32
    %3 = arith.muli %arg0, %c512_i32 : i32
    %4 = arith.index_cast %arg1 : i32 to index
    %5 = memref.load %arg3[%4] : memref<1xi32, #tpu.memory_space<smem>>
    %6 = arith.cmpi sge, %5, %3 : i32
    %7 = arith.index_cast %arg1 : i32 to index
    %8 = memref.load %arg2[%7] : memref<1xi32, #tpu.memory_space<smem>>
    %c512_i32_1 = arith.constant 512 : i32
    %9 = arith.addi %3, %c512_i32_1 : i32
    %10 = arith.cmpi slt, %8, %9 : i32
    %11 = arith.andi %6, %10 : i1
    %12 = arith.extui %11 : i1 to i32
    %c0_i32_2 = arith.constant 0 : i32
    %13 = arith.cmpi ne, %12, %c0_i32_2 : i32
    scf.if %13 {
      %14 = tpu.iota {dimensions = array<i32: 1>} : vector<512x512xi32>
      %c0 = arith.constant 0 : index
      %c0_3 = arith.constant 0 : index
      %15 = vector.load %arg4[%c0, %c0_3] : memref<512x1xi32, #tpu.memory_space<vmem>>, vector<512x1xi32>
      %16 = vector.broadcast %3 : i32 to vector<512x1xi32>
      %17 = arith.subi %15, %16 : vector<512x1xi32>
      %18 = vector.broadcast %17 : vector<512x1xi32> to vector<512x512xi32>
      %19 = arith.cmpi eq, %18, %14 : vector<512x512xi32>
      %20 = arith.extui %19 : vector<512x512xi1> to vector<512x512xi32>
      %21 = arith.sitofp %20 : vector<512x512xi32> to vector<512x512xf32>
      %22 = tpu.iota {dimensions = array<i32: 0>} : vector<4x512xi32>
      %c3_i32 = arith.constant 3 : i32
      %23 = vector.broadcast %c3_i32 : i32 to vector<4x512xi32>
      %24 = arith.cmpi eq, %22, %23 : vector<4x512xi32>
      %c0_4 = arith.constant 0 : index
      %c0_5 = arith.constant 0 : index
      %25 = vector.load %arg5[%c0_4, %c0_5] : memref<4x512xf32, #tpu.memory_space<vmem>>, vector<4x512xf32>
      %cst = arith.constant 1.000000e+00 : f32
      %26 = vector.broadcast %cst : f32 to vector<4x512xf32>
      %27 = arith.select %24, %26, %25 : vector<4x512xi1>, vector<4x512xf32>
      %c0_6 = arith.constant 0 : index
      %c0_7 = arith.constant 0 : index
      %28 = vector.load %arg6[%c0_6, %c0_7] : memref<4x512xf32, #tpu.memory_space<vmem>>, vector<4x512xf32>
      %cst_8 = arith.constant dense<0.000000e+00> : vector<4x512xf32>
      %29 = tpu.matmul %27, %21, %cst_8 {dimension_numbers = #tpu.dot_dimension_numbers<[1], [0], [0], [1], [0, 0, 1, 1], [], []>, precision = #tpu.contract_precision<fp32>} : vector<4x512xf32>, vector<512x512xf32>, vector<4x512xf32> -> vector<4x512xf32>
      %30 = arith.addf %28, %29 : vector<4x512xf32>
      %c0_9 = arith.constant 0 : index
      %c0_10 = arith.constant 0 : index
      %31 = vector.load %arg6[%c0_9, %c0_10] : memref<4x512xf32, #tpu.memory_space<vmem>>, vector<4x512xf32>
      tpu.vector_store %arg6[%c0_9, %c0_10], %30 {strides = array<i32>} : memref<4x512xf32, #tpu.memory_space<vmem>>, vector<4x512xf32>,
    } else {
    }
    return
  }
  func.func @transform_0(%arg0: i32, %arg1: i32, %arg2: memref<1xi32, #tpu.memory_space<smem>>, %arg3: memref<1xi32, #tpu.memory_space<smem>>) -> (i32, i32) {
    %c0_i32 = arith.constant 0 : i32
    %c0_i32_0 = arith.constant 0 : i32
    return %arg1, %c0_i32 : i32, i32
  }
  func.func @transform_1(%arg0: i32, %arg1: i32, %arg2: memref<1xi32, #tpu.memory_space<smem>>, %arg3: memref<1xi32, #tpu.memory_space<smem>>) -> (i32, i32) {
    %c0_i32 = arith.constant 0 : i32
    %c0_i32_0 = arith.constant 0 : i32
    return %c0_i32, %arg1 : i32, i32
  }
  func.func @transform_2(%arg0: i32, %arg1: i32, %arg2: memref<1xi32, #tpu.memory_space<smem>>, %arg3: memref<1xi32, #tpu.memory_space<smem>>) -> (i32, i32) {
    %c0_i32 = arith.constant 0 : i32
    %c0_i32_0 = arith.constant 0 : i32
    return %c0_i32, %arg0 : i32, i32
  }
}

</mosaic_0001>

<bundles_post_ra>
// kernel: tpu_custom_call.1
= control target key start
LH: loop header
LB: loop body
LE: loop exit
PB: predicated region body
PF: predicated region fallthrough
CT: control target
= control target key end

     0   :  { %11 = vsyncpa [#allocation6], 0  ;;  %v7360_v0 = vmov 0.0   ;;  %s15397_s0 = inlined_call_operand.<no memory space> [shape: s32[1], index: 0, kind: input, shape index: {}]   ;;  %s15398_s1 = inlined_call_operand.<no memory space> [shape: s32[1], index: 1, kind: input, shape index: {}]   ;;  %s15399_s2 = inlined_call_operand.vmem [shape: s32[512,1], index: 2, kind: input, shape index: {}]   ;;  %s15400_s3 = inlined_call_operand.vmem [shape: f32[4,512], index: 3, kind: input, shape index: {}]   ;;  %s15401_s4 = inlined_call_operand.hbm [shape: f32[4,512], index: 4, kind: output, shape index: {}]  }
   0x1   :  { %p24_p0 = scmp.ge.s32.totalorder %s15398_s1, 0  ;;  %p27_p1 = scmp.lt.s32.totalorder %s15397_s0, 512  ;;  %20 = vst [vmem:[#allocation5] sm:$0xff] %v7360_v0  ;;  %21 = vst [vmem:[#allocation5 + $0x8] sm:$0xff] %v7360_v0 }
   0x3   :  { %p28_p2 = pnand %p27_p1, %p24_p0 }
   0x5   :  { %31 = sbr.rel (%p28_p2) target bundleno = 1228 (0x4cc), region = 17 }
   0xa   :  { %v52_v1 = vld [vmem:[%s15399_s2 + $0x78] sm:$0xff]  ;;  %v50_v2 = vld [vmem:[%s15399_s2 + $0x68] sm:$0xff]  ;;  %v7361_v3 = vmov 0   ;;  %v51_v4 = vld [vmem:[%s15399_s2 + $0x70] sm:$0xff]  ;;  %v32_v44 = vlaneseq }
   0xb   :  { %7335 = vset.pattern.permute.xlu1 %v7361_v3  ;;  %7334 = vset.pattern.permute.xlu0 %v7361_v3  ;;  %v49_v5 = vld [vmem:[%s15399_s2 + $0x60] sm:$0xff]  ;;  %v48_v6 = vld [vmem:[%s15399_s2 + $0x58] sm:$0xff]  ;;  %v47_v7 = vld [vmem:[%s15399_s2 + $0x50] sm:$0xff] }
   0xc   :  { %212 = vperm.xlu0 %7334, %v52_v1   ;;  %206 = vperm.xlu1 %7335, %v50_v2   ;;  %v46_v8 = vld [vmem:[%s15399_s2 + $0x48] sm:$0xff]  ;;  %v45_v9 = vld [vmem:[%s15399_s2 + $0x40] sm:$0xff]  ;;  %v44_v10 = vld [vmem:[%s15399_s2 + $0x38] sm:$0xff]  ;;  %v7528_v47 = vshrl.u32 %v32_v44, 7 }
   0xd   :  { %v43_v11 = vld [vmem:[%s15399_s2 + $0x30] sm:$0xff]  ;;  %v42_v12 = vld [vmem:[%s15399_s2 + $0x28] sm:$0xff]  ;;  %v41_v13 = vld [vmem:[%s15399_s2 + $0x20] sm:$0xff] }
   0xe   :  { %v40_v14 = vld [vmem:[%s15399_s2 + $0x18] sm:$0xff]  ;;  %v39_v15 = vld [vmem:[%s15399_s2 + $0x10] sm:$0xff]  ;;  %v38_v16 = vld [vmem:[%s15399_s2 + $0x8] sm:$0xff]  ;;  %16285 = vst [vmem:[#allocation8_spill] sm:$0xff] %v7528_v47  ;;  %vm15402_vm0 = vcmp.eq.s32.totalorder %v7528_v47, 3  ;;  %v16312_v47 = vmov 0.0  }
   0xf   :  { %v37_v17 = vld [vmem:[%s15399_s2] sm:$0xff]  ;;  %v68_v18 = vld [vmem:[%s15399_s2 + $0xf8] sm:$0xff]  ;;  %v67_v19 = vld [vmem:[%s15399_s2 + $0xf0] sm:$0xff] }
  0x10   :  { %209 = vperm.xlu0 %7334, %v51_v4   ;;  %203 = vperm.xlu1 %7335, %v49_v5   ;;  %v66_v20 = vld [vmem:[%s15399_s2 + $0xe8] sm:$0xff]  ;;  %v65_v21 = vld [vmem:[%s15399_s2 + $0xe0] sm:$0xff]  ;;  %v64_v22 = vld [vmem:[%s15399_s2 + $0xd8] sm:$0xff] }
  0x11   :  { %v63_v23 = vld [vmem:[%s15399_s2 + $0xd0] sm:$0xff]  ;;  %v62_v24 = vld [vmem:[%s15399_s2 + $0xc8] sm:$0xff]  ;;  %v61_v25 = vld [vmem:[%s15399_s2 + $0xc0] sm:$0xff] }
  0x12   :  { %v60_v26 = vld [vmem:[%s15399_s2 + $0xb8] sm:$0xff]  ;;  %v59_v27 = vld [vmem:[%s15399_s2 + $0xb0] sm:$0xff]  ;;  %v58_v28 = vld [vmem:[%s15399_s2 + $0xa8] sm:$0xff] }
  0x13   :  { %v57_v29 = vld [vmem:[%s15399_s2 + $0xa0] sm:$0xff]  ;;  %v56_v30 = vld [vmem:[%s15399_s2 + $0x98] sm:$0xff]  ;;  %v55_v31 = vld [vmem:[%s15399_s2 + $0x90] sm:$0xff] }
  0x14   :  { %200 = vperm.xlu0 %7334, %v48_v6   ;;  %197 = vperm.xlu1 %7335, %v47_v7   ;;  %v54_v32 = vld [vmem:[%s15399_s2 + $0x88] sm:$0xff]  ;;  %v53_v33 = vld [vmem:[%s15399_s2 + $0x80] sm:$0xff]  ;;  %v84_v34 = vld [vmem:[%s15399_s2 + $0x178] sm:$0xff] }
  0x15   :  { %v83_v35 = vld [vmem:[%s15399_s2 + $0x170] sm:$0xff]  ;;  %v82_v36 = vld [vmem:[%s15399_s2 + $0x168] sm:$0xff]  ;;  %v81_v37 = vld [vmem:[%s15399_s2 + $0x160] sm:$0xff] }
  0x16   :  { %v80_v38 = vld [vmem:[%s15399_s2 + $0x158] sm:$0xff]  ;;  %v79_v39 = vld [vmem:[%s15399_s2 + $0x150] sm:$0xff]  ;;  %v78_v40 = vld [vmem:[%s15399_s2 + $0x148] sm:$0xff] }
  0x17   :  { %v77_v41 = vld [vmem:[%s15399_s2 + $0x140] sm:$0xff]  ;;  %v76_v42 = vld [vmem:[%s15399_s2 + $0x138] sm:$0xff]  ;;  %v75_v43 = vld [vmem:[%s15399_s2 + $0x130] sm:$0xff] }
  0x18   :  { %194 = vperm.xlu0 %7334, %v46_v8   ;;  %191 = vperm.xlu1 %7335, %v45_v9   ;;  %v74_v45 = vld [vmem:[%s15399_s2 + $0x128] sm:$0xff]  ;;  %v73_v46 = vld [vmem:[%s15399_s2 + $0x120] sm:$0xff]  ;;  %v72_v51 = vld [vmem:[%s15399_s2 + $0x118] sm:$0xff] }
  0x19   :  { %v1129_v48 = vld [vmem:[%s15400_s3] sm:$0xff]  ;;  %v71_v52 = vld [vmem:[%s15399_s2 + $0x110] sm:$0xff]  ;;  %v70_v55 = vld [vmem:[%s15399_s2 + $0x108] sm:$0xff] }
  0x1a   :  { %v1133_v49 = vcombine.high %v1129_v48, %v1129_v48  ;;  %v69_v56 = vld [vmem:[%s15399_s2 + $0x100] sm:$0xff]  ;;  %v100_v59 = vld [vmem:[%s15399_s2 + $0x1f8] sm:$0xff]  ;;  %v99_v60 = vld [vmem:[%s15399_s2 + $0x1f0] sm:$0xff]  ;;  %v1137_v4 = vsel %vm15402_vm0, 1.0, %v1129_v48 }
  0x1b   :  { %v98_v62 = vld [vmem:[%s15399_s2 + $0x1e8] sm:$0xff]  ;;  %v97_v63 = vld [vmem:[%s15399_s2 + $0x1e0] sm:$0xff]  ;;  %v96_v0 = vld [vmem:[%s15399_s2 + $0x1d8] sm:$0xff]  ;;  %v7594_v7 = vand.u32 4294901760, %v1137_v4 }
  0x1c   :  { %188 = vperm.xlu0 %7334, %v44_v10   ;;  %185 = vperm.xlu1 %7335, %v43_v11   ;;  %v1138_v50 = vsel %vm15402_vm0, 1.0, %v1133_v49  ;;  %v95_v1 = vld [vmem:[%s15399_s2 + $0x1d0] sm:$0xff]  ;;  %v94_v2 = vld [vmem:[%s15399_s2 + $0x1c8] sm:$0xff]  ;;  %v93_v3 = vld [vmem:[%s15399_s2 + $0x1c0] sm:$0xff]  ;;  %v7605_v11 = vand.u32 127, %v32_v44 }
  0x1d   :  { %v7542_v53 = vand.u32 4294901760, %v1138_v50  ;;  %v92_v5 = vld [vmem:[%s15399_s2 + $0x1b8] sm:$0xff]  ;;  %v91_v6 = vld [vmem:[%s15399_s2 + $0x1b0] sm:$0xff]  ;;  %16290 = vst [vmem:[#allocation13_spill] sm:$0xff] %v7594_v7  ;;  %v90_v8 = vld [vmem:[%s15399_s2 + $0x1a8] sm:$0xff]  ;;  %v7603_v10 = vsub.f32 %v1137_v4, %v7594_v7 }
  0x1e   :  { %v89_v9 = vld [vmem:[%s15399_s2 + $0x1a0] sm:$0xff] }
  0x1f   :  { %16286 = vst [vmem:[#allocation9_spill] sm:$0xff] %v7542_v53  ;;  %v7545_v54 = vsub.f32 %v1138_v50, %v7542_v53  ;;  %1673 = vmatprep.mubr.f32.mxu1 %v7542_v53  ;;  %16291 = vst [vmem:[#allocation14_spill] sm:$0xff] %v7603_v10  ;;  %v16313_v53 = vmov 1.0  }
  0x20   :  { %182 = vperm.xlu0 %7334, %v42_v12   ;;  %179 = vperm.xlu1 %7335, %v41_v13   ;;  %v88_v12 = vld [vmem:[%s15399_s2 + $0x198] sm:$0xff]  ;;  %v87_v13 = vld [vmem:[%s15399_s2 + $0x190] sm:$0xff] }
  0x21   :  { %16287 = vst [vmem:[#allocation10_spill] sm:$0xff] %v7545_v54  ;;  %v7555_v57 = vand.u32 4294901760, %v7545_v54 }
  0x23   :  { %16288 = vst [vmem:[#allocation11_spill] sm:$0xff] %v7555_v57  ;;  %v1274_v58 = vsub.f32 %v7545_v54, %v7555_v57 }
  0x24   :  { %176 = vperm.xlu0 %7334, %v40_v14   ;;  %173 = vperm.xlu1 %7335, %v39_v15   ;;  %v7614_v14 = vand.u32 4294901760, %v7603_v10  ;;  %v7617_v15 = vadd.s32 128, %v7605_v11 }
  0x25   :  { %v7565_v61 = vand.u32 4294901760, %v1274_v58 }
  0x26   :  { %16292 = vst [vmem:[#allocation15_spill] sm:$0xff] %v7614_v14 }
  0x27   :  { %16289 = vst [vmem:[#allocation12_spill] sm:$0xff] %v7565_v61  ;;  %1276 = vmatprep.mubr.f32.mxu0 %v7565_v61 }
  0x28   :  { %170 = vperm.xlu0 %7334, %v38_v16   ;;  %167 = vperm.xlu1 %7335, %v37_v17   ;;  %v86_v16 = vld [vmem:[%s15399_s2 + $0x188] sm:$0xff]  ;;  %v85_v17 = vld [vmem:[%s15399_s2 + $0x180] sm:$0xff] }
  0x2c   :  { %260 = vperm.xlu0 %7334, %v68_v18   ;;  %257 = vperm.xlu1 %7335, %v67_v19   ;;  %v1280_v18 = vsub.f32 %v7603_v10, %v7614_v14 }
  0x30   :  { %254 = vperm.xlu0 %7334, %v66_v20   ;;  %251 = vperm.xlu1 %7335, %v65_v21   ;;  %v15439_v21 = vmov 1.0  }
  0x34   :  { %248 = vperm.xlu0 %7334, %v64_v22   ;;  %245 = vperm.xlu1 %7335, %v63_v23   ;;  %v15435_v22 = vmov 0.0  }
  0x38   :  { %242 = vperm.xlu0 %7334, %v62_v24   ;;  %239 = vperm.xlu1 %7335, %v61_v25  }
  0x3c   :  { %236 = vperm.xlu0 %7334, %v60_v26   ;;  %233 = vperm.xlu1 %7335, %v59_v27   ;;  %v7663_v27 = vand.u32 4294901760, %v1280_v18 }
  0x3e   :  { %16295 = vst [vmem:[#allocation18_spill] sm:$0xff] %v7663_v27 }
  0x40   :  { %230 = vperm.xlu0 %7334, %v58_v28   ;;  %227 = vperm.xlu1 %7335, %v57_v29  }
  0x44   :  { %224 = vperm.xlu0 %7334, %v56_v30   ;;  %221 = vperm.xlu1 %7335, %v55_v31  }
  0x48   :  { %218 = vperm.xlu0 %7334, %v54_v32   ;;  %215 = vperm.xlu1 %7335, %v53_v33  }
  0x4c   :  { %308 = vperm.xlu0 %7334, %v84_v34   ;;  %305 = vperm.xlu1 %7335, %v83_v35  }
  0x50   :  { %302 = vperm.xlu0 %7334, %v82_v36   ;;  %299 = vperm.xlu1 %7335, %v81_v37  }
  0x54   :  { %296 = vperm.xlu0 %7334, %v80_v38   ;;  %293 = vperm.xlu1 %7335, %v79_v39  }
  0x58   :  { %290 = vperm.xlu0 %7334, %v78_v40   ;;  %287 = vperm.xlu1 %7335, %v77_v41  }
  0x5c   :  { %284 = vperm.xlu0 %7334, %v76_v42   ;;  %281 = vperm.xlu1 %7335, %v75_v43  }
  0x60   :  { %278 = vperm.xlu0 %7334, %v74_v45   ;;  %275 = vperm.xlu1 %7335, %v73_v46  }
  0x64   :  { %272 = vperm.xlu0 %7334, %v72_v51   ;;  %269 = vperm.xlu1 %7335, %v71_v52  }
  0x68   :  { %266 = vperm.xlu0 %7334, %v70_v55   ;;  %263 = vperm.xlu1 %7335, %v69_v56  }
  0x6c   :  { %356 = vperm.xlu0 %7334, %v100_v59   ;;  %353 = vperm.xlu1 %7335, %v99_v60  }
  0x70   :  { %350 = vperm.xlu0 %7334, %v98_v62   ;;  %347 = vperm.xlu1 %7335, %v97_v63  }
  0x74   :  { %344 = vperm.xlu0 %7334, %v96_v0   ;;  %341 = vperm.xlu1 %7335, %v95_v1  }
  0x78   :  { %338 = vperm.xlu0 %7334, %v94_v2   ;;  %335 = vperm.xlu1 %7335, %v93_v3  }
  0x7c   :  { %332 = vperm.xlu0 %7334, %v92_v5   ;;  %329 = vperm.xlu1 %7335, %v91_v6  }
  0x80   :  { %326 = vperm.xlu0 %7334, %v90_v8   ;;  %323 = vperm.xlu1 %7335, %v89_v9  }
  0x84   :  { %320 = vperm.xlu0 %7334, %v88_v12   ;;  %317 = vperm.xlu1 %7335, %v87_v13  }
  0x87   :  { %v7627_v19 = vpop.permute.xlu0 %212  ;;  %v7629_v20 = vpop.permute.xlu1 %206 }
  0x88   :  { %16293 = vst [vmem:[#allocation16_spill] sm:$0xff] %v7627_v19  ;;  %16294 = vst [vmem:[#allocation17_spill] sm:$0xff] %v7629_v20  ;;  %314 = vperm.xlu0 %7334, %v86_v16   ;;  %311 = vperm.xlu1 %7335, %v85_v17   ;;  %vm419_vm1 = vcmp.eq.s32.totalorder %v7627_v19, %v7617_v15  ;;  %vm418_vm2 = vcmp.eq.s32.totalorder %v7627_v19, %v7605_v11 }
  0x89   :  { %vm411_vm3 = vcmp.eq.s32.totalorder %v7629_v20, %v7617_v15  ;;  %6561 = vmatprep.subr.msk.mxu0 %vm419_vm1, %v15439_v21  ;;  %vm410_vm4 = vcmp.eq.s32.totalorder %v7629_v20, %v7605_v11  ;;  %v6366_v24 = vsel %vm419_vm1, 1.0, %v15435_v22  ;;  %v6365_v25 = vsel %vm418_vm2, 1.0, %v15435_v22 }
  0x8a   :  { %v6358_v23 = vsel %vm411_vm3, 1.0, %v15435_v22  ;;  %6562 = vmatpush1.msk.msra.mxu0 %vm418_vm2, %v15439_v21  ;;  %v6357_v26 = vsel %vm410_vm4, 1.0, %v15435_v22  ;;  %v7673_v32 = vsub.f32 %v6366_v24, %v6366_v24  ;;  %v7675_v33 = vsub.f32 %v6365_v25, %v6365_v25 }
  0x8b   :  { %v7665_v28 = vpop.permute.xlu0 %209  ;;  %v7667_v29 = vpop.permute.xlu1 %203  ;;  %v7669_v30 = vsub.f32 %v6358_v23, %v6358_v23  ;;  %v7671_v31 = vsub.f32 %v6357_v26, %v6357_v26 }
  0x8c   :  { %16296 = vst [vmem:[#allocation19_spill] sm:$0xff] %v7665_v28  ;;  %16297 = vst [vmem:[#allocation20_spill] sm:$0xff] %v7667_v29  ;;  %vm415_vm5 = vcmp.eq.s32.totalorder %v7665_v28, %v7617_v15  ;;  %vm414_vm6 = vcmp.eq.s32.totalorder %v7665_v28, %v7605_v11  ;;  %vm407_vm7 = vcmp.eq.s32.totalorder %v7667_v29, %v7617_v15  ;;  %v15431_v44 = vand.u32 4294901760, %v7673_v32 }
  0x8d   :  { %16298 = vst [vmem:[#allocation21_spill] sm:$0xff] %v7673_v32  ;;  %vm406_vm8 = vcmp.eq.s32.totalorder %v7667_v29, %v7605_v11  ;;  %v6362_v34 = vsel %vm415_vm5, 1.0, %v15435_v22  ;;  %6563 = vmatprep.subr.msk.mxu0 %vm415_vm5, %v15439_v21  ;;  %v6361_v35 = vsel %vm414_vm6, 1.0, %v15435_v22  ;;  %v6354_v36 = vsel %vm407_vm7, 1.0, %v15435_v22 }
  0x8e   :  { %v6353_v37 = vsel %vm406_vm8, 1.0, %v15435_v22  ;;  %v7705_v38 = vsub.f32 %v6362_v34, %v6362_v34  ;;  %6564 = vmatpush1.msk.msra.mxu0 %vm414_vm6, %v15439_v21  ;;  %v7711_v39 = vsub.f32 %v6361_v35, %v6361_v35  ;;  %v7713_v40 = vsub.f32 %v6354_v36, %v6354_v36 }
  0x8f   :  { %v7715_v41 = vsub.f32 %v6353_v37, %v6353_v37  ;;  %v7717_v42 = vpop.permute.xlu0 %200  ;;  %v7719_v43 = vpop.permute.xlu1 %197  ;;  %6565 = vmatprep.subr.msk.mxu0 %vm411_vm3, %v15439_v21  ;;  %v15428_v45 = vand.u32 4294901760, %v7675_v33  ;;  %v15421_v46 = vand.u32 4294901760, %v7669_v30  ;;  %v15420_v48 = vand.u32 4294901760, %v7671_v31 }
  0x90   :  { %16299 = vst [vmem:[#allocation22_spill] sm:$0xff] %v7717_v42  ;;  %16300 = vst [vmem:[#allocation23_spill] sm:$0xff] %v7719_v43  ;;  %6566 = vmatpush1.msk.msra.mxu0 %vm410_vm4, %v15439_v21  ;;  %vm403_vm9 = vcmp.eq.s32.totalorder %v7717_v42, %v7617_v15  ;;  %vm402_vm10 = vcmp.eq.s32.totalorder %v7717_v42, %v7605_v11  ;;  %vm15629_vm11 = vcmp.eq.s32.totalorder %v7719_v43, %v7617_v15 }
  0x91   :  { %vm15630_vm12 = vcmp.eq.s32.totalorder %v7719_v43, %v7605_v11  ;;  %6567 = vmatprep.subr.msk.mxu0 %vm407_vm7, %v15439_v21  ;;  %v1291_v49 = vsub.f32 %v7673_v32, %v15431_v44  ;;  %v6350_v50 = vsel %vm403_vm9, 1.0, %v15435_v22  ;;  %v1297_v51 = vsub.f32 %v7675_v33, %v15428_v45 }
  0x92   :  { %v6349_v52 = vsel %vm402_vm10, 1.0, %v15435_v22  ;;  %6568 = vmatpush1.msk.msra.mxu0 %vm406_vm8, %v15439_v21  ;;  %v7763_v55 = vsub.f32 %v6350_v50, %v6350_v50  ;;  %v6346_v58 = vsel %vm15629_vm11, 1.0, %v15435_v22  ;;  %v6345_v59 = vsel %vm15630_vm12, 1.0, %v15435_v22 }
  0x93   :  { %v7765_v56 = vsub.f32 %v6349_v52, %v6349_v52  ;;  %v1292_v60 = vand.u32 4294901760, %v1291_v49  ;;  %v7775_v62 = vpop.permute.xlu0 %194  ;;  %v7777_v63 = vpop.permute.xlu1 %191  ;;  %6569 = vmatprep.subr.msk.mxu0 %vm403_vm9, %v15439_v21  ;;  %v1298_v0 = vand.u32 4294901760, %v1297_v51  ;;  %v7783_v1 = vsub.f32 %v6346_v58, %v6346_v58 }
  0x94   :  { %16301 = vst [vmem:[#allocation24_spill] sm:$0xff] %v7775_v62  ;;  %16302 = vst [vmem:[#allocation25_spill] sm:$0xff] %v7777_v63  ;;  %v7785_v2 = vsub.f32 %v6345_v59, %v6345_v59  ;;  %6570 = vmatpush1.msk.msra.mxu0 %vm402_vm10, %v15439_v21  ;;  %v15427_v3 = vand.u32 4294901760, %v7705_v38  ;;  %vm395_vm13 = vcmp.eq.s32.totalorder %v7775_v62, %v7617_v15  ;;  %v15422_v4 = vand.u32 4294901760, %v7711_v39 }
  0x95   :  { %vm15403_vm14 = vcmp.eq.s32.totalorder %v7775_v62, %v7605_v11  ;;  %1293 = vmatprep.subr.mxu1 %v1292_v60  ;;  %6571 = vmatprep.subr.msk.mxu0 %vm15629_vm11, %v15439_v21  ;;  %v6342_v5 = vsel %vm395_vm13, 1.0, %v15435_v22  ;;  %v1315_v8 = vsub.f32 %v7669_v30, %v15421_v46  ;;  %vm15404_vm15 = vcmp.eq.s32.totalorder %v7777_v63, %v7617_v15 }
  0x96   :  { %v6341_v6 = vsel %vm15403_vm14, 1.0, %v15435_v22  ;;  %1299 = vmatpush1.msra.mxu1 %v1298_v0  ;;  %6572 = vmatpush1.msk.msra.mxu0 %vm15630_vm12, %v15439_v21  ;;  %v1303_v9 = vsub.f32 %v7705_v38, %v15427_v3  ;;  %v7821_v12 = vsub.f32 %v6342_v5, %v6342_v5  ;;  %v1309_v13 = vsub.f32 %v7711_v39, %v15422_v4 }
  0x97   :  { %v6338_v16 = vsel %vm15404_vm15, 1.0, %v15435_v22  ;;  %v7830_v17 = vpop.permute.xlu0 %188  ;;  %6573 = vmatprep.subr.msk.mxu0 %vm395_vm13, %v15439_v21  ;;  %v7836_v18 = vsub.f32 %v6341_v6, %v6341_v6  ;;  %v1316_v23 = vand.u32 4294901760, %v1315_v8  ;;  %v1321_v25 = vsub.f32 %v7671_v31, %v15420_v48  ;;  %v7850_v36 = vpop.permute.xlu1 %185 }
  0x98   :  { %16303 = vst [vmem:[#allocation26_spill] sm:$0xff] %v7830_v17  ;;  %v7838_v24 = vsub.f32 %v6338_v16, %v6338_v16  ;;  %v1304_v26 = vand.u32 4294901760, %v1303_v9  ;;  %v1310_v34 = vand.u32 4294901760, %v1309_v13  ;;  %6574 = vmatpush1.msk.msra.mxu0 %vm15403_vm14, %v15439_v21  ;;  %vm15631_vm0 = vcmp.eq.s32.totalorder %v7777_v63, %v7605_v11  ;;  %16304 = vst [vmem:[#allocation27_spill] sm:$0xff] %v7850_v36 }
  0x99   :  { %v15417_v35 = vand.u32 4294901760, %v7713_v40  ;;  %6575 = vmatprep.subr.msk.mxu0 %vm15404_vm15, %v15439_v21  ;;  %v1322_v37 = vand.u32 4294901760, %v1321_v25  ;;  %v6337_v49 = vsel %vm15631_vm0, 1.0, %v15435_v22  ;;  %vm15405_vm14 = vcmp.eq.s32.totalorder %v7830_v17, %v7617_v15 }
  0x9a   :  { %v15414_v50 = vand.u32 4294901760, %v7715_v41  ;;  %1305 = vmatprep.subr.mxu1 %v1304_v26  ;;  %6576 = vmatpush1.msk.msra.mxu0 %vm15631_vm0, %v15439_v21  ;;  %v7867_v51 = vsub.f32 %v6337_v49, %v6337_v49  ;;  %v6334_v58 = vsel %vm15405_vm14, 1.0, %v15435_v22  ;;  %vm15406_vm15 = vcmp.eq.s32.totalorder %v7830_v17, %v7605_v11 }
  0x9b   :  { %v1327_v52 = vsub.f32 %v7713_v40, %v15417_v35  ;;  %1311 = vmatpush1.msra.mxu1 %v1310_v34  ;;  %6577 = vmatprep.subr.msk.mxu0 %vm15405_vm14, %v15439_v21  ;;  %v7882_v59 = vsub.f32 %v6334_v58, %v6334_v58  ;;  %v6333_v0 = vsel %vm15406_vm15, 1.0, %v15435_v22  ;;  %v15413_v5 = vand.u32 4294901760, %v7763_v55  ;;  %v7892_v8 = vpop.permute.xlu0 %182 }
  0x9c   :  { %v1333_v60 = vsub.f32 %v7715_v41, %v15414_v50  ;;  %1317 = vmatprep.subr.mxu1 %v1316_v23  ;;  %16305 = vst [vmem:[#allocation28_spill] sm:$0xff] %v7892_v8  ;;  %6578 = vmatpush1.msk.msra.mxu0 %vm15406_vm15, %v15439_v21  ;;  %v7898_v9 = vsub.f32 %v6333_v0, %v6333_v0  ;;  %v15408_v13 = vand.u32 4294901760, %v7765_v56  ;;  %v15410_v49 = vand.u32 4294901760, %v7783_v1 }
  0x9d   :  { %v1328_v6 = vand.u32 4294901760, %v1327_v52  ;;  %vm15407_vm14 = vcmp.eq.s32.totalorder %v7850_v36, %v7617_v15  ;;  %1323 = vmatpush1.msra.mxu1 %v1322_v37  ;;  %v1339_v23 = vsub.f32 %v7763_v55, %v15413_v5  ;;  %vm15409_vm15 = vcmp.eq.s32.totalorder %v7850_v36, %v7605_v11  ;;  %v7930_v52 = vpop.permute.xlu1 %179 }
  0x9e   :  { %v1334_v16 = vand.u32 4294901760, %v1333_v60  ;;  %v6330_v25 = vsel %vm15407_vm14, 1.0, %v15435_v22  ;;  %6579 = vmatprep.subr.msk.mxu0 %vm15407_vm14, %v15439_v21  ;;  %v1345_v34 = vsub.f32 %v7765_v56, %v15408_v13  ;;  %v6329_v37 = vsel %vm15409_vm15, 1.0, %v15435_v22  ;;  %16306 = vst [vmem:[#allocation29_spill] sm:$0xff] %v7930_v52 }
  0x9f   :  { %1329 = vmatprep.subr.mxu1 %v1328_v6  ;;  %v7916_v26 = vsub.f32 %v6330_v25, %v6330_v25  ;;  %6580 = vmatpush1.msk.msra.mxu0 %vm15409_vm15, %v15439_v21  ;;  %v1340_v58 = vand.u32 4294901760, %v1339_v23  ;;  %v7932_v60 = vsub.f32 %v6329_v37, %v6329_v37  ;;  %vm15411_vm14 = vcmp.eq.s32.totalorder %v7892_v8, %v7617_v15 }
  0xa0   :  { %1335 = vmatpush1.msra.mxu1 %v1334_v16  ;;  %v15412_v0 = vand.u32 4294901760, %v7785_v2  ;;  %v1346_v6 = vand.u32 4294901760, %v1345_v34  ;;  %v1351_v25 = vsub.f32 %v7783_v1, %v15410_v49  ;;  %v6326_v13 = vsel %vm15411_vm14, 1.0, %v15435_v22  ;;  %6581 = vmatprep.subr.msk.mxu0 %vm15411_vm14, %v15439_v21 }
  0xa1   :  { %vm15415_vm15 = vcmp.eq.s32.totalorder %v7892_v8, %v7605_v11  ;;  %1341 = vmatprep.subr.mxu1 %v1340_v58  ;;  %v7950_v16 = vsub.f32 %v6326_v13, %v6326_v13  ;;  %v15416_v37 = vand.u32 4294901760, %v7821_v12  ;;  %v7964_v13 = vpop.permute.xlu0 %176  ;;  %vm15418_vm14 = vcmp.eq.s32.totalorder %v7930_v52, %v7617_v15  ;;  %v7998_v35 = vpop.permute.xlu1 %173 }
  0xa2   :  { %v1357_v23 = vsub.f32 %v7785_v2, %v15412_v0  ;;  %v6325_v34 = vsel %vm15415_vm15, 1.0, %v15435_v22  ;;  %6582 = vmatpush1.msk.msra.mxu0 %vm15415_vm15, %v15439_v21  ;;  %1347 = vmatpush1.msra.mxu1 %v1346_v6  ;;  %v1352_v58 = vand.u32 4294901760, %v1351_v25  ;;  %16307 = vst [vmem:[#allocation30_spill] sm:$0xff] %v7964_v13  ;;  %v15419_v0 = vand.u32 4294901760, %v7836_v18  ;;  %16308 = vst [vmem:[#allocation31_spill] sm:$0xff] %v7998_v35 }
  0xa3   :  { %v7966_v49 = vsub.f32 %v6325_v34, %v6325_v34  ;;  %v1363_v50 = vsub.f32 %v7821_v12, %v15416_v37  ;;  %v6322_v6 = vsel %vm15418_vm14, 1.0, %v15435_v22  ;;  %6583 = vmatprep.subr.msk.mxu0 %vm15418_vm14, %v15439_v21  ;;  %vm15423_vm15 = vcmp.eq.s32.totalorder %v7930_v52, %v7605_v11 }
  0xa4   :  { %v1358_v5 = vand.u32 4294901760, %v1357_v23  ;;  %1353 = vmatprep.subr.mxu1 %v1352_v58  ;;  %v7984_v25 = vsub.f32 %v6322_v6, %v6322_v6  ;;  %v1369_v23 = vsub.f32 %v7836_v18, %v15419_v0  ;;  %v6321_v34 = vsel %vm15423_vm15, 1.0, %v15435_v22  ;;  %6584 = vmatpush1.msk.msra.mxu0 %vm15423_vm15, %v15439_v21 }
  0xa5   :  { %v15424_v37 = vand.u32 4294901760, %v7838_v24  ;;  %v1364_v58 = vand.u32 4294901760, %v1363_v50  ;;  %v8000_v6 = vsub.f32 %v6321_v34, %v6321_v34  ;;  %vm15425_vm14 = vcmp.eq.s32.totalorder %v7964_v13, %v7617_v15  ;;  %v8066_v44 = vpop.permute.xlu1 %167 }
  0xa6   :  { %1359 = vmatpush1.msra.mxu1 %v1358_v5  ;;  %v15426_v0 = vand.u32 4294901760, %v7867_v51  ;;  %v1370_v48 = vand.u32 4294901760, %v1369_v23  ;;  %v6318_v4 = vsel %vm15425_vm14, 1.0, %v15435_v22  ;;  %6585 = vmatprep.subr.msk.mxu0 %vm15425_vm14, %v15439_v21  ;;  %vm15429_vm15 = vcmp.eq.s32.totalorder %v7964_v13, %v7605_v11  ;;  %16310 = vst [vmem:[#allocation33_spill] sm:$0xff] %v8066_v44 }
  0xa7   :  { %v1375_v46 = vsub.f32 %v7838_v24, %v15424_v37  ;;  %1365 = vmatprep.subr.mxu1 %v1364_v58  ;;  %v8018_v50 = vsub.f32 %v6318_v4, %v6318_v4  ;;  %v6317_v23 = vsel %vm15429_vm15, 1.0, %v15435_v22  ;;  %6586 = vmatpush1.msk.msra.mxu0 %vm15429_vm15, %v15439_v21  ;;  %v15430_v34 = vand.u32 4294901760, %v7882_v59  ;;  %v8032_v4 = vpop.permute.xlu0 %170 }
  0xa8   :  { %v1381_v5 = vsub.f32 %v7867_v51, %v15426_v0  ;;  %1371 = vmatpush1.msra.mxu1 %v1370_v48  ;;  %16309 = vst [vmem:[#allocation32_spill] sm:$0xff] %v8032_v4  ;;  %v8034_v37 = vsub.f32 %v6317_v23, %v6317_v23  ;;  %vm15432_vm14 = vcmp.eq.s32.totalorder %v7998_v35, %v7617_v15  ;;  %v15433_v0 = vand.u32 4294901760, %v7898_v9 }
  0xa9   :  { %v1376_v58 = vand.u32 4294901760, %v1375_v46  ;;  %v1387_v45 = vsub.f32 %v7882_v59, %v15430_v34  ;;  %v6314_v48 = vsel %vm15432_vm14, 1.0, %v15435_v22  ;;  %6587 = vmatprep.subr.msk.mxu0 %vm15432_vm14, %v15439_v21  ;;  %vm15443_vm15 = vcmp.eq.s32.totalorder %v7998_v35, %v7605_v11  ;;  %v8134_v10 = vpop.permute.xlu1 %257 }
  0xaa   :  { %v1382_v3 = vand.u32 4294901760, %v1381_v5  ;;  %v8052_v46 = vsub.f32 %v6314_v48, %v6314_v48  ;;  %v1393_v5 = vsub.f32 %v7898_v9, %v15433_v0  ;;  %v6313_v23 = vsel %vm15443_vm15, 1.0, %v15435_v22  ;;  %6588 = vmatpush1.msk.msra.mxu0 %vm15443_vm15, %v15439_v21  ;;  %16318 = vst [vmem:[#allocation39_spill] sm:$0xff] %v8134_v10 }
  0xab   :  { %1377 = vmatprep.subr.mxu1 %v1376_v58  ;;  %v15444_v34 = vand.u32 4294901760, %v7916_v26  ;;  %v1388_v58 = vand.u32 4294901760, %v1387_v45  ;;  %v8068_v48 = vsub.f32 %v6313_v23, %v6313_v23  ;;  %vm15445_vm14 = vcmp.eq.s32.totalorder %v8032_v4, %v7617_v15 }
  0xac   :  { %1383 = vmatpush1.msra.mxu1 %v1382_v3  ;;  %v15446_v0 = vand.u32 4294901760, %v7932_v60  ;;  %v1394_v61 = vand.u32 4294901760, %v1393_v5  ;;  %v6310_v21 = vsel %vm15445_vm14, 1.0, %v16312_v47  ;;  %6589 = vmatprep.subr.msk.mxu0 %vm15445_vm14, %v16313_v53  ;;  %vm15451_vm15 = vcmp.eq.s32.totalorder %v8032_v4, %v7605_v11 }
  0xad   :  { %16311 = vst [vmem:[#allocation34_spill] sm:$0xff] %v8068_v48  ;;  %v1399_v22 = vsub.f32 %v7916_v26, %v15444_v34  ;;  %1389 = vmatprep.subr.mxu1 %v1388_v58  ;;  %v8086_v45 = vsub.f32 %v6310_v21, %v6310_v21  ;;  %v6309_v5 = vsel %vm15451_vm15, 1.0, %v16312_v47  ;;  %6590 = vmatpush1.msk.msra.mxu0 %vm15451_vm15, %v16313_v53  ;;  %v15452_v23 = vand.u32 4294901760, %v7950_v16  ;;  %v8100_v21 = vpop.permute.xlu0 %260 }
  0xae   :  { %v1405_v3 = vsub.f32 %v7932_v60, %v15446_v0  ;;  %1395 = vmatpush1.msra.mxu1 %v1394_v61  ;;  %16315 = vst [vmem:[#allocation36_spill] sm:$0xff] %v8100_v21  ;;  %v8102_v34 = vsub.f32 %v6309_v5, %v6309_v5  ;;  %vm15455_vm14 = vcmp.eq.s32.totalorder %v8066_v44, %v7617_v15  ;;  %v15456_v0 = vand.u32 4294901760, %v7966_v49 }
  0xaf   :  { %16314 = vst [vmem:[#allocation35_spill] sm:$0xff] %v8086_v45  ;;  %v1400_v58 = vand.u32 4294901760, %v1399_v22  ;;  %v1411_v57 = vsub.f32 %v7950_v16, %v15452_v23  ;;  %v6306_v61 = vsel %vm15455_vm14, 1.0, %v16312_v47  ;;  %6591 = vmatprep.subr.msk.mxu0 %vm15455_vm14, %v16313_v53  ;;  %vm15463_vm15 = vcmp.eq.s32.totalorder %v8066_v44, %v7605_v11 }
  0xb0   :  { %16316 = vst [vmem:[#allocation37_spill] sm:$0xff] %v8102_v34  ;;  %v1406_v14 = vand.u32 4294901760, %v1405_v3  ;;  %v8120_v22 = vsub.f32 %v6306_v61, %v6306_v61  ;;  %v1417_v3 = vsub.f32 %v7966_v49, %v15456_v0  ;;  %v6305_v5 = vsel %vm15463_vm15, 1.0, %v16312_v47  ;;  %6592 = vmatpush1.msk.msra.mxu0 %vm15463_vm15, %v16313_v53 }
  0xb1   :  { %1401 = vmatprep.subr.mxu1 %v1400_v58  ;;  %v15464_v23 = vand.u32 4294901760, %v7984_v25  ;;  %v1412_v58 = vand.u32 4294901760, %v1411_v57  ;;  %v8136_v61 = vsub.f32 %v6305_v5, %v6305_v5  ;;  %vm15465_vm14 = vcmp.eq.s32.totalorder %v8100_v21, %v7617_v15  ;;  %v16597_v29 = vld [vmem:[#allocation39_spill] sm:$0xff] }
  0xb2   :  { %16317 = vst [vmem:[#allocation38_spill] sm:$0xff] %v8120_v22  ;;  %1407 = vmatpush1.msra.mxu1 %v1406_v14  ;;  %v15466_v0 = vand.u32 4294901760, %v8000_v6  ;;  %v1418_v4 = vand.u32 4294901760, %v1417_v3  ;;  %v6430_v44 = vsel %vm15465_vm14, 1.0, %v16312_v47  ;;  %6593 = vmatprep.subr.msk.mxu0 %vm15465_vm14, %v16313_v53  ;;  %vm15471_vm15 = vcmp.eq.s32.totalorder %v8100_v21, %v7605_v11  ;;  %v8202_v21 = vpop.permute.xlu1 %251 }
  0xb3   :  { %16319 = vst [vmem:[#allocation40_spill] sm:$0xff] %v8136_v61  ;;  %v1423_v35 = vsub.f32 %v7984_v25, %v15464_v23  ;;  %1413 = vmatprep.subr.mxu1 %v1412_v58  ;;  %v8154_v57 = vsub.f32 %v6430_v44, %v6430_v44  ;;  %v6429_v3 = vsel %vm15471_vm15, 1.0, %v16312_v47  ;;  %6594 = vmatpush2.msk.msra.mxu0 %vm15471_vm15, %v16313_v53  ;;  %v15472_v5 = vand.u32 4294901760, %v8018_v50  ;;  %v8168_v44 = vpop.permute.xlu0 %254 }
  0xb4   :  { %v1429_v14 = vsub.f32 %v8000_v6, %v15466_v0  ;;  %1419 = vmatpush1.msra.mxu1 %v1418_v4  ;;  %16321 = vst [vmem:[#allocation42_spill] sm:$0xff] %v8168_v44  ;;  %v8170_v23 = vsub.f32 %v6429_v3, %v6429_v3  ;;  %vm15475_vm14 = vcmp.eq.s32.totalorder %v8134_v10, %v7617_v15  ;;  %v15476_v0 = vand.u32 4294901760, %v8034_v37 }
  0xb5   :  { %16320 = vst [vmem:[#allocation41_spill] sm:$0xff] %v8154_v57  ;;  %v1424_v58 = vand.u32 4294901760, %v1423_v35  ;;  %v1435_v52 = vsub.f32 %v8018_v50, %v15472_v5  ;;  %v6426_v4 = vsel %vm15475_vm14, 1.0, %v16312_v47  ;;  %6595 = vmatprep.subr.msk.mxu0 %vm15475_vm14, %v16313_v53  ;;  %vm15483_vm15 = vcmp.eq.s32.totalorder %v8134_v10, %v7605_v11  ;;  %16324 = vst [vmem:[#allocation45_spill] sm:$0xff] %v8202_v21 }
  0xb6   :  { %16322 = vst [vmem:[#allocation43_spill] sm:$0xff] %v8170_v23  ;;  %v1430_v13 = vand.u32 4294901760, %v1429_v14  ;;  %v8188_v35 = vsub.f32 %v6426_v4, %v6426_v4  ;;  %v1441_v14 = vsub.f32 %v8034_v37, %v15476_v0  ;;  %v6425_v3 = vsel %vm15483_vm15, 1.0, %v16312_v47  ;;  %6596 = vmatpush2.msk.msra.mxu0 %vm15483_vm15, %v16313_v53 }
  0xb7   :  { %1425 = vmatprep.subr.mxu1 %v1424_v58  ;;  %v15484_v5 = vand.u32 4294901760, %v8052_v46  ;;  %v1436_v58 = vand.u32 4294901760, %v1435_v52  ;;  %v8204_v4 = vsub.f32 %v6425_v3, %v6425_v3  ;;  %vm15485_vm14 = vcmp.eq.s32.totalorder %v8168_v44, %v7617_v15 }
  0xb8   :  { %16323 = vst [vmem:[#allocation44_spill] sm:$0xff] %v8188_v35  ;;  %1431 = vmatpush1.msra.mxu1 %v1430_v13  ;;  %v15486_v0 = vand.u32 4294901760, %v8068_v48  ;;  %v1442_v8 = vand.u32 4294901760, %v1441_v14  ;;  %v6422_v10 = vsel %vm15485_vm14, 1.0, %v16312_v47  ;;  %6597 = vmatprep.subr.msk.mxu0 %vm15485_vm14, %v16313_v53  ;;  %vm15491_vm15 = vcmp.eq.s32.totalorder %v8168_v44, %v7605_v11  ;;  %v8270_v44 = vpop.permute.xlu1 %245 }
  0xb9   :  { %16325 = vst [vmem:[#allocation46_spill] sm:$0xff] %v8204_v4  ;;  %v1447_v36 = vsub.f32 %v8052_v46, %v15484_v5  ;;  %1437 = vmatprep.subr.mxu1 %v1436_v58  ;;  %v8222_v52 = vsub.f32 %v6422_v10, %v6422_v10  ;;  %v6421_v14 = vsel %vm15491_vm15, 1.0, %v16312_v47  ;;  %6598 = vmatpush2.msk.msra.mxu0 %vm15491_vm15, %v16313_v53  ;;  %v15492_v3 = vand.u32 4294901760, %v8086_v45  ;;  %v8236_v10 = vpop.permute.xlu0 %248 }
  0xba   :  { %v1453_v13 = vsub.f32 %v8068_v48, %v15486_v0  ;;  %1443 = vmatpush1.msra.mxu1 %v1442_v8  ;;  %16327 = vst [vmem:[#allocation48_spill] sm:$0xff] %v8236_v10  ;;  %v8238_v5 = vsub.f32 %v6421_v14, %v6421_v14  ;;  %vm15495_vm14 = vcmp.eq.s32.totalorder %v8202_v21, %v7617_v15  ;;  %v15496_v0 = vand.u32 4294901760, %v8102_v34 }
  0xbb   :  { %16326 = vst [vmem:[#allocation47_spill] sm:$0xff] %v8222_v52  ;;  %v1448_v58 = vand.u32 4294901760, %v1447_v36  ;;  %v1459_v48 = vsub.f32 %v8086_v45, %v15492_v3  ;;  %v6418_v8 = vsel %vm15495_vm14, 1.0, %v16312_v47  ;;  %6599 = vmatprep.subr.msk.mxu0 %vm15495_vm14, %v16313_v53  ;;  %vm15503_vm15 = vcmp.eq.s32.totalorder %v8202_v21, %v7605_v11  ;;  %16330 = vst [vmem:[#allocation51_spill] sm:$0xff] %v8270_v44 }
  0xbc   :  { %16328 = vst [vmem:[#allocation49_spill] sm:$0xff] %v8238_v5  ;;  %v1454_v17 = vand.u32 4294901760, %v1453_v13  ;;  %v8256_v36 = vsub.f32 %v6418_v8, %v6418_v8  ;;  %v1465_v13 = vsub.f32 %v8102_v34, %v15496_v0  ;;  %v6417_v14 = vsel %vm15503_vm15, 1.0, %v16312_v47  ;;  %6600 = vmatpush2.msk.msra.mxu0 %vm15503_vm15, %v16313_v53 }
  0xbd   :  { %1449 = vmatprep.subr.mxu1 %v1448_v58  ;;  %v15504_v3 = vand.u32 4294901760, %v8120_v22  ;;  %v1460_v58 = vand.u32 4294901760, %v1459_v48  ;;  %v8272_v8 = vsub.f32 %v6417_v14, %v6417_v14  ;;  %vm15505_vm14 = vcmp.eq.s32.totalorder %v8236_v10, %v7617_v15 }
  0xbe   :  { %16329 = vst [vmem:[#allocation50_spill] sm:$0xff] %v8256_v36  ;;  %1455 = vmatpush1.msra.mxu1 %v1454_v17  ;;  %v15506_v0 = vand.u32 4294901760, %v8136_v61  ;;  %v1466_v34 = vand.u32 4294901760, %v1465_v13  ;;  %v6414_v21 = vsel %vm15505_vm14, 1.0, %v16312_v47  ;;  %6601 = vmatprep.subr.msk.mxu0 %vm15505_vm14, %v16313_v53  ;;  %vm15511_vm15 = vcmp.eq.s32.totalorder %v8236_v10, %v7605_v11  ;;  %v8338_v10 = vpop.permute.xlu1 %239 }
  0xbf   :  { %16331 = vst [vmem:[#allocation52_spill] sm:$0xff] %v8272_v8  ;;  %v1471_v45 = vsub.f32 %v8120_v22, %v15504_v3  ;;  %1461 = vmatprep.subr.mxu1 %v1460_v58  ;;  %v8290_v17 = vsub.f32 %v6414_v21, %v6414_v21  ;;  %v6413_v13 = vsel %vm15511_vm15, 1.0, %v16312_v47  ;;  %6602 = vmatpush2.msk.msra.mxu0 %vm15511_vm15, %v16313_v53  ;;  %v15512_v14 = vand.u32 4294901760, %v8154_v57  ;;  %v8304_v21 = vpop.permute.xlu0 %242 }
  0xc0   :  { %v1477_v48 = vsub.f32 %v8136_v61, %v15506_v0  ;;  %1467 = vmatpush1.msra.mxu1 %v1466_v34  ;;  %16333 = vst [vmem:[#allocation54_spill] sm:$0xff] %v8304_v21  ;;  %v8306_v3 = vsub.f32 %v6413_v13, %v6413_v13  ;;  %vm15515_vm14 = vcmp.eq.s32.totalorder %v8270_v44, %v7617_v15  ;;  %v15516_v0 = vand.u32 4294901760, %v8170_v23 }
  0xc1   :  { %16332 = vst [vmem:[#allocation53_spill] sm:$0xff] %v8290_v17  ;;  %v1472_v58 = vand.u32 4294901760, %v1471_v45  ;;  %v1483_v22 = vsub.f32 %v8154_v57, %v15512_v14  ;;  %v6410_v34 = vsel %vm15515_vm14, 1.0, %v16312_v47  ;;  %6603 = vmatprep.subr.msk.mxu0 %vm15515_vm14, %v16313_v53  ;;  %vm15523_vm15 = vcmp.eq.s32.totalorder %v8270_v44, %v7605_v11  ;;  %16336 = vst [vmem:[#allocation57_spill] sm:$0xff] %v8338_v10 }
  0xc2   :  { %16334 = vst [vmem:[#allocation55_spill] sm:$0xff] %v8306_v3  ;;  %v1478_v61 = vand.u32 4294901760, %v1477_v48  ;;  %v8324_v45 = vsub.f32 %v6410_v34, %v6410_v34  ;;  %v1489_v48 = vsub.f32 %v8170_v23, %v15516_v0  ;;  %v6409_v13 = vsel %vm15523_vm15, 1.0, %v16312_v47  ;;  %6604 = vmatpush2.msk.msra.mxu0 %vm15523_vm15, %v16313_v53 }
  0xc3   :  { %1473 = vmatprep.subr.mxu1 %v1472_v58  ;;  %v15524_v14 = vand.u32 4294901760, %v8188_v35  ;;  %v1484_v58 = vand.u32 4294901760, %v1483_v22  ;;  %v8340_v34 = vsub.f32 %v6409_v13, %v6409_v13  ;;  %vm15525_vm14 = vcmp.eq.s32.totalorder %v8304_v21, %v7617_v15 }
  0xc4   :  { %16335 = vst [vmem:[#allocation56_spill] sm:$0xff] %v8324_v45  ;;  %1479 = vmatpush1.msra.mxu1 %v1478_v61  ;;  %v15526_v0 = vand.u32 4294901760, %v8204_v4  ;;  %v1490_v23 = vand.u32 4294901760, %v1489_v48  ;;  %v6406_v44 = vsel %vm15525_vm14, 1.0, %v16312_v47  ;;  %6605 = vmatprep.subr.msk.mxu0 %vm15525_vm14, %v16313_v53  ;;  %vm15531_vm15 = vcmp.eq.s32.totalorder %v8304_v21, %v7605_v11  ;;  %v8406_v21 = vpop.permute.xlu1 %233 }
  0xc5   :  { %16337 = vst [vmem:[#allocation58_spill] sm:$0xff] %v8340_v34  ;;  %v1495_v57 = vsub.f32 %v8188_v35, %v15524_v14  ;;  %1485 = vmatprep.subr.mxu1 %v1484_v58  ;;  %v8358_v22 = vsub.f32 %v6406_v44, %v6406_v44  ;;  %v6405_v48 = vsel %vm15531_vm15, 1.0, %v16312_v47  ;;  %6606 = vmatpush2.msk.msra.mxu0 %vm15531_vm15, %v16313_v53  ;;  %v15532_v13 = vand.u32 4294901760, %v8222_v52  ;;  %v8372_v44 = vpop.permute.xlu0 %236 }
  0xc6   :  { %v1501_v61 = vsub.f32 %v8204_v4, %v15526_v0  ;;  %1491 = vmatpush2.msra.mxu1 %v1490_v23  ;;  %16339 = vst [vmem:[#allocation60_spill] sm:$0xff] %v8372_v44  ;;  %v8374_v14 = vsub.f32 %v6405_v48, %v6405_v48  ;;  %vm15535_vm14 = vcmp.eq.s32.totalorder %v8338_v10, %v7617_v15  ;;  %v15536_v0 = vand.u32 4294901760, %v8238_v5 }
  0xc7   :  { %16338 = vst [vmem:[#allocation59_spill] sm:$0xff] %v8358_v22  ;;  %v1496_v58 = vand.u32 4294901760, %v1495_v57  ;;  %v1507_v35 = vsub.f32 %v8222_v52, %v15532_v13  ;;  %v6402_v23 = vsel %vm15535_vm14, 1.0, %v16312_v47  ;;  %6607 = vmatprep.subr.msk.mxu0 %vm15535_vm14, %v16313_v53  ;;  %vm15543_vm15 = vcmp.eq.s32.totalorder %v8338_v10, %v7605_v11  ;;  %16342 = vst [vmem:[#allocation63_spill] sm:$0xff] %v8406_v21 }
  0xc8   :  { %16340 = vst [vmem:[#allocation61_spill] sm:$0xff] %v8374_v14  ;;  %v1502_v4 = vand.u32 4294901760, %v1501_v61  ;;  %v8392_v57 = vsub.f32 %v6402_v23, %v6402_v23  ;;  %v1513_v61 = vsub.f32 %v8238_v5, %v15536_v0  ;;  %v6401_v48 = vsel %vm15543_vm15, 1.0, %v16312_v47  ;;  %6608 = vmatpush2.msk.msra.mxu0 %vm15543_vm15, %v16313_v53 }
  0xc9   :  { %1497 = vmatprep.subr.mxu1 %v1496_v58  ;;  %v15544_v13 = vand.u32 4294901760, %v8256_v36  ;;  %v1508_v58 = vand.u32 4294901760, %v1507_v35  ;;  %v8408_v23 = vsub.f32 %v6401_v48, %v6401_v48  ;;  %vm15545_vm14 = vcmp.eq.s32.totalorder %v8372_v44, %v7617_v15 }
  0xca   :  { %16341 = vst [vmem:[#allocation62_spill] sm:$0xff] %v8392_v57  ;;  %1503 = vmatpush2.msra.mxu1 %v1502_v4  ;;  %v15546_v0 = vand.u32 4294901760, %v8272_v8  ;;  %v1514_v5 = vand.u32 4294901760, %v1513_v61  ;;  %v6398_v10 = vsel %vm15545_vm14, 1.0, %v16312_v47  ;;  %6609 = vmatprep.subr.msk.mxu0 %vm15545_vm14, %v16313_v53  ;;  %vm15551_vm15 = vcmp.eq.s32.totalorder %v8372_v44, %v7605_v11  ;;  %v8474_v44 = vpop.permute.xlu1 %227 }
  0xcb   :  { %16343 = vst [vmem:[#allocation64_spill] sm:$0xff] %v8408_v23  ;;  %v1519_v52 = vsub.f32 %v8256_v36, %v15544_v13  ;;  %1509 = vmatprep.subr.mxu1 %v1508_v58  ;;  %v8426_v35 = vsub.f32 %v6398_v10, %v6398_v10  ;;  %v6397_v61 = vsel %vm15551_vm15, 1.0, %v16312_v47  ;;  %6610 = vmatpush2.msk.msra.mxu0 %vm15551_vm15, %v16313_v53  ;;  %v15552_v48 = vand.u32 4294901760, %v8290_v17  ;;  %v8440_v10 = vpop.permute.xlu0 %230 }
  0xcc   :  { %v1525_v4 = vsub.f32 %v8272_v8, %v15546_v0  ;;  %1515 = vmatpush2.msra.mxu1 %v1514_v5  ;;  %16345 = vst [vmem:[#allocation66_spill] sm:$0xff] %v8440_v10  ;;  %v8442_v13 = vsub.f32 %v6397_v61, %v6397_v61  ;;  %vm15555_vm14 = vcmp.eq.s32.totalorder %v8406_v21, %v7617_v15  ;;  %v15556_v0 = vand.u32 4294901760, %v8306_v3 }
  0xcd   :  { %16344 = vst [vmem:[#allocation65_spill] sm:$0xff] %v8426_v35  ;;  %v1520_v58 = vand.u32 4294901760, %v1519_v52  ;;  %v1531_v36 = vsub.f32 %v8290_v17, %v15552_v48  ;;  %v6394_v5 = vsel %vm15555_vm14, 1.0, %v16312_v47  ;;  %6611 = vmatprep.subr.msk.mxu0 %vm15555_vm14, %v16313_v53  ;;  %vm15563_vm15 = vcmp.eq.s32.totalorder %v8406_v21, %v7605_v11  ;;  %16348 = vst [vmem:[#allocation69_spill] sm:$0xff] %v8474_v44 }
  0xce   :  { %16346 = vst [vmem:[#allocation67_spill] sm:$0xff] %v8442_v13  ;;  %v1526_v8 = vand.u32 4294901760, %v1525_v4  ;;  %v8460_v52 = vsub.f32 %v6394_v5, %v6394_v5  ;;  %v1537_v4 = vsub.f32 %v8306_v3, %v15556_v0  ;;  %v6393_v61 = vsel %vm15563_vm15, 1.0, %v16312_v47  ;;  %6612 = vmatpush2.msk.msra.mxu0 %vm15563_vm15, %v16313_v53 }
  0xcf   :  { %1521 = vmatprep.subr.mxu1 %v1520_v58  ;;  %v15564_v48 = vand.u32 4294901760, %v8324_v45  ;;  %v1532_v58 = vand.u32 4294901760, %v1531_v36  ;;  %v8476_v5 = vsub.f32 %v6393_v61, %v6393_v61  ;;  %vm15565_vm14 = vcmp.eq.s32.totalorder %v8440_v10, %v7617_v15 }
  0xd0   :  { %16347 = vst [vmem:[#allocation68_spill] sm:$0xff] %v8460_v52  ;;  %1527 = vmatpush2.msra.mxu1 %v1526_v8  ;;  %v15566_v0 = vand.u32 4294901760, %v8340_v34  ;;  %v1538_v3 = vand.u32 4294901760, %v1537_v4  ;;  %v6390_v21 = vsel %vm15565_vm14, 1.0, %v16312_v47  ;;  %6613 = vmatprep.subr.msk.mxu0 %vm15565_vm14, %v16313_v53  ;;  %vm15571_vm15 = vcmp.eq.s32.totalorder %v8440_v10, %v7605_v11  ;;  %v8542_v10 = vpop.permute.xlu1 %221 }
  0xd1   :  { %16349 = vst [vmem:[#allocation70_spill] sm:$0xff] %v8476_v5  ;;  %v1543_v17 = vsub.f32 %v8324_v45, %v15564_v48  ;;  %1533 = vmatprep.subr.mxu1 %v1532_v58  ;;  %v8494_v36 = vsub.f32 %v6390_v21, %v6390_v21  ;;  %v6389_v4 = vsel %vm15571_vm15, 1.0, %v16312_v47  ;;  %6614 = vmatpush2.msk.msra.mxu0 %vm15571_vm15, %v16313_v53  ;;  %v15572_v61 = vand.u32 4294901760, %v8358_v22  ;;  %v8508_v21 = vpop.permute.xlu0 %224 }
  0xd2   :  { %v1549_v8 = vsub.f32 %v8340_v34, %v15566_v0  ;;  %1539 = vmatpush2.msra.mxu1 %v1538_v3  ;;  %16350 = vst [vmem:[#allocation71_spill] sm:$0xff] %v8508_v21  ;;  %v8510_v48 = vsub.f32 %v6389_v4, %v6389_v4  ;;  %vm15575_vm14 = vcmp.eq.s32.totalorder %v8474_v44, %v7617_v15  ;;  %v15576_v0 = vand.u32 4294901760, %v8374_v14 }
  0xd3   :  { %v1544_v58 = vand.u32 4294901760, %v1543_v17  ;;  %v1555_v45 = vsub.f32 %v8358_v22, %v15572_v61  ;;  %v6386_v3 = vsel %vm15575_vm14, 1.0, %v16312_v47  ;;  %6615 = vmatprep.subr.msk.mxu0 %vm15575_vm14, %v16313_v53  ;;  %vm15583_vm15 = vcmp.eq.s32.totalorder %v8474_v44, %v7605_v11  ;;  %16353 = vst [vmem:[#allocation74_spill] sm:$0xff] %v8542_v10 }
  0xd4   :  { %16351 = vst [vmem:[#allocation72_spill] sm:$0xff] %v8510_v48  ;;  %v1550_v34 = vand.u32 4294901760, %v1549_v8  ;;  %v8528_v17 = vsub.f32 %v6386_v3, %v6386_v3  ;;  %v1561_v8 = vsub.f32 %v8374_v14, %v15576_v0  ;;  %v6385_v4 = vsel %vm15583_vm15, 1.0, %v16312_v47  ;;  %6616 = vmatpush2.msk.msra.mxu0 %vm15583_vm15, %v16313_v53 }
  0xd5   :  { %1545 = vmatprep.subr.mxu1 %v1544_v58  ;;  %v15584_v61 = vand.u32 4294901760, %v8392_v57  ;;  %v1556_v58 = vand.u32 4294901760, %v1555_v45  ;;  %v8544_v3 = vsub.f32 %v6385_v4, %v6385_v4  ;;  %vm15585_vm14 = vcmp.eq.s32.totalorder %v8508_v21, %v7617_v15 }
  0xd6   :  { %16352 = vst [vmem:[#allocation73_spill] sm:$0xff] %v8528_v17  ;;  %1551 = vmatpush2.msra.mxu1 %v1550_v34  ;;  %v15586_v0 = vand.u32 4294901760, %v8408_v23  ;;  %v1562_v14 = vand.u32 4294901760, %v1561_v8  ;;  %v6382_v44 = vsel %vm15585_vm14, 1.0, %v16312_v47  ;;  %6617 = vmatprep.subr.msk.mxu0 %vm15585_vm14, %v16313_v53  ;;  %vm15591_vm15 = vcmp.eq.s32.totalorder %v8508_v21, %v7605_v11  ;;  %v8610_v21 = vpop.permute.xlu1 %215 }
  0xd7   :  { %16354 = vst [vmem:[#allocation75_spill] sm:$0xff] %v8544_v3  ;;  %v1567_v22 = vsub.f32 %v8392_v57, %v15584_v61  ;;  %1557 = vmatprep.subr.mxu1 %v1556_v58  ;;  %v8562_v45 = vsub.f32 %v6382_v44, %v6382_v44  ;;  %v6381_v8 = vsel %vm15591_vm15, 1.0, %v16312_v47  ;;  %6618 = vmatpush2.msk.msra.mxu0 %vm15591_vm15, %v16313_v53  ;;  %v15592_v4 = vand.u32 4294901760, %v8426_v35  ;;  %v8576_v44 = vpop.permute.xlu0 %218 }
  0xd8   :  { %v1573_v34 = vsub.f32 %v8408_v23, %v15586_v0  ;;  %1563 = vmatpush2.msra.mxu1 %v1562_v14  ;;  %16356 = vst [vmem:[#allocation77_spill] sm:$0xff] %v8576_v44  ;;  %v8578_v61 = vsub.f32 %v6381_v8, %v6381_v8  ;;  %vm15595_vm14 = vcmp.eq.s32.totalorder %v8542_v10, %v7617_v15  ;;  %v15596_v0 = vand.u32 4294901760, %v8442_v13 }
  0xd9   :  { %16355 = vst [vmem:[#allocation76_spill] sm:$0xff] %v8562_v45  ;;  %v1568_v58 = vand.u32 4294901760, %v1567_v22  ;;  %v1579_v57 = vsub.f32 %v8426_v35, %v15592_v4  ;;  %v6378_v14 = vsel %vm15595_vm14, 1.0, %v16312_v47  ;;  %6619 = vmatprep.subr.msk.mxu0 %vm15595_vm14, %v16313_v53  ;;  %vm15603_vm15 = vcmp.eq.s32.totalorder %v8542_v10, %v7605_v11  ;;  %16359 = vst [vmem:[#allocation80_spill] sm:$0xff] %v8610_v21 }
  0xda   :  { %16357 = vst [vmem:[#allocation78_spill] sm:$0xff] %v8578_v61  ;;  %v1574_v23 = vand.u32 4294901760, %v1573_v34  ;;  %v8596_v22 = vsub.f32 %v6378_v14, %v6378_v14  ;;  %v1585_v34 = vsub.f32 %v8442_v13, %v15596_v0  ;;  %v6377_v8 = vsel %vm15603_vm15, 1.0, %v16312_v47  ;;  %6620 = vmatpush2.msk.msra.mxu0 %vm15603_vm15, %v16313_v53 }
  0xdb   :  { %1569 = vmatprep.subr.mxu1 %v1568_v58  ;;  %v15606_v4 = vand.u32 4294901760, %v8460_v52  ;;  %v1580_v58 = vand.u32 4294901760, %v1579_v57  ;;  %v8612_v14 = vsub.f32 %v6377_v8, %v6377_v8  ;;  %vm15604_vm14 = vcmp.eq.s32.totalorder %v8576_v44, %v7617_v15 }
  0xdc   :  { %16358 = vst [vmem:[#allocation79_spill] sm:$0xff] %v8596_v22  ;;  %1575 = vmatpush2.msra.mxu1 %v1574_v23  ;;  %v15605_v0 = vand.u32 4294901760, %v8476_v5  ;;  %v1586_v13 = vand.u32 4294901760, %v1585_v34  ;;  %v6374_v10 = vsel %vm15604_vm14, 1.0, %v16312_v47  ;;  %6621 = vmatprep.subr.msk.mxu0 %vm15604_vm14, %v16313_v53  ;;  %vm15611_vm15 = vcmp.eq.s32.totalorder %v8576_v44, %v7605_v11 }
  0xdd   :  { %16360 = vst [vmem:[#allocation81_spill] sm:$0xff] %v8612_v14  ;;  %v1591_v35 = vsub.f32 %v8460_v52, %v15606_v4  ;;  %1581 = vmatprep.subr.mxu1 %v1580_v58  ;;  %v8630_v57 = vsub.f32 %v6374_v10, %v6374_v10  ;;  %v6373_v34 = vsel %vm15611_vm15, 1.0, %v16312_v47  ;;  %6622 = vmatpush2.msk.msra.mxu0 %vm15611_vm15, %v16313_v53  ;;  %v15612_v8 = vand.u32 4294901760, %v8494_v36 }
  0xde   :  { %v1597_v23 = vsub.f32 %v8476_v5, %v15605_v0  ;;  %1587 = vmatpush2.msra.mxu1 %v1586_v13  ;;  %v8644_v10 = vsub.f32 %v6373_v34, %v6373_v34  ;;  %vm423_vm14 = vcmp.eq.s32.totalorder %v8610_v21, %v7617_v15  ;;  %v15613_v0 = vand.u32 4294901760, %v8510_v48 }
  0xdf   :  { %16361 = vst [vmem:[#allocation82_spill] sm:$0xff] %v8630_v57  ;;  %v1592_v58 = vand.u32 4294901760, %v1591_v35  ;;  %v1603_v5 = vsub.f32 %v8494_v36, %v15612_v8  ;;  %v6370_v44 = vsel %vm423_vm14, 1.0, %v16312_v47  ;;  %6623 = vmatprep.subr.msk.mxu0 %vm423_vm14, %v16313_v53  ;;  %vm422_vm15 = vcmp.eq.s32.totalorder %v8610_v21, %v7605_v11 }
  0xe0   :  { %16362 = vst [vmem:[#allocation83_spill] sm:$0xff] %v8644_v10  ;;  %v1598_v4 = vand.u32 4294901760, %v1597_v23  ;;  %v8662_v13 = vsub.f32 %v6370_v44, %v6370_v44  ;;  %v1609_v35 = vsub.f32 %v8510_v48, %v15613_v0  ;;  %v6369_v23 = vsel %vm422_vm15, 1.0, %v16312_v47  ;;  %6624 = vmatpush2.msk.msra.mxu0 %vm422_vm15, %v16313_v53 }
  0xe1   :  { %1593 = vmatprep.subr.mxu1 %v1592_v58  ;;  %v15619_v34 = vand.u32 4294901760, %v8528_v17  ;;  %v1604_v58 = vand.u32 4294901760, %v1603_v5  ;;  %v8676_v44 = vsub.f32 %v6369_v23, %v6369_v23  ;;  %v15621_v8 = vand.u32 4294901760, %v8544_v3  ;;  %1683 = vmatprep.subr.mxu0 %v7673_v32 }
  0xe2   :  { %16363 = vst [vmem:[#allocation84_spill] sm:$0xff] %v8662_v13  ;;  %1599 = vmatpush2.msra.mxu1 %v1598_v4  ;;  %v15622_v0 = vand.u32 4294901760, %v8562_v45  ;;  %v1610_v48 = vand.u32 4294901760, %v1609_v35  ;;  %1282 = vmatmul.mubr.f32.vlgmr.msra.gmra.mxu0 %v7663_v27  ;;  %v15624_v21 = vand.u32 4294901760, %v8578_v61  ;;  %v15625_v4 = vand.u32 4294901760, %v8596_v22 }
  0xe3   :  { %16364 = vst [vmem:[#allocation85_spill] sm:$0xff] %v8676_v44  ;;  %v1615_v47 = vsub.f32 %v8528_v17, %v15619_v34  ;;  %1605 = vmatprep.subr.mxu1 %v1604_v58  ;;  %v1621_v5 = vsub.f32 %v8544_v3, %v15621_v8  ;;  %1686 = vmatpush1.msra.mxu0 %v7675_v33  ;;  %v15626_v35 = vand.u32 4294901760, %v8612_v14  ;;  %v15628_v34 = vand.u32 4294901760, %v8630_v57 }
  0xe4   :  { %v1627_v23 = vsub.f32 %v8562_v45, %v15622_v0  ;;  %1611 = vmatpush2.msra.mxu1 %v1610_v48  ;;  %v1633_v58 = vsub.f32 %v8578_v61, %v15624_v21  ;;  %1689 = vmatprep.subr.mxu0 %v7705_v38  ;;  %v1639_v8 = vsub.f32 %v8596_v22, %v15625_v4  ;;  %v15634_v0 = vand.u32 4294901760, %v8644_v10 }
  0xe5   :  { %v1616_v27 = vand.u32 4294901760, %v1615_v47  ;;  %v1622_v32 = vand.u32 4294901760, %v1621_v5  ;;  %1692 = vmatpush1.msra.mxu0 %v7711_v39  ;;  %v1645_v48 = vsub.f32 %v8612_v14, %v15626_v35  ;;  %1875 = vmatprep.mubr.f32.mxu0 %v7545_v54  ;;  %v1651_v21 = vsub.f32 %v8630_v57, %v15628_v34 }
  0xe6   :  { %v1628_v47 = vand.u32 4294901760, %v1627_v23  ;;  %1695 = vmatprep.subr.mxu0 %v7669_v30  ;;  %v15633_v4 = vand.u32 4294901760, %v8662_v13  ;;  %v1634_v5 = vand.u32 4294901760, %v1633_v58  ;;  %v1657_v35 = vsub.f32 %v8644_v10, %v15634_v0  ;;  %v16386_v0 = vld [vmem:[#allocation29_spill] sm:$0xff] }
  0xe7   :  { %1617 = vmatprep.subr.mxu1 %v1616_v27  ;;  %1698 = vmatpush1.msra.mxu0 %v7671_v31  ;;  %v15632_v54 = vand.u32 4294901760, %v8676_v44  ;;  %v1640_v27 = vand.u32 4294901760, %v1639_v8  ;;  %v1646_v34 = vand.u32 4294901760, %v1645_v48  ;;  %v1652_v58 = vand.u32 4294901760, %v1651_v21  ;;  %v16367_v21 = vld [vmem:[#allocation34_spill] sm:$0xff] }
  0xe8   :  { %1623 = vmatpush2.msra.mxu1 %v1622_v32  ;;  %1701 = vmatprep.subr.mxu0 %v7713_v40  ;;  %v1663_v23 = vsub.f32 %v8662_v13, %v15633_v4  ;;  %v1658_v8 = vand.u32 4294901760, %v1657_v35  ;;  %v16369_v35 = vld [vmem:[#allocation26_spill] sm:$0xff]  ;;  %v16385_v4 = vld [vmem:[#allocation44_spill] sm:$0xff] }
  0xe9   :  { %1629 = vmatprep.subr.mxu1 %v1628_v47  ;;  %1704 = vmatpush1.msra.mxu0 %v7715_v41  ;;  %v1669_v32 = vsub.f32 %v8676_v44, %v15632_v54  ;;  %v16383_v54 = vld [vmem:[#allocation43_spill] sm:$0xff] }
  0xea   :  { %1635 = vmatpush2.msra.mxu1 %v1634_v5  ;;  %1707 = vmatprep.subr.mxu0 %v7763_v55  ;;  %v1664_v47 = vand.u32 4294901760, %v1663_v23  ;;  %v16371_v5 = vld [vmem:[#allocation37_spill] sm:$0xff]  ;;  %v8823_v23 = vpop.permute.xlu0 %308 }
  0xeb   :  { %1641 = vmatprep.subr.mxu1 %v1640_v27  ;;  %1710 = vmatpush1.msra.mxu0 %v7765_v56  ;;  %v1670_v48 = vand.u32 4294901760, %v1669_v32  ;;  %v16373_v27 = vld [vmem:[#allocation38_spill] sm:$0xff]  ;;  %16374 = vst [vmem:[#allocation34_spill] sm:$0xff] %v8823_v23  ;;  %v16375_v32 = vld [vmem:[#allocation27_spill] sm:$0xff] }
  0xec   :  { %1647 = vmatpush2.msra.mxu1 %v1646_v34  ;;  %1713 = vmatprep.subr.mxu0 %v7783_v1  ;;  %v16368_v34 = vld [vmem:[#allocation35_spill] sm:$0xff] }
  0xed   :  { %1653 = vmatprep.subr.mxu1 %v1652_v58  ;;  %1716 = vmatpush1.msra.mxu0 %v7785_v2  ;;  %v16377_v58 = vld [vmem:[#allocation40_spill] sm:$0xff] }
  0xee   :  { %1659 = vmatpush2.msra.mxu1 %v1658_v8  ;;  %1719 = vmatprep.subr.mxu0 %v7821_v12  ;;  %v16379_v8 = vld [vmem:[#allocation41_spill] sm:$0xff] }
  0xef   :  { %1665 = vmatprep.subr.mxu1 %v1664_v47  ;;  %1722 = vmatpush1.msra.mxu0 %v7836_v18  ;;  %v8835_v47 = vpop.permute.xlu1 %305 }
  0xf0   :  { %1671 = vmatpush2.msra.mxu1 %v1670_v48  ;;  %1725 = vmatprep.subr.mxu0 %v7838_v24  ;;  %16380 = vst [vmem:[#allocation35_spill] sm:$0xff] %v8835_v47  ;;  %v16381_v48 = vld [vmem:[#allocation28_spill] sm:$0xff] }
  0xf1   :  { %1675 = vmatmul.mubr.f32.vlgmr.msra.gmra.mxu1 %v7594_v7  ;;  %6625 = vmatprep.subr.msk.mxu1 %vm419_vm1, %v16313_v53  ;;  %v16388_v7 = vld [vmem:[#allocation46_spill] sm:$0xff] }
  0xf2   :  { %6626 = vmatpush1.msk.msra.mxu1 %vm418_vm2, %v16313_v53  ;;  %1728 = vmatpush1.msra.mxu0 %v7867_v51 }
  0xf3   :  { %6627 = vmatprep.subr.msk.mxu1 %vm415_vm5, %v16313_v53  ;;  %1731 = vmatprep.subr.mxu0 %v7882_v59 }
  0xf4   :  { %6628 = vmatpush1.msk.msra.mxu1 %vm414_vm6, %v16313_v53  ;;  %1734 = vmatpush1.msra.mxu0 %v7898_v9 }
  0xf5   :  { %6629 = vmatprep.subr.msk.mxu1 %vm411_vm3, %v16313_v53  ;;  %1737 = vmatprep.subr.mxu0 %v7916_v26 }
  0xf6   :  { %6630 = vmatpush1.msk.msra.mxu1 %vm410_vm4, %v16313_v53  ;;  %1740 = vmatpush1.msra.mxu0 %v7932_v60 }
  0xf7   :  { %6631 = vmatprep.subr.msk.mxu1 %vm407_vm7, %v16313_v53  ;;  %1743 = vmatprep.subr.mxu0 %v7950_v16 }
  0xf8   :  { %6632 = vmatpush1.msk.msra.mxu1 %vm406_vm8, %v16313_v53  ;;  %1746 = vmatpush1.msra.mxu0 %v7966_v49 }
  0xf9   :  { %6633 = vmatprep.subr.msk.mxu1 %vm403_vm9, %v16313_v53  ;;  %1749 = vmatprep.subr.mxu0 %v7984_v25 }
  0xfa   :  { %6634 = vmatpush1.msk.msra.mxu1 %vm402_vm10, %v16313_v53  ;;  %1752 = vmatpush1.msra.mxu0 %v8000_v6 }
  0xfb   :  { %6635 = vmatprep.subr.msk.mxu1 %vm15629_vm11, %v16313_v53  ;;  %1755 = vmatprep.subr.mxu0 %v8018_v50  ;;  %vm16365_vm11 = vcmp.eq.s32.totalorder %v7775_v62, %v7605_v11 }
  0xfc   :  { %6636 = vmatpush1.msk.msra.mxu1 %vm15630_vm12, %v16313_v53  ;;  %1758 = vmatpush1.msra.mxu0 %v8034_v37  ;;  %vm16366_vm12 = vcmp.eq.s32.totalorder %v7777_v63, %v7617_v15 }
  0xfd   :  { %6637 = vmatprep.subr.msk.mxu1 %vm395_vm13, %v16313_v53  ;;  %1761 = vmatprep.subr.mxu0 %v8052_v46 }
  0xfe   :  { %6638 = vmatpush1.msk.msra.mxu1 %vm16365_vm11, %v16313_v53  ;;  %1764 = vmatpush1.msra.mxu0 %v16367_v21  ;;  %vm16370_vm11 = vcmp.eq.s32.totalorder %v16369_v35, %v7617_v15 }
  0xff   :  { %6639 = vmatprep.subr.msk.mxu1 %vm16366_vm12, %v16313_v53  ;;  %1767 = vmatprep.subr.mxu0 %v16368_v34  ;;  %vm16372_vm12 = vcmp.eq.s32.totalorder %v16369_v35, %v7605_v11 }
 0x100   :  { %6640 = vmatpush1.msk.msra.mxu1 %vm15631_vm0, %v16313_v53  ;;  %1770 = vmatpush1.msra.mxu0 %v16371_v5  ;;  %vm16376_vm0 = vcmp.eq.s32.totalorder %v16375_v32, %v7617_v15 }
 0x101   :  { %6641 = vmatprep.subr.msk.mxu1 %vm16370_vm11, %v16313_v53  ;;  %1773 = vmatprep.subr.mxu0 %v16373_v27  ;;  %vm16378_vm11 = vcmp.eq.s32.totalorder %v16375_v32, %v7605_v11 }
 0x102   :  { %6642 = vmatpush1.msk.msra.mxu1 %vm16372_vm12, %v16313_v53  ;;  %1776 = vmatpush1.msra.mxu0 %v16377_v58  ;;  %vm16382_vm12 = vcmp.eq.s32.totalorder %v16381_v48, %v7617_v15  ;;  %v16392_v58 = vld [vmem:[#allocation30_spill] sm:$0xff] }
 0x103   :  { %6643 = vmatprep.subr.msk.mxu1 %vm16376_vm0, %v16313_v53  ;;  %1779 = vmatprep.subr.mxu0 %v16379_v8  ;;  %vm16384_vm0 = vcmp.eq.s32.totalorder %v16381_v48, %v7605_v11  ;;  %v8857_v8 = vpop.permute.xlu0 %302 }
 0x104   :  { %6644 = vmatpush1.msk.msra.mxu1 %vm16378_vm11, %v16313_v53  ;;  %1782 = vmatpush2.msra.mxu0 %v16383_v54  ;;  %vm16387_vm11 = vcmp.eq.s32.totalorder %v16386_v0, %v7617_v15  ;;  %v16390_v54 = vld [vmem:[#allocation47_spill] sm:$0xff]  ;;  %16391 = vst [vmem:[#allocation37_spill] sm:$0xff] %v8857_v8  ;;  %v16400_v8 = vld [vmem:[#allocation52_spill] sm:$0xff] }
 0x105   :  { %6645 = vmatprep.subr.msk.mxu1 %vm16382_vm12, %v16313_v53  ;;  %1785 = vmatprep.subr.mxu0 %v16385_v4  ;;  %vm16389_vm12 = vcmp.eq.s32.totalorder %v16386_v0, %v7605_v11  ;;  %v16394_v4 = vld [vmem:[#allocation49_spill] sm:$0xff]  ;;  %v8869_v0 = vpop.permute.xlu1 %299 }
 0x106   :  { %6646 = vmatpush1.msk.msra.mxu1 %vm16384_vm0, %v16313_v53  ;;  %1788 = vmatpush2.msra.mxu0 %v16388_v7  ;;  %vm16393_vm0 = vcmp.eq.s32.totalorder %v16392_v58, %v7617_v15  ;;  %v16396_v7 = vld [vmem:[#allocation50_spill] sm:$0xff]  ;;  %16397 = vst [vmem:[#allocation38_spill] sm:$0xff] %v8869_v0 }
 0x107   :  { %6647 = vmatprep.subr.msk.mxu1 %vm16387_vm11, %v16313_v53  ;;  %1791 = vmatprep.subr.mxu0 %v16390_v54  ;;  %vm16395_vm11 = vcmp.eq.s32.totalorder %v16392_v58, %v7605_v11  ;;  %v16398_v54 = vld [vmem:[#allocation31_spill] sm:$0xff]  ;;  %v16403_v58 = vld [vmem:[#allocation32_spill] sm:$0xff]  ;;  %v8891_v0 = vpop.permute.xlu0 %296 }
 0x108   :  { %6648 = vmatpush1.msk.msra.mxu1 %vm16389_vm12, %v16313_v53  ;;  %1794 = vmatpush2.msra.mxu0 %v16394_v4  ;;  %vm16399_vm12 = vcmp.eq.s32.totalorder %v16398_v54, %v7617_v15  ;;  %v16402_v4 = vld [vmem:[#allocation53_spill] sm:$0xff]  ;;  %16408 = vst [vmem:[#allocation86_spill] sm:$0xff] %v8891_v0 }
 0x109   :  { %6649 = vmatprep.subr.msk.mxu1 %vm16393_vm0, %v16313_v53  ;;  %1797 = vmatprep.subr.mxu0 %v16396_v7  ;;  %vm16401_vm0 = vcmp.eq.s32.totalorder %v16398_v54, %v7605_v11  ;;  %v16405_v7 = vld [vmem:[#allocation55_spill] sm:$0xff]  ;;  %v16409_v54 = vld [vmem:[#allocation33_spill] sm:$0xff] }
 0x10a   :  { %6650 = vmatpush1.msk.msra.mxu1 %vm16395_vm11, %v16313_v53  ;;  %1800 = vmatpush2.msra.mxu0 %v16400_v8  ;;  %vm16404_vm11 = vcmp.eq.s32.totalorder %v16403_v58, %v7617_v15  ;;  %v16407_v8 = vld [vmem:[#allocation56_spill] sm:$0xff]  ;;  %v16417_v0 = vld [vmem:[#allocation61_spill] sm:$0xff] }
 0x10b   :  { %6651 = vmatprep.subr.msk.mxu1 %vm16399_vm12, %v16313_v53  ;;  %1803 = vmatprep.subr.mxu0 %v16402_v4  ;;  %vm16406_vm12 = vcmp.eq.s32.totalorder %v16403_v58, %v7605_v11  ;;  %v16411_v4 = vld [vmem:[#allocation58_spill] sm:$0xff]  ;;  %v8903_v58 = vpop.permute.xlu1 %293 }
 0x10c   :  { %6652 = vmatpush1.msk.msra.mxu1 %vm16401_vm0, %v16313_v53  ;;  %1806 = vmatpush2.msra.mxu0 %v16405_v7  ;;  %vm16410_vm0 = vcmp.eq.s32.totalorder %v16409_v54, %v7617_v15  ;;  %v16413_v7 = vld [vmem:[#allocation59_spill] sm:$0xff]  ;;  %16414 = vst [vmem:[#allocation87_spill] sm:$0xff] %v8903_v58  ;;  %v8925_v58 = vpop.permute.xlu0 %290 }
 0x10d   :  { %6653 = vmatprep.subr.msk.mxu1 %vm16404_vm11, %v16313_v53  ;;  %1809 = vmatprep.subr.mxu0 %v16407_v8  ;;  %vm16412_vm11 = vcmp.eq.s32.totalorder %v16409_v54, %v7605_v11  ;;  %v16415_v8 = vld [vmem:[#allocation36_spill] sm:$0xff]  ;;  %v16420_v54 = vld [vmem:[#allocation39_spill] sm:$0xff]  ;;  %16425 = vst [vmem:[#allocation88_spill] sm:$0xff] %v8925_v58 }
 0x10e   :  { %6654 = vmatpush1.msk.msra.mxu1 %vm16406_vm12, %v16313_v53  ;;  %1812 = vmatpush2.msra.mxu0 %v16411_v4  ;;  %vm16416_vm12 = vcmp.eq.s32.totalorder %v16415_v8, %v7617_v15  ;;  %v16419_v4 = vld [vmem:[#allocation62_spill] sm:$0xff] }
 0x10f   :  { %6655 = vmatprep.subr.msk.mxu1 %vm16410_vm0, %v16313_v53  ;;  %1815 = vmatprep.subr.mxu0 %v16413_v7  ;;  %vm16418_vm0 = vcmp.eq.s32.totalorder %v16415_v8, %v7605_v11  ;;  %v16422_v7 = vld [vmem:[#allocation64_spill] sm:$0xff]  ;;  %v16426_v8 = vld [vmem:[#allocation42_spill] sm:$0xff] }
 0x110   :  { %6656 = vmatpush1.msk.msra.mxu1 %vm16412_vm11, %v16313_v53  ;;  %1818 = vmatpush2.msra.mxu0 %v16417_v0  ;;  %vm16421_vm11 = vcmp.eq.s32.totalorder %v16420_v54, %v7617_v15  ;;  %v16424_v0 = vld [vmem:[#allocation65_spill] sm:$0xff] }
 0x111   :  { %6657 = vmatprep.subr.msk.mxu1 %vm16416_vm12, %v16313_v53  ;;  %1821 = vmatprep.subr.mxu0 %v16419_v4  ;;  %vm16423_vm12 = vcmp.eq.s32.totalorder %v16420_v54, %v7605_v11  ;;  %v16428_v4 = vld [vmem:[#allocation67_spill] sm:$0xff]  ;;  %v16433_v54 = vld [vmem:[#allocation70_spill] sm:$0xff] }
 0x112   :  { %6658 = vmatpush2.msk.msra.mxu1 %vm16418_vm0, %v16313_v53  ;;  %1824 = vmatpush2.msra.mxu0 %v16422_v7  ;;  %vm16427_vm0 = vcmp.eq.s32.totalorder %v16426_v8, %v7617_v15  ;;  %v8937_v7 = vpop.permute.xlu1 %287 }
 0x113   :  { %6659 = vmatprep.subr.msk.mxu1 %vm16421_vm11, %v16313_v53  ;;  %1827 = vmatprep.subr.mxu0 %v16424_v0  ;;  %vm16429_vm11 = vcmp.eq.s32.totalorder %v16426_v8, %v7605_v11  ;;  %16430 = vst [vmem:[#allocation89_spill] sm:$0xff] %v8937_v7  ;;  %v16431_v0 = vld [vmem:[#allocation45_spill] sm:$0xff] }
 0x114   :  { %6660 = vmatpush2.msk.msra.mxu1 %vm16423_vm12, %v16313_v53  ;;  %1830 = vmatpush2.msra.mxu0 %v16428_v4  ;;  %vm16432_vm12 = vcmp.eq.s32.totalorder %v16431_v0, %v7617_v15  ;;  %v16435_v4 = vld [vmem:[#allocation48_spill] sm:$0xff] }
 0x115   :  { %6661 = vmatprep.subr.msk.mxu1 %vm16427_vm0, %v16313_v53  ;;  %1833 = vmatprep.subr.mxu0 %v8460_v52  ;;  %vm16434_vm0 = vcmp.eq.s32.totalorder %v16431_v0, %v7605_v11  ;;  %v16437_v52 = vld [vmem:[#allocation72_spill] sm:$0xff]  ;;  %v16440_v0 = vld [vmem:[#allocation51_spill] sm:$0xff] }
 0x116   :  { %6662 = vmatpush2.msk.msra.mxu1 %vm16429_vm11, %v16313_v53  ;;  %1836 = vmatpush2.msra.mxu0 %v16433_v54  ;;  %vm16436_vm11 = vcmp.eq.s32.totalorder %v16435_v4, %v7617_v15  ;;  %v8959_v54 = vpop.permute.xlu0 %284 }
 0x117   :  { %6663 = vmatprep.subr.msk.mxu1 %vm16432_vm12, %v16313_v53  ;;  %1839 = vmatprep.subr.mxu0 %v8494_v36  ;;  %vm16438_vm12 = vcmp.eq.s32.totalorder %v16435_v4, %v7605_v11  ;;  %16439 = vst [vmem:[#allocation90_spill] sm:$0xff] %v8959_v54 }
 0x118   :  { %6664 = vmatpush2.msk.msra.mxu1 %vm16434_vm0, %v16313_v53  ;;  %1842 = vmatpush2.msra.mxu0 %v16437_v52  ;;  %vm16441_vm0 = vcmp.eq.s32.totalorder %v16440_v0, %v7617_v15  ;;  %v8971_v52 = vpop.permute.xlu1 %281 }
 0x119   :  { %6665 = vmatprep.subr.msk.mxu1 %vm16436_vm11, %v16313_v53  ;;  %1845 = vmatprep.subr.mxu0 %v8528_v17  ;;  %vm16442_vm11 = vcmp.eq.s32.totalorder %v16440_v0, %v7605_v11  ;;  %16443 = vst [vmem:[#allocation91_spill] sm:$0xff] %v8971_v52  ;;  %v16444_v17 = vld [vmem:[#allocation54_spill] sm:$0xff] }
 0x11a   :  { %6666 = vmatpush2.msk.msra.mxu1 %vm16438_vm12, %v16313_v53  ;;  %1848 = vmatpush2.msra.mxu0 %v8544_v3  ;;  %vm16445_vm12 = vcmp.eq.s32.totalorder %v16444_v17, %v7617_v15  ;;  %v16447_v3 = vld [vmem:[#allocation57_spill] sm:$0xff] }
 0x11b   :  { %6667 = vmatprep.subr.msk.mxu1 %vm16441_vm0, %v16313_v53  ;;  %1851 = vmatprep.subr.mxu0 %v8562_v45  ;;  %vm16446_vm0 = vcmp.eq.s32.totalorder %v16444_v17, %v7605_v11  ;;  %v16451_v45 = vld [vmem:[#allocation60_spill] sm:$0xff] }
 0x11c   :  { %6668 = vmatpush2.msk.msra.mxu1 %vm16442_vm11, %v16313_v53  ;;  %1854 = vmatpush2.msra.mxu0 %v8578_v61  ;;  %vm16448_vm11 = vcmp.eq.s32.totalorder %v16447_v3, %v7617_v15  ;;  %v8993_v61 = vpop.permute.xlu0 %278 }
 0x11d   :  { %6669 = vmatprep.subr.msk.mxu1 %vm16445_vm12, %v16313_v53  ;;  %1857 = vmatprep.subr.mxu0 %v8596_v22  ;;  %vm16449_vm12 = vcmp.eq.s32.totalorder %v16447_v3, %v7605_v11  ;;  %16450 = vst [vmem:[#allocation92_spill] sm:$0xff] %v8993_v61  ;;  %v16459_v22 = vld [vmem:[#allocation66_spill] sm:$0xff] }
 0x11e   :  { %6670 = vmatpush2.msk.msra.mxu1 %vm16446_vm0, %v16313_v53  ;;  %1860 = vmatpush2.msra.mxu0 %v8612_v14  ;;  %vm16452_vm0 = vcmp.eq.s32.totalorder %v16451_v45, %v7617_v15  ;;  %v9005_v14 = vpop.permute.xlu1 %275 }
 0x11f   :  { %6671 = vmatprep.subr.msk.mxu1 %vm16448_vm11, %v16313_v53  ;;  %1863 = vmatprep.subr.mxu0 %v8630_v57  ;;  %vm16453_vm11 = vcmp.eq.s32.totalorder %v16451_v45, %v7605_v11  ;;  %16454 = vst [vmem:[#allocation93_spill] sm:$0xff] %v9005_v14  ;;  %v16455_v57 = vld [vmem:[#allocation63_spill] sm:$0xff]  ;;  %v16468_v45 = vand.u32 4294901760, %v7705_v38  ;;  %v16476_v38 = vand.u32 4294901760, %v7671_v31  ;;  %v16483_v31 = vld [vmem:[#allocation77_spill] sm:$0xff] }
 0x120   :  { %6672 = vmatpush2.msk.msra.mxu1 %vm16449_vm12, %v16313_v53  ;;  %1866 = vmatpush2.msra.mxu0 %v8644_v10  ;;  %vm16456_vm12 = vcmp.eq.s32.totalorder %v16455_v57, %v7617_v15  ;;  %v16458_v10 = vld [vmem:[#allocation14_spill] sm:$0xff] }
 0x121   :  { %6673 = vmatprep.subr.msk.mxu1 %vm16452_vm0, %v16313_v53  ;;  %1869 = vmatprep.subr.mxu0 %v8662_v13  ;;  %vm16457_vm0 = vcmp.eq.s32.totalorder %v16455_v57, %v7605_v11  ;;  %v16461_v13 = vld [vmem:[#allocation21_spill] sm:$0xff]  ;;  %v9029_v57 = vpop.permute.xlu0 %272 }
 0x122   :  { %6674 = vmatpush2.msk.msra.mxu1 %vm16453_vm11, %v16313_v53  ;;  %1872 = vmatpush2.msra.mxu0 %v8676_v44  ;;  %vm16460_vm11 = vcmp.eq.s32.totalorder %v16459_v22, %v7617_v15  ;;  %v16462_v14 = vand.u32 4294901760, %v16461_v13  ;;  %v16464_v44 = vand.u32 4294901760, %v7675_v33  ;;  %16465 = vst [vmem:[#allocation21_spill] sm:$0xff] %v9029_v57  ;;  %v9043_v33 = vpop.permute.xlu1 %269  ;;  %v16472_v13 = vld [vmem:[#allocation71_spill] sm:$0xff] }
 0x123   :  { %6675 = vmatprep.subr.msk.mxu1 %vm16456_vm12, %v16313_v53  ;;  %1878 = vmatmul.mubr.f32.vlgmr.msra.gmra.mxu0 %v16458_v10  ;;  %vm16463_vm12 = vcmp.eq.s32.totalorder %v16459_v22, %v7605_v11  ;;  %v16466_v10 = vld [vmem:[#allocation69_spill] sm:$0xff]  ;;  %16471 = vst [vmem:[#allocation94_spill] sm:$0xff] %v9043_v33 }
 0x124   :  { %6676 = vmatpush2.msk.msra.mxu1 %vm16457_vm0, %v16313_v53  ;;  %2028 = vmatprep.subr.mxu0 %v16462_v14  ;;  %vm16467_vm0 = vcmp.eq.s32.totalorder %v16466_v10, %v7617_v15  ;;  %v16470_v14 = vand.u32 4294901760, %v7711_v39  ;;  %v16477_v39 = vld [vmem:[#allocation74_spill] sm:$0xff] }
 0x125   :  { %6677 = vmatprep.subr.msk.mxu1 %vm16460_vm11, %v16313_v53  ;;  %2032 = vmatpush1.msra.mxu0 %v16464_v44  ;;  %vm16469_vm11 = vcmp.eq.s32.totalorder %v16466_v10, %v7605_v11  ;;  %v16474_v44 = vand.u32 4294901760, %v7669_v30  ;;  %v16481_v30 = vand.u32 4294901760, %v7715_v41 }
 0x126   :  { %6678 = vmatpush2.msk.msra.mxu1 %vm16463_vm12, %v16313_v53  ;;  %2036 = vmatprep.subr.mxu0 %v16468_v45  ;;  %vm16473_vm12 = vcmp.eq.s32.totalorder %v16472_v13, %v7617_v15  ;;  %v16479_v45 = vand.u32 4294901760, %v7713_v40  ;;  %v16487_v40 = vand.u32 4294901760, %v7763_v55  ;;  %v16492_v55 = vld [vmem:[#allocation15_spill] sm:$0xff] }
 0x127   :  { %6679 = vmatprep.subr.msk.mxu1 %vm16467_vm0, %v16313_v53  ;;  %2040 = vmatpush1.msra.mxu0 %v16470_v14  ;;  %vm16475_vm0 = vcmp.eq.s32.totalorder %v16472_v13, %v7605_v11  ;;  %v9069_v14 = vpop.permute.xlu0 %266 }
 0x128   :  { %6680 = vmatpush2.msk.msra.mxu1 %vm16469_vm11, %v16313_v53  ;;  %2044 = vmatprep.subr.mxu0 %v16474_v44  ;;  %vm16478_vm11 = vcmp.eq.s32.totalorder %v16477_v39, %v7617_v15  ;;  %16482 = vst [vmem:[#allocation95_spill] sm:$0xff] %v9069_v14  ;;  %v16485_v44 = vld [vmem:[#allocation11_spill] sm:$0xff] }
 0x129   :  { %6681 = vmatprep.subr.msk.mxu1 %vm16473_vm12, %v16313_v53  ;;  %2048 = vmatpush1.msra.mxu0 %v16476_v38  ;;  %vm16480_vm12 = vcmp.eq.s32.totalorder %v16477_v39, %v7605_v11  ;;  %v9082_v38 = vpop.permute.xlu1 %263 }
 0x12a   :  { %6682 = vmatpush2.msk.msra.mxu1 %vm16475_vm0, %v16313_v53  ;;  %2052 = vmatprep.subr.mxu0 %v16479_v45  ;;  %vm16484_vm0 = vcmp.eq.s32.totalorder %v16483_v31, %v7617_v15  ;;  %16488 = vst [vmem:[#allocation96_spill] sm:$0xff] %v9082_v38  ;;  %v16490_v45 = vand.u32 4294901760, %v7765_v56  ;;  %v16493_v56 = vand.u32 4294901760, %v7785_v2 }
 0x12b   :  { %6683 = vmatprep.subr.msk.mxu1 %vm16478_vm11, %v16313_v53  ;;  %2056 = vmatpush1.msra.mxu0 %v16481_v30  ;;  %vm16486_vm11 = vcmp.eq.s32.totalorder %v16483_v31, %v7605_v11  ;;  %v16491_v30 = vand.u32 4294901760, %v7783_v1  ;;  %v16495_v1 = vand.u32 4294901760, %v7821_v12  ;;  %v16499_v12 = vand.u32 4294901760, %v7867_v51 }
 0x12c   :  { %6684 = vmatpush2.msk.msra.mxu1 %vm16480_vm12, %v16313_v53  ;;  %2015 = vmatprep.mubr.f32.mxu1 %v16485_v44  ;;  %v16503_v51 = vand.u32 4294901760, %v7916_v26  ;;  %v16509_v26 = vand.u32 4294901760, %v7966_v49  ;;  %v16515_v49 = vand.u32 4294901760, %v8018_v50  ;;  %v16522_v50 = vand.u32 4294901760, %v16367_v21 }
 0x12d   :  { %6685 = vmatprep.subr.msk.mxu1 %vm16484_vm0, %v16313_v53  ;;  %2060 = vmatprep.subr.mxu0 %v16487_v40  ;;  %v9107_v40 = vpop.permute.xlu0 %356  ;;  %v9121_v2 = vpop.permute.xlu1 %353  ;;  %vm15764_vm12 = vcmp.eq.s32.totalorder %v8835_v47, %v7617_v15  ;;  %vm16528_vm0 = vcmp.eq.s32.totalorder %v16381_v48, %v7617_v15 }
 0x12e   :  { %6686 = vmatpush2.msk.msra.mxu1 %vm16486_vm11, %v16313_v53  ;;  %2064 = vmatpush1.msra.mxu0 %v16490_v45  ;;  %16494 = vst [vmem:[#allocation97_spill] sm:$0xff] %v9107_v40  ;;  %v16496_v45 = vand.u32 4294901760, %v7836_v18  ;;  %16497 = vst [vmem:[#allocation98_spill] sm:$0xff] %v9121_v2  ;;  %v16500_v18 = vand.u32 4294901760, %v7882_v59  ;;  %v16504_v59 = vand.u32 4294901760, %v7932_v60  ;;  %v16510_v60 = vand.u32 4294901760, %v7984_v25 }
 0x12f   :  { %6687 = vmatprep.subr.msk.mxu1 %vm423_vm14, %v16313_v53  ;;  %2068 = vmatprep.subr.mxu0 %v16491_v30  ;;  %v16498_v30 = vand.u32 4294901760, %v7838_v24  ;;  %v16501_v24 = vand.u32 4294901760, %v7898_v9  ;;  %v16517_v25 = vand.u32 4294901760, %v8034_v37  ;;  %v16524_v37 = vand.u32 4294901760, %v16368_v34 }
 0x130   :  { %6688 = vmatpush2.msk.msra.mxu1 %vm422_vm15, %v16313_v53  ;;  %2072 = vmatpush1.msra.mxu0 %v16493_v56  ;;  %v16529_v34 = vand.u32 4294901760, %v16373_v27  ;;  %vm15766_vm11 = vcmp.eq.s32.totalorder %v8835_v47, %v7605_v11 }
 0x131   :  { %2019 = vmatmul.mubr.f32.vlgmr.msra.gmra.mxu1 %v16492_v55  ;;  %6689 = vmatprep.subr.msk.mxu1 %vm419_vm1, %v16313_v53  ;;  %v9147_v56 = vpop.permute.xlu0 %350  ;;  %v9161_v9 = vpop.permute.xlu1 %347  ;;  %vm16506_vm1 = vcmp.eq.s32.totalorder %v7719_v43, %v7617_v15 }
 0x132   :  { %6690 = vmatpush1.msk.msra.mxu1 %vm418_vm2, %v16313_v53  ;;  %2076 = vmatprep.subr.mxu0 %v16495_v1  ;;  %16502 = vst [vmem:[#allocation99_spill] sm:$0xff] %v9147_v56  ;;  %16505 = vst [vmem:[#allocation100_spill] sm:$0xff] %v9161_v9  ;;  %v16507_v1 = vand.u32 4294901760, %v7950_v16  ;;  %vm16508_vm2 = vcmp.eq.s32.totalorder %v7719_v43, %v7605_v11  ;;  %v16512_v16 = vand.u32 4294901760, %v8000_v6 }
 0x133   :  { %6691 = vmatprep.subr.msk.mxu1 %vm415_vm5, %v16313_v53  ;;  %2080 = vmatpush1.msra.mxu0 %v16496_v45  ;;  %vm16516_vm5 = vcmp.eq.s32.totalorder %v7777_v63, %v7605_v11 }
 0x134   :  { %6692 = vmatpush1.msk.msra.mxu1 %vm414_vm6, %v16313_v53  ;;  %2084 = vmatprep.subr.mxu0 %v16498_v30  ;;  %vm16519_vm6 = vcmp.eq.s32.totalorder %v16369_v35, %v7617_v15  ;;  %v16520_v30 = vand.u32 4294901760, %v8052_v46  ;;  %v16526_v46 = vand.u32 4294901760, %v16371_v5  ;;  %v16532_v5 = vld [vmem:[#allocation40_spill] sm:$0xff] }
 0x135   :  { %6693 = vmatprep.subr.msk.mxu1 %vm411_vm3, %v16313_v53  ;;  %2088 = vmatpush1.msra.mxu0 %v16499_v12  ;;  %vm16511_vm3 = vcmp.eq.s32.totalorder %v7775_v62, %v7605_v11  ;;  %v9187_v45 = vpop.permute.xlu0 %344  ;;  %v9201_v6 = vpop.permute.xlu1 %341  ;;  %v16530_v12 = vmov 0.0  }
 0x136   :  { %6694 = vmatpush1.msk.msra.mxu1 %vm410_vm4, %v16313_v53  ;;  %2092 = vmatprep.subr.mxu0 %v16500_v18  ;;  %16513 = vst [vmem:[#allocation101_spill] sm:$0xff] %v9187_v45  ;;  %vm16514_vm4 = vcmp.eq.s32.totalorder %v7777_v63, %v7617_v15  ;;  %16518 = vst [vmem:[#allocation102_spill] sm:$0xff] %v9201_v6 }
 0x137   :  { %6695 = vmatprep.subr.msk.mxu1 %vm407_vm7, %v16313_v53  ;;  %2096 = vmatpush1.msra.mxu0 %v16501_v24  ;;  %vm16521_vm7 = vcmp.eq.s32.totalorder %v16369_v35, %v7605_v11  ;;  %v16533_v24 = vand.u32 4294901760, %v16532_v5 }
 0x138   :  { %6696 = vmatpush1.msk.msra.mxu1 %vm406_vm8, %v16313_v53  ;;  %2100 = vmatprep.subr.mxu0 %v16503_v51  ;;  %vm15763_vm8 = vcmp.eq.s32.totalorder %v8823_v23, %v7617_v15 }
 0x139   :  { %6697 = vmatprep.subr.msk.mxu1 %vm403_vm9, %v16313_v53  ;;  %2104 = vmatpush1.msra.mxu0 %v16504_v59  ;;  %vm16523_vm9 = vcmp.eq.s32.totalorder %v16375_v32, %v7617_v15  ;;  %v9233_v21 = vpop.permute.xlu0 %338  ;;  %v6494_v18 = vsel %vm15763_vm8, 1.0, %v16530_v12  ;;  %v9257_v51 = vpop.permute.xlu1 %335  ;;  %v16535_v59 = vld [vmem:[#allocation29_spill] sm:$0xff] }
 0x13a   :  { %6698 = vmatpush1.msk.msra.mxu1 %vm402_vm10, %v16313_v53  ;;  %2108 = vmatprep.subr.mxu0 %v16507_v1  ;;  %vm15762_vm10 = vcmp.eq.s32.totalorder %v8823_v23, %v7605_v11  ;;  %16527 = vst [vmem:[#allocation103_spill] sm:$0xff] %v9233_v21  ;;  %16534 = vst [vmem:[#allocation40_spill] sm:$0xff] %v9257_v51  ;;  %v16537_v1 = vld [vmem:[#allocation41_spill] sm:$0xff]  ;;  %v16663_v51 = vld [vmem:[#allocation60_spill] sm:$0xff] }
 0x13b   :  { %6699 = vmatprep.subr.msk.mxu1 %vm16506_vm1, %v16313_v53  ;;  %2112 = vmatpush1.msra.mxu0 %v16509_v26  ;;  %vm16531_vm1 = vcmp.eq.s32.totalorder %v16381_v48, %v7605_v11  ;;  %v6493_v27 = vsel %vm15762_vm10, 1.0, %v16530_v12  ;;  %v16538_v26 = vand.u32 4294901760, %v16537_v1  ;;  %v16572_v48 = vld [vmem:[#allocation52_spill] sm:$0xff] }
 0x13c   :  { %6700 = vmatpush1.msk.msra.mxu1 %vm16508_vm2, %v16313_v53  ;;  %2116 = vmatprep.subr.mxu0 %v16510_v60  ;;  %vm16536_vm2 = vcmp.eq.s32.totalorder %v16535_v59, %v7617_v15  ;;  %v6490_v60 = vsel %vm15764_vm12, 1.0, %v16530_v12  ;;  %v9291_v5 = vsub.f32 %v6493_v27, %v6493_v27 }
 0x13d   :  { %6701 = vmatprep.subr.msk.mxu1 %vm395_vm13, %v16313_v53  ;;  %2120 = vmatpush1.msra.mxu0 %v16512_v16  ;;  %vm16525_vm13 = vcmp.eq.s32.totalorder %v16375_v32, %v7605_v11  ;;  %v16539_v16 = vld [vmem:[#allocation37_spill] sm:$0xff]  ;;  %v9307_v27 = vpop.permute.xlu0 %332  ;;  %v9336_v44 = vpop.permute.xlu1 %329  ;;  %v16573_v32 = vand.u32 4294901760, %v16572_v48 }
 0x13e   :  { %6702 = vmatpush1.msk.msra.mxu1 %vm16511_vm3, %v16313_v53  ;;  %2124 = vmatprep.subr.mxu0 %v16515_v49  ;;  %vm15790_vm3 = vcmp.eq.s32.totalorder %v16539_v16, %v7617_v15  ;;  %v16541_v49 = vld [vmem:[#allocation43_spill] sm:$0xff] }
 0x13f   :  { %6703 = vmatprep.subr.msk.mxu1 %vm16514_vm4, %v16313_v53  ;;  %2128 = vmatpush1.msra.mxu0 %v16517_v25  ;;  %vm16540_vm4 = vcmp.eq.s32.totalorder %v16535_v59, %v7605_v11  ;;  %v16542_v25 = vand.u32 4294901760, %v16541_v49  ;;  %16548 = vst [vmem:[#allocation43_spill] sm:$0xff] %v9291_v5  ;;  %v6486_v49 = vsel %vm15790_vm3, 1.0, %v16530_v12  ;;  %v16570_v59 = vld [vmem:[#allocation87_spill] sm:$0xff] }
 0x140   :  { %6704 = vmatpush1.msk.msra.mxu1 %vm16516_vm5, %v16313_v53  ;;  %2132 = vmatprep.subr.mxu0 %v16520_v30  ;;  %v9277_v30 = vsub.f32 %v6494_v18, %v6494_v18  ;;  %vm15789_vm5 = vcmp.eq.s32.totalorder %v16539_v16, %v7605_v11  ;;  %v16549_v18 = vld [vmem:[#allocation38_spill] sm:$0xff] }
 0x141   :  { %6705 = vmatprep.subr.msk.mxu1 %vm16519_vm6, %v16313_v53  ;;  %2136 = vmatpush1.msra.mxu0 %v16522_v50  ;;  %v6489_v50 = vsel %vm15766_vm11, 1.0, %v16530_v12 }
 0x142   :  { %6706 = vmatpush1.msk.msra.mxu1 %vm16521_vm7, %v16313_v53  ;;  %2140 = vmatprep.subr.mxu0 %v16524_v37  ;;  %16543 = vst [vmem:[#allocation41_spill] sm:$0xff] %v9277_v30  ;;  %v16544_v37 = vld [vmem:[#allocation30_spill] sm:$0xff]  ;;  %vm15782_vm7 = vcmp.eq.s32.totalorder %v16549_v18, %v7617_v15  ;;  %v9315_v55 = vsub.f32 %v6489_v50, %v6489_v50 }
 0x143   :  { %6707 = vmatprep.subr.msk.mxu1 %vm16523_vm9, %v16313_v53  ;;  %2144 = vmatpush1.msra.mxu0 %v16526_v46  ;;  %vm16545_vm6 = vcmp.eq.s32.totalorder %v16544_v37, %v7617_v15  ;;  %v16546_v46 = vld [vmem:[#allocation44_spill] sm:$0xff]  ;;  %vm16550_vm9 = vcmp.eq.s32.totalorder %v16544_v37, %v7605_v11  ;;  %v16563_v50 = vld [vmem:[#allocation86_spill] sm:$0xff]  ;;  %v9344_v37 = vsub.f32 %v6486_v49, %v6486_v49  ;;  %v16583_v49 = vand.u32 4294901760, %v9277_v30 }
 0x144   :  { %6708 = vmatpush1.msk.msra.mxu1 %vm16525_vm13, %v16313_v53  ;;  %2148 = vmatprep.subr.mxu0 %v16529_v34  ;;  %v16547_v34 = vand.u32 4294901760, %v16546_v46  ;;  %v16557_v46 = vld [vmem:[#allocation47_spill] sm:$0xff] }
 0x145   :  { %6709 = vmatprep.subr.msk.mxu1 %vm16528_vm0, %v16313_v53  ;;  %2152 = vmatpush1.msra.mxu0 %v16533_v24  ;;  %v16551_v24 = vld [vmem:[#allocation46_spill] sm:$0xff]  ;;  %16559 = vst [vmem:[#allocation47_spill] sm:$0xff] %v9315_v55  ;;  %v9392_v63 = vsub.f32 %v9277_v30, %v16583_v49  ;;  %v16589_v49 = vand.u32 4294901760, %v9291_v5 }
 0x146   :  { %6710 = vmatpush1.msk.msra.mxu1 %vm16531_vm1, %v16313_v53  ;;  %2156 = vmatprep.subr.mxu0 %v16538_v26  ;;  %v16552_v1 = vand.u32 4294901760, %v16551_v24  ;;  %v9301_v26 = vsub.f32 %v6490_v60, %v6490_v60  ;;  %16554 = vst [vmem:[#allocation46_spill] sm:$0xff] %v9307_v27  ;;  %v6485_v60 = vsel %vm15789_vm5, 1.0, %v16530_v12  ;;  %v16561_v24 = vld [vmem:[#allocation49_spill] sm:$0xff]  ;;  %vm15775_vm1 = vcmp.eq.s32.totalorder %v16549_v18, %v7605_v11 }
 0x147   :  { %6711 = vmatprep.subr.msk.mxu1 %vm16536_vm2, %v16313_v53  ;;  %2160 = vmatpush2.msra.mxu0 %v16542_v25  ;;  %v16555_v25 = vld [vmem:[#allocation31_spill] sm:$0xff]  ;;  %vm15739_vm2 = vcmp.eq.s32.totalorder %v16563_v50, %v7617_v15  ;;  %16564 = vst [vmem:[#allocation49_spill] sm:$0xff] %v9336_v44  ;;  %v9411_v43 = vsub.f32 %v9291_v5, %v16589_v49  ;;  %v9435_v5 = vpop.permute.xlu1 %323 }
 0x148   :  { %6712 = vmatpush1.msk.msra.mxu1 %vm16540_vm4, %v16313_v53  ;;  %2164 = vmatprep.subr.mxu0 %v16547_v34  ;;  %16553 = vst [vmem:[#allocation44_spill] sm:$0xff] %v9301_v26  ;;  %vm16556_vm13 = vcmp.eq.s32.totalorder %v16555_v25, %v7617_v15  ;;  %v16558_v34 = vand.u32 4294901760, %v16557_v46  ;;  %vm16560_vm0 = vcmp.eq.s32.totalorder %v16555_v25, %v7605_v11  ;;  %v6482_v46 = vsel %vm15782_vm7, 1.0, %v16530_v12  ;;  %v16565_v25 = vld [vmem:[#allocation32_spill] sm:$0xff] }
 0x149   :  { %6713 = vmatprep.subr.msk.mxu1 %vm16545_vm6, %v16313_v53  ;;  %2168 = vmatpush2.msra.mxu0 %v16552_v1  ;;  %v16562_v1 = vand.u32 4294901760, %v16561_v24  ;;  %vm16566_vm4 = vcmp.eq.s32.totalorder %v16565_v25, %v7617_v15  ;;  %v16567_v24 = vld [vmem:[#allocation50_spill] sm:$0xff]  ;;  %vm15710_vm6 = vcmp.eq.s32.totalorder %v16563_v50, %v7605_v11  ;;  %v6478_v48 = vsel %vm15739_vm2, 1.0, %v16530_v12  ;;  %16596 = vst [vmem:[#allocation104_spill] sm:$0xff] %v9435_v5  ;;  %v16617_v5 = vld [vmem:[#allocation45_spill] sm:$0xff] }
 0x14a   :  { %6714 = vmatpush1.msk.msra.mxu1 %vm16550_vm9, %v16313_v53  ;;  %2172 = vmatprep.subr.mxu0 %v16558_v34  ;;  %16569 = vst [vmem:[#allocation50_spill] sm:$0xff] %v9344_v37  ;;  %vm15679_vm9 = vcmp.eq.s32.totalorder %v16570_v59, %v7617_v15  ;;  %v16577_v34 = vld [vmem:[#allocation53_spill] sm:$0xff]  ;;  %v9428_v20 = vsub.f32 %v6478_v48, %v6478_v48  ;;  %v16595_v28 = vand.u32 4294901760, %v9301_v26 }
 0x14b   :  { %6715 = vmatprep.subr.msk.mxu1 %vm16556_vm13, %v16313_v53  ;;  %2176 = vmatpush2.msra.mxu0 %v16562_v1  ;;  %v16568_v1 = vand.u32 4294901760, %v16567_v24  ;;  %vm16571_vm13 = vcmp.eq.s32.totalorder %v16565_v25, %v7605_v11  ;;  %v9357_v24 = vsub.f32 %v6485_v60, %v6485_v60  ;;  %v16578_v35 = vand.u32 4294901760, %v16577_v34 }
 0x14c   :  { %6716 = vmatpush1.msk.msra.mxu1 %vm16560_vm0, %v16313_v53  ;;  %vm15690_vm0 = vcmp.eq.s32.totalorder %v16570_v59, %v7605_v11  ;;  %v9368_v25 = vsub.f32 %v6482_v46, %v6482_v46  ;;  %v6477_v34 = vsel %vm15710_vm6, 1.0, %v16530_v12  ;;  %v6474_v60 = vsel %vm15679_vm9, 1.0, %v16530_v12 }
 0x14d   :  { %6717 = vmatprep.subr.msk.mxu1 %vm16566_vm4, %v16313_v53  ;;  %2180 = vmatprep.subr.mxu0 %v16568_v1  ;;  %16574 = vst [vmem:[#allocation52_spill] sm:$0xff] %v9357_v24  ;;  %v16575_v1 = vld [vmem:[#allocation33_spill] sm:$0xff]  ;;  %v6473_v42 = vsel %vm15690_vm0, 1.0, %v16530_v12  ;;  %vm15700_vm9 = vcmp.eq.s32.totalorder %v8925_v58, %v7605_v11  ;;  %v9433_v19 = vsub.f32 %v9301_v26, %v16595_v28  ;;  %v16602_v28 = vand.u32 4294901760, %v9315_v55 }
 0x14e   :  { %6718 = vmatpush1.msk.msra.mxu1 %vm16571_vm13, %v16313_v53  ;;  %2184 = vmatpush2.msra.mxu0 %v16573_v32  ;;  %vm16576_vm4 = vcmp.eq.s32.totalorder %v16575_v1, %v7617_v15  ;;  %16579 = vst [vmem:[#allocation53_spill] sm:$0xff] %v9368_v25  ;;  %v6481_v32 = vsel %vm15775_vm1, 1.0, %v16530_v12  ;;  %vm16580_vm13 = vcmp.eq.s32.totalorder %v16575_v1, %v7605_v11  ;;  %v16587_v1 = vld [vmem:[#allocation56_spill] sm:$0xff] }
 0x14f   :  { %6719 = vmatprep.subr.msk.mxu1 %vm16576_vm4, %v16313_v53  ;;  %2188 = vmatprep.subr.mxu0 %v16578_v35  ;;  %v16581_v35 = vld [vmem:[#allocation55_spill] sm:$0xff]  ;;  %vm15696_vm4 = vcmp.eq.s32.totalorder %v8925_v58, %v7617_v15  ;;  %v16588_v62 = vand.u32 4294901760, %v16587_v1  ;;  %v9426_v49 = vsub.f32 %v6481_v32, %v6481_v32  ;;  %vm16598_vm0 = vcmp.eq.s32.totalorder %v16597_v29, %v7617_v15 }
 0x150   :  { %6720 = vmatpush1.msk.msra.mxu1 %vm16580_vm13, %v16313_v53  ;;  %v16582_v46 = vand.u32 4294901760, %v16581_v35  ;;  %v9400_v35 = vpop.permute.xlu0 %326  ;;  %v6470_v32 = vsel %vm15696_vm4, 1.0, %v16530_v12  ;;  %v9452_v48 = vsub.f32 %v9315_v55, %v16602_v28  ;;  %v9465_v26 = vsub.f32 %v6473_v42, %v6473_v42 }
 0x151   :  { %16584 = vst [vmem:[#allocation55_spill] sm:$0xff] %v9400_v35  ;;  %16593 = vst [vmem:[#allocation56_spill] sm:$0xff] %v9426_v49  ;;  %v6469_v28 = vsel %vm15700_vm9, 1.0, %v16530_v12  ;;  %vm16608_vm4 = vcmp.eq.s32.totalorder %v16426_v8, %v7617_v15  ;;  %vm16612_vm9 = vcmp.eq.s32.totalorder %v16426_v8, %v7605_v11  ;;  %v16630_v35 = vand.u32 4294901760, %v9357_v24 }
 0x152   :  { %2192 = vmatpush2.msra.mxu0 %v16582_v46  ;;  %v16585_v46 = vld [vmem:[#allocation36_spill] sm:$0xff]  ;;  %16607 = vst [vmem:[#allocation105_spill] sm:$0xff] %v9465_v26  ;;  %vm16631_vm6 = vcmp.eq.s32.totalorder %v16435_v4, %v7605_v11 }
 0x153   :  { %vm16586_vm13 = vcmp.eq.s32.totalorder %v16585_v46, %v7617_v15  ;;  %2196 = vmatprep.subr.mxu0 %v16588_v62  ;;  %v16591_v62 = vld [vmem:[#allocation58_spill] sm:$0xff] }
 0x154   :  { %6721 = vmatprep.subr.msk.mxu1 %vm16586_vm13, %v16313_v53  ;;  %vm16590_vm13 = vcmp.eq.s32.totalorder %v16585_v46, %v7605_v11  ;;  %v16592_v1 = vand.u32 4294901760, %v16591_v62  ;;  %16594 = vst [vmem:[#allocation58_spill] sm:$0xff] %v9428_v20  ;;  %v16599_v46 = vld [vmem:[#allocation59_spill] sm:$0xff]  ;;  %v9443_v62 = vsub.f32 %v6477_v34, %v6477_v34 }
 0x155   :  { %6722 = vmatpush2.msk.msra.mxu1 %vm16590_vm13, %v16313_v53  ;;  %v16600_v30 = vand.u32 4294901760, %v16599_v46  ;;  %vm15705_vm13 = vcmp.eq.s32.totalorder %v8937_v7, %v7617_v15  ;;  %v16613_v46 = vld [vmem:[#allocation64_spill] sm:$0xff] }
 0x156   :  { %2200 = vmatpush2.msra.mxu0 %v16592_v1  ;;  %6723 = vmatprep.subr.msk.mxu1 %vm16598_vm0, %v16313_v53  ;;  %16601 = vst [vmem:[#allocation59_spill] sm:$0xff] %v9443_v62  ;;  %vm16603_vm0 = vcmp.eq.s32.totalorder %v16597_v29, %v7605_v11  ;;  %v9463_v1 = vsub.f32 %v6474_v60, %v6474_v60  ;;  %v16609_v29 = vld [vmem:[#allocation62_spill] sm:$0xff]  ;;  %v16611_v60 = vand.u32 4294901760, %v9344_v37 }
 0x157   :  { %2204 = vmatprep.subr.mxu0 %v16600_v30  ;;  %6724 = vmatpush2.msk.msra.mxu1 %vm16603_vm0, %v16313_v53  ;;  %v16604_v30 = vld [vmem:[#allocation61_spill] sm:$0xff]  ;;  %v16610_v55 = vand.u32 4294901760, %v16609_v29  ;;  %vm15709_vm0 = vcmp.eq.s32.totalorder %v8937_v7, %v7605_v11  ;;  %v16614_v29 = vand.u32 4294901760, %v16613_v46 }
 0x158   :  { %v16605_v34 = vand.u32 4294901760, %v16604_v30  ;;  %16606 = vst [vmem:[#allocation61_spill] sm:$0xff] %v9463_v1  ;;  %6725 = vmatprep.subr.msk.mxu1 %vm16608_vm4, %v16313_v53  ;;  %v9481_v42 = vsub.f32 %v9344_v37, %v16611_v60  ;;  %v9493_v30 = vsub.f32 %v6470_v32, %v6470_v32  ;;  %v6466_v60 = vsel %vm15705_vm13, 1.0, %v16530_v12  ;;  %v9500_v37 = vpop.permute.xlu0 %320  ;;  %v16619_v46 = vld [vmem:[#allocation65_spill] sm:$0xff]  ;;  %v9528_v32 = vpop.permute.xlu1 %317 }
 0x159   :  { %6726 = vmatpush2.msk.msra.mxu1 %vm16612_vm9, %v16313_v53  ;;  %16616 = vst [vmem:[#allocation64_spill] sm:$0xff] %v9500_v37  ;;  %vm16618_vm9 = vcmp.eq.s32.totalorder %v16617_v5, %v7617_v15  ;;  %vm15712_vm4 = vcmp.eq.s32.totalorder %v8959_v54, %v7617_v15  ;;  %vm16622_vm13 = vcmp.eq.s32.totalorder %v16617_v5, %v7605_v11 }
 0x15a   :  { %2208 = vmatpush2.msra.mxu0 %v16605_v34  ;;  %16615 = vst [vmem:[#allocation62_spill] sm:$0xff] %v9493_v30  ;;  %6727 = vmatprep.subr.msk.mxu1 %vm16618_vm9, %v16313_v53  ;;  %v16623_v34 = vld [vmem:[#allocation67_spill] sm:$0xff]  ;;  %vm15719_vm9 = vcmp.eq.s32.totalorder %v8959_v54, %v7605_v11  ;;  %v9537_v5 = vsub.f32 %v6466_v60, %v6466_v60 }
 0x15b   :  { %2212 = vmatprep.subr.mxu0 %v16610_v55  ;;  %v9509_v55 = vsub.f32 %v6469_v28, %v6469_v28  ;;  %6728 = vmatpush2.msk.msra.mxu1 %vm16622_vm13, %v16313_v53  ;;  %v16624_v37 = vand.u32 4294901760, %v16623_v34  ;;  %16625 = vst [vmem:[#allocation67_spill] sm:$0xff] %v9528_v32  ;;  %vm16626_vm13 = vcmp.eq.s32.totalorder %v16435_v4, %v7617_v15  ;;  %v6461_v8 = vsel %vm15719_vm9, 1.0, %v16530_v12  ;;  %v16650_v32 = vld [vmem:[#allocation75_spill] sm:$0xff] }
 0x15c   :  { %2216 = vmatpush2.msra.mxu0 %v16614_v29  ;;  %v16620_v29 = vand.u32 4294901760, %v16619_v46  ;;  %v6465_v46 = vsel %vm15709_vm0, 1.0, %v16530_v12  ;;  %6729 = vmatprep.subr.msk.mxu1 %vm16626_vm13, %v16313_v53  ;;  %v9542_v28 = vsub.f32 %v9357_v24, %v16630_v35  ;;  %vm15725_vm0 = vcmp.eq.s32.totalorder %v8971_v52, %v7617_v15  ;;  %v9639_v27 = vpop.permute.xlu1 %311 }
 0x15d   :  { %16621 = vst [vmem:[#allocation65_spill] sm:$0xff] %v9509_v55  ;;  %6730 = vmatpush2.msk.msra.mxu1 %vm16631_vm6, %v16313_v53  ;;  %v6462_v35 = vsel %vm15712_vm4, 1.0, %v16530_v12  ;;  %vm15738_vm13 = vcmp.eq.s32.totalorder %v8971_v52, %v7605_v11  ;;  %vm16635_vm6 = vcmp.eq.s32.totalorder %v16440_v0, %v7617_v15  ;;  %vm15737_vm4 = vcmp.eq.s32.totalorder %v8993_v61, %v7617_v15 }
 0x15e   :  { %2220 = vmatprep.subr.mxu0 %v16620_v29  ;;  %v16632_v29 = vld [vmem:[#allocation70_spill] sm:$0xff]  ;;  %6731 = vmatprep.subr.msk.mxu1 %vm16635_vm6, %v16313_v53  ;;  %vm16639_vm6 = vcmp.eq.s32.totalorder %v16440_v0, %v7605_v11  ;;  %vm16645_vm9 = vcmp.eq.s32.totalorder %v16444_v17, %v7617_v15  ;;  %v16651_v44 = vand.u32 4294901760, %v16650_v32  ;;  %16654 = vst [vmem:[#allocation106_spill] sm:$0xff] %v9639_v27 }
 0x15f   :  { %2224 = vmatpush2.msra.mxu0 %v16624_v37  ;;  %v16627_v37 = vld [vmem:[#allocation68_spill] sm:$0xff]  ;;  %6732 = vmatpush2.msk.msra.mxu1 %vm16639_vm6, %v16313_v53  ;;  %vm15733_vm6 = vcmp.eq.s32.totalorder %v8993_v61, %v7605_v11 }
 0x160   :  { %v16628_v34 = vand.u32 4294901760, %v16627_v37  ;;  %16629 = vst [vmem:[#allocation68_spill] sm:$0xff] %v9537_v5  ;;  %v16633_v37 = vand.u32 4294901760, %v16632_v29  ;;  %v16636_v29 = vand.u32 4294901760, %v8494_v36  ;;  %v16640_v36 = vld [vmem:[#allocation72_spill] sm:$0xff]  ;;  %6733 = vmatprep.subr.msk.mxu1 %vm16645_vm9, %v16313_v53 }
 0x162   :  { %2228 = vmatprep.subr.mxu0 %v16628_v34  ;;  %v16634_v34 = vand.u32 4294901760, %v9368_v25 }
 0x163   :  { %2232 = vmatpush2.msra.mxu0 %v16633_v37  ;;  %v9570_v37 = vsub.f32 %v6465_v46, %v6465_v46  ;;  %v16641_v46 = vand.u32 4294901760, %v16640_v36  ;;  %v9605_v36 = vpop.permute.xlu0 %314 }
 0x164   :  { %v9555_v60 = vsub.f32 %v9368_v25, %v16634_v34  ;;  %2236 = vmatprep.subr.mxu0 %v16636_v29  ;;  %v16638_v34 = vand.u32 4294901760, %v9426_v49  ;;  %v16642_v29 = vand.u32 4294901760, %v9428_v20  ;;  %v16643_v25 = vand.u32 4294901760, %v9443_v62  ;;  %16644 = vst [vmem:[#allocation72_spill] sm:$0xff] %v9605_v36 }
 0x165   :  { %16637 = vst [vmem:[#allocation70_spill] sm:$0xff] %v9570_v37  ;;  %2240 = vmatpush2.msra.mxu0 %v16641_v46  ;;  %v16646_v46 = vld [vmem:[#allocation73_spill] sm:$0xff]  ;;  %vm15740_vm9 = vcmp.eq.s32.totalorder %v9605_v36, %v7605_v11 }
 0x166   :  { %v9575_v4 = vsub.f32 %v9426_v49, %v16638_v34  ;;  %v9592_v34 = vsub.f32 %v9428_v20, %v16642_v29  ;;  %v6458_v49 = vsel %vm15725_vm0, 1.0, %v16530_v12  ;;  %v9601_v24 = vsub.f32 %v9443_v62, %v16643_v25 }
 0x167   :  { %v16647_v29 = vand.u32 4294901760, %v16646_v46  ;;  %v9614_v20 = vsub.f32 %v6462_v35, %v6462_v35  ;;  %v6457_v25 = vsel %vm15738_vm13, 1.0, %v16530_v12  ;;  %vm16649_vm0 = vcmp.eq.s32.totalorder %v16444_v17, %v7605_v11  ;;  %v16665_v17 = vld [vmem:[#allocation79_spill] sm:$0xff] }
 0x168   :  { %6734 = vmatpush2.msk.msra.mxu1 %vm16649_vm0, %v16313_v53  ;;  %v16653_v35 = vand.u32 4294901760, %v9463_v1  ;;  %v6454_v62 = vsel %vm15737_vm4, 1.0, %v16530_v12  ;;  %vm16655_vm0 = vcmp.eq.s32.totalorder %v16447_v3, %v7617_v15  ;;  %v9648_v46 = vsub.f32 %v6458_v49, %v6458_v49  ;;  %v16674_v49 = vld [vmem:[#allocation63_spill] sm:$0xff] }
 0x169   :  { %2244 = vmatprep.subr.mxu0 %v16647_v29  ;;  %16648 = vst [vmem:[#allocation73_spill] sm:$0xff] %v9614_v20  ;;  %v9628_v29 = vsub.f32 %v6461_v8, %v6461_v8  ;;  %6735 = vmatprep.subr.msk.mxu1 %vm16655_vm0, %v16313_v53  ;;  %vm16659_vm0 = vcmp.eq.s32.totalorder %v16447_v3, %v7605_v11  ;;  %v16666_v21 = vand.u32 4294901760, %v16665_v17  ;;  %v16668_v3 = vand.u32 4294901760, %v9465_v26  ;;  %v16671_v17 = vld [vmem:[#allocation81_spill] sm:$0xff] }
 0x16a   :  { %2248 = vmatpush2.msra.mxu0 %v16651_v44  ;;  %v9633_v0 = vsub.f32 %v9463_v1, %v16653_v35  ;;  %v16656_v44 = vld [vmem:[#allocation76_spill] sm:$0xff]  ;;  %v6453_v35 = vsel %vm15733_vm6, 1.0, %v16530_v12  ;;  %6736 = vmatpush2.msk.msra.mxu1 %vm16659_vm0, %v16313_v53  ;;  %v9665_v1 = vsub.f32 %v6457_v25, %v6457_v25  ;;  %vm16664_vm6 = vcmp.eq.s32.totalorder %v16663_v51, %v7617_v15  ;;  %v16676_v25 = vld [vmem:[#allocation82_spill] sm:$0xff] }
 0x16b   :  { %16652 = vst [vmem:[#allocation75_spill] sm:$0xff] %v9628_v29  ;;  %v16657_v8 = vand.u32 4294901760, %v16656_v44  ;;  %16658 = vst [vmem:[#allocation76_spill] sm:$0xff] %v9648_v46  ;;  %v16660_v44 = vld [vmem:[#allocation78_spill] sm:$0xff]  ;;  %6737 = vmatprep.subr.msk.mxu1 %vm16664_vm6, %v16313_v53  ;;  %v9673_v6 = vsub.f32 %v6454_v62, %v6454_v62  ;;  %vm15747_vm4 = vcmp.eq.s32.totalorder %v9639_v27, %v7605_v11  ;;  %v6501_v32 = vsel %vm15740_vm9, 1.0, %v16530_v12 }
 0x16c   :  { %16662 = vst [vmem:[#allocation78_spill] sm:$0xff] %v9665_v1  ;;  %vm16670_vm6 = vcmp.eq.s32.totalorder %v16663_v51, %v7605_v11  ;;  %vm16675_vm2 = vcmp.eq.s32.totalorder %v16674_v49, %v7617_v15  ;;  %vm16679_vm9 = vcmp.eq.s32.totalorder %v16674_v49, %v7605_v11  ;;  %v16680_v51 = vld [vmem:[#allocation83_spill] sm:$0xff]  ;;  %v9732_v62 = vsel %vm15747_vm4, 1.0, %v16530_v12 }
 0x16d   :  { %2252 = vmatprep.subr.mxu0 %v16657_v8  ;;  %v16661_v8 = vand.u32 4294901760, %v16660_v44  ;;  %16667 = vst [vmem:[#allocation79_spill] sm:$0xff] %v9673_v6  ;;  %v9678_v44 = vsub.f32 %v9465_v26, %v16668_v3  ;;  %6738 = vmatpush2.msk.msra.mxu1 %vm16670_vm6, %v16313_v53  ;;  %v9692_v3 = vsub.f32 %v6453_v35, %v6453_v35  ;;  %v16681_v26 = vand.u32 4294901760, %v16680_v51  ;;  %v16684_v51 = vld [vmem:[#allocation84_spill] sm:$0xff] }
 0x16e   :  { %6739 = vmatprep.subr.msk.mxu1 %vm16675_vm2, %v16313_v53  ;;  %vm499_vm6 = vcmp.eq.s32.totalorder %v9029_v57, %v7617_v15  ;;  %vm15843_vm2 = vcmp.eq.s32.totalorder %v9029_v57, %v7605_v11  ;;  %16682 = vst [vmem:[#allocation82_spill] sm:$0xff] %v9732_v62  ;;  %v16686_v49 = vand.u32 4294901760, %v9509_v55  ;;  %v9750_v62 = vsub.f32 %v6501_v32, %v6501_v32  ;;  %v16691_v32 = vld [vmem:[#allocation9_spill] sm:$0xff] }
 0x16f   :  { %2256 = vmatpush2.msra.mxu0 %v16661_v8  ;;  %v16669_v8 = vld [vmem:[#allocation93_spill] sm:$0xff]  ;;  %16673 = vst [vmem:[#allocation81_spill] sm:$0xff] %v9692_v3  ;;  %6740 = vmatpush2.msk.msra.mxu1 %vm16679_vm9, %v16313_v53  ;;  %vm16683_vm9 = vcmp.eq.s32.totalorder %v16459_v22, %v7617_v15  ;;  %vm15810_vm4 = vcmp.eq.s32.totalorder %v9043_v33, %v7617_v15  ;;  %v16699_v27 = vand.u32 4294901760, %v9614_v20 }
 0x170   :  { %2260 = vmatprep.subr.mxu0 %v16666_v21  ;;  %vm15802_vm0 = vcmp.eq.s32.totalorder %v16669_v8, %v7617_v15  ;;  %v16672_v21 = vand.u32 4294901760, %v16671_v17  ;;  %vm15748_vm13 = vcmp.eq.s32.totalorder %v16669_v8, %v7605_v11  ;;  %v16677_v17 = vand.u32 4294901760, %v16676_v25  ;;  %6741 = vmatprep.subr.msk.mxu1 %vm16683_vm9, %v16313_v53  ;;  %16687 = vst [vmem:[#allocation83_spill] sm:$0xff] %v9750_v62 }
 0x171   :  { %v6450_v25 = vsel %vm15802_vm0, 1.0, %v16530_v12  ;;  %vm16688_vm9 = vcmp.eq.s32.totalorder %v16459_v22, %v7605_v11  ;;  %2282 = vmatprep.mubr.f32.mxu0 %v16691_v32  ;;  %v9799_v36 = vsub.f32 %v9614_v20, %v16699_v27  ;;  %v6442_v27 = vsel %vm15810_vm4, 1.0, %v16530_v12  ;;  %2419 = vmatprep.mubr.f32.mxu1 %v16691_v32 }
 0x172   :  { %2264 = vmatpush2.msra.mxu0 %v16672_v21  ;;  %v16678_v21 = vand.u32 4294901760, %v9493_v30  ;;  %6742 = vmatpush2.msk.msra.mxu1 %vm16688_vm9, %v16313_v53  ;;  %v9770_v22 = vsub.f32 %v6450_v25, %v6450_v25  ;;  %vm15809_vm9 = vcmp.eq.s32.totalorder %v9043_v33, %v7605_v11  ;;  %v16711_v20 = vand.u32 4294901760, %v9665_v1 }
 0x173   :  { %2268 = vmatprep.subr.mxu0 %v16677_v17  ;;  %v16695_v17 = vld [vmem:[#allocation13_spill] sm:$0xff] }
 0x174   :  { %v9709_v35 = vsub.f32 %v9493_v30, %v16678_v21  ;;  %2272 = vmatpush2.msra.mxu0 %v16681_v26  ;;  %v16685_v26 = vand.u32 4294901760, %v16684_v51  ;;  %v9744_v21 = vsub.f32 %v9509_v55, %v16686_v49  ;;  %v6449_v30 = vsel %vm15748_vm13, 1.0, %v16530_v12  ;;  %v16689_v51 = vld [vmem:[#allocation85_spill] sm:$0xff]  ;;  %16693 = vst [vmem:[#allocation84_spill] sm:$0xff] %v9770_v22 }
 0x175   :  { %v6446_v49 = vsel %vm499_vm6, 1.0, %v16530_v12  ;;  %vm16692_vm13 = vcmp.eq.s32.totalorder %v16466_v10, %v7617_v15  ;;  %v6445_v55 = vsel %vm15843_vm2, 1.0, %v16530_v12  ;;  %v9789_v62 = vsub.f32 %v6449_v30, %v6449_v30 }
 0x176   :  { %2276 = vmatprep.subr.mxu0 %v16685_v26  ;;  %v16690_v26 = vand.u32 4294901760, %v16689_v51  ;;  %6743 = vmatprep.subr.msk.mxu1 %vm16692_vm13, %v16313_v53  ;;  %v16694_v51 = vand.u32 4294901760, %v9537_v5  ;;  %vm16696_vm13 = vcmp.eq.s32.totalorder %v16466_v10, %v7605_v11  ;;  %v9810_v25 = vsub.f32 %v6446_v49, %v6446_v49 }
 0x177   :  { %6744 = vmatpush2.msk.msra.mxu1 %vm16696_vm13, %v16313_v53  ;;  %16697 = vst [vmem:[#allocation85_spill] sm:$0xff] %v9789_v62  ;;  %vm16700_vm13 = vcmp.eq.s32.totalorder %v16472_v13, %v7617_v15  ;;  %v9825_v30 = vsub.f32 %v6445_v55, %v6445_v55  ;;  %v16704_v49 = vand.u32 4294901760, %v9628_v29  ;;  %v16709_v55 = vand.u32 4294901760, %v9648_v46 }
 0x178   :  { %2280 = vmatpush2.msra.mxu0 %v16690_v26  ;;  %v9775_v26 = vsub.f32 %v9537_v5, %v16694_v51  ;;  %v16698_v51 = vand.u32 4294901760, %v9570_v37  ;;  %6745 = vmatprep.subr.msk.mxu1 %vm16700_vm13, %v16313_v53  ;;  %16701 = vst [vmem:[#allocation107_spill] sm:$0xff] %v9810_v25  ;;  %vm16702_vm13 = vcmp.eq.s32.totalorder %v16472_v13, %v7605_v11 }
 0x179   :  { %2284 = vmatmul.mubr.f32.vlgmr.msra.gmra.mxu0 %v16695_v17  ;;  %6753 = vmatprep.subr.msk.mxu0 %vm15763_vm8, %v16313_v53  ;;  %16703 = vst [vmem:[#allocation108_spill] sm:$0xff] %v9825_v30  ;;  %v9830_v10 = vsub.f32 %v9628_v29, %v16704_v49  ;;  %vm15820_vm8 = vcmp.eq.s32.totalorder %v9069_v14, %v7605_v11 }
 0x17a   :  { %v9794_v5 = vsub.f32 %v9570_v37, %v16698_v51  ;;  %6754 = vmatpush1.msk.msra.mxu0 %vm15762_vm10, %v16313_v53  ;;  %6746 = vmatpush2.msk.msra.mxu1 %vm16702_vm13, %v16313_v53  ;;  %v6441_v51 = vsel %vm15809_vm9, 1.0, %v16530_v12  ;;  %vm16705_vm13 = vcmp.eq.s32.totalorder %v16477_v39, %v7617_v15  ;;  %vm15821_vm10 = vcmp.eq.s32.totalorder %v9069_v14, %v7617_v15 }
 0x17b   :  { %6755 = vmatprep.subr.msk.mxu0 %vm15764_vm12, %v16313_v53  ;;  %6747 = vmatprep.subr.msk.mxu1 %vm16705_vm13, %v16313_v53  ;;  %vm16706_vm12 = vcmp.eq.s32.totalorder %v16477_v39, %v7605_v11  ;;  %v9861_v13 = vsub.f32 %v6442_v27, %v6442_v27  ;;  %vm15818_vm13 = vcmp.eq.s32.totalorder %v9082_v38, %v7617_v15 }
 0x17c   :  { %6756 = vmatpush1.msk.msra.mxu0 %vm15766_vm11, %v16313_v53  ;;  %6748 = vmatpush2.msk.msra.mxu1 %vm16706_vm12, %v16313_v53  ;;  %vm16707_vm11 = vcmp.eq.s32.totalorder %v16483_v31, %v7617_v15  ;;  %v9873_v49 = vsub.f32 %v6441_v51, %v6441_v51  ;;  %v9878_v27 = vsub.f32 %v9648_v46, %v16709_v55  ;;  %v6438_v55 = vsel %vm15821_vm10, 1.0, %v16530_v12 }
 0x17d   :  { %6757 = vmatprep.subr.msk.mxu0 %vm15790_vm3, %v16313_v53  ;;  %6749 = vmatprep.subr.msk.mxu1 %vm16707_vm11, %v16313_v53  ;;  %vm15817_vm12 = vcmp.eq.s32.totalorder %v9082_v38, %v7605_v11  ;;  %vm16710_vm11 = vcmp.eq.s32.totalorder %v16483_v31, %v7605_v11  ;;  %v9899_v39 = vsub.f32 %v9665_v1, %v16711_v20  ;;  %v6437_v46 = vsel %vm15820_vm8, 1.0, %v16530_v12 }
 0x17e   :  { %16708 = vst [vmem:[#allocation109_spill] sm:$0xff] %v9873_v49  ;;  %6758 = vmatpush1.msk.msra.mxu0 %vm15789_vm5, %v16313_v53  ;;  %6750 = vmatpush2.msk.msra.mxu1 %vm16710_vm11, %v16313_v53  ;;  %v16712_v51 = vand.u32 4294901760, %v9673_v6  ;;  %v6434_v31 = vsel %vm15818_vm13, 1.0, %v16530_v12  ;;  %vm15819_vm11 = vcmp.eq.s32.totalorder %v9107_v40, %v7617_v15  ;;  %v9947_v29 = vsub.f32 %v6438_v55, %v6438_v55 }
 0x17f   :  { %6759 = vmatprep.subr.msk.mxu0 %vm15782_vm7, %v16313_v53  ;;  %6751 = vmatprep.subr.msk.mxu1 %vm423_vm14, %v16313_v53  ;;  %vm15837_vm14 = vcmp.eq.s32.totalorder %v9107_v40, %v7605_v11  ;;  %v9949_v18 = vsub.f32 %v6437_v46, %v6437_v46  ;;  %v16716_v1 = vand.u32 4294901760, %v9692_v3  ;;  %v6558_v46 = vsel %vm15819_vm11, 1.0, %v16530_v12 }
 0x180   :  { %v9916_v20 = vsub.f32 %v9673_v6, %v16712_v51  ;;  %6760 = vmatpush1.msk.msra.mxu0 %vm15775_vm1, %v16313_v53  ;;  %6752 = vmatpush2.msk.msra.mxu1 %vm422_vm15, %v16313_v53  ;;  %v6433_v51 = vsel %vm15817_vm12, 1.0, %v16530_v12  ;;  %vm16713_vm1 = vcmp.eq.s32.totalorder %v16563_v50, %v7617_v15  ;;  %16714 = vst [vmem:[#allocation110_spill] sm:$0xff] %v9947_v29  ;;  %v16718_v55 = vand.u32 4294901760, %v9392_v63 }
 0x181   :  { %6761 = vmatprep.subr.msk.mxu0 %vm16713_vm1, %v16313_v53  ;;  %16715 = vst [vmem:[#allocation111_spill] sm:$0xff] %v9949_v18  ;;  %v9954_v37 = vsub.f32 %v9692_v3, %v16716_v1  ;;  %2421 = vmatmul.mubr.f32.vlgmr.msra.gmra.mxu1 %v16695_v17  ;;  %vm16717_vm15 = vcmp.eq.s32.totalorder %v16563_v50, %v7605_v11  ;;  %v16721_v17 = vand.u32 4294901760, %v9770_v22  ;;  %v6557_v63 = vsel %vm15837_vm14, 1.0, %v16530_v12 }
 0x182   :  { %6762 = vmatpush1.msk.msra.mxu0 %vm16717_vm15, %v16313_v53  ;;  %vm15791_vm1 = vcmp.eq.s32.totalorder %v9121_v2, %v7617_v15  ;;  %2577 = vmatprep.subr.mxu1 %v16718_v55  ;;  %vm16719_vm7 = vcmp.eq.s32.totalorder %v16570_v59, %v7617_v15  ;;  %v9975_v41 = vsub.f32 %v6434_v31, %v6434_v31  ;;  %v16722_v55 = vand.u32 4294901760, %v9411_v43 }
 0x183   :  { %6763 = vmatprep.subr.msk.mxu0 %vm16719_vm7, %v16313_v53  ;;  %v9977_v6 = vsub.f32 %v6433_v51, %v6433_v51  ;;  %v9982_v32 = vsub.f32 %v9770_v22, %v16721_v17  ;;  %vm16723_vm7 = vcmp.eq.s32.totalorder %v16570_v59, %v7605_v11  ;;  %v16724_v51 = vand.u32 4294901760, %v9789_v62 }
 0x184   :  { %16720 = vst [vmem:[#allocation112_spill] sm:$0xff] %v9975_v41  ;;  %2583 = vmatpush1.msra.mxu1 %v16722_v55  ;;  %6764 = vmatpush1.msk.msra.mxu0 %vm16723_vm7, %v16313_v53  ;;  %v16725_v1 = vand.u32 4294901760, %v9810_v25  ;;  %vm15792_vm15 = vcmp.eq.s32.totalorder %v9121_v2, %v7605_v11  ;;  %v16726_v43 = vand.u32 4294901760, %v9433_v19  ;;  %vm16727_vm7 = vcmp.eq.s32.totalorder %v8925_v58, %v7617_v15 }
 0x185   :  { %v9998_v17 = vsub.f32 %v9789_v62, %v16724_v51  ;;  %6765 = vmatprep.subr.msk.mxu0 %vm16727_vm7, %v16313_v53  ;;  %v10014_v51 = vsub.f32 %v6558_v46, %v6558_v46  ;;  %vm16730_vm5 = vcmp.eq.s32.totalorder %v8925_v58, %v7605_v11  ;;  %v10027_v19 = vsub.f32 %v6557_v63, %v6557_v63 }
 0x186   :  { %v10003_v22 = vsub.f32 %v9810_v25, %v16725_v1  ;;  %2589 = vmatprep.subr.mxu1 %v16726_v43  ;;  %v6554_v1 = vsel %vm15791_vm1, 1.0, %v16530_v12  ;;  %v16729_v25 = vand.u32 4294901760, %v9452_v48  ;;  %6766 = vmatpush1.msk.msra.mxu0 %vm16730_vm5, %v16313_v53  ;;  %v16732_v46 = vand.u32 4294901760, %v9825_v30 }
 0x187   :  { %16728 = vst [vmem:[#allocation113_spill] sm:$0xff] %v10014_v51  ;;  %16731 = vst [vmem:[#allocation114_spill] sm:$0xff] %v10027_v19  ;;  %vm15832_vm7 = vcmp.eq.s32.totalorder %v9147_v56, %v7617_v15  ;;  %v16733_v48 = vand.u32 4294901760, %v9481_v42  ;;  %vm16734_vm3 = vcmp.eq.s32.totalorder %v8937_v7, %v7617_v15  ;;  %v6553_v63 = vsel %vm15792_vm15, 1.0, %v16530_v12 }
 0x188   :  { %2595 = vmatpush1.msra.mxu1 %v16729_v25  ;;  %v10032_v43 = vsub.f32 %v9825_v30, %v16732_v46  ;;  %6767 = vmatprep.subr.msk.mxu0 %vm16734_vm3, %v16313_v53  ;;  %vm15793_vm5 = vcmp.eq.s32.totalorder %v9147_v56, %v7605_v11  ;;  %v16735_v42 = vand.u32 4294901760, %v9542_v28  ;;  %vm16736_vm1 = vcmp.eq.s32.totalorder %v8937_v7, %v7605_v11  ;;  %v16761_v25 = vld [vmem:[#allocation102_spill] sm:$0xff] }
 0x189   :  { %2601 = vmatprep.subr.mxu1 %v16733_v48  ;;  %6768 = vmatpush1.msk.msra.mxu0 %vm16736_vm1, %v16313_v53  ;;  %v10059_v55 = vsub.f32 %v6554_v1, %v6554_v1  ;;  %vm15798_vm3 = vcmp.eq.s32.totalorder %v9161_v9, %v7617_v15  ;;  %v16738_v31 = vand.u32 4294901760, %v9555_v60  ;;  %vm16739_vm15 = vcmp.eq.s32.totalorder %v8959_v54, %v7617_v15 }
 0x18a   :  { %2607 = vmatpush1.msra.mxu1 %v16735_v42  ;;  %6769 = vmatprep.subr.msk.mxu0 %vm16739_vm15, %v16313_v53  ;;  %v16740_v28 = vand.u32 4294901760, %v9861_v13  ;;  %v6550_v1 = vsel %vm15832_vm7, 1.0, %v16530_v12  ;;  %vm15801_vm1 = vcmp.eq.s32.totalorder %v9161_v9, %v7605_v11  ;;  %v16741_v60 = vand.u32 4294901760, %v9575_v4 }
 0x18b   :  { %16737 = vst [vmem:[#allocation115_spill] sm:$0xff] %v10059_v55  ;;  %2613 = vmatprep.subr.mxu1 %v16738_v31  ;;  %vm16742_vm15 = vcmp.eq.s32.totalorder %v8959_v54, %v7605_v11  ;;  %v16744_v48 = vand.u32 4294901760, %v9873_v49  ;;  %v6549_v4 = vsel %vm15793_vm5, 1.0, %v16530_v12  ;;  %vm15842_vm5 = vcmp.eq.s32.totalorder %v9187_v45, %v7617_v15 }
 0x18c   :  { %v10072_v42 = vsub.f32 %v9861_v13, %v16740_v28  ;;  %2619 = vmatpush1.msra.mxu1 %v16741_v60  ;;  %6770 = vmatpush1.msk.msra.mxu0 %vm16742_vm15, %v16313_v53  ;;  %v10088_v28 = vsub.f32 %v6553_v63, %v6553_v63  ;;  %v16745_v60 = vand.u32 4294901760, %v9592_v34  ;;  %vm16746_vm15 = vcmp.eq.s32.totalorder %v8971_v52, %v7617_v15 }
 0x18d   :  { %v10093_v46 = vsub.f32 %v9873_v49, %v16744_v48  ;;  %6771 = vmatprep.subr.msk.mxu0 %vm16746_vm15, %v16313_v53  ;;  %v16747_v63 = vand.u32 4294901760, %v9947_v29  ;;  %v6546_v48 = vsel %vm15798_vm3, 1.0, %v16530_v12  ;;  %v16748_v34 = vand.u32 4294901760, %v9601_v24 }
 0x18e   :  { %16743 = vst [vmem:[#allocation116_spill] sm:$0xff] %v10088_v28  ;;  %2625 = vmatprep.subr.mxu1 %v16745_v60  ;;  %vm16749_vm15 = vcmp.eq.s32.totalorder %v8971_v52, %v7605_v11  ;;  %v10123_v60 = vsub.f32 %v6550_v1, %v6550_v1  ;;  %v16751_v49 = vand.u32 4294901760, %v9633_v0  ;;  %vm16752_vm3 = vcmp.eq.s32.totalorder %v8993_v61, %v7617_v15 }
 0x18f   :  { %v10108_v31 = vsub.f32 %v9947_v29, %v16747_v63  ;;  %2631 = vmatpush1.msra.mxu1 %v16748_v34  ;;  %6772 = vmatpush1.msk.msra.mxu0 %vm16749_vm15, %v16313_v53  ;;  %v6545_v63 = vsel %vm15801_vm1, 1.0, %v16530_v12  ;;  %v10138_v1 = vsub.f32 %v6549_v4, %v6549_v4  ;;  %v16754_v34 = vand.u32 4294901760, %v9949_v18 }
 0x190   :  { %16750 = vst [vmem:[#allocation117_spill] sm:$0xff] %v10123_v60  ;;  %2637 = vmatprep.subr.mxu1 %v16751_v49  ;;  %6773 = vmatprep.subr.msk.mxu0 %vm16752_vm3, %v16313_v53  ;;  %vm15804_vm15 = vcmp.eq.s32.totalorder %v9187_v45, %v7605_v11  ;;  %v16755_v0 = vand.u32 4294901760, %v9678_v44  ;;  %vm16756_vm1 = vcmp.eq.s32.totalorder %v8993_v61, %v7605_v11  ;;  %v16758_v29 = vand.u32 4294901760, %v9709_v35 }
 0x191   :  { %16753 = vst [vmem:[#allocation118_spill] sm:$0xff] %v10138_v1  ;;  %v10143_v52 = vsub.f32 %v9949_v18, %v16754_v34  ;;  %6774 = vmatpush1.msk.msra.mxu0 %vm16756_vm1, %v16313_v53  ;;  %v10154_v4 = vsub.f32 %v6546_v48, %v6546_v48  ;;  %v6542_v34 = vsel %vm15842_vm5, 1.0, %v16530_v12  ;;  %v16760_v48 = vand.u32 4294901760, %v9975_v41 }
 0x192   :  { %2643 = vmatpush1.msra.mxu1 %v16755_v0  ;;  %6775 = vmatprep.subr.msk.mxu0 %vm15802_vm0, %v16313_v53  ;;  %v10168_v0 = vsub.f32 %v6545_v63, %v6545_v63  ;;  %vm15845_vm3 = vcmp.eq.s32.totalorder %v16761_v25, %v7617_v15  ;;  %v16762_v35 = vand.u32 4294901760, %v9744_v21  ;;  %vm16763_vm1 = vcmp.eq.s32.totalorder %v16669_v8, %v7605_v11  ;;  %v16768_v8 = vld [vmem:[#allocation103_spill] sm:$0xff] }
 0x193   :  { %16757 = vst [vmem:[#allocation119_spill] sm:$0xff] %v10154_v4  ;;  %2649 = vmatprep.subr.mxu1 %v16758_v29  ;;  %v10173_v49 = vsub.f32 %v9975_v41, %v16760_v48  ;;  %6776 = vmatpush1.msk.msra.mxu0 %vm16763_vm1, %v16313_v53  ;;  %v16764_v29 = vand.u32 4294901760, %v9977_v6  ;;  %v6541_v48 = vsel %vm15804_vm15, 1.0, %v16530_v12  ;;  %v16765_v44 = vand.u32 4294901760, %v10014_v51 }
 0x194   :  { %16759 = vst [vmem:[#allocation120_spill] sm:$0xff] %v10168_v0  ;;  %2655 = vmatpush1.msra.mxu1 %v16762_v35  ;;  %vm590_vm0 = vcmp.eq.s32.totalorder %v16761_v25, %v7605_v11  ;;  %v16766_v35 = vand.u32 4294901760, %v9775_v26  ;;  %6777 = vmatprep.subr.msk.mxu0 %vm499_vm6, %v16313_v53  ;;  %v10206_v24 = vsub.f32 %v6542_v34, %v6542_v34  ;;  %v6538_v26 = vsel %vm15845_vm3, 1.0, %v16530_v12 }
 0x195   :  { %v10186_v63 = vsub.f32 %v9977_v6, %v16764_v29  ;;  %v10195_v21 = vsub.f32 %v10014_v51, %v16765_v44  ;;  %vm587_vm1 = vcmp.eq.s32.totalorder %v16768_v8, %v7617_v15  ;;  %vm586_vm15 = vcmp.eq.s32.totalorder %v16768_v8, %v7605_v11  ;;  %6778 = vmatpush1.msk.msra.mxu0 %vm15843_vm2, %v16313_v53 }
 0x196   :  { %2661 = vmatprep.subr.mxu1 %v16766_v35  ;;  %16767 = vst [vmem:[#allocation121_spill] sm:$0xff] %v10206_v24  ;;  %v16769_v44 = vand.u32 4294901760, %v9794_v5  ;;  %v16770_v34 = vand.u32 4294901760, %v10027_v19  ;;  %6779 = vmatprep.subr.msk.mxu0 %vm15810_vm4, %v16313_v53  ;;  %v10236_v51 = vsub.f32 %v6541_v48, %v6541_v48  ;;  %v16773_v5 = vand.u32 4294901760, %v9830_v10  ;;  %v16776_v48 = vld [vmem:[#allocation40_spill] sm:$0xff] }
 0x197   :  { %6780 = vmatpush1.msk.msra.mxu0 %vm15809_vm9, %v16313_v53  ;;  %v6533_v10 = vsel %vm586_vm15, 1.0, %v16530_v12  ;;  %vm583_vm9 = vcmp.eq.s32.totalorder %v16776_v48, %v7617_v15  ;;  %vm15852_vm4 = vcmp.eq.s32.totalorder %v16776_v48, %v7605_v11  ;;  %v16777_v29 = vand.u32 4294901760, %v9899_v39 }
 0x198   :  { %2667 = vmatpush1.msra.mxu1 %v16769_v44  ;;  %v10225_v35 = vsub.f32 %v10027_v19, %v16770_v34  ;;  %v16771_v44 = vand.u32 4294901760, %v9799_v36  ;;  %16772 = vst [vmem:[#allocation122_spill] sm:$0xff] %v10236_v51  ;;  %v6537_v34 = vsel %vm590_vm0, 1.0, %v16530_v12  ;;  %6781 = vmatprep.subr.msk.mxu0 %vm15821_vm10, %v16313_v53  ;;  %v10265_v36 = vsub.f32 %v6538_v26, %v6538_v26 }
 0x199   :  { %6782 = vmatpush1.msk.msra.mxu0 %vm15820_vm8, %v16313_v53  ;;  %v10279_v26 = vsub.f32 %v6537_v34, %v6537_v34  ;;  %v16779_v57 = vand.u32 4294901760, %v10088_v28  ;;  %v16780_v39 = vand.u32 4294901760, %v9916_v20  ;;  %v10299_v34 = vsub.f32 %v6533_v10, %v6533_v10  ;;  %v16789_v10 = vld [vmem:[#allocation49_spill] sm:$0xff] }
 0x19a   :  { %2673 = vmatprep.subr.mxu1 %v16771_v44  ;;  %v6534_v44 = vsel %vm587_vm1, 1.0, %v16530_v12  ;;  %16775 = vst [vmem:[#allocation123_spill] sm:$0xff] %v10265_v36  ;;  %6783 = vmatprep.subr.msk.mxu0 %vm15818_vm13, %v16313_v53  ;;  %v16784_v14 = vand.u32 4294901760, %v9954_v37  ;;  %v6530_v20 = vsel %vm583_vm9, 1.0, %v16530_v12  ;;  %vm15856_vm8 = vcmp.eq.s32.totalorder %v16789_v10, %v7605_v11 }
 0x19b   :  { %2679 = vmatpush1.msra.mxu1 %v16773_v5  ;;  %v16774_v5 = vand.u32 4294901760, %v9878_v27  ;;  %v10289_v19 = vsub.f32 %v10088_v28, %v16779_v57  ;;  %16782 = vst [vmem:[#allocation125_spill] sm:$0xff] %v10299_v34  ;;  %6784 = vmatpush1.msk.msra.mxu0 %vm15817_vm12, %v16313_v53  ;;  %v16787_v57 = vld [vmem:[#allocation46_spill] sm:$0xff]  ;;  %v16790_v37 = vand.u32 4294901760, %v10003_v22  ;;  %vm16791_vm10 = vcmp.eq.s32.totalorder %v9121_v2, %v7617_v15  ;;  %v1130_v22 = vld [vmem:[%s15400_s3 + $0x8] sm:$0xff] }
 0x19c   :  { %6785 = vmatprep.subr.msk.mxu0 %vm15819_vm11, %v16313_v53  ;;  %vm15853_vm12 = vcmp.eq.s32.totalorder %v16787_v57, %v7617_v15  ;;  %vm15855_vm13 = vcmp.eq.s32.totalorder %v16787_v57, %v7605_v11  ;;  %vm575_vm11 = vcmp.eq.s32.totalorder %v16789_v10, %v7617_v15  ;;  %v16839_v57 = vld [vmem:[#allocation72_spill] sm:$0xff] }
 0x19d   :  { %2685 = vmatprep.subr.mxu1 %v16774_v5  ;;  %v16778_v5 = vand.u32 4294901760, %v10059_v55  ;;  %6786 = vmatpush2.msk.msra.mxu0 %vm15837_vm14, %v16313_v53  ;;  %v6522_v38 = vsel %vm575_vm11, 1.0, %v16530_v12  ;;  %vm16804_vm14 = vcmp.eq.s32.totalorder %v9161_v9, %v7617_v15 }
 0x19e   :  { %2691 = vmatpush1.msra.mxu1 %v16777_v29  ;;  %v10297_v29 = vsub.f32 %v6534_v44, %v6534_v44  ;;  %v6529_v44 = vsel %vm15852_vm4, 1.0, %v16530_v12  ;;  %6787 = vmatprep.subr.msk.mxu0 %vm16791_vm10, %v16313_v53  ;;  %vm16795_vm10 = vcmp.eq.s32.totalorder %v9121_v2, %v7605_v11  ;;  %v16798_v2 = vand.u32 4294901760, %v10072_v42 }
 0x19f   :  { %v10284_v33 = vsub.f32 %v10059_v55, %v16778_v5  ;;  %2697 = vmatprep.subr.mxu1 %v16780_v39  ;;  %v16783_v5 = vand.u32 4294901760, %v10123_v60  ;;  %v16786_v39 = vand.u32 4294901760, %v10138_v1  ;;  %6788 = vmatpush2.msk.msra.mxu0 %vm16795_vm10, %v16313_v53  ;;  %v16800_v42 = vand.u32 4294901760, %v10093_v46 }
 0x1a0   :  { %16781 = vst [vmem:[#allocation124_spill] sm:$0xff] %v10297_v29  ;;  %2703 = vmatpush1.msra.mxu1 %v16784_v14  ;;  %v16785_v14 = vand.u32 4294901760, %v9982_v32  ;;  %v16788_v32 = vand.u32 4294901760, %v9998_v17  ;;  %6789 = vmatprep.subr.msk.mxu0 %vm15832_vm7, %v16313_v53  ;;  %vm16801_vm10 = vcmp.eq.s32.totalorder %v9147_v56, %v7605_v11 }
 0x1a1   :  { %v10304_v27 = vsub.f32 %v10123_v60, %v16783_v5  ;;  %v10332_v5 = vsub.f32 %v10138_v1, %v16786_v39  ;;  %v16793_v39 = vand.u32 4294901760, %v10154_v4  ;;  %6790 = vmatpush2.msk.msra.mxu0 %vm16801_vm10, %v16313_v53  ;;  %v16807_v1 = vand.u32 4294901760, %v10143_v52  ;;  %v16815_v52 = vld [vmem:[#allocation104_spill] sm:$0xff] }
 0x1a2   :  { %2709 = vmatprep.subr.mxu1 %v16785_v14  ;;  %v10360_v14 = vsub.f32 %v6529_v44, %v6529_v44  ;;  %v16796_v44 = vand.u32 4294901760, %v10168_v0  ;;  %6791 = vmatprep.subr.msk.mxu0 %vm16804_vm14, %v16313_v53  ;;  %vm16808_vm10 = vcmp.eq.s32.totalorder %v9161_v9, %v7605_v11 }
 0x1a3   :  { %2715 = vmatpush1.msra.mxu1 %v16788_v32  ;;  %v10358_v32 = vsub.f32 %v6530_v20, %v6530_v20  ;;  %v10365_v40 = vsub.f32 %v10154_v4, %v16793_v39  ;;  %v6526_v20 = vsel %vm15853_vm12, 1.0, %v16530_v12  ;;  %v16803_v4 = vand.u32 4294901760, %v10108_v31  ;;  %6792 = vmatpush2.msk.msra.mxu0 %vm16808_vm10, %v16313_v53 }
 0x1a4   :  { %2721 = vmatprep.subr.mxu1 %v16790_v37  ;;  %v16794_v37 = vand.u32 4294901760, %v10032_v43  ;;  %v10383_v39 = vsub.f32 %v10168_v0, %v16796_v44  ;;  %v6525_v43 = vsel %vm15855_vm13, 1.0, %v16530_v12  ;;  %v16799_v0 = vand.u32 4294901760, %v10236_v51  ;;  %6793 = vmatprep.subr.msk.mxu0 %vm15842_vm5, %v16313_v53 }
 0x1a5   :  { %16792 = vst [vmem:[#allocation126_spill] sm:$0xff] %v10358_v32  ;;  %v2804_v46 = vand.u32 4294901760, %v10365_v40  ;;  %v10433_v56 = vsub.f32 %v6525_v43, %v6525_v43  ;;  %v15844_v44 = vand.u32 4294901760, %v10297_v29  ;;  %v16810_v40 = vand.u32 4294901760, %v10173_v49 }
 0x1a6   :  { %2727 = vmatpush1.msra.mxu1 %v16794_v37  ;;  %v16797_v37 = vand.u32 4294901760, %v10206_v24  ;;  %v2810_v31 = vand.u32 4294901760, %v10383_v39  ;;  %v16811_v39 = vand.u32 4294901760, %v10186_v63  ;;  %vm16812_vm10 = vcmp.eq.s32.totalorder %v9187_v45, %v7605_v11  ;;  %v16816_v63 = vld [vmem:[#allocation8_spill] sm:$0xff] }
 0x1a7   :  { %2733 = vmatprep.subr.mxu1 %v16798_v2  ;;  %v6521_v2 = vsel %vm15856_vm8, 1.0, %v16530_v12  ;;  %16806 = vst [vmem:[#allocation128_spill] sm:$0xff] %v10433_v56  ;;  %6794 = vmatpush2.msk.msra.mxu0 %vm16812_vm10, %v16313_v53  ;;  %v16813_v49 = vand.u32 4294901760, %v10265_v36  ;;  %vm567_vm5 = vcmp.eq.s32.totalorder %v16815_v52, %v7617_v15  ;;  %vm16817_vm2 = vcmp.eq.s32.totalorder %v16816_v63, 3 }
 0x1a8   :  { %v10392_v17 = vsub.f32 %v10206_v24, %v16797_v37  ;;  %v10408_v37 = vsub.f32 %v10236_v51, %v16799_v0  ;;  %2739 = vmatpush1.msra.mxu1 %v16800_v42  ;;  %v16802_v24 = vld [vmem:[#allocation55_spill] sm:$0xff]  ;;  %v1134_v51 = vcombine.high %v1130_v22, %v1130_v22  ;;  %v10431_v42 = vsub.f32 %v6526_v20, %v6526_v20 }
 0x1a9   :  { %vm571_vm7 = vcmp.eq.s32.totalorder %v16802_v24, %v7617_v15  ;;  %2745 = vmatprep.subr.mxu1 %v16803_v4  ;;  %v10444_v0 = vsub.f32 %v6522_v38, %v6522_v38  ;;  %vm570_vm14 = vcmp.eq.s32.totalorder %v16802_v24, %v7605_v11  ;;  %v10471_v43 = vsub.f32 %v10265_v36, %v16813_v49 }
 0x1aa   :  { %16805 = vst [vmem:[#allocation127_spill] sm:$0xff] %v10431_v42  ;;  %2751 = vmatpush1.msra.mxu1 %v16807_v1  ;;  %v10455_v1 = vsub.f32 %v6521_v2, %v6521_v2  ;;  %v6518_v38 = vsel %vm571_vm7, 1.0, %v16530_v12  ;;  %v16814_v2 = vand.u32 4294901760, %v10279_v26  ;;  %v16818_v4 = vand.u32 4294901760, %v10195_v21  ;;  %6795 = vmatprep.subr.msk.mxu0 %vm15845_vm3, %v16313_v53 }
 0x1ab   :  { %16809 = vst [vmem:[#allocation129_spill] sm:$0xff] %v10444_v0  ;;  %2757 = vmatprep.subr.mxu1 %v16810_v40  ;;  %v6517_v49 = vsel %vm570_vm14, 1.0, %v16530_v12  ;;  %vm16819_vm10 = vcmp.eq.s32.totalorder %v16816_v63, 3  ;;  %v16820_v21 = vand.u32 4294901760, %v10225_v35  ;;  %6796 = vmatpush2.msk.msra.mxu0 %vm590_vm0, %v16313_v53  ;;  %v16823_v63 = vand.u32 4294901760, %v10284_v33 }
 0x1ac   :  { %2763 = vmatpush1.msra.mxu1 %v16811_v39  ;;  %v10476_v40 = vsub.f32 %v10279_v26, %v16814_v2  ;;  %v1140_v39 = vsel %vm16817_vm2, 1.0, %v1134_v51  ;;  %v10495_v2 = vsub.f32 %v10297_v29, %v15844_v44  ;;  %vm566_vm2 = vcmp.eq.s32.totalorder %v16815_v52, %v7605_v11  ;;  %v16822_v44 = vld [vmem:[#allocation64_spill] sm:$0xff]  ;;  %6797 = vmatprep.subr.msk.mxu0 %vm587_vm1, %v16313_v53 }
 0x1ad   :  { %2769 = vmatprep.subr.mxu1 %v16818_v4  ;;  %v1139_v51 = vsel %vm16819_vm10, 1.0, %v1130_v22  ;;  %v10507_v4 = vsub.f32 %v6518_v38, %v6518_v38  ;;  %vm15913_vm3 = vcmp.eq.s32.totalorder %v16822_v44, %v7617_v15  ;;  %v6514_v35 = vsel %vm567_vm5, 1.0, %v16530_v12  ;;  %6798 = vmatpush2.msk.msra.mxu0 %vm586_vm15, %v16313_v53 }
 0x1ae   :  { %2775 = vmatpush2.msra.mxu1 %v16820_v21  ;;  %v16824_v22 = vand.u32 4294901760, %v10299_v34  ;;  %vm15910_vm10 = vcmp.eq.s32.totalorder %v16822_v44, %v7605_v11  ;;  %v10530_v33 = vand.u32 4294901760, %v1140_v39  ;;  %v16826_v21 = vand.u32 4294901760, %v10289_v19  ;;  %6799 = vmatprep.subr.msk.mxu0 %vm583_vm9, %v16313_v53  ;;  %v16853_v44 = vld [vmem:[#allocation82_spill] sm:$0xff] }
 0x1af   :  { %16821 = vst [vmem:[#allocation8_spill] sm:$0xff] %v10507_v4  ;;  %2781 = vmatprep.subr.mxu1 %v16823_v63  ;;  %v2828_v63 = vand.u32 4294901760, %v10471_v43  ;;  %v10539_v45 = vsub.f32 %v6517_v49, %v6517_v49  ;;  %v10545_v20 = vand.u32 4294901760, %v1139_v51  ;;  %v16828_v25 = vand.u32 4294901760, %v10304_v27  ;;  %6800 = vmatpush2.msk.msra.mxu0 %vm15852_vm4, %v16313_v53 }
 0x1b0   :  { %v10526_v38 = vsub.f32 %v10299_v34, %v16824_v22  ;;  %16825 = vst [vmem:[#allocation130_spill] sm:$0xff] %v10530_v33  ;;  %2787 = vmatpush2.msra.mxu1 %v16826_v21  ;;  %v6513_v22 = vsel %vm566_vm2, 1.0, %v16530_v12  ;;  %v2834_v19 = vand.u32 4294901760, %v10476_v40  ;;  %v2840_v43 = vand.u32 4294901760, %v10495_v2  ;;  %6801 = vmatprep.subr.msk.mxu0 %vm15853_vm12, %v16313_v53 }
 0x1b1   :  { %16827 = vst [vmem:[#allocation131_spill] sm:$0xff] %v10545_v20  ;;  %2793 = vmatprep.subr.mxu1 %v16828_v25  ;;  %v6510_v49 = vsel %vm15913_vm3, 1.0, %v16530_v12  ;;  %v16829_v8 = vand.u32 4294901760, %v10332_v5  ;;  %v10566_v25 = vsub.f32 %v6514_v35, %v6514_v35  ;;  %v16831_v27 = vand.u32 4294901760, %v10358_v32  ;;  %6802 = vmatpush2.msk.msra.mxu0 %vm15855_vm13, %v16313_v53 }
 0x1b2   :  { %v16832_v2 = vand.u32 4294901760, %v10360_v14  ;;  %v2846_v5 = vand.u32 4294901760, %v10526_v38  ;;  %v10583_v35 = vsub.f32 %v6513_v22, %v6513_v22  ;;  %v10600_v38 = vsub.f32 %v1139_v51, %v10545_v20  ;;  %6803 = vmatprep.subr.msk.mxu0 %vm575_vm11, %v16313_v53  ;;  %2957 = vmatprep.mubr.f32.mxu1 %v10530_v33 }
 0x1b3   :  { %2799 = vmatpush2.msra.mxu1 %v16829_v8  ;;  %16830 = vst [vmem:[#allocation132_spill] sm:$0xff] %v10566_v25  ;;  %v2851_v40 = vsub.f32 %v10358_v32, %v16831_v27  ;;  %v6509_v8 = vsel %vm15910_vm10, 1.0, %v16530_v12  ;;  %v16833_v27 = vld [vmem:[#allocation67_spill] sm:$0xff]  ;;  %v16837_v22 = vand.u32 4294901760, %v10392_v17  ;;  %vm15876_vm13 = vcmp.eq.s32.totalorder %v16839_v57, %v7617_v15  ;;  %6804 = vmatpush2.msk.msra.mxu0 %vm15856_vm8, %v16313_v53 }
 0x1b4   :  { %v2857_v9 = vsub.f32 %v10360_v14, %v16832_v2  ;;  %2805 = vmatprep.subr.mxu1 %v2804_v46  ;;  %vm15909_vm4 = vcmp.eq.s32.totalorder %v16833_v27, %v7617_v15  ;;  %v10588_v2 = vsub.f32 %v1140_v39, %v10530_v33  ;;  %v10594_v46 = vsub.f32 %v6510_v49, %v6510_v49  ;;  %v16896_v33 = vld [vmem:[#allocation76_spill] sm:$0xff] }
 0x1b5   :  { %2811 = vmatpush2.msra.mxu1 %v2810_v31  ;;  %vm15869_vm12 = vcmp.eq.s32.totalorder %v16833_v27, %v7605_v11  ;;  %16836 = vst [vmem:[#allocation135_spill] sm:$0xff] %v10600_v38  ;;  %v10608_v31 = vsub.f32 %v6509_v8, %v6509_v8  ;;  %v16838_v39 = vand.u32 4294901760, %v10431_v42  ;;  %v16840_v51 = vand.u32 4294901760, %v10408_v37  ;;  %6805 = vmatprep.subr.msk.mxu0 %vm571_vm7, %v16313_v53 }
 0x1b6   :  { %16834 = vst [vmem:[#allocation133_spill] sm:$0xff] %v10588_v2  ;;  %16835 = vst [vmem:[#allocation134_spill] sm:$0xff] %v10594_v46  ;;  %2817 = vmatprep.subr.mxu1 %v16837_v22  ;;  %v2852_v17 = vand.u32 4294901760, %v2851_v40  ;;  %v2858_v8 = vand.u32 4294901760, %v2857_v9  ;;  %v6506_v22 = vsel %vm15909_vm4, 1.0, %v16530_v12  ;;  %v6505_v37 = vsel %vm15869_vm12, 1.0, %v16530_v12  ;;  %6806 = vmatpush2.msk.msra.mxu0 %vm570_vm14, %v16313_v53 }
 0x1b7   :  { %v2863_v49 = vsub.f32 %v10431_v42, %v16838_v39  ;;  %2823 = vmatpush2.msra.mxu1 %v16840_v51  ;;  %v16841_v40 = vld [vmem:[#allocation106_spill] sm:$0xff]  ;;  %v10639_v51 = vand.u32 4294901760, %v10588_v2  ;;  %v6502_v9 = vsel %vm15876_vm13, 1.0, %v16530_v12  ;;  %v10654_v10 = vand.u32 4294901760, %v10600_v38  ;;  %6807 = vmatprep.subr.msk.mxu0 %vm567_vm5, %v16313_v53 }
 0x1b8   :  { %2829 = vmatprep.subr.mxu1 %v2828_v63  ;;  %vm15875_vm8 = vcmp.eq.s32.totalorder %v16841_v40, %v7617_v15  ;;  %v16843_v63 = vand.u32 4294901760, %v10433_v56  ;;  %v10660_v24 = vsub.f32 %v6506_v22, %v6506_v22  ;;  %6808 = vmatpush2.msk.msra.mxu0 %vm566_vm2, %v16313_v53  ;;  %v16847_v21 = vand.u32 4294901760, %v10455_v1 }
 0x1b9   :  { %16842 = vst [vmem:[#allocation136_spill] sm:$0xff] %v10639_v51  ;;  %2835 = vmatpush2.msra.mxu1 %v2834_v19  ;;  %16844 = vst [vmem:[#allocation137_spill] sm:$0xff] %v10654_v10  ;;  %v2864_v19 = vand.u32 4294901760, %v2863_v49  ;;  %v6498_v22 = vsel %vm15875_vm8, 1.0, %v16530_v12  ;;  %6809 = vmatprep.subr.msk.mxu0 %vm15913_vm3, %v16313_v53  ;;  %v2564_v12 = vsub.f32 %v10600_v38, %v10654_v10 }
 0x1ba   :  { %v2869_v39 = vsub.f32 %v10433_v56, %v16843_v63  ;;  %2841 = vmatprep.subr.mxu1 %v2840_v43  ;;  %16845 = vst [vmem:[#allocation138_spill] sm:$0xff] %v10660_v24  ;;  %v16846_v63 = vand.u32 4294901760, %v10444_v0  ;;  %v10670_v43 = vsub.f32 %v6505_v37, %v6505_v37  ;;  %v2881_v49 = vsub.f32 %v10455_v1, %v16847_v21 }
 0x1bb   :  { %2847 = vmatpush2.msra.mxu1 %v2846_v5  ;;  %v10684_v5 = vsub.f32 %v6502_v9, %v6502_v9  ;;  %v16849_v37 = vand.u32 4294901760, %v10507_v4  ;;  %v2558_v21 = vsub.f32 %v10588_v2, %v10639_v51  ;;  %6810 = vmatpush2.msk.msra.mxu0 %vm15910_vm10, %v16313_v53  ;;  %v10706_v52 = vsub.f32 %v6498_v22, %v6498_v22 }
 0x1bc   :  { %v2875_v48 = vsub.f32 %v10444_v0, %v16846_v63  ;;  %2853 = vmatprep.subr.mxu1 %v2852_v17  ;;  %v2870_v17 = vand.u32 4294901760, %v2869_v39  ;;  %v16850_v63 = vand.u32 4294901760, %v10539_v45  ;;  %6811 = vmatprep.subr.msk.mxu0 %vm15909_vm4, %v16313_v53  ;;  %v16852_v39 = vand.u32 4294901760, %v10566_v25 }
 0x1bd   :  { %16848 = vst [vmem:[#allocation139_spill] sm:$0xff] %v10684_v5  ;;  %v2887_v56 = vsub.f32 %v10507_v4, %v16849_v37  ;;  %2859 = vmatpush2.msra.mxu1 %v2858_v8  ;;  %16851 = vst [vmem:[#allocation140_spill] sm:$0xff] %v10706_v52  ;;  %v10714_v10 = vsub.f32 %v16853_v44, %v16853_v44  ;;  %6812 = vmatpush2.msk.msra.mxu0 %vm15869_vm12, %v16313_v53  ;;  %v16859_v37 = vand.u32 4294901760, %v10608_v31 }
 0x1be   :  { %v2893_v9 = vsub.f32 %v10539_v45, %v16850_v63  ;;  %2865 = vmatprep.subr.mxu1 %v2864_v19  ;;  %v2876_v8 = vand.u32 4294901760, %v2875_v48  ;;  %v2899_v51 = vsub.f32 %v10566_v25, %v16852_v39  ;;  %v2882_v19 = vand.u32 4294901760, %v2881_v49  ;;  %6813 = vmatprep.subr.msk.mxu0 %vm15876_vm13, %v16313_v53 }
 0x1bf   :  { %2871 = vmatpush2.msra.mxu1 %v2870_v17  ;;  %v16854_v48 = vand.u32 4294901760, %v10583_v35  ;;  %v2888_v44 = vand.u32 4294901760, %v2887_v56  ;;  %v10728_v17 = vand.u32 4294901760, %v2558_v21  ;;  %v16856_v39 = vand.u32 4294901760, %v10594_v46  ;;  %v16860_v21 = vld [vmem:[#allocation83_spill] sm:$0xff] }
 0x1c0   :  { %2877 = vmatprep.subr.mxu1 %v2876_v8  ;;  %vm16857_vm12 = vcmp.eq.s32.totalorder %v16839_v57, %v7605_v11  ;;  %v2894_v8 = vand.u32 4294901760, %v2893_v9  ;;  %v2917_v56 = vsub.f32 %v10608_v31, %v16859_v37  ;;  %v16863_v37 = vand.u32 4294901760, %v10670_v43  ;;  %v16866_v57 = vld [vmem:[#allocation41_spill] sm:$0xff] }
 0x1c1   :  { %v2905_v22 = vsub.f32 %v10583_v35, %v16854_v48  ;;  %16855 = vst [vmem:[#allocation82_spill] sm:$0xff] %v10728_v17  ;;  %v2911_v63 = vsub.f32 %v10594_v46, %v16856_v39  ;;  %2883 = vmatpush2.msra.mxu1 %v2882_v19  ;;  %6814 = vmatpush2.msk.msra.mxu0 %vm16857_vm12, %v16313_v53  ;;  %v10738_v48 = vand.u32 4294901760, %v2564_v12  ;;  %v2900_v19 = vand.u32 4294901760, %v2899_v51 }
 0x1c2   :  { %2889 = vmatprep.subr.mxu1 %v2888_v44  ;;  %6815 = vmatprep.subr.msk.mxu0 %vm15875_vm8, %v16313_v53  ;;  %v16861_v39 = vand.u32 4294901760, %v10660_v24  ;;  %vm16862_vm12 = vcmp.eq.s32.totalorder %v16841_v40, %v7605_v11  ;;  %v2929_v44 = vsub.f32 %v10670_v43, %v16863_v37  ;;  %v2918_v12 = vand.u32 4294901760, %v2917_v56 }
 0x1c3   :  { %16858 = vst [vmem:[#allocation141_spill] sm:$0xff] %v10738_v48  ;;  %2895 = vmatpush2.msra.mxu1 %v2894_v8  ;;  %6816 = vmatpush2.msk.msra.mxu0 %vm16862_vm12, %v16313_v53  ;;  %v2906_v9 = vand.u32 4294901760, %v2905_v22  ;;  %v2912_v51 = vand.u32 4294901760, %v2911_v63  ;;  %v16865_v22 = vand.u32 4294901760, %v16860_v21  ;;  %v16867_v27 = vand.u32 4294901760, %v10706_v52 }
 0x1c4   :  { %v2923_v49 = vsub.f32 %v10660_v24, %v16861_v39  ;;  %2560 = vmatprep.mubr.f32.mxu0 %v10728_v17  ;;  %2901 = vmatprep.subr.mxu1 %v2900_v19  ;;  %v16864_v39 = vand.u32 4294901760, %v10684_v5  ;;  %v16868_v19 = vld [vmem:[#allocation43_spill] sm:$0xff]  ;;  %vm16878_vm12 = vcmp.eq.s32.totalorder %v8823_v23, %v7617_v15  ;;  %vm16880_vm8 = vcmp.eq.s32.totalorder %v8823_v23, %v7605_v11 }
 0x1c5   :  { %2566 = vmatmul.mubr.f32.vlgmr.msra.gmra.mxu0 %v10738_v48  ;;  %2907 = vmatpush2.msra.mxu1 %v2906_v9  ;;  %v2941_v40 = vsub.f32 %v16860_v21, %v16865_v22  ;;  %v2947_v63 = vsub.f32 %v10706_v52, %v16867_v27  ;;  %v16869_v48 = vand.u32 4294901760, %v10714_v10  ;;  %v16870_v9 = vld [vmem:[#allocation44_spill] sm:$0xff]  ;;  %v16871_v17 = vld [vmem:[#allocation47_spill] sm:$0xff]  ;;  %vm16882_vm13 = vcmp.eq.s32.totalorder %v8835_v47, %v7617_v15 }
 0x1c6   :  { %v2935_v8 = vsub.f32 %v10684_v5, %v16864_v39  ;;  %2967 = vmatprep.subr.mxu0 %v16866_v57  ;;  %2913 = vmatprep.subr.mxu1 %v2912_v51  ;;  %v2924_v37 = vand.u32 4294901760, %v2923_v49  ;;  %v2930_v39 = vand.u32 4294901760, %v2929_v44  ;;  %v16872_v51 = vld [vmem:[#allocation50_spill] sm:$0xff]  ;;  %v16873_v57 = vld [vmem:[#allocation52_spill] sm:$0xff]  ;;  %v16874_v44 = vld [vmem:[#allocation53_spill] sm:$0xff] }
 0x1c7   :  { %2970 = vmatpush1.msra.mxu0 %v16868_v19  ;;  %2919 = vmatpush2.msra.mxu1 %v2918_v12  ;;  %v2953_v56 = vsub.f32 %v10714_v10, %v16869_v48  ;;  %v2942_v49 = vand.u32 4294901760, %v2941_v40  ;;  %v2948_v27 = vand.u32 4294901760, %v2947_v63  ;;  %v16875_v48 = vld [vmem:[#allocation56_spill] sm:$0xff]  ;;  %v16877_v40 = vld [vmem:[#allocation59_spill] sm:$0xff]  ;;  %v16881_v63 = vld [vmem:[#allocation105_spill] sm:$0xff] }
 0x1c8   :  { %2973 = vmatprep.subr.mxu0 %v16870_v9  ;;  %2925 = vmatprep.subr.mxu1 %v2924_v37  ;;  %v2936_v22 = vand.u32 4294901760, %v2935_v8  ;;  %v16876_v8 = vld [vmem:[#allocation58_spill] sm:$0xff]  ;;  %v16879_v37 = vld [vmem:[#allocation61_spill] sm:$0xff] }
 0x1c9   :  { %2976 = vmatpush1.msra.mxu0 %v16871_v17  ;;  %2931 = vmatpush2.msra.mxu1 %v2930_v39  ;;  %v2954_v12 = vand.u32 4294901760, %v2953_v56  ;;  %v16883_v39 = vld [vmem:[#allocation62_spill] sm:$0xff]  ;;  %v16885_v56 = vld [vmem:[#allocation65_spill] sm:$0xff] }
 0x1ca   :  { %2979 = vmatprep.subr.mxu0 %v16872_v51  ;;  %2937 = vmatprep.subr.mxu1 %v2936_v22  ;;  %v16887_v22 = vld [vmem:[#allocation68_spill] sm:$0xff] }
 0x1cb   :  { %2982 = vmatpush1.msra.mxu0 %v16873_v57  ;;  %2943 = vmatpush2.msra.mxu1 %v2942_v49  ;;  %v16889_v49 = vld [vmem:[#allocation70_spill] sm:$0xff] }
 0x1cc   :  { %2985 = vmatprep.subr.mxu0 %v16874_v44  ;;  %2949 = vmatprep.subr.mxu1 %v2948_v27  ;;  %v16890_v27 = vld [vmem:[#allocation38_spill] sm:$0xff] }
 0x1cd   :  { %2988 = vmatpush1.msra.mxu0 %v16875_v48  ;;  %2955 = vmatpush2.msra.mxu1 %v2954_v12  ;;  %v16892_v12 = vld [vmem:[#allocation73_spill] sm:$0xff] }
 0x1ce   :  { %2991 = vmatprep.subr.mxu0 %v16876_v8  ;;  %2959 = vmatmul.mubr.f32.vlgmr.msra.gmra.mxu1 %v10545_v20  ;;  %v16894_v20 = vld [vmem:[#allocation75_spill] sm:$0xff] }
 0x1cf   :  { %2994 = vmatpush1.msra.mxu0 %v16877_v40  ;;  %6817 = vmatprep.subr.msk.mxu1 %vm16878_vm12, %v16313_v53  ;;  %vm16884_vm12 = vcmp.eq.s32.totalorder %v8835_v47, %v7605_v11 }
 0x1d0   :  { %2997 = vmatprep.subr.mxu0 %v16879_v37  ;;  %6818 = vmatpush1.msk.msra.mxu1 %vm16880_vm8, %v16313_v53  ;;  %vm16886_vm8 = vcmp.eq.s32.totalorder %v16539_v16, %v7617_v15 }
 0x1d1   :  { %3000 = vmatpush1.msra.mxu0 %v16881_v63  ;;  %6819 = vmatprep.subr.msk.mxu1 %vm16882_vm13, %v16313_v53  ;;  %vm16888_vm13 = vcmp.eq.s32.totalorder %v16539_v16, %v7605_v11 }
 0x1d2   :  { %3003 = vmatprep.subr.mxu0 %v16883_v39  ;;  %6820 = vmatpush1.msk.msra.mxu1 %vm16884_vm12, %v16313_v53  ;;  %vm16891_vm12 = vcmp.eq.s32.totalorder %v16890_v27, %v7617_v15 }
 0x1d3   :  { %3006 = vmatpush1.msra.mxu0 %v16885_v56  ;;  %6821 = vmatprep.subr.msk.mxu1 %vm16886_vm8, %v16313_v53  ;;  %vm16893_vm8 = vcmp.eq.s32.totalorder %v16890_v27, %v7605_v11 }
 0x1d4   :  { %3009 = vmatprep.subr.mxu0 %v16887_v22  ;;  %6822 = vmatpush1.msk.msra.mxu1 %vm16888_vm13, %v16313_v53  ;;  %vm16895_vm13 = vcmp.eq.s32.totalorder %v16563_v50, %v7617_v15 }
 0x1d5   :  { %3012 = vmatpush1.msra.mxu0 %v16889_v49  ;;  %6823 = vmatprep.subr.msk.mxu1 %vm16891_vm12, %v16313_v53  ;;  %vm16897_vm12 = vcmp.eq.s32.totalorder %v16563_v50, %v7605_v11 }
 0x1d6   :  { %3015 = vmatprep.subr.mxu0 %v16892_v12  ;;  %6824 = vmatpush1.msk.msra.mxu1 %vm16893_vm8, %v16313_v53  ;;  %v16898_v12 = vld [vmem:[#allocation78_spill] sm:$0xff]  ;;  %vm16899_vm8 = vcmp.eq.s32.totalorder %v16570_v59, %v7617_v15 }
 0x1d7   :  { %3018 = vmatpush1.msra.mxu0 %v16894_v20  ;;  %6825 = vmatprep.subr.msk.mxu1 %vm16895_vm13, %v16313_v53  ;;  %v16900_v20 = vld [vmem:[#allocation79_spill] sm:$0xff]  ;;  %vm16901_vm13 = vcmp.eq.s32.totalorder %v16570_v59, %v7605_v11 }
 0x1d8   :  { %3021 = vmatprep.subr.mxu0 %v16896_v33  ;;  %6826 = vmatpush1.msk.msra.mxu1 %vm16897_vm12, %v16313_v53  ;;  %vm16902_vm12 = vcmp.eq.s32.totalorder %v8925_v58, %v7617_v15 }
 0x1d9   :  { %3024 = vmatpush1.msra.mxu0 %v16898_v12  ;;  %6827 = vmatprep.subr.msk.mxu1 %vm16899_vm8, %v16313_v53  ;;  %v16903_v12 = vld [vmem:[#allocation84_spill] sm:$0xff]  ;;  %vm16904_vm8 = vcmp.eq.s32.totalorder %v8925_v58, %v7605_v11 }
 0x1da   :  { %3027 = vmatprep.subr.mxu0 %v16900_v20  ;;  %6828 = vmatpush1.msk.msra.mxu1 %vm16901_vm13, %v16313_v53  ;;  %vm16905_vm13 = vcmp.eq.s32.totalorder %v8937_v7, %v7617_v15 }
 0x1db   :  { %3030 = vmatpush1.msra.mxu0 %v9692_v3  ;;  %6829 = vmatprep.subr.msk.mxu1 %vm16902_vm12, %v16313_v53  ;;  %v16906_v3 = vld [vmem:[#allocation107_spill] sm:$0xff]  ;;  %vm16907_vm12 = vcmp.eq.s32.totalorder %v8937_v7, %v7605_v11 }
 0x1dc   :  { %3033 = vmatprep.subr.mxu0 %v16903_v12  ;;  %6830 = vmatpush1.msk.msra.mxu1 %vm16904_vm8, %v16313_v53  ;;  %vm16908_vm8 = vcmp.eq.s32.totalorder %v8959_v54, %v7617_v15 }
 0x1dd   :  { %3036 = vmatpush1.msra.mxu0 %v9789_v62  ;;  %6831 = vmatprep.subr.msk.mxu1 %vm16905_vm13, %v16313_v53  ;;  %vm16909_vm13 = vcmp.eq.s32.totalorder %v8959_v54, %v7605_v11  ;;  %v16911_v62 = vld [vmem:[#allocation91_spill] sm:$0xff] }
 0x1de   :  { %3039 = vmatprep.subr.mxu0 %v16906_v3  ;;  %6832 = vmatpush1.msk.msra.mxu1 %vm16907_vm12, %v16313_v53  ;;  %v16910_v3 = vld [vmem:[#allocation109_spill] sm:$0xff]  ;;  %vm16912_vm12 = vcmp.eq.s32.totalorder %v16911_v62, %v7617_v15 }
 0x1df   :  { %3042 = vmatpush1.msra.mxu0 %v9825_v30  ;;  %6833 = vmatprep.subr.msk.mxu1 %vm16908_vm8, %v16313_v53  ;;  %v16913_v30 = vld [vmem:[#allocation110_spill] sm:$0xff]  ;;  %vm16914_vm8 = vcmp.eq.s32.totalorder %v16911_v62, %v7605_v11  ;;  %v16922_v62 = vld [vmem:[#allocation21_spill] sm:$0xff] }
 0x1e0   :  { %3045 = vmatprep.subr.mxu0 %v9861_v13  ;;  %6834 = vmatpush1.msk.msra.mxu1 %vm16909_vm13, %v16313_v53  ;;  %vm16915_vm13 = vcmp.eq.s32.totalorder %v8993_v61, %v7617_v15 }
 0x1e1   :  { %3048 = vmatpush1.msra.mxu0 %v16910_v3  ;;  %6835 = vmatprep.subr.msk.mxu1 %vm16912_vm12, %v16313_v53  ;;  %vm16916_vm12 = vcmp.eq.s32.totalorder %v8993_v61, %v7605_v11 }
 0x1e2   :  { %3051 = vmatprep.subr.mxu0 %v16913_v30  ;;  %6836 = vmatpush1.msk.msra.mxu1 %vm16914_vm8, %v16313_v53  ;;  %v16917_v30 = vld [vmem:[#allocation93_spill] sm:$0xff] }
 0x1e3   :  { %3054 = vmatpush1.msra.mxu0 %v9949_v18  ;;  %6837 = vmatprep.subr.msk.mxu1 %vm16915_vm13, %v16313_v53  ;;  %vm16918_vm8 = vcmp.eq.s32.totalorder %v16917_v30, %v7617_v15  ;;  %v16919_v18 = vld [vmem:[#allocation113_spill] sm:$0xff]  ;;  %vm16920_vm13 = vcmp.eq.s32.totalorder %v16917_v30, %v7605_v11 }
 0x1e4   :  { %3057 = vmatprep.subr.mxu0 %v9975_v41  ;;  %6838 = vmatpush1.msk.msra.mxu1 %vm16916_vm12, %v16313_v53  ;;  %v16921_v41 = vld [vmem:[#allocation114_spill] sm:$0xff]  ;;  %vm16923_vm12 = vcmp.eq.s32.totalorder %v16922_v62, %v7605_v11  ;;  %v16933_v62 = vld [vmem:[#allocation96_spill] sm:$0xff] }
 0x1e5   :  { %3060 = vmatpush1.msra.mxu0 %v9977_v6  ;;  %6839 = vmatprep.subr.msk.mxu1 %vm16918_vm8, %v16313_v53 }
 0x1e6   :  { %3063 = vmatprep.subr.mxu0 %v16919_v18  ;;  %6840 = vmatpush1.msk.msra.mxu1 %vm16920_vm13, %v16313_v53  ;;  %v16924_v18 = vld [vmem:[#allocation94_spill] sm:$0xff] }
 0x1e7   :  { %3066 = vmatpush2.msra.mxu0 %v16921_v41  ;;  %6841 = vmatprep.subr.msk.mxu1 %vm499_vm6, %v16313_v53  ;;  %vm16925_vm8 = vcmp.eq.s32.totalorder %v16924_v18, %v7617_v15  ;;  %vm16926_vm13 = vcmp.eq.s32.totalorder %v16924_v18, %v7605_v11  ;;  %v16928_v41 = vld [vmem:[#allocation95_spill] sm:$0xff]  ;;  %v16938_v18 = vld [vmem:[#allocation97_spill] sm:$0xff] }
 0x1e8   :  { %3069 = vmatprep.subr.mxu0 %v10059_v55  ;;  %6842 = vmatpush1.msk.msra.mxu1 %vm16923_vm12, %v16313_v53  ;;  %v16927_v55 = vld [vmem:[#allocation118_spill] sm:$0xff]  ;;  %vm16929_vm12 = vcmp.eq.s32.totalorder %v16928_v41, %v7617_v15 }
 0x1e9   :  { %3072 = vmatpush2.msra.mxu0 %v10088_v28  ;;  %6843 = vmatprep.subr.msk.mxu1 %vm16925_vm8, %v16313_v53  ;;  %v16930_v28 = vld [vmem:[#allocation119_spill] sm:$0xff]  ;;  %vm16931_vm8 = vcmp.eq.s32.totalorder %v16928_v41, %v7605_v11 }
 0x1ea   :  { %3075 = vmatprep.subr.mxu0 %v10123_v60  ;;  %6844 = vmatpush1.msk.msra.mxu1 %vm16926_vm13, %v16313_v53  ;;  %v16932_v60 = vld [vmem:[#allocation120_spill] sm:$0xff]  ;;  %vm16934_vm13 = vcmp.eq.s32.totalorder %v16933_v62, %v7617_v15 }
 0x1eb   :  { %3078 = vmatpush2.msra.mxu0 %v16927_v55  ;;  %6845 = vmatprep.subr.msk.mxu1 %vm16929_vm12, %v16313_v53  ;;  %v16935_v55 = vld [vmem:[#allocation121_spill] sm:$0xff]  ;;  %vm16936_vm12 = vcmp.eq.s32.totalorder %v16933_v62, %v7605_v11 }
 0x1ec   :  { %3081 = vmatprep.subr.mxu0 %v16930_v28  ;;  %6846 = vmatpush1.msk.msra.mxu1 %vm16931_vm8, %v16313_v53  ;;  %v16937_v28 = vld [vmem:[#allocation122_spill] sm:$0xff]  ;;  %vm16939_vm8 = vcmp.eq.s32.totalorder %v16938_v18, %v7617_v15 }
 0x1ed   :  { %3084 = vmatpush2.msra.mxu0 %v16932_v60  ;;  %6847 = vmatprep.subr.msk.mxu1 %vm16934_vm13, %v16313_v53  ;;  %vm16940_vm13 = vcmp.eq.s32.totalorder %v16938_v18, %v7605_v11 }
 0x1ee   :  { %3087 = vmatprep.subr.mxu0 %v16935_v55  ;;  %6848 = vmatpush1.msk.msra.mxu1 %vm16936_vm12, %v16313_v53  ;;  %v16941_v55 = vld [vmem:[#allocation98_spill] sm:$0xff] }
 0x1ef   :  { %3090 = vmatpush2.msra.mxu0 %v16937_v28  ;;  %6849 = vmatprep.subr.msk.mxu1 %vm16939_vm8, %v16313_v53  ;;  %vm16942_vm12 = vcmp.eq.s32.totalorder %v16941_v55, %v7617_v15  ;;  %vm16943_vm8 = vcmp.eq.s32.totalorder %v16941_v55, %v7605_v11 }
 0x1f0   :  { %3093 = vmatprep.subr.mxu0 %v10265_v36  ;;  %6850 = vmatpush2.msk.msra.mxu1 %vm16940_vm13, %v16313_v53  ;;  %v16944_v36 = vld [vmem:[#allocation99_spill] sm:$0xff] }
 0x1f1   :  { %3096 = vmatpush2.msra.mxu0 %v10279_v26  ;;  %6851 = vmatprep.subr.msk.mxu1 %vm16942_vm12, %v16313_v53  ;;  %vm16945_vm13 = vcmp.eq.s32.totalorder %v16944_v36, %v7617_v15  ;;  %vm16946_vm12 = vcmp.eq.s32.totalorder %v16944_v36, %v7605_v11 }
 0x1f2   :  { %3099 = vmatprep.subr.mxu0 %v10297_v29  ;;  %6852 = vmatpush2.msk.msra.mxu1 %vm16943_vm8, %v16313_v53  ;;  %v16947_v29 = vld [vmem:[#allocation100_spill] sm:$0xff] }
 0x1f3   :  { %3102 = vmatpush2.msra.mxu0 %v10299_v34  ;;  %6853 = vmatprep.subr.msk.mxu1 %vm16945_vm13, %v16313_v53  ;;  %vm16948_vm8 = vcmp.eq.s32.totalorder %v16947_v29, %v7617_v15  ;;  %vm16949_vm13 = vcmp.eq.s32.totalorder %v16947_v29, %v7605_v11  ;;  %v16951_v34 = vld [vmem:[#allocation101_spill] sm:$0xff] }
 0x1f4   :  { %3105 = vmatprep.subr.mxu0 %v10358_v32  ;;  %6854 = vmatpush2.msk.msra.mxu1 %vm16946_vm12, %v16313_v53  ;;  %v16950_v32 = vld [vmem:[#allocation128_spill] sm:$0xff]  ;;  %vm16952_vm12 = vcmp.eq.s32.totalorder %v16951_v34, %v7617_v15 }
 0x1f5   :  { %3108 = vmatpush2.msra.mxu0 %v10360_v14  ;;  %6855 = vmatprep.subr.msk.mxu1 %vm16948_vm8, %v16313_v53  ;;  %vm16953_vm8 = vcmp.eq.s32.totalorder %v16951_v34, %v7605_v11 }
 0x1f6   :  { %3111 = vmatprep.subr.mxu0 %v10431_v42  ;;  %6856 = vmatpush2.msk.msra.mxu1 %vm16949_vm13, %v16313_v53  ;;  %v16954_v42 = vld [vmem:[#allocation102_spill] sm:$0xff] }
 0x1f7   :  { %3114 = vmatpush2.msra.mxu0 %v16950_v32  ;;  %6857 = vmatprep.subr.msk.mxu1 %vm16952_vm12, %v16313_v53  ;;  %vm16955_vm13 = vcmp.eq.s32.totalorder %v16954_v42, %v7617_v15 }
 0x1f8   :  { %3117 = vmatprep.subr.mxu0 %v10444_v0  ;;  %6858 = vmatpush2.msk.msra.mxu1 %vm16953_vm8, %v16313_v53 }
 0x1f9   :  { %3120 = vmatpush2.msra.mxu0 %v10455_v1  ;;  %6859 = vmatprep.subr.msk.mxu1 %vm16955_vm13, %v16313_v53 }
 0x1fa   :  { %3123 = vmatprep.subr.mxu0 %v10507_v4  ;;  %6860 = vmatpush2.msk.msra.mxu1 %vm590_vm0, %v16313_v53  ;;  %v16957_v4 = vld [vmem:[#allocation40_spill] sm:$0xff] }
 0x1fb   :  { %3126 = vmatpush2.msra.mxu0 %v10539_v45  ;;  %6861 = vmatprep.subr.msk.mxu1 %vm587_vm1, %v16313_v53  ;;  %vm16958_vm12 = vcmp.eq.s32.totalorder %v16957_v4, %v7605_v11 }
 0x1fc   :  { %3129 = vmatprep.subr.mxu0 %v10566_v25  ;;  %6862 = vmatpush2.msk.msra.mxu1 %vm586_vm15, %v16313_v53  ;;  %v16959_v25 = vld [vmem:[#allocation46_spill] sm:$0xff] }
 0x1fd   :  { %3132 = vmatpush2.msra.mxu0 %v10583_v35  ;;  %6863 = vmatprep.subr.msk.mxu1 %vm583_vm9, %v16313_v53  ;;  %vm16960_vm8 = vcmp.eq.s32.totalorder %v16959_v25, %v7617_v15  ;;  %vm16961_vm13 = vcmp.eq.s32.totalorder %v16959_v25, %v7605_v11 }
 0x1fe   :  { %3135 = vmatprep.subr.mxu0 %v10594_v46  ;;  %6864 = vmatpush2.msk.msra.mxu1 %vm16958_vm12, %v16313_v53  ;;  %v16962_v46 = vld [vmem:[#allocation49_spill] sm:$0xff] }
 0x1ff   :  { %3138 = vmatpush2.msra.mxu0 %v10608_v31  ;;  %6865 = vmatprep.subr.msk.mxu1 %vm16960_vm8, %v16313_v53  ;;  %vm16963_vm12 = vcmp.eq.s32.totalorder %v16962_v46, %v7605_v11 }
 0x200   :  { %3141 = vmatprep.subr.mxu0 %v10660_v24  ;;  %6866 = vmatpush2.msk.msra.mxu1 %vm16961_vm13, %v16313_v53  ;;  %v16968_v24 = vld [vmem:[#allocation64_spill] sm:$0xff] }
 0x201   :  { %3144 = vmatpush2.msra.mxu0 %v10670_v43  ;;  %6867 = vmatprep.subr.msk.mxu1 %vm575_vm11, %v16313_v53 }
 0x202   :  { %3147 = vmatprep.subr.mxu0 %v10684_v5  ;;  %6868 = vmatpush2.msk.msra.mxu1 %vm16963_vm12, %v16313_v53  ;;  %v16971_v5 = vld [vmem:[#allocation67_spill] sm:$0xff] }
 0x203   :  { %3150 = vmatpush2.msra.mxu0 %v16860_v21  ;;  %6869 = vmatprep.subr.msk.mxu1 %vm571_vm7, %v16313_v53  ;;  %vm16973_vm8 = vcmp.eq.s32.totalorder %v16971_v5, %v7605_v11 }
 0x204   :  { %3153 = vmatprep.subr.mxu0 %v10706_v52  ;;  %6870 = vmatpush2.msk.msra.mxu1 %vm570_vm14, %v16313_v53  ;;  %v16966_v52 = vld [vmem:[#allocation41_spill] sm:$0xff] }
 0x205   :  { %3156 = vmatpush2.msra.mxu0 %v10714_v10  ;;  %3159 = vmatprep.mubr.f32.mxu0 %v10588_v2  ;;  %v16967_v21 = vand.u32 4294901760, %v16966_v52  ;;  %v16969_v2 = vand.u32 4294901760, %v16868_v19  ;;  %v16972_v52 = vand.u32 4294901760, %v16871_v17  ;;  %v16979_v17 = vand.u32 4294901760, %v16874_v44  ;;  %v16980_v19 = vld [vmem:[#allocation106_spill] sm:$0xff]  ;;  %v16986_v44 = vld [vmem:[#allocation137_spill] sm:$0xff] }
 0x206   :  { %6871 = vmatprep.subr.msk.mxu1 %vm567_vm5, %v16313_v53  ;;  %3162 = vmatmul.mubr.f32.vlgmr.msra.gmra.mxu0 %v10600_v38  ;;  %v16970_v38 = vand.u32 4294901760, %v16870_v9  ;;  %v16982_v9 = vand.u32 4294901760, %v16875_v48  ;;  %v16989_v48 = vand.u32 4294901760, %v16879_v37  ;;  %v16995_v37 = vand.u32 4294901760, %v16885_v56  ;;  %v17001_v56 = vld [vmem:[#allocation73_spill] sm:$0xff] }
 0x207   :  { %6872 = vmatpush2.msk.msra.mxu1 %vm566_vm2, %v16313_v53  ;;  %3312 = vmatprep.subr.mxu0 %v16967_v21  ;;  %v16975_v21 = vld [vmem:[#allocation72_spill] sm:$0xff] }
 0x208   :  { %6873 = vmatprep.subr.msk.mxu1 %vm15913_vm3, %v16313_v53  ;;  %3316 = vmatpush1.msra.mxu0 %v16969_v2  ;;  %v16974_v2 = vand.u32 4294901760, %v16872_v51  ;;  %vm16976_vm13 = vcmp.eq.s32.totalorder %v16975_v21, %v7617_v15  ;;  %vm16978_vm12 = vcmp.eq.s32.totalorder %v16975_v21, %v7605_v11  ;;  %v16985_v51 = vand.u32 4294901760, %v16876_v8 }
 0x209   :  { %6874 = vmatpush2.msk.msra.mxu1 %vm15910_vm10, %v16313_v53  ;;  %3320 = vmatprep.subr.mxu0 %v16970_v38  ;;  %v16977_v38 = vand.u32 4294901760, %v16873_v57  ;;  %v16984_v57 = vld [vmem:[#allocation136_spill] sm:$0xff]  ;;  %v16991_v8 = vand.u32 4294901760, %v16881_v63  ;;  %v16997_v63 = vand.u32 4294901760, %v16887_v22  ;;  %v17004_v22 = vld [vmem:[#allocation75_spill] sm:$0xff] }
 0x20a   :  { %6875 = vmatprep.subr.msk.mxu1 %vm15909_vm4, %v16313_v53  ;;  %3324 = vmatpush1.msra.mxu0 %v16972_v52  ;;  %v16987_v52 = vand.u32 4294901760, %v16877_v40  ;;  %v16993_v40 = vand.u32 4294901760, %v16883_v39  ;;  %v16999_v39 = vand.u32 4294901760, %v16889_v49  ;;  %v17007_v49 = vand.u32 4294901760, %v16896_v33  ;;  %v17014_v33 = vld [vmem:[#allocation81_spill] sm:$0xff] }
 0x20b   :  { %6876 = vmatpush2.msk.msra.mxu1 %vm16973_vm8, %v16313_v53  ;;  %3328 = vmatprep.subr.mxu0 %v16974_v2  ;;  %vm16981_vm8 = vcmp.eq.s32.totalorder %v16980_v19, %v7617_v15  ;;  %v17002_v2 = vand.u32 4294901760, %v17001_v56  ;;  %v11223_v56 = vadd.s32 384, %v7605_v11  ;;  %vm17042_vm4 = vcmp.eq.s32.totalorder %v8993_v61, %v7605_v11 }
 0x20c   :  { %6877 = vmatprep.subr.msk.mxu1 %vm16976_vm13, %v16313_v53  ;;  %3332 = vmatpush1.msra.mxu0 %v16977_v38  ;;  %vm16983_vm13 = vcmp.eq.s32.totalorder %v16980_v19, %v7605_v11  ;;  %v17005_v38 = vand.u32 4294901760, %v17004_v22  ;;  %v11232_v22 = vadd.s32 256, %v7605_v11 }
 0x20d   :  { %6878 = vmatpush2.msk.msra.mxu1 %vm16978_vm12, %v16313_v53  ;;  %3336 = vmatprep.subr.mxu0 %v16979_v17  ;;  %vm16988_vm12 = vcmp.eq.s32.totalorder %v8823_v23, %v7617_v15  ;;  %v17009_v17 = vld [vmem:[#allocation78_spill] sm:$0xff] }
 0x20e   :  { %6879 = vmatprep.subr.msk.mxu1 %vm16981_vm8, %v16313_v53  ;;  %3340 = vmatpush1.msra.mxu0 %v16982_v9  ;;  %vm16990_vm8 = vcmp.eq.s32.totalorder %v8823_v23, %v7605_v11  ;;  %v17010_v9 = vand.u32 4294901760, %v17009_v17  ;;  %v17036_v17 = vld [vmem:[#allocation111_spill] sm:$0xff] }
 0x20f   :  { %6880 = vmatpush2.msk.msra.mxu1 %vm16983_vm13, %v16313_v53  ;;  %3299 = vmatprep.mubr.f32.mxu1 %v16984_v57  ;;  %vm16992_vm13 = vcmp.eq.s32.totalorder %v8835_v47, %v7617_v15 }
 0x210   :  { %3344 = vmatprep.subr.mxu0 %v16985_v51  ;;  %3303 = vmatmul.mubr.f32.vlgmr.msra.gmra.mxu1 %v16986_v44  ;;  %v17012_v51 = vand.u32 4294901760, %v16900_v20  ;;  %v17019_v20 = vld [vmem:[#allocation85_spill] sm:$0xff]  ;;  %v17078_v44 = vld [vmem:[#allocation23_spill] sm:$0xff] }
 0x211   :  { %3348 = vmatpush1.msra.mxu0 %v16987_v52  ;;  %6881 = vmatprep.subr.msk.mxu1 %vm16988_vm12, %v16313_v53  ;;  %vm16994_vm12 = vcmp.eq.s32.totalorder %v8835_v47, %v7605_v11  ;;  %v17015_v52 = vand.u32 4294901760, %v17014_v33  ;;  %v17041_v33 = vld [vmem:[#allocation16_spill] sm:$0xff] }
 0x212   :  { %3352 = vmatprep.subr.mxu0 %v16989_v48  ;;  %6882 = vmatpush1.msk.msra.mxu1 %vm16990_vm8, %v16313_v53  ;;  %vm16996_vm8 = vcmp.eq.s32.totalorder %v16539_v16, %v7617_v15  ;;  %v17017_v48 = vand.u32 4294901760, %v16903_v12  ;;  %v17025_v12 = vld [vmem:[#allocation108_spill] sm:$0xff] }
 0x213   :  { %3356 = vmatpush1.msra.mxu0 %v16991_v8  ;;  %6883 = vmatprep.subr.msk.mxu1 %vm16992_vm13, %v16313_v53  ;;  %vm16998_vm13 = vcmp.eq.s32.totalorder %v16539_v16, %v7605_v11  ;;  %v17020_v8 = vand.u32 4294901760, %v17019_v20 }
 0x214   :  { %3360 = vmatprep.subr.mxu0 %v16993_v40  ;;  %6884 = vmatpush1.msk.msra.mxu1 %vm16994_vm12, %v16313_v53  ;;  %vm17000_vm12 = vcmp.eq.s32.totalorder %v16890_v27, %v7617_v15  ;;  %v17022_v40 = vld [vmem:[#allocation107_spill] sm:$0xff] }
 0x215   :  { %3364 = vmatpush1.msra.mxu0 %v16995_v37  ;;  %6885 = vmatprep.subr.msk.mxu1 %vm16996_vm8, %v16313_v53  ;;  %vm17003_vm8 = vcmp.eq.s32.totalorder %v16890_v27, %v7605_v11  ;;  %v17023_v37 = vand.u32 4294901760, %v17022_v40 }
 0x216   :  { %3368 = vmatprep.subr.mxu0 %v16997_v63  ;;  %6886 = vmatpush1.msk.msra.mxu1 %vm16998_vm13, %v16313_v53  ;;  %vm17006_vm13 = vcmp.eq.s32.totalorder %v16563_v50, %v7617_v15  ;;  %v17026_v63 = vand.u32 4294901760, %v17025_v12 }
 0x217   :  { %3372 = vmatpush1.msra.mxu0 %v16999_v39  ;;  %6887 = vmatprep.subr.msk.mxu1 %vm17000_vm12, %v16313_v53  ;;  %vm17008_vm12 = vcmp.eq.s32.totalorder %v16563_v50, %v7605_v11  ;;  %v17028_v39 = vand.u32 4294901760, %v9861_v13  ;;  %v17033_v13 = vld [vmem:[#allocation110_spill] sm:$0xff] }
 0x218   :  { %3376 = vmatprep.subr.mxu0 %v17002_v2  ;;  %6888 = vmatpush1.msk.msra.mxu1 %vm17003_vm8, %v16313_v53  ;;  %vm17011_vm8 = vcmp.eq.s32.totalorder %v16570_v59, %v7617_v15  ;;  %v17030_v2 = vand.u32 4294901760, %v16910_v3  ;;  %v17039_v3 = vld [vmem:[#allocation112_spill] sm:$0xff] }
 0x219   :  { %3380 = vmatpush1.msra.mxu0 %v17005_v38  ;;  %6889 = vmatprep.subr.msk.mxu1 %vm17006_vm13, %v16313_v53  ;;  %vm17013_vm13 = vcmp.eq.s32.totalorder %v16570_v59, %v7605_v11  ;;  %v17031_v38 = vld [vmem:[#allocation91_spill] sm:$0xff]  ;;  %v17130_v59 = vld [vmem:[#allocation132_spill] sm:$0xff] }
 0x21a   :  { %3384 = vmatprep.subr.mxu0 %v17007_v49  ;;  %6890 = vmatpush1.msk.msra.mxu1 %vm17008_vm12, %v16313_v53  ;;  %vm17016_vm12 = vcmp.eq.s32.totalorder %v8925_v58, %v7617_v15  ;;  %v17034_v49 = vand.u32 4294901760, %v17033_v13  ;;  %v17056_v13 = vld [vmem:[#allocation116_spill] sm:$0xff] }
 0x21b   :  { %3388 = vmatpush1.msra.mxu0 %v17010_v9  ;;  %6891 = vmatprep.subr.msk.mxu1 %vm17011_vm8, %v16313_v53  ;;  %vm17018_vm8 = vcmp.eq.s32.totalorder %v8925_v58, %v7605_v11  ;;  %v17037_v9 = vand.u32 4294901760, %v17036_v17  ;;  %v17120_v58 = vand.u32 4294901760, %v10455_v1 }
 0x21c   :  { %3392 = vmatprep.subr.mxu0 %v17012_v51  ;;  %6892 = vmatpush1.msk.msra.mxu1 %vm17013_vm13, %v16313_v53  ;;  %vm17021_vm13 = vcmp.eq.s32.totalorder %v8937_v7, %v7617_v15  ;;  %v17040_v51 = vand.u32 4294901760, %v17039_v3  ;;  %v17058_v3 = vld [vmem:[#allocation17_spill] sm:$0xff] }
 0x21d   :  { %3396 = vmatpush1.msra.mxu0 %v17015_v52  ;;  %6893 = vmatprep.subr.msk.mxu1 %vm17016_vm12, %v16313_v53  ;;  %vm17024_vm12 = vcmp.eq.s32.totalorder %v8937_v7, %v7605_v11  ;;  %v17043_v52 = vand.u32 4294901760, %v9977_v6  ;;  %v17049_v6 = vld [vmem:[#allocation114_spill] sm:$0xff] }
 0x21e   :  { %3400 = vmatprep.subr.mxu0 %v17017_v48  ;;  %6894 = vmatpush1.msk.msra.mxu1 %vm17018_vm8, %v16313_v53  ;;  %vm17027_vm8 = vcmp.eq.s32.totalorder %v8959_v54, %v7617_v15  ;;  %v17045_v48 = vld [vmem:[#allocation113_spill] sm:$0xff]  ;;  %v17050_v40 = vand.u32 4294901760, %v17049_v6 }
 0x21f   :  { %3404 = vmatpush1.msra.mxu0 %v17020_v8  ;;  %6895 = vmatprep.subr.msk.mxu1 %vm17021_vm13, %v16313_v53  ;;  %vm17029_vm13 = vcmp.eq.s32.totalorder %v8959_v54, %v7605_v11  ;;  %v17046_v20 = vand.u32 4294901760, %v17045_v48  ;;  %v17047_v8 = vld [vmem:[#allocation19_spill] sm:$0xff] }
 0x220   :  { %3408 = vmatprep.subr.mxu0 %v17023_v37  ;;  %6896 = vmatpush1.msk.msra.mxu1 %vm17024_vm12, %v16313_v53  ;;  %vm17032_vm12 = vcmp.eq.s32.totalorder %v17031_v38, %v7617_v15  ;;  %vm15911_vm10 = vcmp.eq.s32.totalorder %v17047_v8, %v11223_v56  ;;  %v17051_v37 = vmov 0.0  }
 0x221   :  { %3412 = vmatpush1.msra.mxu0 %v17026_v63  ;;  %6897 = vmatprep.subr.msk.mxu1 %vm17027_vm8, %v16313_v53  ;;  %vm17035_vm8 = vcmp.eq.s32.totalorder %v17031_v38, %v7605_v11  ;;  %v17052_v63 = vld [vmem:[#allocation21_spill] sm:$0xff] }
 0x222   :  { %3416 = vmatprep.subr.mxu0 %v17028_v39  ;;  %6898 = vmatpush1.msk.msra.mxu1 %vm17029_vm13, %v16313_v53  ;;  %vm17038_vm13 = vcmp.eq.s32.totalorder %v8993_v61, %v7617_v15  ;;  %v17053_v39 = vld [vmem:[#allocation115_spill] sm:$0xff]  ;;  %v17101_v61 = vld [vmem:[#allocation25_spill] sm:$0xff] }
 0x223   :  { %3420 = vmatpush1.msra.mxu0 %v17030_v2  ;;  %6899 = vmatprep.subr.msk.mxu1 %vm17032_vm12, %v16313_v53  ;;  %vm15915_vm12 = vcmp.eq.s32.totalorder %v17041_v33, %v11223_v56  ;;  %v17054_v2 = vand.u32 4294901760, %v17053_v39 }
 0x224   :  { %3424 = vmatprep.subr.mxu0 %v17034_v49  ;;  %6900 = vmatpush1.msk.msra.mxu1 %vm17035_vm8, %v16313_v53  ;;  %vm17044_vm8 = vcmp.eq.s32.totalorder %v16917_v30, %v7617_v15  ;;  %v6368_v12 = vsel %vm15915_vm12, 1.0, %v17051_v37  ;;  %v17057_v49 = vand.u32 4294901760, %v17056_v13  ;;  %vm17073_vm12 = vcmp.eq.s32.totalorder %v16933_v62, %v7617_v15 }
 0x225   :  { %3428 = vmatpush1.msra.mxu0 %v17037_v9  ;;  %6901 = vmatprep.subr.msk.mxu1 %vm17038_vm13, %v16313_v53  ;;  %vm15912_vm13 = vcmp.eq.s32.totalorder %v17041_v33, %v11232_v22  ;;  %v6364_v9 = vsel %vm15911_vm10, 1.0, %v17051_v37 }
 0x226   :  { %3432 = vmatprep.subr.mxu0 %v17040_v51  ;;  %6902 = vmatpush1.msk.msra.mxu1 %vm17042_vm4, %v16313_v53  ;;  %vm17048_vm4 = vcmp.eq.s32.totalorder %v16917_v30, %v7605_v11  ;;  %v6367_v17 = vsel %vm15912_vm13, 1.0, %v17051_v37  ;;  %v17059_v51 = vld [vmem:[#allocation94_spill] sm:$0xff]  ;;  %v17111_v30 = vand.u32 4294901760, %v16950_v32 }
 0x227   :  { %3436 = vmatpush1.msra.mxu0 %v17043_v52  ;;  %6903 = vmatprep.subr.msk.mxu1 %vm17044_vm8, %v16313_v53  ;;  %vm15914_vm8 = vcmp.eq.s32.totalorder %v17047_v8, %v11232_v22  ;;  %v17061_v52 = vld [vmem:[#allocation117_spill] sm:$0xff]  ;;  %vm17063_vm10 = vcmp.eq.s32.totalorder %v17059_v51, %v7605_v11 }
 0x228   :  { %3440 = vmatprep.subr.mxu0 %v17046_v20  ;;  %6904 = vmatpush1.msk.msra.mxu1 %vm17048_vm4, %v16313_v53  ;;  %vm17055_vm4 = vcmp.eq.s32.totalorder %v17052_v63, %v7605_v11  ;;  %v17062_v48 = vand.u32 4294901760, %v17061_v52  ;;  %v11310_v20 = vsub.f32 %v6368_v12, %v6368_v12  ;;  %v6363_v6 = vsel %vm15914_vm8, 1.0, %v17051_v37  ;;  %v17068_v12 = vld [vmem:[#allocation119_spill] sm:$0xff] }
 0x229   :  { %3444 = vmatpush2.msra.mxu0 %v17050_v40  ;;  %6905 = vmatprep.subr.msk.mxu1 %vm499_vm6, %v16313_v53  ;;  %vm15993_vm6 = vcmp.eq.s32.totalorder %v17058_v3, %v11223_v56  ;;  %v17064_v40 = vld [vmem:[#allocation118_spill] sm:$0xff]  ;;  %vm17067_vm8 = vcmp.eq.s32.totalorder %v16928_v41, %v7617_v15  ;;  %v17069_v13 = vand.u32 4294901760, %v17068_v12  ;;  %v11336_v52 = vsub.f32 %v6364_v9, %v6364_v9  ;;  %v17074_v9 = vld [vmem:[#allocation121_spill] sm:$0xff] }
 0x22a   :  { %3448 = vmatprep.subr.mxu0 %v17054_v2  ;;  %6906 = vmatpush1.msk.msra.mxu1 %vm17055_vm4, %v16313_v53  ;;  %vm17060_vm4 = vcmp.eq.s32.totalorder %v17059_v51, %v7617_v15  ;;  %v17065_v39 = vand.u32 4294901760, %v17064_v40  ;;  %v17066_v2 = vld [vmem:[#allocation20_spill] sm:$0xff]  ;;  %v17071_v40 = vand.u32 4294901760, %v16932_v60  ;;  %v17075_v12 = vand.u32 4294901760, %v17074_v9 }
 0x22b   :  { %3452 = vmatpush2.msra.mxu0 %v17057_v49  ;;  %6907 = vmatprep.subr.msk.mxu1 %vm17060_vm4, %v16313_v53  ;;  %vm15918_vm4 = vcmp.eq.s32.totalorder %v17058_v3, %v11232_v22  ;;  %vm15916_vm13 = vcmp.eq.s32.totalorder %v17066_v2, %v11223_v56  ;;  %vm15917_vm3 = vcmp.eq.s32.totalorder %v17066_v2, %v11232_v22  ;;  %v17077_v9 = vand.u32 4294901760, %v16937_v28 }
 0x22c   :  { %3456 = vmatprep.subr.mxu0 %v17062_v48  ;;  %6908 = vmatpush1.msk.msra.mxu1 %vm17063_vm10, %v16313_v53  ;;  %v11334_v49 = vsub.f32 %v6367_v17, %v6367_v17  ;;  %v6360_v48 = vsel %vm15993_vm6, 1.0, %v17051_v37  ;;  %vm17070_vm10 = vcmp.eq.s32.totalorder %v16928_v41, %v7605_v11  ;;  %v17072_v17 = vld [vmem:[#allocation22_spill] sm:$0xff]  ;;  %v6356_v60 = vsel %vm15916_vm13, 1.0, %v17051_v37 }
 0x22d   :  { %3460 = vmatpush2.msra.mxu0 %v17065_v39  ;;  %6909 = vmatprep.subr.msk.mxu1 %vm17067_vm8, %v16313_v53  ;;  %v11348_v39 = vsub.f32 %v6363_v6, %v6363_v6  ;;  %vm15995_vm8 = vcmp.eq.s32.totalorder %v17072_v17, %v11223_v56  ;;  %v6355_v6 = vsel %vm15917_vm3, 1.0, %v17051_v37  ;;  %vm15923_vm13 = vcmp.eq.s32.totalorder %v17078_v44, %v11223_v56 }
 0x22e   :  { %3464 = vmatprep.subr.mxu0 %v17069_v13  ;;  %6910 = vmatpush1.msk.msra.mxu1 %vm17070_vm10, %v16313_v53  ;;  %v6359_v13 = vsel %vm15918_vm4, 1.0, %v17051_v37  ;;  %vm15924_vm10 = vcmp.eq.s32.totalorder %v17072_v17, %v11232_v22  ;;  %vm17079_vm3 = vcmp.eq.s32.totalorder %v16938_v18, %v7617_v15  ;;  %v6352_v28 = vsel %vm15995_vm8, 1.0, %v17051_v37 }
 0x22f   :  { %3468 = vmatpush2.msra.mxu0 %v17071_v40  ;;  %6911 = vmatprep.subr.msk.mxu1 %vm17073_vm12, %v16313_v53  ;;  %vm17076_vm12 = vcmp.eq.s32.totalorder %v16933_v62, %v7605_v11  ;;  %v17080_v40 = vld [vmem:[#allocation123_spill] sm:$0xff]  ;;  %vm17082_vm4 = vcmp.eq.s32.totalorder %v16938_v18, %v7605_v11  ;;  %v11405_v62 = vsub.f32 %v6356_v60, %v6356_v60  ;;  %v17100_v63 = vand.u32 4294901760, %v11336_v52 }
 0x230   :  { %3472 = vmatprep.subr.mxu0 %v17075_v12  ;;  %6912 = vmatpush1.msk.msra.mxu1 %vm17076_vm12, %v16313_v53  ;;  %v11377_v12 = vsub.f32 %v6360_v48, %v6360_v48  ;;  %v17081_v57 = vand.u32 4294901760, %v17080_v40  ;;  %vm15930_vm12 = vcmp.eq.s32.totalorder %v17078_v44, %v11232_v22  ;;  %v17083_v40 = vand.u32 4294901760, %v10279_v26 }
 0x231   :  { %3476 = vmatpush2.msra.mxu0 %v17077_v9  ;;  %6913 = vmatprep.subr.msk.mxu1 %vm17079_vm3, %v16313_v53  ;;  %17085 = vst [vmem:[#allocation44_spill] sm:$0xff] %v11405_v62  ;;  %v11407_v41 = vsub.f32 %v6355_v6, %v6355_v6  ;;  %vm17087_vm3 = vcmp.eq.s32.totalorder %v16941_v55, %v7617_v15  ;;  %v17088_v9 = vld [vmem:[#allocation124_spill] sm:$0xff]  ;;  %v6351_v26 = vsel %vm15924_vm10, 1.0, %v17051_v37  ;;  %v6348_v6 = vsel %vm15923_vm13, 1.0, %v17051_v37 }
 0x232   :  { %3480 = vmatprep.subr.mxu0 %v17081_v57  ;;  %6914 = vmatpush2.msk.msra.mxu1 %vm17082_vm4, %v16313_v53  ;;  %v11403_v57 = vsub.f32 %v6359_v13, %v6359_v13  ;;  %v17089_v48 = vand.u32 4294901760, %v17088_v9  ;;  %v17090_v13 = vand.u32 4294901760, %v11310_v20  ;;  %v11436_v18 = vsub.f32 %v6352_v28, %v6352_v28 }
 0x233   :  { %3484 = vmatpush2.msra.mxu0 %v17083_v40  ;;  %17086 = vst [vmem:[#allocation47_spill] sm:$0xff] %v11407_v41  ;;  %6915 = vmatprep.subr.msk.mxu1 %vm17087_vm3, %v16313_v53  ;;  %v17091_v40 = vld [vmem:[#allocation24_spill] sm:$0xff]  ;;  %vm17092_vm3 = vcmp.eq.s32.totalorder %v16941_v55, %v7605_v11  ;;  %vm17096_vm10 = vcmp.eq.s32.totalorder %v16944_v36, %v7617_v15  ;;  %v17097_v55 = vld [vmem:[#allocation126_spill] sm:$0xff]  ;;  %v17099_v28 = vand.u32 4294901760, %v11334_v49  ;;  %v17118_v54 = vand.u32 4294901760, %v11377_v12 }
 0x234   :  { %17084 = vst [vmem:[#allocation43_spill] sm:$0xff] %v11403_v57  ;;  %3488 = vmatprep.subr.mxu0 %v17089_v48  ;;  %v11422_v60 = vsub.f32 %v11310_v20, %v17090_v13  ;;  %vm15942_vm4 = vcmp.eq.s32.totalorder %v17091_v40, %v11223_v56  ;;  %6916 = vmatpush2.msk.msra.mxu1 %vm17092_vm3, %v16313_v53  ;;  %v17093_v48 = vld [vmem:[#allocation125_spill] sm:$0xff]  ;;  %17095 = vst [vmem:[#allocation50_spill] sm:$0xff] %v11436_v18  ;;  %v6347_v13 = vsel %vm15930_vm12, 1.0, %v17051_v37 }
 0x235   :  { %v17094_v9 = vand.u32 4294901760, %v17093_v48  ;;  %vm15933_vm13 = vcmp.eq.s32.totalorder %v17091_v40, %v11232_v22  ;;  %6917 = vmatprep.subr.msk.mxu1 %vm17096_vm10, %v16313_v53  ;;  %v17098_v48 = vand.u32 4294901760, %v17097_v55  ;;  %v11459_v51 = vsub.f32 %v11336_v52, %v17100_v63 }
 0x236   :  { %vm15939_vm3 = vcmp.eq.s32.totalorder %v17101_v61, %v11223_v56  ;;  %vm17102_vm10 = vcmp.eq.s32.totalorder %v16944_v36, %v7605_v11  ;;  %v17103_v55 = vand.u32 4294901760, %v10360_v14  ;;  %v6344_v63 = vsel %vm15942_vm4, 1.0, %v17051_v37  ;;  %v17107_v36 = vld [vmem:[#allocation127_spill] sm:$0xff]  ;;  %v17113_v14 = vld [vmem:[#allocation26_spill] sm:$0xff] }
 0x237   :  { %3492 = vmatpush2.msra.mxu0 %v17094_v9  ;;  %v11454_v9 = vsub.f32 %v11334_v49, %v17099_v28  ;;  %6918 = vmatpush2.msk.msra.mxu1 %vm17102_vm10, %v16313_v53  ;;  %v11472_v28 = vsub.f32 %v6348_v6, %v6348_v6  ;;  %vm17106_vm12 = vcmp.eq.s32.totalorder %v16947_v29, %v7617_v15  ;;  %v17108_v38 = vand.u32 4294901760, %v17107_v36 }
 0x238   :  { %3496 = vmatprep.subr.mxu0 %v17098_v48  ;;  %v11470_v48 = vsub.f32 %v6351_v26, %v6351_v26  ;;  %6919 = vmatprep.subr.msk.mxu1 %vm17106_vm12, %v16313_v53  ;;  %v11486_v26 = vsub.f32 %v6347_v13, %v6347_v13  ;;  %v6343_v6 = vsel %vm15933_vm13, 1.0, %v17051_v37  ;;  %vm17110_vm10 = vcmp.eq.s32.totalorder %v16947_v29, %v7605_v11 }
 0x239   :  { %3500 = vmatpush2.msra.mxu0 %v17103_v55  ;;  %17105 = vst [vmem:[#allocation53_spill] sm:$0xff] %v11472_v28  ;;  %6920 = vmatpush2.msk.msra.mxu1 %vm17110_vm10, %v16313_v53  ;;  %v17112_v36 = vand.u32 4294901760, %v11348_v39  ;;  %v6340_v13 = vsel %vm15939_vm3, 1.0, %v17051_v37  ;;  %vm16027_vm12 = vcmp.eq.s32.totalorder %v17101_v61, %v11232_v22  ;;  %vm16015_vm13 = vcmp.eq.s32.totalorder %v17113_v14, %v11223_v56 }
 0x23a   :  { %17104 = vst [vmem:[#allocation52_spill] sm:$0xff] %v11470_v48  ;;  %3504 = vmatprep.subr.mxu0 %v17108_v38  ;;  %17109 = vst [vmem:[#allocation56_spill] sm:$0xff] %v11486_v26  ;;  %vm17114_vm10 = vcmp.eq.s32.totalorder %v16951_v34, %v7617_v15  ;;  %v11520_v29 = vsub.f32 %v6344_v63, %v6344_v63  ;;  %v11525_v7 = vsub.f32 %v11377_v12, %v17118_v54  ;;  %v17124_v54 = vld [vmem:[#allocation8_spill] sm:$0xff] }
 0x23b   :  { %3508 = vmatpush2.msra.mxu0 %v17111_v30  ;;  %v11502_v38 = vsub.f32 %v11348_v39, %v17112_v36  ;;  %6921 = vmatprep.subr.msk.mxu1 %vm17114_vm10, %v16313_v53  ;;  %v17115_v30 = vld [vmem:[#allocation129_spill] sm:$0xff]  ;;  %vm17119_vm3 = vcmp.eq.s32.totalorder %v16951_v34, %v7605_v11  ;;  %vm16016_vm10 = vcmp.eq.s32.totalorder %v17113_v14, %v11232_v22  ;;  %v17125_v1 = vand.u32 4294901760, %v17124_v54  ;;  %v17136_v54 = vld [vmem:[#allocation134_spill] sm:$0xff] }
 0x23c   :  { %v17116_v32 = vand.u32 4294901760, %v17115_v30  ;;  %17117 = vst [vmem:[#allocation58_spill] sm:$0xff] %v11520_v29  ;;  %6922 = vmatpush2.msk.msra.mxu1 %vm17119_vm3, %v16313_v53  ;;  %v11533_v30 = vsub.f32 %v6343_v6, %v6343_v6  ;;  %vm17123_vm4 = vcmp.eq.s32.totalorder %v16954_v42, %v7617_v15  ;;  %v6339_v6 = vsel %vm16027_vm12, 1.0, %v17051_v37 }
 0x23d   :  { %6923 = vmatprep.subr.msk.mxu1 %vm17123_vm4, %v16313_v53  ;;  %v6336_v55 = vsel %vm16015_vm13, 1.0, %v17051_v37  ;;  %v17131_v42 = vand.u32 4294901760, %v17130_v59  ;;  %v17132_v59 = vand.u32 4294901760, %v10583_v35  ;;  %v17137_v0 = vand.u32 4294901760, %v17136_v54 }
 0x23e   :  { %3512 = vmatprep.subr.mxu0 %v17116_v32  ;;  %17121 = vst [vmem:[#allocation59_spill] sm:$0xff] %v11533_v30  ;;  %v17122_v32 = vand.u32 4294901760, %v11403_v57  ;;  %6924 = vmatpush2.msk.msra.mxu1 %vm590_vm0, %v16313_v53  ;;  %v11598_v34 = vsub.f32 %v6336_v55, %v6336_v55  ;;  %v17140_v54 = vand.u32 4294901760, %v10608_v31  ;;  %v17145_v31 = vld [vmem:[#allocation138_spill] sm:$0xff] }
 0x23f   :  { %3516 = vmatpush2.msra.mxu0 %v17120_v58  ;;  %v11549_v58 = vsub.f32 %v6340_v13, %v6340_v13  ;;  %v17128_v13 = vand.u32 4294901760, %v10539_v45  ;;  %6925 = vmatprep.subr.msk.mxu1 %vm587_vm1, %v16313_v53  ;;  %v11596_v45 = vsub.f32 %v6339_v6, %v6339_v6  ;;  %v17138_v6 = vld [vmem:[#allocation28_spill] sm:$0xff]  ;;  %vm17139_vm1 = vcmp.eq.s32.totalorder %v16957_v4, %v7605_v11  ;;  %v17148_v4 = vld [vmem:[#allocation29_spill] sm:$0xff] }
 0x240   :  { %v11538_v63 = vsub.f32 %v11403_v57, %v17122_v32  ;;  %3520 = vmatprep.subr.mxu0 %v17125_v1  ;;  %v17127_v32 = vand.u32 4294901760, %v11405_v62  ;;  %6926 = vmatpush2.msk.msra.mxu1 %vm586_vm15, %v16313_v53  ;;  %17134 = vst [vmem:[#allocation62_spill] sm:$0xff] %v11598_v34  ;;  %v17135_v1 = vand.u32 4294901760, %v11407_v41  ;;  %vm15954_vm15 = vcmp.eq.s32.totalorder %v17138_v6, %v11223_v56 }
 0x241   :  { %17126 = vst [vmem:[#allocation61_spill] sm:$0xff] %v11549_v58  ;;  %3524 = vmatpush2.msra.mxu0 %v17128_v13  ;;  %v6335_v13 = vsel %vm16016_vm10, 1.0, %v17051_v37  ;;  %17133 = vst [vmem:[#allocation105_spill] sm:$0xff] %v11596_v45  ;;  %6927 = vmatprep.subr.msk.mxu1 %vm583_vm9, %v16313_v53  ;;  %vm17144_vm9 = vcmp.eq.s32.totalorder %v16959_v25, %v7617_v15  ;;  %vm16022_vm3 = vcmp.eq.s32.totalorder %v17138_v6, %v11232_v22 }
 0x242   :  { %v11558_v36 = vsub.f32 %v11405_v62, %v17127_v32  ;;  %v17129_v32 = vld [vmem:[#allocation27_spill] sm:$0xff]  ;;  %3528 = vmatprep.subr.mxu0 %v17131_v42  ;;  %v11603_v50 = vsub.f32 %v11407_v41, %v17135_v1  ;;  %6928 = vmatpush2.msk.msra.mxu1 %vm17139_vm1, %v16313_v53  ;;  %v17143_v42 = vand.u32 4294901760, %v11470_v48  ;;  %vm16023_vm1 = vcmp.eq.s32.totalorder %v17148_v4, %v11223_v56 }
 0x243   :  { %vm16017_vm4 = vcmp.eq.s32.totalorder %v17129_v32, %v11223_v56  ;;  %vm16018_vm0 = vcmp.eq.s32.totalorder %v17129_v32, %v11232_v22  ;;  %3532 = vmatpush2.msra.mxu0 %v17132_v59  ;;  %v17142_v59 = vand.u32 4294901760, %v11436_v18  ;;  %6929 = vmatprep.subr.msk.mxu1 %vm17144_vm9, %v16313_v53  ;;  %vm17149_vm9 = vcmp.eq.s32.totalorder %v16959_v25, %v7605_v11  ;;  %v17152_v25 = vld [vmem:[#allocation139_spill] sm:$0xff] }
 0x244   :  { %3536 = vmatprep.subr.mxu0 %v17137_v0  ;;  %v6332_v55 = vsel %vm16017_vm4, 1.0, %v17051_v37  ;;  %v11625_v0 = vsub.f32 %v6335_v13, %v6335_v13  ;;  %v11635_v27 = vsub.f32 %v11470_v48, %v17143_v42  ;;  %v6331_v1 = vsel %vm16018_vm0, 1.0, %v17051_v37  ;;  %6930 = vmatpush2.msk.msra.mxu1 %vm17149_vm9, %v16313_v53  ;;  %v17172_v41 = vld [vmem:[#allocation131_spill] sm:$0xff] }
 0x245   :  { %3540 = vmatpush2.msra.mxu0 %v17140_v54  ;;  %v11630_v35 = vsub.f32 %v11436_v18, %v17142_v59  ;;  %v17146_v13 = vand.u32 4294901760, %v17145_v31  ;;  %v17147_v54 = vand.u32 4294901760, %v11472_v28  ;;  %v17150_v31 = vand.u32 4294901760, %v10670_v43  ;;  %6931 = vmatprep.subr.msk.mxu1 %vm575_vm11, %v16313_v53 }
 0x246   :  { %17141 = vst [vmem:[#allocation65_spill] sm:$0xff] %v11625_v0  ;;  %v6328_v42 = vsel %vm15954_vm15, 1.0, %v17051_v37  ;;  %v17153_v47 = vand.u32 4294901760, %v17152_v25  ;;  %v17154_v43 = vand.u32 4294901760, %v11486_v26  ;;  %vm15975_vm9 = vcmp.eq.s32.totalorder %v17148_v4, %v11232_v22  ;;  %v17157_v25 = vld [vmem:[#allocation83_spill] sm:$0xff] }
 0x247   :  { %3544 = vmatprep.subr.mxu0 %v17146_v13  ;;  %v11650_v59 = vsub.f32 %v11472_v28, %v17147_v54  ;;  %v11664_v54 = vsub.f32 %v6332_v55, %v6332_v55  ;;  %v17155_v13 = vld [vmem:[#allocation30_spill] sm:$0xff]  ;;  %vm17156_vm11 = vcmp.eq.s32.totalorder %v16962_v46, %v7605_v11  ;;  %v6324_v23 = vsel %vm16023_vm1, 1.0, %v17051_v37 }
 0x248   :  { %3548 = vmatpush2.msra.mxu0 %v17150_v31  ;;  %v11680_v55 = vsub.f32 %v11486_v26, %v17154_v43  ;;  %vm15973_vm15 = vcmp.eq.s32.totalorder %v17155_v13, %v11223_v56  ;;  %6932 = vmatpush2.msk.msra.mxu1 %vm17156_vm11, %v16313_v53  ;;  %v11694_v43 = vsub.f32 %v6331_v1, %v6331_v1  ;;  %v6327_v31 = vsel %vm16022_vm3, 1.0, %v17051_v37  ;;  %v17167_v1 = vld [vmem:[#allocation130_spill] sm:$0xff] }
 0x249   :  { %17151 = vst [vmem:[#allocation68_spill] sm:$0xff] %v11664_v54  ;;  %3552 = vmatprep.subr.mxu0 %v17153_v47  ;;  %v17158_v47 = vand.u32 4294901760, %v17157_v25  ;;  %6933 = vmatprep.subr.msk.mxu1 %vm571_vm7, %v16313_v53  ;;  %v17161_v25 = vld [vmem:[#allocation140_spill] sm:$0xff]  ;;  %v11712_v26 = vsub.f32 %v6328_v42, %v6328_v42  ;;  %v17164_v28 = vand.u32 4294901760, %v11520_v29  ;;  %v17165_v18 = vand.u32 4294901760, %v10714_v10 }
 0x24a   :  { %17159 = vst [vmem:[#allocation70_spill] sm:$0xff] %v11694_v43  ;;  %6934 = vmatpush2.msk.msra.mxu1 %vm570_vm14, %v16313_v53  ;;  %v6323_v42 = vsel %vm15975_vm9, 1.0, %v17051_v37  ;;  %3566 = vmatprep.mubr.f32.mxu0 %v17167_v1  ;;  %v11747_v46 = vsub.f32 %v6324_v23, %v6324_v23  ;;  %vm16033_vm7 = vcmp.eq.s32.totalorder %v17155_v13, %v11232_v22  ;;  %v17173_v23 = vld [vmem:[#allocation31_spill] sm:$0xff] }
 0x24b   :  { %3556 = vmatpush2.msra.mxu0 %v17158_v47  ;;  %v17162_v47 = vand.u32 4294901760, %v17161_v25  ;;  %17163 = vst [vmem:[#allocation76_spill] sm:$0xff] %v11712_v26  ;;  %v11717_v48 = vsub.f32 %v11520_v29, %v17164_v28  ;;  %v17166_v25 = vand.u32 4294901760, %v11533_v30  ;;  %v6320_v28 = vsel %vm15973_vm15, 1.0, %v17051_v37  ;;  %6935 = vmatprep.subr.msk.mxu1 %vm567_vm5, %v16313_v53 }
 0x24c   :  { %17170 = vst [vmem:[#allocation84_spill] sm:$0xff] %v11747_v46  ;;  %6936 = vmatpush2.msk.msra.mxu1 %vm566_vm2, %v16313_v53  ;;  %vm16032_vm5 = vcmp.eq.s32.totalorder %v17173_v23, %v11223_v56  ;;  %vm15984_vm14 = vcmp.eq.s32.totalorder %v17173_v23, %v11232_v22  ;;  %vm17174_vm11 = vcmp.eq.s32.totalorder %v17041_v33, %v11223_v56 }
 0x24d   :  { %3560 = vmatprep.subr.mxu0 %v17162_v47  ;;  %v11728_v47 = vsub.f32 %v11533_v30, %v17166_v25  ;;  %v11745_v25 = vsub.f32 %v6327_v31, %v6327_v31  ;;  %v17171_v30 = vand.u32 4294901760, %v11549_v58  ;;  %vm17175_vm2 = vcmp.eq.s32.totalorder %v16968_v24, %v7617_v15  ;;  %3703 = vmatprep.mubr.f32.mxu1 %v17167_v1 }
 0x24e   :  { %3564 = vmatpush2.msra.mxu0 %v17165_v18  ;;  %6937 = vmatprep.subr.msk.mxu1 %vm17175_vm2, %v16313_v53  ;;  %v11775_v10 = vsub.f32 %v6323_v42, %v6323_v42  ;;  %v11777_v31 = vsub.f32 %v6320_v28, %v6320_v28  ;;  %vm17178_vm15 = vcmp.eq.s32.totalorder %v17041_v33, %v11232_v22  ;;  %v17181_v28 = vld [vmem:[#allocation32_spill] sm:$0xff]  ;;  %v6316_v18 = vsel %vm16032_vm5, 1.0, %v17051_v37 }
 0x24f   :  { %17169 = vst [vmem:[#allocation79_spill] sm:$0xff] %v11745_v25  ;;  %v11752_v29 = vsub.f32 %v11549_v58, %v17171_v30  ;;  %3568 = vmatmul.mubr.f32.vlgmr.msra.gmra.mxu0 %v17172_v41  ;;  %6945 = vmatprep.subr.msk.mxu0 %vm17174_vm11, %v16313_v53  ;;  %vm17179_vm11 = vcmp.eq.s32.totalorder %v16968_v24, %v7605_v11  ;;  %v17180_v30 = vand.u32 4294901760, %v11596_v45  ;;  %v6315_v16 = vsel %vm15984_vm14, 1.0, %v17051_v37  ;;  %v17187_v24 = vld [vmem:[#allocation33_spill] sm:$0xff] }
 0x250   :  { %17176 = vst [vmem:[#allocation109_spill] sm:$0xff] %v11775_v10  ;;  %17177 = vst [vmem:[#allocation120_spill] sm:$0xff] %v11777_v31  ;;  %6946 = vmatpush1.msk.msra.mxu0 %vm17178_vm15, %v16313_v53  ;;  %6938 = vmatpush2.msk.msra.mxu1 %vm17179_vm11, %v16313_v53  ;;  %vm16035_vm2 = vcmp.eq.s32.totalorder %v17181_v28, %v11223_v56  ;;  %vm16036_vm9 = vcmp.eq.s32.totalorder %v17181_v28, %v11232_v22  ;;  %v17186_v58 = vand.u32 4294901760, %v11598_v34 }
 0x251   :  { %v11792_v42 = vsub.f32 %v11596_v45, %v17180_v30  ;;  %vm17182_vm15 = vcmp.eq.s32.totalorder %v17047_v8, %v11223_v56  ;;  %vm17183_vm11 = vcmp.eq.s32.totalorder %v16971_v5, %v7617_v15  ;;  %v6319_v30 = vsel %vm16033_vm7, 1.0, %v17051_v37 }
 0x252   :  { %6947 = vmatprep.subr.msk.mxu0 %vm17182_vm15, %v16313_v53  ;;  %6939 = vmatprep.subr.msk.mxu1 %vm17183_vm11, %v16313_v53  ;;  %vm17184_vm15 = vcmp.eq.s32.totalorder %v17047_v8, %v11232_v22  ;;  %vm17185_vm11 = vcmp.eq.s32.totalorder %v16971_v5, %v7605_v11  ;;  %v11831_v33 = vsub.f32 %v11598_v34, %v17186_v58  ;;  %v17189_v45 = vand.u32 4294901760, %v11625_v0 }
 0x253   :  { %6948 = vmatpush1.msk.msra.mxu0 %vm17184_vm15, %v16313_v53  ;;  %6940 = vmatpush2.msk.msra.mxu1 %vm17185_vm11, %v16313_v53  ;;  %vm15997_vm14 = vcmp.eq.s32.totalorder %v17187_v24, %v11223_v56  ;;  %vm17188_vm15 = vcmp.eq.s32.totalorder %v16975_v21, %v7617_v15  ;;  %v6312_v62 = vsel %vm16035_vm2, 1.0, %v17051_v37  ;;  %v6311_v5 = vsel %vm16036_vm9, 1.0, %v17051_v37 }
 0x254   :  { %6949 = vmatprep.subr.msk.mxu0 %vm15993_vm6, %v16313_v53  ;;  %6941 = vmatprep.subr.msk.mxu1 %vm17188_vm15, %v16313_v53  ;;  %v11847_v58 = vsub.f32 %v11625_v0, %v17189_v45  ;;  %vm17190_vm11 = vcmp.eq.s32.totalorder %v17058_v3, %v11232_v22  ;;  %vm17191_vm15 = vcmp.eq.s32.totalorder %v16975_v21, %v7605_v11  ;;  %v17196_v34 = vand.u32 4294901760, %v11664_v54 }
 0x255   :  { %6950 = vmatpush1.msk.msra.mxu0 %vm17190_vm11, %v16313_v53  ;;  %6942 = vmatpush2.msk.msra.mxu1 %vm17191_vm15, %v16313_v53  ;;  %v11867_v0 = vsub.f32 %v6319_v30, %v6319_v30  ;;  %v11869_v8 = vsub.f32 %v6316_v18, %v6316_v18  ;;  %v11871_v57 = vsub.f32 %v6315_v16, %v6315_v16  ;;  %v6308_v16 = vsel %vm15997_vm14, 1.0, %v17051_v37 }
 0x256   :  { %vm17194_vm6 = vcmp.eq.s32.totalorder %v17066_v2, %v11223_v56  ;;  %vm17195_vm11 = vcmp.eq.s32.totalorder %v16980_v19, %v7617_v15  ;;  %v11884_v45 = vsub.f32 %v11664_v54, %v17196_v34  ;;  %vm17198_vm15 = vcmp.eq.s32.totalorder %v16980_v19, %v7605_v11 }
 0x257   :  { %17192 = vst [vmem:[#allocation122_spill] sm:$0xff] %v11867_v0  ;;  %17193 = vst [vmem:[#allocation128_spill] sm:$0xff] %v11869_v8  ;;  %6951 = vmatprep.subr.msk.mxu0 %vm17194_vm6, %v16313_v53  ;;  %6943 = vmatprep.subr.msk.mxu1 %vm17195_vm11, %v16313_v53  ;;  %vm17197_vm6 = vcmp.eq.s32.totalorder %v17066_v2, %v11232_v22  ;;  %v11901_v34 = vsub.f32 %v6312_v62, %v6312_v62  ;;  %v17200_v21 = vand.u32 4294901760, %v11694_v43 }
 0x258   :  { %6952 = vmatpush1.msk.msra.mxu0 %vm17197_vm6, %v16313_v53  ;;  %6944 = vmatpush2.msk.msra.mxu1 %vm17198_vm15, %v16313_v53  ;;  %v11908_v30 = vsub.f32 %v6311_v5, %v6311_v5  ;;  %v17202_v15 = vand.u32 4294901760, %v11712_v26  ;;  %vm16007_vm11 = vcmp.eq.s32.totalorder %v17187_v24, %v11232_v22  ;;  %v17203_v5 = vld [vmem:[#allocation36_spill] sm:$0xff]  ;;  %vm17204_vm15 = vcmp.eq.s32.totalorder %v17072_v17, %v11232_v22 }
 0x259   :  { %17199 = vst [vmem:[#allocation41_spill] sm:$0xff] %v11901_v34  ;;  %v11906_v18 = vsub.f32 %v11694_v43, %v17200_v21  ;;  %6953 = vmatprep.subr.msk.mxu0 %vm15995_vm8, %v16313_v53  ;;  %vm16006_vm6 = vcmp.eq.s32.totalorder %v17203_v5, %v11223_v56  ;;  %3705 = vmatmul.mubr.f32.vlgmr.msra.gmra.mxu1 %v17172_v41  ;;  %v17206_v1 = vand.u32 4294901760, %v11422_v60  ;;  %v17209_v11 = vand.u32 4294901760, %v11747_v46  ;;  %v17210_v60 = vld [vmem:[#allocation39_spill] sm:$0xff] }
 0x25a   :  { %17201 = vst [vmem:[#allocation73_spill] sm:$0xff] %v11908_v30  ;;  %v11919_v62 = vsub.f32 %v11712_v26, %v17202_v15  ;;  %6954 = vmatpush1.msk.msra.mxu0 %vm17204_vm15, %v16313_v53  ;;  %v11930_v21 = vsub.f32 %v6308_v16, %v6308_v16  ;;  %vm16042_vm8 = vcmp.eq.s32.totalorder %v17203_v5, %v11232_v22  ;;  %v17208_v16 = vand.u32 4294901760, %v11745_v25 }
 0x25b   :  { %3861 = vmatprep.subr.mxu1 %v17206_v1  ;;  %vm17207_vm14 = vcmp.eq.s32.totalorder %v17078_v44, %v11223_v56  ;;  %v11951_v26 = vsub.f32 %v11747_v46, %v17209_v11  ;;  %vm481_vm15 = vcmp.eq.s32.totalorder %v17210_v60, %v11223_v56  ;;  %v17211_v1 = vand.u32 4294901760, %v11454_v9 }
 0x25c   :  { %17205 = vst [vmem:[#allocation75_spill] sm:$0xff] %v11930_v21  ;;  %6955 = vmatprep.subr.msk.mxu0 %vm17207_vm14, %v16313_v53  ;;  %v11946_v19 = vsub.f32 %v11745_v25, %v17208_v16  ;;  %vm17212_vm14 = vcmp.eq.s32.totalorder %v17078_v44, %v11232_v22  ;;  %v6307_v16 = vsel %vm16007_vm11, 1.0, %v17051_v37  ;;  %v6432_v11 = vsel %vm16006_vm6, 1.0, %v17051_v37 }
 0x25d   :  { %3867 = vmatpush1.msra.mxu1 %v17211_v1  ;;  %6956 = vmatpush1.msk.msra.mxu0 %vm17212_vm14, %v16313_v53  ;;  %v17213_v1 = vand.u32 4294901760, %v11459_v51  ;;  %vm17214_vm14 = vcmp.eq.s32.totalorder %v17091_v40, %v11223_v56  ;;  %v6431_v25 = vsel %vm16042_vm8, 1.0, %v17051_v37  ;;  %vm16045_vm6 = vcmp.eq.s32.totalorder %v17210_v60, %v11232_v22 }
 0x25e   :  { %6957 = vmatprep.subr.msk.mxu0 %vm17214_vm14, %v16313_v53  ;;  %v17215_v51 = vand.u32 4294901760, %v11502_v38  ;;  %vm17216_vm11 = vcmp.eq.s32.totalorder %v17091_v40, %v11232_v22  ;;  %v17218_v15 = vand.u32 4294901760, %v11777_v31  ;;  %v6428_v38 = vsel %vm481_vm15, 1.0, %v17051_v37 }
 0x25f   :  { %3873 = vmatprep.subr.mxu1 %v17213_v1  ;;  %6958 = vmatpush1.msk.msra.mxu0 %vm17216_vm11, %v16313_v53  ;;  %v17217_v1 = vand.u32 4294901760, %v11775_v10  ;;  %v17220_v41 = vand.u32 4294901760, %v11525_v7  ;;  %vm17221_vm11 = vcmp.eq.s32.totalorder %v17101_v61, %v11223_v56  ;;  %v17223_v40 = vand.u32 4294901760, %v11538_v63 }
 0x260   :  { %3879 = vmatpush1.msra.mxu1 %v17215_v51  ;;  %v11999_v9 = vsub.f32 %v11777_v31, %v17218_v15  ;;  %v17219_v51 = vld [vmem:[#allocation42_spill] sm:$0xff]  ;;  %6959 = vmatprep.subr.msk.mxu0 %vm17221_vm11, %v16313_v53  ;;  %v12014_v15 = vsub.f32 %v6307_v16, %v6307_v16  ;;  %v17224_v7 = vand.u32 4294901760, %v11867_v0  ;;  %v6427_v16 = vsel %vm16045_vm6, 1.0, %v17051_v37 }
 0x261   :  { %v11994_v46 = vsub.f32 %v11775_v10, %v17217_v1  ;;  %vm477_vm14 = vcmp.eq.s32.totalorder %v17219_v51, %v11223_v56  ;;  %3885 = vmatprep.subr.mxu1 %v17220_v41  ;;  %v12017_v10 = vsub.f32 %v6432_v11, %v6432_v11  ;;  %6960 = vmatpush1.msk.msra.mxu0 %vm16027_vm12, %v16313_v53  ;;  %v17225_v11 = vand.u32 4294901760, %v11869_v8 }
 0x262   :  { %3891 = vmatpush1.msra.mxu1 %v17223_v40  ;;  %v12028_v41 = vsub.f32 %v11867_v0, %v17224_v7  ;;  %v17226_v31 = vand.u32 4294901760, %v11558_v36  ;;  %6961 = vmatprep.subr.msk.mxu0 %vm16015_vm13, %v16313_v53  ;;  %v12046_v7 = vsub.f32 %v6431_v25, %v6431_v25  ;;  %v12048_v1 = vsub.f32 %v6428_v38, %v6428_v38 }
 0x263   :  { %17222 = vst [vmem:[#allocation78_spill] sm:$0xff] %v12017_v10  ;;  %v12037_v63 = vsub.f32 %v11869_v8, %v17225_v11  ;;  %v6424_v11 = vsel %vm477_vm14, 1.0, %v17051_v37  ;;  %v17229_v40 = vand.u32 4294901760, %v11603_v50  ;;  %6962 = vmatpush1.msk.msra.mxu0 %vm16016_vm10, %v16313_v53  ;;  %vm16046_vm11 = vcmp.eq.s32.totalorder %v17219_v51, %v11232_v22 }
 0x264   :  { %3897 = vmatprep.subr.mxu1 %v17226_v31  ;;  %17227 = vst [vmem:[#allocation81_spill] sm:$0xff] %v12046_v7  ;;  %17228 = vst [vmem:[#allocation85_spill] sm:$0xff] %v12048_v1  ;;  %v17230_v31 = vld [vmem:[#allocation45_spill] sm:$0xff]  ;;  %v17231_v38 = vand.u32 4294901760, %v11630_v35  ;;  %6963 = vmatprep.subr.msk.mxu0 %vm16017_vm4, %v16313_v53  ;;  %v12073_v50 = vsub.f32 %v6427_v16, %v6427_v16  ;;  %v17232_v36 = vand.u32 4294901760, %v11635_v27  ;;  %v17235_v25 = vand.u32 4294901760, %v11650_v59 }
 0x265   :  { %3903 = vmatpush1.msra.mxu1 %v17229_v40  ;;  %vm16058_vm13 = vcmp.eq.s32.totalorder %v17230_v31, %v11223_v56  ;;  %vm16052_vm10 = vcmp.eq.s32.totalorder %v17230_v31, %v11232_v22  ;;  %6964 = vmatpush1.msk.msra.mxu0 %vm16018_vm0, %v16313_v53  ;;  %v17234_v40 = vand.u32 4294901760, %v11871_v57  ;;  %vm17236_vm4 = vcmp.eq.s32.totalorder %v17138_v6, %v11223_v56  ;;  %v17243_v35 = vld [vmem:[#allocation51_spill] sm:$0xff] }
 0x266   :  { %3909 = vmatprep.subr.mxu1 %v17231_v38  ;;  %v12087_v38 = vsub.f32 %v6424_v11, %v6424_v11  ;;  %6965 = vmatprep.subr.msk.mxu0 %vm17236_vm4, %v16313_v53  ;;  %v6423_v27 = vsel %vm16046_vm11, 1.0, %v17051_v37  ;;  %v17237_v11 = vand.u32 4294901760, %v11901_v34  ;;  %v6420_v59 = vsel %vm16058_vm13, 1.0, %v17051_v37 }
 0x267   :  { %3915 = vmatpush1.msra.mxu1 %v17232_v36  ;;  %v12092_v8 = vsub.f32 %v11871_v57, %v17234_v40  ;;  %v17239_v40 = vand.u32 4294901760, %v11680_v55  ;;  %6966 = vmatpush1.msk.msra.mxu0 %vm16022_vm3, %v16313_v53  ;;  %v17240_v55 = vand.u32 4294901760, %v11717_v48  ;;  %v17242_v16 = vand.u32 4294901760, %v11930_v21 }
 0x268   :  { %17233 = vst [vmem:[#allocation107_spill] sm:$0xff] %v12087_v38  ;;  %3921 = vmatprep.subr.mxu1 %v17235_v25  ;;  %v12107_v36 = vsub.f32 %v11901_v34, %v17237_v11  ;;  %v17238_v25 = vld [vmem:[#allocation48_spill] sm:$0xff]  ;;  %v6419_v11 = vsel %vm16052_vm10, 1.0, %v17051_v37  ;;  %6967 = vmatprep.subr.msk.mxu0 %vm16023_vm1, %v16313_v53  ;;  %vm16054_vm3 = vcmp.eq.s32.totalorder %v17243_v35, %v11223_v56  ;;  %v17248_v48 = vand.u32 4294901760, %v11752_v29 }
 0x269   :  { %vm16051_vm0 = vcmp.eq.s32.totalorder %v17238_v25, %v11223_v56  ;;  %3927 = vmatpush1.msra.mxu1 %v17239_v40  ;;  %vm16053_vm4 = vcmp.eq.s32.totalorder %v17238_v25, %v11232_v22  ;;  %v17241_v40 = vand.u32 4294901760, %v11908_v30  ;;  %v12143_v34 = vsub.f32 %v11930_v21, %v17242_v16 }
 0x26a   :  { %3933 = vmatprep.subr.mxu1 %v17240_v55  ;;  %v17244_v55 = vand.u32 4294901760, %v11728_v47  ;;  %vm17245_vm1 = vcmp.eq.s32.totalorder %v17148_v4, %v11232_v22  ;;  %v12157_v32 = vsub.f32 %v6420_v59, %v6420_v59  ;;  %v6416_v16 = vsel %vm16051_vm0, 1.0, %v17051_v37 }
 0x26b   :  { %v12138_v6 = vsub.f32 %v11908_v30, %v17241_v40  ;;  %6968 = vmatpush1.msk.msra.mxu0 %vm17245_vm1, %v16313_v53  ;;  %v12155_v30 = vsub.f32 %v6423_v27, %v6423_v27  ;;  %vm17249_vm12 = vcmp.eq.s32.totalorder %v17155_v13, %v11223_v56  ;;  %v6415_v27 = vsel %vm16053_vm4, 1.0, %v17051_v37 }
 0x26c   :  { %3939 = vmatpush1.msra.mxu1 %v17244_v55  ;;  %17247 = vst [vmem:[#allocation110_spill] sm:$0xff] %v12157_v32  ;;  %6969 = vmatprep.subr.msk.mxu0 %vm17249_vm12, %v16313_v53  ;;  %v12170_v55 = vsub.f32 %v6419_v11, %v6419_v11  ;;  %vm16055_vm1 = vcmp.eq.s32.totalorder %v17243_v35, %v11232_v22  ;;  %v17250_v29 = vand.u32 4294901760, %v11792_v42  ;;  %v17251_v59 = vand.u32 4294901760, %v12014_v15 }
 0x26d   :  { %17246 = vst [vmem:[#allocation108_spill] sm:$0xff] %v12155_v30  ;;  %3945 = vmatprep.subr.mxu1 %v17248_v48  ;;  %6970 = vmatpush1.msk.msra.mxu0 %vm16033_vm7, %v16313_v53  ;;  %v17252_v48 = vand.u32 4294901760, %v12017_v10  ;;  %v6412_v42 = vsel %vm16054_vm3, 1.0, %v17051_v37  ;;  %v17253_v40 = vand.u32 4294901760, %v11831_v33  ;;  %v12207_v13 = vsub.f32 %v6416_v16, %v6416_v16 }
 0x26e   :  { %3951 = vmatpush1.msra.mxu1 %v17250_v29  ;;  %v12187_v11 = vsub.f32 %v12014_v15, %v17251_v59  ;;  %6971 = vmatprep.subr.msk.mxu0 %vm16032_vm5, %v16313_v53  ;;  %v17256_v29 = vand.u32 4294901760, %v11847_v58  ;;  %vm17257_vm12 = vcmp.eq.s32.totalorder %v17173_v23, %v11232_v22  ;;  %v6411_v33 = vsel %vm16055_vm1, 1.0, %v17051_v37  ;;  %v17262_v59 = vld [vmem:[#allocation57_spill] sm:$0xff] }
 0x26f   :  { %v12192_v47 = vsub.f32 %v12017_v10, %v17252_v48  ;;  %3957 = vmatprep.subr.mxu1 %v17253_v40  ;;  %17254 = vst [vmem:[#allocation111_spill] sm:$0xff] %v12207_v13  ;;  %v17255_v10 = vand.u32 4294901760, %v12046_v7  ;;  %6972 = vmatpush1.msk.msra.mxu0 %vm17257_vm12, %v16313_v53  ;;  %v17258_v40 = vld [vmem:[#allocation54_spill] sm:$0xff]  ;;  %v12235_v58 = vsub.f32 %v6415_v27, %v6415_v27  ;;  %v17263_v16 = vand.u32 4294901760, %v11906_v18 }
 0x270   :  { %3963 = vmatpush1.msra.mxu1 %v17256_v29  ;;  %vm16057_vm5 = vcmp.eq.s32.totalorder %v17258_v40, %v11223_v56  ;;  %vm16037_vm7 = vcmp.eq.s32.totalorder %v17258_v40, %v11232_v22  ;;  %6973 = vmatprep.subr.msk.mxu0 %vm16035_vm2, %v16313_v53  ;;  %v12237_v29 = vsub.f32 %v6412_v42, %v6412_v42  ;;  %v17264_v42 = vand.u32 4294901760, %v12048_v1 }
 0x271   :  { %v12212_v4 = vsub.f32 %v12046_v7, %v17255_v10  ;;  %v17259_v10 = vand.u32 4294901760, %v11884_v45  ;;  %17260 = vst [vmem:[#allocation112_spill] sm:$0xff] %v12235_v58  ;;  %vm457_vm12 = vcmp.eq.s32.totalorder %v17262_v59, %v11223_v56  ;;  %6974 = vmatpush1.msk.msra.mxu0 %vm16036_vm9, %v16313_v53  ;;  %v17265_v23 = vand.u32 4294901760, %v11919_v62 }
 0x272   :  { %17261 = vst [vmem:[#allocation113_spill] sm:$0xff] %v12237_v29  ;;  %vm17266_vm2 = vcmp.eq.s32.totalorder %v17187_v24, %v11223_v56  ;;  %v12262_v18 = vsub.f32 %v6411_v33, %v6411_v33  ;;  %v17269_v27 = vand.u32 4294901760, %v12073_v50  ;;  %v6404_v62 = vsel %vm457_vm12, 1.0, %v17051_v37  ;;  %v17273_v33 = vld [vmem:[#allocation60_spill] sm:$0xff] }
 0x273   :  { %3969 = vmatprep.subr.mxu1 %v17259_v10  ;;  %v12253_v10 = vsub.f32 %v12048_v1, %v17264_v42  ;;  %6975 = vmatprep.subr.msk.mxu0 %vm17266_vm2, %v16313_v53  ;;  %v6407_v42 = vsel %vm16037_vm7, 1.0, %v17051_v37  ;;  %vm17268_vm2 = vcmp.eq.s32.totalorder %v17187_v24, %v11232_v22  ;;  %vm456_vm9 = vcmp.eq.s32.totalorder %v17262_v59, %v11232_v22 }
 0x274   :  { %3975 = vmatpush1.msra.mxu1 %v17263_v16  ;;  %v6408_v16 = vsel %vm16057_vm5, 1.0, %v17051_v37  ;;  %6976 = vmatpush1.msk.msra.mxu0 %vm17268_vm2, %v16313_v53  ;;  %v12283_v45 = vsub.f32 %v12073_v50, %v17269_v27  ;;  %vm17271_vm2 = vcmp.eq.s32.totalorder %v17203_v5, %v11223_v56  ;;  %vm453_vm7 = vcmp.eq.s32.totalorder %v17273_v33, %v11223_v56 }
 0x275   :  { %3981 = vmatprep.subr.mxu1 %v17265_v23  ;;  %v17267_v23 = vand.u32 4294901760, %v11946_v19  ;;  %v17270_v19 = vand.u32 4294901760, %v11951_v26  ;;  %6977 = vmatprep.subr.msk.mxu0 %vm17271_vm2, %v16313_v53  ;;  %v17274_v26 = vand.u32 4294901760, %v11994_v46  ;;  %v12313_v28 = vsub.f32 %v6408_v16, %v6408_v16 }
 0x276   :  { %6978 = vmatpush2.msk.msra.mxu0 %vm16042_vm8, %v16313_v53  ;;  %v17278_v24 = vand.u32 4294901760, %v11999_v9  ;;  %v6403_v46 = vsel %vm456_vm9, 1.0, %v17051_v37  ;;  %v17279_v16 = vand.u32 4294901760, %v12157_v32  ;;  %vm16066_vm2 = vcmp.eq.s32.totalorder %v17273_v33, %v11232_v22 }
 0x277   :  { %3987 = vmatpush1.msra.mxu1 %v17267_v23  ;;  %v17272_v23 = vand.u32 4294901760, %v12087_v38  ;;  %17275 = vst [vmem:[#allocation114_spill] sm:$0xff] %v12313_v28  ;;  %6979 = vmatprep.subr.msk.mxu0 %vm481_vm15, %v16313_v53  ;;  %v17281_v9 = vand.u32 4294901760, %v12028_v41  ;;  %v17283_v5 = vand.u32 4294901760, %v12037_v63  ;;  %v17290_v51 = vand.u32 4294901760, %v12138_v6 }
 0x278   :  { %3993 = vmatprep.subr.mxu1 %v17270_v19  ;;  %6980 = vmatpush2.msk.msra.mxu0 %vm16045_vm6, %v16313_v53  ;;  %v17289_v19 = vld [vmem:[#allocation66_spill] sm:$0xff]  ;;  %v16056_v6 = vand.u32 4294901760, %v12313_v28 }
 0x279   :  { %v12300_v27 = vsub.f32 %v12087_v38, %v17272_v23  ;;  %3999 = vmatpush1.msra.mxu1 %v17274_v26  ;;  %v12315_v23 = vsub.f32 %v6407_v42, %v6407_v42  ;;  %v17277_v38 = vand.u32 4294901760, %v12155_v30  ;;  %v12335_v42 = vsub.f32 %v12157_v32, %v17279_v16  ;;  %6981 = vmatprep.subr.msk.mxu0 %vm477_vm14, %v16313_v53 }
 0x27a   :  { %4005 = vmatprep.subr.mxu1 %v17278_v24  ;;  %v17280_v24 = vld [vmem:[#allocation63_spill] sm:$0xff]  ;;  %v12348_v26 = vsub.f32 %v6404_v62, %v6404_v62  ;;  %v6400_v16 = vsel %vm453_vm7, 1.0, %v17051_v37  ;;  %6982 = vmatpush2.msk.msra.mxu0 %vm16046_vm11, %v16313_v53  ;;  %vm16069_vm11 = vcmp.eq.s32.totalorder %v17289_v19, %v11223_v56 }
 0x27b   :  { %17276 = vst [vmem:[#allocation115_spill] sm:$0xff] %v12315_v23  ;;  %v12320_v48 = vsub.f32 %v12155_v30, %v17277_v38  ;;  %vm16067_vm8 = vcmp.eq.s32.totalorder %v17280_v24, %v11223_v56  ;;  %4011 = vmatpush1.msra.mxu1 %v17281_v9  ;;  %v4070_v38 = vand.u32 4294901760, %v12283_v45  ;;  %v4076_v41 = vand.u32 4294901760, %v12300_v27  ;;  %6983 = vmatprep.subr.msk.mxu0 %vm16058_vm13, %v16313_v53 }
 0x27c   :  { %17282 = vst [vmem:[#allocation116_spill] sm:$0xff] %v12348_v26  ;;  %4017 = vmatprep.subr.mxu1 %v17283_v5  ;;  %v17284_v45 = vand.u32 4294901760, %v12170_v55  ;;  %v17285_v9 = vand.u32 4294901760, %v12207_v13  ;;  %vm16068_vm6 = vcmp.eq.s32.totalorder %v17280_v24, %v11232_v22  ;;  %v17286_v5 = vand.u32 4294901760, %v12092_v8  ;;  %6984 = vmatpush2.msk.msra.mxu0 %vm16052_vm10, %v16313_v53 }
 0x27d   :  { %v4082_v63 = vand.u32 4294901760, %v12320_v48  ;;  %v12381_v27 = vsub.f32 %v6403_v46, %v6403_v46  ;;  %v6396_v8 = vsel %vm16067_vm8, 1.0, %v17051_v37  ;;  %v4088_v48 = vand.u32 4294901760, %v12335_v42  ;;  %6985 = vmatprep.subr.msk.mxu0 %vm16051_vm0, %v16313_v53 }
 0x27e   :  { %v12365_v62 = vsub.f32 %v12170_v55, %v17284_v45  ;;  %v12370_v60 = vsub.f32 %v12207_v13, %v17285_v9  ;;  %4023 = vmatpush1.msra.mxu1 %v17286_v5  ;;  %v6399_v45 = vsel %vm16066_vm2, 1.0, %v17051_v37  ;;  %v17287_v9 = vand.u32 4294901760, %v12107_v36  ;;  %6986 = vmatpush2.msk.msra.mxu0 %vm16053_vm4, %v16313_v53 }
 0x27f   :  { %v12398_v46 = vsub.f32 %v6400_v16, %v6400_v16  ;;  %v17291_v36 = vand.u32 4294901760, %v12235_v58  ;;  %v6395_v42 = vsel %vm16068_vm6, 1.0, %v17051_v37  ;;  %v12427_v5 = vsub.f32 %v6399_v45, %v6399_v45  ;;  %6987 = vmatprep.subr.msk.mxu0 %vm16054_vm3, %v16313_v53 }
 0x280   :  { %4029 = vmatprep.subr.mxu1 %v17287_v9  ;;  %v4100_v31 = vand.u32 4294901760, %v12370_v60  ;;  %v17294_v16 = vand.u32 4294901760, %v12187_v11  ;;  %vm444_vm0 = vcmp.eq.s32.totalorder %v17289_v19, %v11232_v22  ;;  %v17295_v60 = vld [vmem:[#allocation69_spill] sm:$0xff]  ;;  %v17296_v11 = vand.u32 4294901760, %v12192_v47  ;;  %6988 = vmatpush2.msk.msra.mxu0 %vm16055_vm1, %v16313_v53 }
 0x281   :  { %17288 = vst [vmem:[#allocation17_spill] sm:$0xff] %v12398_v46  ;;  %4035 = vmatpush1.msra.mxu1 %v17290_v51  ;;  %v12412_v9 = vsub.f32 %v12235_v58, %v17291_v36  ;;  %v17292_v51 = vand.u32 4294901760, %v12143_v34  ;;  %v4094_v36 = vand.u32 4294901760, %v12365_v62  ;;  %v12430_v58 = vsub.f32 %v6396_v8, %v6396_v8  ;;  %6989 = vmatprep.subr.msk.mxu0 %vm16057_vm5, %v16313_v53 }
 0x282   :  { %v6392_v34 = vsel %vm16069_vm11, 1.0, %v17051_v37  ;;  %vm441_vm10 = vcmp.eq.s32.totalorder %v17295_v60, %v11223_v56  ;;  %v12453_v45 = vsub.f32 %v6395_v42, %v6395_v42  ;;  %v17297_v8 = vand.u32 4294901760, %v12237_v29 }
 0x283   :  { %4041 = vmatprep.subr.mxu1 %v17292_v51  ;;  %17293 = vst [vmem:[#allocation117_spill] sm:$0xff] %v12430_v58  ;;  %vm440_vm4 = vcmp.eq.s32.totalorder %v17295_v60, %v11232_v22  ;;  %v17298_v62 = vand.u32 4294901760, %v12212_v4  ;;  %v4106_v47 = vand.u32 4294901760, %v12412_v9  ;;  %v17299_v42 = vand.u32 4294901760, %v12262_v18  ;;  %v17300_v51 = vld [vmem:[#allocation71_spill] sm:$0xff] }
 0x284   :  { %4047 = vmatpush1.msra.mxu1 %v17294_v16  ;;  %v4111_v16 = vsub.f32 %v12237_v29, %v17297_v8  ;;  %v4123_v8 = vsub.f32 %v12313_v28, %v16056_v6  ;;  %vm16116_vm3 = vcmp.eq.s32.totalorder %v17300_v51, %v11223_v56  ;;  %v17301_v4 = vand.u32 4294901760, %v12253_v10  ;;  %v17305_v10 = vld [vmem:[#allocation74_spill] sm:$0xff] }
 0x285   :  { %4053 = vmatprep.subr.mxu1 %v17296_v11  ;;  %v4117_v11 = vsub.f32 %v12262_v18, %v17299_v42  ;;  %v12482_v9 = vsub.f32 %v6392_v34, %v6392_v34  ;;  %v6388_v42 = vsel %vm441_vm10, 1.0, %v17051_v37  ;;  %vm17303_vm1 = vcmp.eq.s32.totalorder %v17258_v40, %v11232_v22 }
 0x286   :  { %4059 = vmatpush2.msra.mxu1 %v17298_v62  ;;  %v6391_v62 = vsel %vm444_vm0, 1.0, %v17051_v37  ;;  %6990 = vmatpush2.msk.msra.mxu0 %vm17303_vm1, %v16313_v53  ;;  %v17304_v34 = vand.u32 4294901760, %v12315_v23  ;;  %v6387_v6 = vsel %vm440_vm4, 1.0, %v17051_v37  ;;  %vm16111_vm5 = vcmp.eq.s32.totalorder %v17300_v51, %v11232_v22 }
 0x287   :  { %4065 = vmatprep.subr.mxu1 %v17301_v4  ;;  %17302 = vst [vmem:[#allocation118_spill] sm:$0xff] %v12482_v9  ;;  %vm16110_vm13 = vcmp.eq.s32.totalorder %v17305_v10, %v11223_v56  ;;  %6991 = vmatprep.subr.msk.mxu0 %vm457_vm12, %v16313_v53  ;;  %v6384_v35 = vsel %vm16116_vm3, 1.0, %v17051_v37  ;;  %v12526_v28 = vsub.f32 %v6388_v42, %v6388_v42  ;;  %v17310_v42 = vand.u32 4294901760, %v12398_v46 }
 0x288   :  { %4071 = vmatpush2.msra.mxu1 %v4070_v38  ;;  %v4129_v4 = vsub.f32 %v12315_v23, %v17304_v34  ;;  %v4112_v38 = vand.u32 4294901760, %v4111_v16  ;;  %v17306_v34 = vand.u32 4294901760, %v12348_v26  ;;  %6992 = vmatpush2.msk.msra.mxu0 %vm456_vm9, %v16313_v53  ;;  %v12524_v23 = vsub.f32 %v6391_v62, %v6391_v62 }
 0x289   :  { %4077 = vmatprep.subr.mxu1 %v4076_v41  ;;  %v4118_v41 = vand.u32 4294901760, %v4117_v11  ;;  %v4124_v16 = vand.u32 4294901760, %v4123_v8  ;;  %17307 = vst [vmem:[#allocation20_spill] sm:$0xff] %v12526_v28  ;;  %6993 = vmatprep.subr.msk.mxu0 %vm453_vm7, %v16313_v53  ;;  %v6383_v11 = vsel %vm16111_vm5, 1.0, %v17051_v37  ;;  %v12549_v8 = vsub.f32 %v6384_v35, %v6384_v35  ;;  %v17311_v35 = vld [vmem:[#allocation77_spill] sm:$0xff] }
 0x28a   :  { %v4135_v40 = vsub.f32 %v12348_v26, %v17306_v34  ;;  %4083 = vmatpush2.msra.mxu1 %v4082_v63  ;;  %v12532_v34 = vsub.f32 %v6387_v6, %v6387_v6  ;;  %v17308_v63 = vand.u32 4294901760, %v12381_v27  ;;  %6994 = vmatpush2.msk.msra.mxu0 %vm16066_vm2, %v16313_v53  ;;  %v4130_v6 = vand.u32 4294901760, %v4129_v4 }
 0x28b   :  { %4089 = vmatprep.subr.mxu1 %v4088_v48  ;;  %v6380_v48 = vsel %vm16110_vm13, 1.0, %v17051_v37  ;;  %17309 = vst [vmem:[#allocation119_spill] sm:$0xff] %v12549_v8  ;;  %vm16109_vm1 = vcmp.eq.s32.totalorder %v17305_v10, %v11232_v22  ;;  %6995 = vmatprep.subr.msk.mxu0 %vm16067_vm8, %v16313_v53  ;;  %v16072_v4 = vand.u32 4294901760, %v12430_v58  ;;  %vm16108_vm2 = vcmp.eq.s32.totalorder %v17311_v35, %v11223_v56  ;;  %v17330_v10 = vld [vmem:[#allocation18_spill] sm:$0xff] }
 0x28c   :  { %v4141_v25 = vsub.f32 %v12381_v27, %v17308_v63  ;;  %4095 = vmatpush2.msra.mxu1 %v4094_v36  ;;  %v4136_v36 = vand.u32 4294901760, %v4135_v40  ;;  %v4147_v63 = vsub.f32 %v12398_v46, %v17310_v42  ;;  %6996 = vmatpush2.msk.msra.mxu0 %vm16068_vm6, %v16313_v53  ;;  %v12570_v62 = vsub.f32 %v6380_v48, %v6380_v48  ;;  %v17313_v42 = vld [vmem:[#allocation80_spill] sm:$0xff] }
 0x28d   :  { %4101 = vmatprep.subr.mxu1 %v4100_v31  ;;  %v12568_v31 = vsub.f32 %v6383_v11, %v6383_v11  ;;  %vm16082_vm8 = vcmp.eq.s32.totalorder %v17311_v35, %v11232_v22  ;;  %6997 = vmatprep.subr.msk.mxu0 %vm16069_vm11, %v16313_v53  ;;  %v6379_v11 = vsel %vm16109_vm1, 1.0, %v17051_v37  ;;  %vm16081_vm6 = vcmp.eq.s32.totalorder %v17313_v42, %v11223_v56 }
 0x28e   :  { %4107 = vmatpush2.msra.mxu1 %v4106_v47  ;;  %17312 = vst [vmem:[#allocation22_spill] sm:$0xff] %v12570_v62  ;;  %v4142_v47 = vand.u32 4294901760, %v4141_v25  ;;  %6998 = vmatpush2.msk.msra.mxu0 %vm444_vm0, %v16313_v53  ;;  %v6376_v40 = vsel %vm16108_vm2, 1.0, %v17051_v37  ;;  %vm16080_vm11 = vcmp.eq.s32.totalorder %v17313_v42, %v11232_v22  ;;  %v6375_v19 = vsel %vm16082_vm8, 1.0, %v17051_v37 }
 0x28f   :  { %4113 = vmatprep.subr.mxu1 %v4112_v38  ;;  %v17314_v38 = vand.u32 4294901760, %v12427_v5  ;;  %6999 = vmatprep.subr.msk.mxu0 %vm441_vm10, %v16313_v53  ;;  %v17319_v33 = vand.u32 4294901760, %v12524_v23  ;;  %v17322_v59 = vand.u32 4294901760, %v12532_v34 }
 0x290   :  { %4119 = vmatpush2.msra.mxu1 %v4118_v41  ;;  %v4148_v41 = vand.u32 4294901760, %v4147_v63  ;;  %7000 = vmatpush2.msk.msra.mxu0 %vm440_vm4, %v16313_v53  ;;  %v17315_v63 = vand.u32 4294901760, %v12453_v45 }
 0x291   :  { %v4153_v25 = vsub.f32 %v12427_v5, %v17314_v38  ;;  %4125 = vmatprep.subr.mxu1 %v4124_v16  ;;  %v4159_v38 = vsub.f32 %v12430_v58, %v16072_v4  ;;  %v12616_v16 = vsub.f32 %v6379_v11, %v6379_v11  ;;  %v6372_v4 = vsel %vm16081_vm6, 1.0, %v17051_v37  ;;  %7001 = vmatprep.subr.msk.mxu0 %vm16116_vm3, %v16313_v53 }
 0x292   :  { %4131 = vmatpush2.msra.mxu1 %v4130_v6  ;;  %v4165_v24 = vsub.f32 %v12453_v45, %v17315_v63  ;;  %v12630_v6 = vsub.f32 %v6376_v40, %v6376_v40  ;;  %v17317_v11 = vand.u32 4294901760, %v12482_v9  ;;  %v6371_v63 = vsel %vm16080_vm11, 1.0, %v17051_v37  ;;  %7002 = vmatpush2.msk.msra.mxu0 %vm16111_vm5, %v16313_v53 }
 0x293   :  { %4137 = vmatprep.subr.mxu1 %v4136_v36  ;;  %v4154_v36 = vand.u32 4294901760, %v4153_v25  ;;  %v12644_v40 = vsub.f32 %v6375_v19, %v6375_v19  ;;  %7003 = vmatprep.subr.msk.mxu0 %vm16110_vm13, %v16313_v53  ;;  %v12654_v60 = vsub.f32 %v6372_v4, %v6372_v4  ;;  %v17321_v37 = vand.u32 4294901760, %v12526_v28 }
 0x294   :  { %17316 = vst [vmem:[#allocation121_spill] sm:$0xff] %v12630_v6  ;;  %v4171_v48 = vsub.f32 %v12482_v9, %v17317_v11  ;;  %4143 = vmatpush2.msra.mxu1 %v4142_v47  ;;  %v4177_v11 = vsub.f32 %v12524_v23, %v17319_v33  ;;  %v4160_v47 = vand.u32 4294901760, %v4159_v38  ;;  %7004 = vmatpush2.msk.msra.mxu0 %vm16109_vm1, %v16313_v53  ;;  %v4166_v33 = vand.u32 4294901760, %v4165_v24 }
 0x295   :  { %17318 = vst [vmem:[#allocation23_spill] sm:$0xff] %v12644_v40  ;;  %4149 = vmatprep.subr.mxu1 %v4148_v41  ;;  %17320 = vst [vmem:[#allocation123_spill] sm:$0xff] %v12654_v60  ;;  %v4183_v19 = vsub.f32 %v12526_v28, %v17321_v37  ;;  %v12664_v41 = vsub.f32 %v6371_v63, %v6371_v63  ;;  %v4189_v4 = vsub.f32 %v12532_v34, %v17322_v59 }
 0x296   :  { %4155 = vmatpush2.msra.mxu1 %v4154_v36  ;;  %7005 = vmatprep.subr.msk.mxu0 %vm16108_vm2, %v16313_v53  ;;  %v4172_v37 = vand.u32 4294901760, %v4171_v48  ;;  %v17323_v36 = vand.u32 4294901760, %v12549_v8  ;;  %v4178_v59 = vand.u32 4294901760, %v4177_v11  ;;  %v17324_v63 = vand.u32 4294901760, %v12568_v31 }
 0x297   :  { %4161 = vmatprep.subr.mxu1 %v4160_v47  ;;  %7006 = vmatpush2.msk.msra.mxu0 %vm16082_vm8, %v16313_v53  ;;  %v4184_v48 = vand.u32 4294901760, %v4183_v19  ;;  %v4190_v11 = vand.u32 4294901760, %v4189_v4  ;;  %v16083_v38 = vand.u32 4294901760, %v12664_v41  ;;  %v17327_v19 = vld [vmem:[#allocation12_spill] sm:$0xff]  ;;  %v17329_v4 = vand.u32 4294901760, %v12644_v40 }
 0x298   :  { %v4195_v25 = vsub.f32 %v12549_v8, %v17323_v36  ;;  %4167 = vmatpush2.msra.mxu1 %v4166_v33  ;;  %v4201_v47 = vsub.f32 %v12568_v31, %v17324_v63  ;;  %7007 = vmatprep.subr.msk.mxu0 %vm16081_vm6, %v16313_v53  ;;  %v17325_v33 = vand.u32 4294901760, %v12570_v62 }
 0x299   :  { %4173 = vmatprep.subr.mxu1 %v4172_v37  ;;  %7008 = vmatpush2.msk.msra.mxu0 %vm16080_vm11, %v16313_v53  ;;  %v17326_v37 = vand.u32 4294901760, %v12616_v16  ;;  %v4225_v42 = vsub.f32 %v12644_v40, %v17329_v4  ;;  %v17335_v4 = vld [vmem:[#allocation9_spill] sm:$0xff] }
 0x29a   :  { %v4207_v36 = vsub.f32 %v12570_v62, %v17325_v33  ;;  %4179 = vmatpush2.msra.mxu1 %v4178_v59  ;;  %3844 = vmatprep.mubr.f32.mxu0 %v17327_v19  ;;  %v4196_v35 = vand.u32 4294901760, %v4195_v25  ;;  %v17328_v33 = vand.u32 4294901760, %v12630_v6  ;;  %v4202_v24 = vand.u32 4294901760, %v4201_v47 }
 0x29b   :  { %v4213_v63 = vsub.f32 %v12616_v16, %v17326_v37  ;;  %4185 = vmatprep.subr.mxu1 %v4184_v48  ;;  %4251 = vmatprep.subr.mxu0 %v11310_v20  ;;  %v17331_v48 = vand.u32 4294901760, %v12654_v60  ;;  %v4237_v47 = vsub.f32 %v12664_v41, %v16083_v38  ;;  %v17354_v38 = vld [vmem:[#allocation62_spill] sm:$0xff] }
 0x29c   :  { %v4219_v59 = vsub.f32 %v12630_v6, %v17328_v33  ;;  %4191 = vmatpush2.msra.mxu1 %v4190_v11  ;;  %3850 = vmatmul.mubr.f32.vlgmr.msra.gmra.mxu0 %v17330_v10  ;;  %v4208_v37 = vand.u32 4294901760, %v4207_v36  ;;  %v4226_v10 = vand.u32 4294901760, %v4225_v42  ;;  %v17332_v36 = vld [vmem:[#allocation43_spill] sm:$0xff]  ;;  %v17338_v42 = vld [vmem:[#allocation52_spill] sm:$0xff] }
 0x29d   :  { %4197 = vmatprep.subr.mxu1 %v4196_v35  ;;  %v4231_v25 = vsub.f32 %v12654_v60, %v17331_v48  ;;  %4254 = vmatpush1.msra.mxu0 %v11334_v49  ;;  %v4214_v19 = vand.u32 4294901760, %v4213_v63  ;;  %v17333_v63 = vld [vmem:[#allocation44_spill] sm:$0xff]  ;;  %v17334_v33 = vld [vmem:[#allocation47_spill] sm:$0xff] }
 0x29e   :  { %4203 = vmatpush2.msra.mxu1 %v4202_v24  ;;  %4257 = vmatprep.subr.mxu0 %v11336_v52  ;;  %v4220_v11 = vand.u32 4294901760, %v4219_v59  ;;  %v4238_v24 = vand.u32 4294901760, %v4237_v47  ;;  %v17336_v59 = vld [vmem:[#allocation50_spill] sm:$0xff]  ;;  %v17339_v48 = vld [vmem:[#allocation16_spill] sm:$0xff]  ;;  %v17344_v47 = vld [vmem:[#allocation19_spill] sm:$0xff] }
 0x29f   :  { %4209 = vmatprep.subr.mxu1 %v4208_v37  ;;  %4260 = vmatpush1.msra.mxu0 %v11348_v39  ;;  %v4232_v35 = vand.u32 4294901760, %v4231_v25  ;;  %v17337_v37 = vld [vmem:[#allocation13_spill] sm:$0xff]  ;;  %vm17340_vm11 = vcmp.eq.s32.totalorder %v17339_v48, %v11223_v56  ;;  %vm17342_vm6 = vcmp.eq.s32.totalorder %v17339_v48, %v11232_v22  ;;  %vm17345_vm8 = vcmp.eq.s32.totalorder %v17344_v47, %v11223_v56 }
 0x2a0   :  { %4215 = vmatpush2.msra.mxu1 %v4214_v19  ;;  %4263 = vmatprep.subr.mxu0 %v11377_v12  ;;  %v17341_v25 = vld [vmem:[#allocation53_spill] sm:$0xff]  ;;  %v17343_v19 = vld [vmem:[#allocation56_spill] sm:$0xff] }
 0x2a1   :  { %4221 = vmatprep.subr.mxu1 %v4220_v11  ;;  %4266 = vmatpush1.msra.mxu0 %v17332_v36  ;;  %v17346_v11 = vld [vmem:[#allocation58_spill] sm:$0xff] }
 0x2a2   :  { %4227 = vmatpush2.msra.mxu1 %v4226_v10  ;;  %4269 = vmatprep.subr.mxu0 %v17333_v63  ;;  %v17348_v10 = vld [vmem:[#allocation59_spill] sm:$0xff] }
 0x2a3   :  { %4233 = vmatprep.subr.mxu1 %v4232_v35  ;;  %4272 = vmatpush1.msra.mxu0 %v17334_v33  ;;  %v17350_v35 = vld [vmem:[#allocation61_spill] sm:$0xff] }
 0x2a4   :  { %4239 = vmatpush2.msra.mxu1 %v4238_v24  ;;  %4241 = vmatprep.mubr.f32.mxu1 %v17335_v4  ;;  %v17352_v24 = vld [vmem:[#allocation105_spill] sm:$0xff]  ;;  %v17360_v4 = vld [vmem:[#allocation76_spill] sm:$0xff] }
 0x2a5   :  { %4275 = vmatprep.subr.mxu0 %v17336_v59  ;;  %4243 = vmatmul.mubr.f32.vlgmr.msra.gmra.mxu1 %v17337_v37  ;;  %v17356_v37 = vld [vmem:[#allocation65_spill] sm:$0xff] }
 0x2a6   :  { %4278 = vmatpush1.msra.mxu0 %v17338_v42  ;;  %7009 = vmatprep.subr.msk.mxu1 %vm17340_vm11, %v16313_v53  ;;  %vm17347_vm11 = vcmp.eq.s32.totalorder %v17344_v47, %v11232_v22 }
 0x2a7   :  { %4281 = vmatprep.subr.mxu0 %v17341_v25  ;;  %7010 = vmatpush1.msk.msra.mxu1 %vm17342_vm6, %v16313_v53  ;;  %vm17349_vm6 = vcmp.eq.s32.totalorder %v17058_v3, %v11223_v56 }
 0x2a8   :  { %4284 = vmatpush1.msra.mxu0 %v17343_v19  ;;  %7011 = vmatprep.subr.msk.mxu1 %vm17345_vm8, %v16313_v53  ;;  %vm17351_vm8 = vcmp.eq.s32.totalorder %v17058_v3, %v11232_v22 }
 0x2a9   :  { %4287 = vmatprep.subr.mxu0 %v17346_v11  ;;  %7012 = vmatpush1.msk.msra.mxu1 %vm17347_vm11, %v16313_v53  ;;  %vm17353_vm11 = vcmp.eq.s32.totalorder %v17066_v2, %v11223_v56 }
 0x2aa   :  { %4290 = vmatpush1.msra.mxu0 %v17348_v10  ;;  %7013 = vmatprep.subr.msk.mxu1 %vm17349_vm6, %v16313_v53  ;;  %vm17355_vm6 = vcmp.eq.s32.totalorder %v17066_v2, %v11232_v22 }
 0x2ab   :  { %4293 = vmatprep.subr.mxu0 %v17350_v35  ;;  %7014 = vmatpush1.msk.msra.mxu1 %vm17351_vm8, %v16313_v53  ;;  %vm17357_vm8 = vcmp.eq.s32.totalorder %v17072_v17, %v11223_v56 }
 0x2ac   :  { %4296 = vmatpush1.msra.mxu0 %v17352_v24  ;;  %7015 = vmatprep.subr.msk.mxu1 %vm17353_vm11, %v16313_v53  ;;  %vm17358_vm11 = vcmp.eq.s32.totalorder %v17072_v17, %v11232_v22 }
 0x2ad   :  { %4299 = vmatprep.subr.mxu0 %v17354_v38  ;;  %7016 = vmatpush1.msk.msra.mxu1 %vm17355_vm6, %v16313_v53  ;;  %vm17359_vm6 = vcmp.eq.s32.totalorder %v17078_v44, %v11223_v56 }
 0x2ae   :  { %4302 = vmatpush1.msra.mxu0 %v17356_v37  ;;  %7017 = vmatprep.subr.msk.mxu1 %vm17357_vm8, %v16313_v53  ;;  %vm17361_vm8 = vcmp.eq.s32.totalorder %v17078_v44, %v11232_v22  ;;  %v17363_v37 = vld [vmem:[#allocation24_spill] sm:$0xff] }
 0x2af   :  { %4305 = vmatprep.subr.mxu0 %v11664_v54  ;;  %7018 = vmatpush1.msk.msra.mxu1 %vm17358_vm11, %v16313_v53  ;;  %v17362_v54 = vld [vmem:[#allocation79_spill] sm:$0xff]  ;;  %vm17364_vm11 = vcmp.eq.s32.totalorder %v17363_v37, %v11223_v56 }
 0x2b0   :  { %4308 = vmatpush1.msra.mxu0 %v11694_v43  ;;  %7019 = vmatprep.subr.msk.mxu1 %vm17359_vm6, %v16313_v53  ;;  %v17365_v43 = vld [vmem:[#allocation84_spill] sm:$0xff]  ;;  %vm17366_vm6 = vcmp.eq.s32.totalorder %v17363_v37, %v11232_v22 }
 0x2b1   :  { %4311 = vmatprep.subr.mxu0 %v17360_v4  ;;  %7020 = vmatpush1.msk.msra.mxu1 %vm17361_vm8, %v16313_v53  ;;  %v17367_v4 = vld [vmem:[#allocation109_spill] sm:$0xff]  ;;  %vm17368_vm8 = vcmp.eq.s32.totalorder %v17101_v61, %v11223_v56 }
 0x2b2   :  { %4314 = vmatpush1.msra.mxu0 %v17362_v54  ;;  %7021 = vmatprep.subr.msk.mxu1 %vm17364_vm11, %v16313_v53  ;;  %v17369_v54 = vld [vmem:[#allocation120_spill] sm:$0xff]  ;;  %vm17370_vm11 = vcmp.eq.s32.totalorder %v17101_v61, %v11232_v22 }
 0x2b3   :  { %4317 = vmatprep.subr.mxu0 %v17365_v43  ;;  %7022 = vmatpush1.msk.msra.mxu1 %vm17366_vm6, %v16313_v53  ;;  %vm17371_vm6 = vcmp.eq.s32.totalorder %v17113_v14, %v11223_v56  ;;  %v17379_v61 = vld [vmem:[#allocation28_spill] sm:$0xff] }
 0x2b4   :  { %4320 = vmatpush1.msra.mxu0 %v17367_v4  ;;  %7023 = vmatprep.subr.msk.mxu1 %vm17368_vm8, %v16313_v53  ;;  %v17372_v4 = vld [vmem:[#allocation128_spill] sm:$0xff]  ;;  %vm17373_vm8 = vcmp.eq.s32.totalorder %v17113_v14, %v11232_v22 }
 0x2b5   :  { %4323 = vmatprep.subr.mxu0 %v17369_v54  ;;  %7024 = vmatpush1.msk.msra.mxu1 %vm17370_vm11, %v16313_v53  ;;  %v17374_v54 = vld [vmem:[#allocation27_spill] sm:$0xff] }
 0x2b6   :  { %4326 = vmatpush1.msra.mxu0 %v11867_v0  ;;  %7025 = vmatprep.subr.msk.mxu1 %vm17371_vm6, %v16313_v53  ;;  %vm17375_vm11 = vcmp.eq.s32.totalorder %v17374_v54, %v11223_v56  ;;  %v17376_v0 = vld [vmem:[#allocation41_spill] sm:$0xff]  ;;  %vm17377_vm6 = vcmp.eq.s32.totalorder %v17374_v54, %v11232_v22 }
 0x2b7   :  { %4329 = vmatprep.subr.mxu0 %v17372_v4  ;;  %7026 = vmatpush1.msk.msra.mxu1 %vm17373_vm8, %v16313_v53  ;;  %v17378_v4 = vld [vmem:[#allocation73_spill] sm:$0xff]  ;;  %vm17380_vm8 = vcmp.eq.s32.totalorder %v17379_v61, %v11223_v56 }
 0x2b8   :  { %4332 = vmatpush1.msra.mxu0 %v11871_v57  ;;  %7027 = vmatprep.subr.msk.mxu1 %vm17375_vm11, %v16313_v53  ;;  %vm17381_vm11 = vcmp.eq.s32.totalorder %v17379_v61, %v11232_v22 }
 0x2b9   :  { %4335 = vmatprep.subr.mxu0 %v17376_v0  ;;  %7028 = vmatpush1.msk.msra.mxu1 %vm17377_vm6, %v16313_v53  ;;  %v17382_v0 = vld [vmem:[#allocation29_spill] sm:$0xff] }
 0x2ba   :  { %4338 = vmatpush1.msra.mxu0 %v17378_v4  ;;  %7029 = vmatprep.subr.msk.mxu1 %vm17380_vm8, %v16313_v53  ;;  %vm17383_vm6 = vcmp.eq.s32.totalorder %v17382_v0, %v11223_v56  ;;  %v17384_v4 = vld [vmem:[#allocation78_spill] sm:$0xff]  ;;  %vm17385_vm8 = vcmp.eq.s32.totalorder %v17382_v0, %v11232_v22 }
 0x2bb   :  { %4341 = vmatprep.subr.mxu0 %v11930_v21  ;;  %7030 = vmatpush1.msk.msra.mxu1 %vm17381_vm11, %v16313_v53  ;;  %v17386_v21 = vld [vmem:[#allocation30_spill] sm:$0xff] }
 0x2bc   :  { %4344 = vmatpush1.msra.mxu0 %v12014_v15  ;;  %7031 = vmatprep.subr.msk.mxu1 %vm17383_vm6, %v16313_v53  ;;  %vm17387_vm11 = vcmp.eq.s32.totalorder %v17386_v21, %v11223_v56  ;;  %vm17388_vm6 = vcmp.eq.s32.totalorder %v17386_v21, %v11232_v22 }
 0x2bd   :  { %4347 = vmatprep.subr.mxu0 %v17384_v4  ;;  %7032 = vmatpush1.msk.msra.mxu1 %vm17385_vm8, %v16313_v53  ;;  %v17389_v4 = vld [vmem:[#allocation31_spill] sm:$0xff] }
 0x2be   :  { %4350 = vmatpush2.msra.mxu0 %v12046_v7  ;;  %7033 = vmatprep.subr.msk.mxu1 %vm17387_vm11, %v16313_v53  ;;  %vm17390_vm8 = vcmp.eq.s32.totalorder %v17389_v4, %v11223_v56  ;;  %v17391_v7 = vld [vmem:[#allocation107_spill] sm:$0xff]  ;;  %vm17392_vm11 = vcmp.eq.s32.totalorder %v17389_v4, %v11232_v22 }
 0x2bf   :  { %4353 = vmatprep.subr.mxu0 %v12048_v1  ;;  %7034 = vmatpush1.msk.msra.mxu1 %vm17388_vm6, %v16313_v53  ;;  %v17393_v1 = vld [vmem:[#allocation32_spill] sm:$0xff] }
 0x2c0   :  { %4356 = vmatpush2.msra.mxu0 %v12073_v50  ;;  %7035 = vmatprep.subr.msk.mxu1 %vm17390_vm8, %v16313_v53  ;;  %vm17394_vm6 = vcmp.eq.s32.totalorder %v17393_v1, %v11223_v56  ;;  %vm17395_vm8 = vcmp.eq.s32.totalorder %v17393_v1, %v11232_v22 }
 0x2c1   :  { %4359 = vmatprep.subr.mxu0 %v17391_v7  ;;  %7036 = vmatpush1.msk.msra.mxu1 %vm17392_vm11, %v16313_v53  ;;  %v17396_v7 = vld [vmem:[#allocation33_spill] sm:$0xff] }
 0x2c2   :  { %4362 = vmatpush2.msra.mxu0 %v12155_v30  ;;  %7037 = vmatprep.subr.msk.mxu1 %vm17394_vm6, %v16313_v53  ;;  %vm17397_vm11 = vcmp.eq.s32.totalorder %v17396_v7, %v11223_v56  ;;  %vm17398_vm6 = vcmp.eq.s32.totalorder %v17396_v7, %v11232_v22  ;;  %v17400_v30 = vld [vmem:[#allocation36_spill] sm:$0xff]  ;;  %v17407_v7 = vld [vmem:[#allocation42_spill] sm:$0xff] }
 0x2c3   :  { %4365 = vmatprep.subr.mxu0 %v12157_v32  ;;  %7038 = vmatpush1.msk.msra.mxu1 %vm17395_vm8, %v16313_v53  ;;  %v17399_v32 = vld [vmem:[#allocation112_spill] sm:$0xff]  ;;  %vm17401_vm8 = vcmp.eq.s32.totalorder %v17400_v30, %v11223_v56 }
 0x2c4   :  { %4368 = vmatpush2.msra.mxu0 %v12170_v55  ;;  %7039 = vmatprep.subr.msk.mxu1 %vm17397_vm11, %v16313_v53  ;;  %vm17402_vm11 = vcmp.eq.s32.totalorder %v17400_v30, %v11232_v22 }
 0x2c5   :  { %4371 = vmatprep.subr.mxu0 %v12207_v13  ;;  %7040 = vmatpush1.msk.msra.mxu1 %vm17398_vm6, %v16313_v53  ;;  %v17403_v13 = vld [vmem:[#allocation39_spill] sm:$0xff] }
 0x2c6   :  { %4374 = vmatpush2.msra.mxu0 %v17399_v32  ;;  %7041 = vmatprep.subr.msk.mxu1 %vm17401_vm8, %v16313_v53  ;;  %v17404_v32 = vld [vmem:[#allocation114_spill] sm:$0xff]  ;;  %vm17405_vm6 = vcmp.eq.s32.totalorder %v17403_v13, %v11232_v22  ;;  %vm17408_vm8 = vcmp.eq.s32.totalorder %v17407_v7, %v11232_v22 }
 0x2c7   :  { %4377 = vmatprep.subr.mxu0 %v12237_v29  ;;  %7042 = vmatpush2.msk.msra.mxu1 %vm17402_vm11, %v16313_v53  ;;  %v17406_v29 = vld [vmem:[#allocation115_spill] sm:$0xff] }
 0x2c8   :  { %4380 = vmatpush2.msra.mxu0 %v12262_v18  ;;  %7043 = vmatprep.subr.msk.mxu1 %vm481_vm15, %v16313_v53 }
 0x2c9   :  { %4383 = vmatprep.subr.mxu0 %v17404_v32  ;;  %7044 = vmatpush2.msk.msra.mxu1 %vm17405_vm6, %v16313_v53  ;;  %v17409_v32 = vld [vmem:[#allocation45_spill] sm:$0xff] }
 0x2ca   :  { %4386 = vmatpush2.msra.mxu0 %v17406_v29  ;;  %7045 = vmatprep.subr.msk.mxu1 %vm477_vm14, %v16313_v53  ;;  %vm17410_vm11 = vcmp.eq.s32.totalorder %v17409_v32, %v11223_v56  ;;  %vm17411_vm6 = vcmp.eq.s32.totalorder %v17409_v32, %v11232_v22 }
 0x2cb   :  { %4389 = vmatprep.subr.mxu0 %v12348_v26  ;;  %7046 = vmatpush2.msk.msra.mxu1 %vm17408_vm8, %v16313_v53  ;;  %v17412_v26 = vld [vmem:[#allocation48_spill] sm:$0xff] }
 0x2cc   :  { %4392 = vmatpush2.msra.mxu0 %v12381_v27  ;;  %7047 = vmatprep.subr.msk.mxu1 %vm17410_vm11, %v16313_v53  ;;  %vm17413_vm8 = vcmp.eq.s32.totalorder %v17412_v26, %v11223_v56  ;;  %vm17414_vm11 = vcmp.eq.s32.totalorder %v17412_v26, %v11232_v22 }
 0x2cd   :  { %4395 = vmatprep.subr.mxu0 %v12398_v46  ;;  %7048 = vmatpush2.msk.msra.mxu1 %vm17411_vm6, %v16313_v53  ;;  %v17415_v46 = vld [vmem:[#allocation51_spill] sm:$0xff] }
 0x2ce   :  { %4398 = vmatpush2.msra.mxu0 %v12427_v5  ;;  %7049 = vmatprep.subr.msk.mxu1 %vm17413_vm8, %v16313_v53  ;;  %vm17416_vm6 = vcmp.eq.s32.totalorder %v17415_v46, %v11223_v56  ;;  %vm17417_vm8 = vcmp.eq.s32.totalorder %v17415_v46, %v11232_v22 }
 0x2cf   :  { %4401 = vmatprep.subr.mxu0 %v12430_v58  ;;  %7050 = vmatpush2.msk.msra.mxu1 %vm17414_vm11, %v16313_v53  ;;  %v17418_v58 = vld [vmem:[#allocation54_spill] sm:$0xff] }
 0x2d0   :  { %4404 = vmatpush2.msra.mxu0 %v12453_v45  ;;  %7051 = vmatprep.subr.msk.mxu1 %vm17416_vm6, %v16313_v53  ;;  %vm17419_vm11 = vcmp.eq.s32.totalorder %v17418_v58, %v11223_v56  ;;  %vm17420_vm6 = vcmp.eq.s32.totalorder %v17418_v58, %v11232_v22 }
 0x2d1   :  { %4407 = vmatprep.subr.mxu0 %v12482_v9  ;;  %7052 = vmatpush2.msk.msra.mxu1 %vm17417_vm8, %v16313_v53  ;;  %v17614_v9 = vld [vmem:[#allocation22_spill] sm:$0xff] }
 0x2d2   :  { %4410 = vmatpush2.msra.mxu0 %v12524_v23  ;;  %7053 = vmatprep.subr.msk.mxu1 %vm17419_vm11, %v16313_v53 }
 0x2d3   :  { %4413 = vmatprep.subr.mxu0 %v12526_v28  ;;  %7054 = vmatpush2.msk.msra.mxu1 %vm17420_vm6, %v16313_v53  ;;  %v17422_v28 = vld [vmem:[#allocation60_spill] sm:$0xff] }
 0x2d4   :  { %4416 = vmatpush2.msra.mxu0 %v12532_v34  ;;  %7055 = vmatprep.subr.msk.mxu1 %vm457_vm12, %v16313_v53  ;;  %vm17423_vm8 = vcmp.eq.s32.totalorder %v17422_v28, %v11232_v22 }
 0x2d5   :  { %4419 = vmatprep.subr.mxu0 %v12549_v8  ;;  %7056 = vmatpush2.msk.msra.mxu1 %vm456_vm9, %v16313_v53  ;;  %v17424_v8 = vld [vmem:[#allocation63_spill] sm:$0xff] }
 0x2d6   :  { %4422 = vmatpush2.msra.mxu0 %v12568_v31  ;;  %7057 = vmatprep.subr.msk.mxu1 %vm453_vm7, %v16313_v53  ;;  %vm17425_vm11 = vcmp.eq.s32.totalorder %v17424_v8, %v11223_v56  ;;  %vm17426_vm6 = vcmp.eq.s32.totalorder %v17424_v8, %v11232_v22  ;;  %v17435_v8 = vld [vmem:[#allocation74_spill] sm:$0xff] }
 0x2d7   :  { %4425 = vmatprep.subr.mxu0 %v12570_v62  ;;  %7058 = vmatpush2.msk.msra.mxu1 %vm17423_vm8, %v16313_v53  ;;  %v17427_v62 = vld [vmem:[#allocation66_spill] sm:$0xff] }
 0x2d8   :  { %4428 = vmatpush2.msra.mxu0 %v12616_v16  ;;  %7059 = vmatprep.subr.msk.mxu1 %vm17425_vm11, %v16313_v53  ;;  %vm17428_vm8 = vcmp.eq.s32.totalorder %v17427_v62, %v11223_v56 }
 0x2d9   :  { %4431 = vmatprep.subr.mxu0 %v12630_v6  ;;  %7060 = vmatpush2.msk.msra.mxu1 %vm17426_vm6, %v16313_v53  ;;  %v17429_v6 = vld [vmem:[#allocation10_spill] sm:$0xff] }
 0x2da   :  { %4434 = vmatpush2.msra.mxu0 %v12644_v40  ;;  %7061 = vmatprep.subr.msk.mxu1 %vm17428_vm8, %v16313_v53  ;;  %v17431_v40 = vld [vmem:[#allocation14_spill] sm:$0xff] }
 0x2db   :  { %4437 = vmatprep.subr.mxu0 %v12654_v60  ;;  %7062 = vmatpush2.msk.msra.mxu1 %vm444_vm0, %v16313_v53  ;;  %v17432_v60 = vand.u32 4294901760, %v11310_v20  ;;  %v17436_v20 = vand.u32 4294901760, %v11348_v39  ;;  %v17441_v39 = vand.u32 4294901760, %v17333_v63  ;;  %v17448_v63 = vld [vmem:[#allocation15_spill] sm:$0xff] }
 0x2dc   :  { %4440 = vmatpush2.msra.mxu0 %v12664_v41  ;;  %4443 = vmatprep.mubr.f32.mxu0 %v17429_v6  ;;  %v17433_v6 = vand.u32 4294901760, %v11334_v49  ;;  %v17437_v49 = vand.u32 4294901760, %v11377_v12  ;;  %v17444_v12 = vand.u32 4294901760, %v17334_v33  ;;  %v17451_v33 = vand.u32 4294901760, %v17341_v25 }
 0x2dd   :  { %7063 = vmatprep.subr.msk.mxu1 %vm441_vm10, %v16313_v53  ;;  %4446 = vmatmul.mubr.f32.vlgmr.msra.gmra.mxu0 %v17431_v40  ;;  %v17434_v40 = vand.u32 4294901760, %v11336_v52  ;;  %v17439_v52 = vand.u32 4294901760, %v17332_v36  ;;  %v17446_v36 = vld [vmem:[#allocation11_spill] sm:$0xff]  ;;  %v17457_v25 = vand.u32 4294901760, %v17348_v10 }
 0x2de   :  { %7064 = vmatpush2.msk.msra.mxu1 %vm440_vm4, %v16313_v53  ;;  %4596 = vmatprep.subr.mxu0 %v17432_v60  ;;  %v17438_v60 = vld [vmem:[#allocation77_spill] sm:$0xff] }
 0x2df   :  { %7065 = vmatprep.subr.msk.mxu1 %vm16116_vm3, %v16313_v53  ;;  %4600 = vmatpush1.msra.mxu0 %v17433_v6  ;;  %vm17440_vm11 = vcmp.eq.s32.totalorder %v17438_v60, %v11232_v22  ;;  %v17442_v6 = vld [vmem:[#allocation80_spill] sm:$0xff] }
 0x2e0   :  { %7066 = vmatpush2.msk.msra.mxu1 %vm16111_vm5, %v16313_v53  ;;  %4604 = vmatprep.subr.mxu0 %v17434_v40  ;;  %vm17443_vm6 = vcmp.eq.s32.totalorder %v17442_v6, %v11223_v56  ;;  %vm17445_vm8 = vcmp.eq.s32.totalorder %v17442_v6, %v11232_v22  ;;  %v17447_v40 = vand.u32 4294901760, %v17336_v59  ;;  %v17453_v59 = vand.u32 4294901760, %v17343_v19 }
 0x2e1   :  { %7067 = vmatprep.subr.msk.mxu1 %vm16110_vm13, %v16313_v53  ;;  %4608 = vmatpush1.msra.mxu0 %v17436_v20  ;;  %v17449_v20 = vand.u32 4294901760, %v17338_v42  ;;  %v17455_v42 = vand.u32 4294901760, %v17346_v11  ;;  %v17461_v19 = vand.u32 4294901760, %v17352_v24  ;;  %v17465_v11 = vld [vmem:[#allocation65_spill] sm:$0xff] }
 0x2e2   :  { %7068 = vmatpush2.msk.msra.mxu1 %vm16109_vm1, %v16313_v53  ;;  %4612 = vmatprep.subr.mxu0 %v17437_v49  ;;  %v17466_v10 = vand.u32 4294901760, %v17465_v11  ;;  %vm17502_vm1 = vcmp.eq.s32.totalorder %v17374_v54, %v11232_v22 }
 0x2e3   :  { %7069 = vmatprep.subr.msk.mxu1 %vm16108_vm2, %v16313_v53  ;;  %4616 = vmatpush1.msra.mxu0 %v17439_v52  ;;  %v17477_v52 = vld [vmem:[#allocation79_spill] sm:$0xff] }
 0x2e4   :  { %7070 = vmatpush2.msk.msra.mxu1 %vm17440_vm11, %v16313_v53  ;;  %4620 = vmatprep.subr.mxu0 %v17441_v39  ;;  %vm17450_vm11 = vcmp.eq.s32.totalorder %v17339_v48, %v11223_v56  ;;  %v17478_v39 = vand.u32 4294901760, %v17477_v52  ;;  %v1676_v52 = vpop.f32.mrf.mxu1 }
 0x2e5   :  { %7071 = vmatprep.subr.msk.mxu1 %vm17443_vm6, %v16313_v53  ;;  %4624 = vmatpush1.msra.mxu0 %v17444_v12  ;;  %vm17452_vm6 = vcmp.eq.s32.totalorder %v17339_v48, %v11232_v22  ;;  %v17459_v48 = vand.u32 4294901760, %v17350_v35  ;;  %v17482_v12 = vld [vmem:[#allocation109_spill] sm:$0xff] }
 0x2e6   :  { %7072 = vmatpush2.msk.msra.mxu1 %vm17445_vm8, %v16313_v53  ;;  %4583 = vmatprep.mubr.f32.mxu1 %v17446_v36  ;;  %vm17454_vm8 = vcmp.eq.s32.totalorder %v17344_v47, %v11223_v56  ;;  %v17483_v36 = vand.u32 4294901760, %v17482_v12  ;;  %v17517_v12 = vld [vmem:[#allocation81_spill] sm:$0xff] }
 0x2e7   :  { %4628 = vmatprep.subr.mxu0 %v17447_v40  ;;  %4587 = vmatmul.mubr.f32.vlgmr.msra.gmra.mxu1 %v17448_v63  ;;  %v17486_v40 = vld [vmem:[#allocation120_spill] sm:$0xff] }
 0x2e8   :  { %4632 = vmatpush1.msra.mxu0 %v17449_v20  ;;  %7073 = vmatprep.subr.msk.mxu1 %vm17450_vm11, %v16313_v53  ;;  %vm17456_vm11 = vcmp.eq.s32.totalorder %v17344_v47, %v11232_v22  ;;  %v17463_v47 = vand.u32 4294901760, %v17354_v38  ;;  %v17471_v38 = vld [vmem:[#allocation70_spill] sm:$0xff]  ;;  %v17487_v63 = vand.u32 4294901760, %v17486_v40 }
 0x2e9   :  { %4636 = vmatprep.subr.mxu0 %v17451_v33  ;;  %7074 = vmatpush1.msk.msra.mxu1 %vm17452_vm6, %v16313_v53  ;;  %vm17458_vm6 = vcmp.eq.s32.totalorder %v17058_v3, %v11223_v56  ;;  %v17472_v24 = vand.u32 4294901760, %v17471_v38  ;;  %v17488_v20 = vld [vmem:[#allocation34_spill] sm:$0xff]  ;;  %v17493_v33 = vld [vmem:[#allocation128_spill] sm:$0xff]  ;;  %v17509_v38 = vld [vmem:[#allocation37_spill] sm:$0xff] }
 0x2ea   :  { %4640 = vmatpush1.msra.mxu0 %v17453_v59  ;;  %7075 = vmatprep.subr.msk.mxu1 %vm17454_vm8, %v16313_v53  ;;  %vm17460_vm8 = vcmp.eq.s32.totalorder %v17058_v3, %v11232_v22  ;;  %v17468_v3 = vld [vmem:[#allocation68_spill] sm:$0xff]  ;;  %v17494_v59 = vand.u32 4294901760, %v17493_v33 }
 0x2eb   :  { %4644 = vmatprep.subr.mxu0 %v17455_v42  ;;  %7076 = vmatpush1.msk.msra.mxu1 %vm17456_vm11, %v16313_v53  ;;  %vm17462_vm11 = vcmp.eq.s32.totalorder %v17066_v2, %v11223_v56  ;;  %v17469_v35 = vand.u32 4294901760, %v17468_v3  ;;  %v17496_v42 = vand.u32 4294901760, %v11871_v57  ;;  %v17503_v57 = vld [vmem:[#allocation73_spill] sm:$0xff] }
 0x2ec   :  { %4648 = vmatpush1.msra.mxu0 %v17457_v25  ;;  %7077 = vmatprep.subr.msk.mxu1 %vm17458_vm6, %v16313_v53  ;;  %vm17464_vm6 = vcmp.eq.s32.totalorder %v17066_v2, %v11232_v22  ;;  %v17474_v2 = vld [vmem:[#allocation76_spill] sm:$0xff]  ;;  %v17497_v25 = vmov 0.0   ;;  %v17504_v11 = vand.u32 4294901760, %v17503_v57 }
 0x2ed   :  { %4652 = vmatprep.subr.mxu0 %v17459_v48  ;;  %7078 = vmatpush1.msk.msra.mxu1 %vm17460_vm8, %v16313_v53  ;;  %vm17467_vm8 = vcmp.eq.s32.totalorder %v17072_v17, %v11223_v56  ;;  %v17475_v49 = vand.u32 4294901760, %v17474_v2  ;;  %v17512_v2 = vand.u32 4294901760, %v12014_v15  ;;  %v1283_v15 = vpop.f32.mrf.mxu0 }
 0x2ee   :  { %4656 = vmatpush1.msra.mxu0 %v17461_v19  ;;  %7079 = vmatprep.subr.msk.mxu1 %vm17462_vm11, %v16313_v53  ;;  %vm17470_vm11 = vcmp.eq.s32.totalorder %v17072_v17, %v11232_v22  ;;  %v17480_v17 = vand.u32 4294901760, %v17365_v43  ;;  %v17490_v43 = vld [vmem:[#allocation122_spill] sm:$0xff]  ;;  %v17499_v19 = vld [vmem:[#allocation41_spill] sm:$0xff] }
 0x2ef   :  { %4660 = vmatprep.subr.mxu0 %v17463_v47  ;;  %7080 = vmatpush1.msk.msra.mxu1 %vm17464_vm6, %v16313_v53  ;;  %vm17473_vm6 = vcmp.eq.s32.totalorder %v17078_v44, %v11223_v56  ;;  %v17500_v47 = vand.u32 4294901760, %v17499_v19  ;;  %v17529_v19 = vand.u32 4294901760, %v12073_v50 }
 0x2f0   :  { %4664 = vmatpush1.msra.mxu0 %v17466_v10  ;;  %7081 = vmatprep.subr.msk.mxu1 %vm17467_vm8, %v16313_v53  ;;  %vm17476_vm8 = vcmp.eq.s32.totalorder %v17078_v44, %v11232_v22  ;;  %v17484_v44 = vld [vmem:[#allocation25_spill] sm:$0xff]  ;;  %v17506_v10 = vld [vmem:[#allocation75_spill] sm:$0xff] }
 0x2f1   :  { %4668 = vmatprep.subr.mxu0 %v17469_v35  ;;  %7082 = vmatpush1.msk.msra.mxu1 %vm17470_vm11, %v16313_v53  ;;  %vm17479_vm11 = vcmp.eq.s32.totalorder %v17363_v37, %v11223_v56  ;;  %vm17489_vm2 = vcmp.eq.s32.totalorder %v17484_v44, %v11232_v22  ;;  %v17507_v3 = vand.u32 4294901760, %v17506_v10  ;;  %v1678_v10 = vpop.f32.mrf.mxu1 }
 0x2f2   :  { %4672 = vmatpush1.msra.mxu0 %v17472_v24  ;;  %7083 = vmatprep.subr.msk.mxu1 %vm17473_vm6, %v16313_v53  ;;  %vm17481_vm6 = vcmp.eq.s32.totalorder %v17363_v37, %v11232_v22  ;;  %v17491_v37 = vand.u32 4294901760, %v17490_v43  ;;  %v17510_v24 = vld [vmem:[#allocation72_spill] sm:$0xff]  ;;  %v17523_v43 = vld [vmem:[#allocation85_spill] sm:$0xff] }
 0x2f3   :  { %4676 = vmatprep.subr.mxu0 %v17475_v49  ;;  %7084 = vmatpush1.msk.msra.mxu1 %vm17476_vm8, %v16313_v53  ;;  %vm17485_vm8 = vcmp.eq.s32.totalorder %v17484_v44, %v11223_v56  ;;  %vm16117_vm5 = vcmp.eq.s32.totalorder %v17510_v24, %v11232_v22 }
 0x2f4   :  { %4680 = vmatpush1.msra.mxu0 %v17478_v39  ;;  %7085 = vmatprep.subr.msk.mxu1 %vm17479_vm11, %v16313_v53  ;;  %vm16168_vm11 = vcmp.eq.s32.totalorder %v17488_v20, %v11223_v56  ;;  %v17514_v39 = vld [vmem:[#allocation78_spill] sm:$0xff] }
 0x2f5   :  { %4684 = vmatprep.subr.mxu0 %v17480_v17  ;;  %7086 = vmatpush1.msk.msra.mxu1 %vm17481_vm6, %v16313_v53  ;;  %vm17492_vm6 = vcmp.eq.s32.totalorder %v17113_v14, %v11223_v56  ;;  %v6496_v48 = vsel %vm16168_vm11, 1.0, %v17497_v25  ;;  %v17515_v17 = vand.u32 4294901760, %v17514_v39 }
 0x2f6   :  { %4688 = vmatpush1.msra.mxu0 %v17483_v36  ;;  %7087 = vmatprep.subr.msk.mxu1 %vm17485_vm8, %v16313_v53  ;;  %vm17495_vm8 = vcmp.eq.s32.totalorder %v17113_v14, %v11232_v22  ;;  %v17501_v14 = vld [vmem:[#allocation35_spill] sm:$0xff]  ;;  %v13200_v35 = vsub.f32 %v6496_v48, %v6496_v48  ;;  %v17518_v36 = vand.u32 4294901760, %v17517_v12  ;;  %v17527_v48 = vld [vmem:[#allocation106_spill] sm:$0xff] }
 0x2f7   :  { %4692 = vmatprep.subr.mxu0 %v17487_v63  ;;  %7088 = vmatpush1.msk.msra.mxu1 %vm17489_vm2, %v16313_v53  ;;  %vm16112_vm2 = vcmp.eq.s32.totalorder %v17488_v20, %v11232_v22  ;;  %vm16114_vm13 = vcmp.eq.s32.totalorder %v17501_v14, %v11232_v22  ;;  %v17520_v63 = vld [vmem:[#allocation38_spill] sm:$0xff]  ;;  %vm16122_vm3 = vcmp.eq.s32.totalorder %v17527_v48, %v11232_v22 }
 0x2f8   :  { %4696 = vmatpush1.msra.mxu0 %v17491_v37  ;;  %7089 = vmatprep.subr.msk.mxu1 %vm17492_vm6, %v16313_v53  ;;  %vm17498_vm6 = vcmp.eq.s32.totalorder %v17374_v54, %v11223_v56  ;;  %17508 = vst [vmem:[#allocation124_spill] sm:$0xff] %v13200_v35  ;;  %v6495_v54 = vsel %vm16112_vm2, 1.0, %v17497_v25  ;;  %vm17513_vm2 = vcmp.eq.s32.totalorder %v17382_v0, %v11223_v56  ;;  %v17524_v37 = vand.u32 4294901760, %v17523_v43 }
 0x2f9   :  { %4700 = vmatprep.subr.mxu0 %v17494_v59  ;;  %7090 = vmatpush1.msk.msra.mxu1 %vm17495_vm8, %v16313_v53  ;;  %vm16113_vm8 = vcmp.eq.s32.totalorder %v17501_v14, %v11223_v56  ;;  %v13238_v44 = vsub.f32 %v6495_v54, %v6495_v54  ;;  %v17526_v59 = vld [vmem:[#allocation86_spill] sm:$0xff] }
 0x2fa   :  { %4704 = vmatpush1.msra.mxu0 %v17496_v42  ;;  %7091 = vmatprep.subr.msk.mxu1 %vm17498_vm6, %v16313_v53  ;;  %vm17505_vm6 = vcmp.eq.s32.totalorder %v17379_v61, %v11223_v56  ;;  %v6492_v49 = vsel %vm16113_vm8, 1.0, %v17497_v25  ;;  %vm17516_vm8 = vcmp.eq.s32.totalorder %v17382_v0, %v11232_v22  ;;  %v13252_v0 = vsel %vm16117_vm5, 1.0, %v17497_v25 }
 0x2fb   :  { %4708 = vmatprep.subr.mxu0 %v17500_v47  ;;  %7092 = vmatpush1.msk.msra.mxu1 %vm17502_vm1, %v16313_v53  ;;  %vm16115_vm1 = vcmp.eq.s32.totalorder %v17509_v38, %v11223_v56  ;;  %17519 = vst [vmem:[#allocation125_spill] sm:$0xff] %v13238_v44  ;;  %17521 = vst [vmem:[#allocation126_spill] sm:$0xff] %v13252_v0  ;;  %v13260_v33 = vsub.f32 %v6492_v49, %v6492_v49  ;;  %v16121_v42 = vand.u32 4294901760, %v13200_v35  ;;  %v1285_v49 = vpop.f32.mrf.mxu0 }
 0x2fc   :  { %4712 = vmatpush1.msra.mxu0 %v17504_v11  ;;  %7093 = vmatprep.subr.msk.mxu1 %vm17505_vm6, %v16313_v53  ;;  %vm17511_vm6 = vcmp.eq.s32.totalorder %v17379_v61, %v11232_v22  ;;  %v6491_v61 = vsel %vm16114_vm13, 1.0, %v17497_v25  ;;  %v6488_v40 = vsel %vm16115_vm1, 1.0, %v17497_v25  ;;  %vm16119_vm13 = vcmp.eq.s32.totalorder %v17520_v63, %v11232_v22 }
 0x2fd   :  { %4716 = vmatprep.subr.mxu0 %v17507_v3  ;;  %7094 = vmatpush1.msk.msra.mxu1 %vm17511_vm6, %v16313_v53  ;;  %vm16170_vm6 = vcmp.eq.s32.totalorder %v17509_v38, %v11232_v22  ;;  %17525 = vst [vmem:[#allocation127_spill] sm:$0xff] %v13260_v33  ;;  %vm16173_vm1 = vcmp.eq.s32.totalorder %v17526_v59, %v11223_v56 }
 0x2fe   :  { %4720 = vmatpush1.msra.mxu0 %v17512_v2  ;;  %7095 = vmatprep.subr.msk.mxu1 %vm17513_vm2, %v16313_v53  ;;  %vm16118_vm2 = vcmp.eq.s32.totalorder %v17520_v63, %v11223_v56  ;;  %vm17528_vm5 = vcmp.eq.s32.totalorder %v17386_v21, %v11232_v22  ;;  %v13273_v47 = vsub.f32 %v6491_v61, %v6491_v61  ;;  %v6487_v57 = vsel %vm16170_vm6, 1.0, %v17497_v25  ;;  %v17538_v61 = vld [vmem:[#allocation87_spill] sm:$0xff] }
 0x2ff   :  { %4724 = vmatprep.subr.mxu0 %v17515_v17  ;;  %7096 = vmatpush1.msk.msra.mxu1 %vm17516_vm8, %v16313_v53  ;;  %vm17522_vm8 = vcmp.eq.s32.totalorder %v17386_v21, %v11223_v56  ;;  %v13281_v11 = vadd.f32 %v1676_v52, %v1283_v15  ;;  %v17532_v21 = vld [vmem:[#allocation107_spill] sm:$0xff]  ;;  %v13289_v3 = vsub.f32 %v6488_v40, %v6488_v40  ;;  %v6484_v54 = vsel %vm16118_vm2, 1.0, %v17497_v25  ;;  %v17536_v52 = vld [vmem:[#allocation108_spill] sm:$0xff] }
 0x300   :  { %4728 = vmatpush2.msra.mxu0 %v17518_v36  ;;  %7097 = vmatprep.subr.msk.mxu1 %vm17522_vm8, %v16313_v53  ;;  %17530 = vst [vmem:[#allocation26_spill] sm:$0xff] %v13273_v47  ;;  %vm16120_vm8 = vcmp.eq.s32.totalorder %v17526_v59, %v11232_v22  ;;  %v17533_v50 = vand.u32 4294901760, %v17532_v21  ;;  %v6483_v2 = vsel %vm16119_vm13, 1.0, %v17497_v25  ;;  %v17537_v39 = vand.u32 4294901760, %v17536_v52  ;;  %v13334_v21 = vpop.f32.mrf.mxu0 }
 0x301   :  { %4732 = vmatprep.subr.mxu0 %v17524_v37  ;;  %7098 = vmatpush1.msk.msra.mxu1 %vm17528_vm5, %v16313_v53  ;;  %vm17531_vm5 = vcmp.eq.s32.totalorder %v17389_v4, %v11223_v56  ;;  %17534 = vst [vmem:[#allocation129_spill] sm:$0xff] %v13289_v3  ;;  %v6480_v17 = vsel %vm16173_vm1, 1.0, %v17497_v25  ;;  %vm16174_vm2 = vcmp.eq.s32.totalorder %v17538_v61, %v11223_v56  ;;  %v16123_v15 = vand.u32 4294901760, %v13238_v44 }
 0x302   :  { %4736 = vmatpush2.msra.mxu0 %v17529_v19  ;;  %7099 = vmatprep.subr.msk.mxu1 %vm17531_vm5, %v16313_v53  ;;  %vm17535_vm5 = vcmp.eq.s32.totalorder %v17389_v4, %v11232_v22  ;;  %vm16129_vm13 = vcmp.eq.s32.totalorder %v17538_v61, %v11232_v22  ;;  %v17540_v4 = vld [vmem:[#allocation110_spill] sm:$0xff]  ;;  %v13320_v36 = vsub.f32 %v6487_v57, %v6487_v57  ;;  %v6479_v40 = vsel %vm16120_vm8, 1.0, %v17497_v25 }
 0x303   :  { %4740 = vmatprep.subr.mxu0 %v17533_v50  ;;  %7100 = vmatpush1.msk.msra.mxu1 %vm17535_vm5, %v16313_v53  ;;  %vm17539_vm5 = vcmp.eq.s32.totalorder %v17393_v1, %v11223_v56  ;;  %v17541_v12 = vand.u32 4294901760, %v17540_v4  ;;  %v13329_v43 = vsub.f32 %v13200_v35, %v16121_v42  ;;  %v16124_v37 = vand.u32 4294901760, %v13260_v33  ;;  %v17547_v4 = vld [vmem:[#allocation33_spill] sm:$0xff]  ;;  %v17557_v42 = vld [vmem:[#allocation88_spill] sm:$0xff] }
 0x304   :  { %4744 = vmatpush2.msra.mxu0 %v17537_v39  ;;  %7101 = vmatprep.subr.msk.mxu1 %vm17539_vm5, %v16313_v53  ;;  %17542 = vst [vmem:[#allocation8_spill] sm:$0xff] %v13320_v36  ;;  %v13332_v19 = vadd.f32 %v1678_v10, %v1285_v49  ;;  %vm17543_vm5 = vcmp.eq.s32.totalorder %v17393_v1, %v11232_v22  ;;  %v17544_v57 = vand.u32 4294901760, %v12170_v55  ;;  %v17549_v10 = vld [vmem:[#allocation111_spill] sm:$0xff]  ;;  %v6476_v1 = vsel %vm16174_vm2, 1.0, %v17497_v25  ;;  %v13402_v39 = vpop.f32.mrf.mxu1 }
 0x305   :  { %4748 = vmatprep.subr.mxu0 %v17541_v12  ;;  %7102 = vmatpush1.msk.msra.mxu1 %vm17543_vm5, %v16313_v53  ;;  %v13342_v50 = vsub.f32 %v6484_v54, %v6484_v54  ;;  %v13344_v52 = vsub.f32 %v6483_v2, %v6483_v2  ;;  %vm17548_vm8 = vcmp.eq.s32.totalorder %v17547_v4, %v11223_v56  ;;  %v17550_v49 = vand.u32 4294901760, %v17549_v10 }
 0x306   :  { %4752 = vmatpush2.msra.mxu0 %v17544_v57  ;;  %7103 = vmatprep.subr.msk.mxu1 %vm17548_vm8, %v16313_v53  ;;  %v13353_v12 = vsub.f32 %v6480_v17, %v6480_v17  ;;  %v6475_v55 = vsel %vm16129_vm13, 1.0, %v17497_v25  ;;  %v13368_v2 = vsel %vm16122_vm3, 1.0, %v17497_v25  ;;  %vm17553_vm8 = vcmp.eq.s32.totalorder %v17547_v4, %v11232_v22  ;;  %v17554_v17 = vld [vmem:[#allocation112_spill] sm:$0xff]  ;;  %v17559_v4 = vld [vmem:[#allocation113_spill] sm:$0xff]  ;;  %v2022_v35 = vpop.f32.mrf.mxu1 }
 0x307   :  { %17545 = vst [vmem:[#allocation132_spill] sm:$0xff] %v13342_v50  ;;  %17546 = vst [vmem:[#allocation134_spill] sm:$0xff] %v13344_v52  ;;  %4756 = vmatprep.subr.mxu0 %v17550_v49  ;;  %7104 = vmatpush1.msk.msra.mxu1 %vm17553_vm8, %v16313_v53  ;;  %v17555_v57 = vand.u32 4294901760, %v17554_v17  ;;  %v13376_v10 = vsub.f32 %v6479_v40, %v6479_v40  ;;  %v13381_v49 = vsub.f32 %v13238_v44, %v16123_v15  ;;  %v13400_v15 = vpop.f32.mrf.mxu0 }
 0x308   :  { %17551 = vst [vmem:[#allocation138_spill] sm:$0xff] %v13353_v12  ;;  %17552 = vst [vmem:[#allocation139_spill] sm:$0xff] %v13368_v2  ;;  %vm16130_vm5 = vcmp.eq.s32.totalorder %v17557_v42, %v11223_v56  ;;  %vm17558_vm3 = vcmp.eq.s32.totalorder %v17400_v30, %v11223_v56  ;;  %v17560_v54 = vand.u32 4294901760, %v17559_v4  ;;  %v13395_v40 = vsub.f32 %v13260_v33, %v16124_v37  ;;  %v17572_v33 = vld [vmem:[#allocation90_spill] sm:$0xff]  ;;  %v13505_v0 = vpop.f32.mrf.mxu1 }
 0x309   :  { %4760 = vmatpush2.msra.mxu0 %v17555_v57  ;;  %17556 = vst [vmem:[#allocation83_spill] sm:$0xff] %v13376_v10  ;;  %7105 = vmatprep.subr.msk.mxu1 %vm17558_vm3, %v16313_v53  ;;  %vm16178_vm8 = vcmp.eq.s32.totalorder %v17557_v42, %v11232_v22  ;;  %vm17561_vm3 = vcmp.eq.s32.totalorder %v17400_v30, %v11232_v22  ;;  %v17565_v17 = vand.u32 4294901760, %v13273_v47  ;;  %v17566_v30 = vld [vmem:[#allocation114_spill] sm:$0xff]  ;;  %v17591_v24 = vand.u32 4294901760, %v13353_v12 }
 0x30a   :  { %4764 = vmatprep.subr.mxu0 %v17560_v54  ;;  %7106 = vmatpush2.msk.msra.mxu1 %vm17561_vm3, %v16313_v53  ;;  %v17562_v54 = vand.u32 4294901760, %v12262_v18  ;;  %v13410_v4 = vsub.f32 %v6476_v1, %v6476_v1  ;;  %v13412_v37 = vsub.f32 %v6475_v55, %v6475_v55  ;;  %v17567_v44 = vand.u32 4294901760, %v17566_v30 }
 0x30b   :  { %v13417_v57 = vsub.f32 %v13273_v47, %v17565_v17  ;;  %7107 = vmatprep.subr.msk.mxu1 %vm481_vm15, %v16313_v53  ;;  %v6472_v18 = vsel %vm16130_vm5, 1.0, %v17497_v25  ;;  %v17568_v1 = vand.u32 4294901760, %v13289_v3  ;;  %v17569_v17 = vld [vmem:[#allocation89_spill] sm:$0xff]  ;;  %vm17570_vm15 = vcmp.eq.s32.totalorder %v17403_v13, %v11232_v22  ;;  %v17573_v13 = vld [vmem:[#allocation116_spill] sm:$0xff] }
 0x30c   :  { %4768 = vmatpush2.msra.mxu0 %v17562_v54  ;;  %17563 = vst [vmem:[#allocation140_spill] sm:$0xff] %v13410_v4  ;;  %17564 = vst [vmem:[#allocation71_spill] sm:$0xff] %v13412_v37  ;;  %vm16152_vm3 = vcmp.eq.s32.totalorder %v17569_v17, %v11223_v56  ;;  %vm16148_vm13 = vcmp.eq.s32.totalorder %v17569_v17, %v11232_v22  ;;  %v13439_v54 = vpop.f32.mrf.mxu0  ;;  %7108 = vmatpush2.msk.msra.mxu1 %vm17570_vm15, %v16313_v53  ;;  %v17575_v30 = vand.u32 4294901760, %v13320_v36 }
 0x30d   :  { %4772 = vmatprep.subr.mxu0 %v17567_v44  ;;  %v13433_v55 = vsub.f32 %v13289_v3, %v17568_v1  ;;  %v17571_v44 = vand.u32 4294901760, %v17406_v29  ;;  %v6471_v1 = vsel %vm16178_vm8, 1.0, %v17497_v25  ;;  %vm16141_vm5 = vcmp.eq.s32.totalorder %v17572_v33, %v11223_v56  ;;  %7109 = vmatprep.subr.msk.mxu1 %vm477_vm14, %v16313_v53 }
 0x30e   :  { %v17574_v29 = vand.u32 4294901760, %v17573_v13  ;;  %v13465_v47 = vsub.f32 %v13320_v36, %v17575_v30  ;;  %vm16147_vm15 = vcmp.eq.s32.totalorder %v17572_v33, %v11232_v22  ;;  %vm17576_vm14 = vcmp.eq.s32.totalorder %v17407_v7, %v11232_v22 }
 0x30f   :  { %4776 = vmatpush2.msra.mxu0 %v17571_v44  ;;  %7110 = vmatpush2.msk.msra.mxu1 %vm17576_vm14, %v16313_v53  ;;  %v17577_v13 = vand.u32 4294901760, %v12381_v27  ;;  %v6468_v30 = vsel %vm16152_vm3, 1.0, %v17497_v25  ;;  %v6467_v44 = vsel %vm16148_vm13, 1.0, %v17497_v25  ;;  %v17578_v3 = vand.u32 4294901760, %v13342_v50  ;;  %v17580_v27 = vld [vmem:[#allocation17_spill] sm:$0xff] }
 0x310   :  { %4780 = vmatprep.subr.mxu0 %v17574_v29  ;;  %v13476_v29 = vsub.f32 %v6472_v18, %v6472_v18  ;;  %vm17579_vm14 = vcmp.eq.s32.totalorder %v17409_v32, %v11223_v56  ;;  %v17581_v18 = vand.u32 4294901760, %v17580_v27  ;;  %v13498_v36 = vsub.f32 %v6471_v1, %v6471_v1 }
 0x311   :  { %4784 = vmatpush2.msra.mxu0 %v17577_v13  ;;  %v13489_v7 = vsub.f32 %v13342_v50, %v17578_v3  ;;  %7111 = vmatprep.subr.msk.mxu1 %vm17579_vm14, %v16313_v53  ;;  %v6464_v3 = vsel %vm16141_vm5, 1.0, %v17497_v25  ;;  %v2287_v50 = vpop.f32.mrf.mxu0  ;;  %vm17582_vm14 = vcmp.eq.s32.totalorder %v17409_v32, %v11232_v22  ;;  %v17583_v27 = vand.u32 4294901760, %v12427_v5  ;;  %v17585_v13 = vld [vmem:[#allocation91_spill] sm:$0xff]  ;;  %v17587_v32 = vld [vmem:[#allocation117_spill] sm:$0xff] }
 0x312   :  { %4788 = vmatprep.subr.mxu0 %v17581_v18  ;;  %7112 = vmatpush2.msk.msra.mxu1 %vm17582_vm14, %v16313_v53  ;;  %v17584_v1 = vand.u32 4294901760, %v13344_v52  ;;  %v6463_v2 = vsel %vm16147_vm15, 1.0, %v17497_v25  ;;  %vm16149_vm5 = vcmp.eq.s32.totalorder %v17585_v13, %v11223_v56  ;;  %vm17586_vm14 = vcmp.eq.s32.totalorder %v17412_v26, %v11223_v56 }
 0x313   :  { %4792 = vmatpush2.msra.mxu0 %v17583_v27  ;;  %7113 = vmatprep.subr.msk.mxu1 %vm17586_vm14, %v16313_v53  ;;  %v17588_v5 = vand.u32 4294901760, %v17587_v32  ;;  %v13531_v27 = vsub.f32 %v6468_v30, %v6468_v30  ;;  %v13539_v33 = vsub.f32 %v13353_v12, %v17591_v24  ;;  %v13541_v48 = vpop.f32.mrf.mxu0  ;;  %vm17592_vm14 = vcmp.eq.s32.totalorder %v17412_v26, %v11232_v22  ;;  %v2424_v30 = vpop.f32.mrf.mxu1 }
 0x314   :  { %v13516_v18 = vsub.f32 %v13344_v52, %v17584_v1  ;;  %v13534_v52 = vsub.f32 %v6467_v44, %v6467_v44  ;;  %7114 = vmatpush2.msk.msra.mxu1 %vm17592_vm14, %v16313_v53  ;;  %v17593_v32 = vand.u32 4294901760, %v12453_v45  ;;  %vm16204_vm15 = vcmp.eq.s32.totalorder %v17585_v13, %v11232_v22  ;;  %v17595_v44 = vld [vmem:[#allocation118_spill] sm:$0xff] }
 0x315   :  { %4796 = vmatprep.subr.mxu0 %v17588_v5  ;;  %17589 = vst [vmem:[#allocation12_spill] sm:$0xff] %v13531_v27  ;;  %v13550_v5 = vsub.f32 %v6464_v3, %v6464_v3  ;;  %vm17594_vm13 = vcmp.eq.s32.totalorder %v17415_v46, %v11223_v56  ;;  %v17596_v26 = vand.u32 4294901760, %v17595_v44  ;;  %v13561_v1 = vsub.f32 %v6463_v2, %v6463_v2  ;;  %v17598_v3 = vld [vmem:[#allocation92_spill] sm:$0xff] }
 0x316   :  { %17590 = vst [vmem:[#allocation18_spill] sm:$0xff] %v13534_v52  ;;  %4800 = vmatpush2.msra.mxu0 %v17593_v32  ;;  %7115 = vmatprep.subr.msk.mxu1 %vm17594_vm13, %v16313_v53  ;;  %v6460_v45 = vsel %vm16149_vm5, 1.0, %v17497_v25  ;;  %vm16192_vm14 = vcmp.eq.s32.totalorder %v17598_v3, %v11223_v56  ;;  %vm17599_vm13 = vcmp.eq.s32.totalorder %v17415_v46, %v11232_v22  ;;  %v17600_v44 = vand.u32 4294901760, %v12524_v23  ;;  %v17603_v23 = vld [vmem:[#allocation20_spill] sm:$0xff]  ;;  %v2569_v32 = vpop.f32.mrf.mxu0 }
 0x317   :  { %4804 = vmatprep.subr.mxu0 %v17596_v26  ;;  %17597 = vst [vmem:[#allocation43_spill] sm:$0xff] %v13561_v1  ;;  %7116 = vmatpush2.msk.msra.mxu1 %vm17599_vm13, %v16313_v53  ;;  %v17601_v26 = vand.u32 4294901760, %v13376_v10  ;;  %vm16195_vm5 = vcmp.eq.s32.totalorder %v17598_v3, %v11232_v22  ;;  %v1880_v12 = vadd.f32 %v13334_v21, %v13281_v11  ;;  %v6459_v2 = vsel %vm16204_vm15, 1.0, %v17497_v25  ;;  %v2960_v11 = vpop.f32.mrf.mxu1 }
 0x318   :  { %4808 = vmatpush2.msra.mxu0 %v17600_v44  ;;  %v1882_v46 = vadd.f32 %v13400_v15, %v13332_v19  ;;  %vm17602_vm13 = vcmp.eq.s32.totalorder %v17418_v58, %v11223_v56  ;;  %v17604_v44 = vand.u32 4294901760, %v17603_v23  ;;  %vm17605_vm3 = vcmp.eq.s32.totalorder %v17418_v58, %v11232_v22 }
 0x319   :  { %v13580_v24 = vsub.f32 %v13376_v10, %v17601_v26  ;;  %7117 = vmatprep.subr.msk.mxu1 %vm17602_vm13, %v16313_v53  ;;  %v17606_v15 = vand.u32 4294901760, %v12532_v34  ;;  %v13606_v19 = vsub.f32 %v6460_v45, %v6460_v45  ;;  %v17607_v21 = vand.u32 4294901760, %v13410_v4  ;;  %v17608_v26 = vld [vmem:[#allocation93_spill] sm:$0xff]  ;;  %v17609_v34 = vld [vmem:[#allocation119_spill] sm:$0xff] }
 0x31a   :  { %4812 = vmatprep.subr.mxu0 %v17604_v44  ;;  %7118 = vmatpush2.msk.msra.mxu1 %vm17605_vm3, %v16313_v53  ;;  %v6456_v44 = vsel %vm16192_vm14, 1.0, %v17497_v25  ;;  %vm16200_vm13 = vcmp.eq.s32.totalorder %v17608_v26, %v11223_v56  ;;  %v2021_v58 = vadd.f32 %v13402_v39, %v1880_v12  ;;  %v2023_v10 = vadd.f32 %v2022_v35, %v1882_v46  ;;  %v3163_v39 = vpop.f32.mrf.mxu0  ;;  %v17618_v12 = vld [vmem:[#allocation63_spill] sm:$0xff] }
 0x31b   :  { %4816 = vmatpush2.msra.mxu0 %v17606_v15  ;;  %v13611_v23 = vsub.f32 %v13410_v4, %v17607_v21  ;;  %7119 = vmatprep.subr.msk.mxu1 %vm457_vm12, %v16313_v53  ;;  %v17610_v45 = vand.u32 4294901760, %v17609_v34  ;;  %v17611_v15 = vand.u32 4294901760, %v13412_v37  ;;  %v6455_v4 = vsel %vm16195_vm5, 1.0, %v17497_v25 }
 0x31c   :  { %7120 = vmatpush2.msk.msra.mxu1 %vm456_vm9, %v16313_v53  ;;  %v17612_v35 = vand.u32 4294901760, %v12568_v31  ;;  %v13642_v46 = vsub.f32 %v6459_v2, %v6459_v2  ;;  %v17613_v34 = vand.u32 4294901760, %v13476_v29  ;;  %v2288_v3 = vadd.f32 %v2287_v50, %v2023_v10 }
 0x31d   :  { %4820 = vmatprep.subr.mxu0 %v17610_v45  ;;  %v13629_v21 = vsub.f32 %v13412_v37, %v17611_v15  ;;  %v2286_v37 = vadd.f32 %v13439_v54, %v2021_v58  ;;  %7121 = vmatprep.subr.msk.mxu1 %vm453_vm7, %v16313_v53  ;;  %v17615_v31 = vand.u32 4294901760, %v17614_v9  ;;  %v6452_v2 = vsel %vm16200_vm13, 1.0, %v17497_v25 }
 0x31e   :  { %4824 = vmatpush2.msra.mxu0 %v17612_v35  ;;  %v13647_v45 = vsub.f32 %v13476_v29, %v17613_v34  ;;  %vm16196_vm9 = vcmp.eq.s32.totalorder %v17608_v26, %v11232_v22  ;;  %v2962_v35 = vpop.f32.mrf.mxu1  ;;  %vm17616_vm12 = vcmp.eq.s32.totalorder %v17422_v28, %v11232_v22  ;;  %v17617_v50 = vand.u32 4294901760, %v12616_v16  ;;  %v17620_v28 = vld [vmem:[#allocation121_spill] sm:$0xff] }
 0x31f   :  { %4828 = vmatprep.subr.mxu0 %v17615_v31  ;;  %7122 = vmatpush2.msk.msra.mxu1 %vm17616_vm12, %v16313_v53  ;;  %v13670_v54 = vsub.f32 %v6456_v44, %v6456_v44  ;;  %v13672_v58 = vsub.f32 %v6455_v4, %v6455_v4  ;;  %v16160_v34 = vand.u32 4294901760, %v13531_v27  ;;  %v2423_v9 = vadd.f32 %v13505_v0, %v2286_v37  ;;  %v17622_v44 = vld [vmem:[#allocation21_spill] sm:$0xff]  ;;  %v3165_v4 = vpop.f32.mrf.mxu0  ;;  %v17624_v0 = vld [vmem:[#allocation23_spill] sm:$0xff] }
 0x320   :  { %4832 = vmatpush2.msra.mxu0 %v17617_v50  ;;  %v2425_v31 = vadd.f32 %v2424_v30, %v2288_v3  ;;  %vm17619_vm7 = vcmp.eq.s32.totalorder %v17618_v12, %v11223_v56  ;;  %v17621_v15 = vand.u32 4294901760, %v17620_v28  ;;  %vm16197_vm3 = vcmp.eq.s32.totalorder %v17622_v44, %v11223_v56  ;;  %v3304_v50 = vpop.f32.mrf.mxu1 }
 0x321   :  { %7123 = vmatprep.subr.msk.mxu1 %vm17619_vm7, %v16313_v53  ;;  %vm17623_vm12 = vcmp.eq.s32.totalorder %v17618_v12, %v11232_v22  ;;  %v17625_v37 = vand.u32 4294901760, %v17624_v0  ;;  %v13691_v30 = vsub.f32 %v6452_v2, %v6452_v2  ;;  %v6451_v3 = vsel %vm16196_vm9, 1.0, %v17497_v25  ;;  %v17628_v12 = vld [vmem:[#allocation123_spill] sm:$0xff]  ;;  %v17632_v0 = vld [vmem:[#allocation9_spill] sm:$0xff] }
 0x322   :  { %4836 = vmatprep.subr.mxu0 %v17621_v15  ;;  %7124 = vmatpush2.msk.msra.mxu1 %vm17623_vm12, %v16313_v53  ;;  %vm16161_vm7 = vcmp.eq.s32.totalorder %v17622_v44, %v11232_v22  ;;  %v2568_v28 = vadd.f32 %v13541_v48, %v2423_v9  ;;  %v2570_v16 = vadd.f32 %v2569_v32, %v2425_v31  ;;  %v17629_v2 = vand.u32 4294901760, %v17628_v12  ;;  %v3569_v32 = vpop.f32.mrf.mxu0  ;;  %v3306_v15 = vpop.f32.mrf.mxu1  ;;  %v17635_v12 = vld [vmem:[#allocation13_spill] sm:$0xff] }
 0x323   :  { %4840 = vmatpush2.msra.mxu0 %v17625_v37  ;;  %17626 = vst [vmem:[#allocation44_spill] sm:$0xff] %v13691_v30  ;;  %vm17627_vm12 = vcmp.eq.s32.totalorder %v17427_v62, %v11223_v56  ;;  %v17630_v37 = vand.u32 4294901760, %v13498_v36  ;;  %v17631_v48 = vand.u32 4294901760, %v12664_v41  ;;  %v13722_v9 = vsub.f32 %v13531_v27, %v16160_v34  ;;  %4850 = vmatprep.mubr.f32.mxu0 %v17632_v0 }
 0x324   :  { %7125 = vmatprep.subr.msk.mxu1 %vm17627_vm12, %v16313_v53  ;;  %4844 = vmatprep.subr.mxu0 %v17629_v2  ;;  %v6448_v31 = vsel %vm16197_vm3, 1.0, %v17497_v25  ;;  %v2961_v62 = vadd.f32 %v2960_v11, %v2568_v28  ;;  %v6447_v34 = vsel %vm16161_vm7, 1.0, %v17497_v25  ;;  %v17636_v11 = vand.u32 4294901760, %v13534_v52 }
 0x325   :  { %v13711_v10 = vsub.f32 %v13498_v36, %v17630_v37  ;;  %7126 = vmatpush2.msk.msra.mxu1 %vm444_vm0, %v16313_v53  ;;  %4848 = vmatpush2.msra.mxu0 %v17631_v48  ;;  %v2963_v37 = vadd.f32 %v2962_v35, %v2570_v16  ;;  %v13735_v48 = vsub.f32 %v6451_v3, %v6451_v3  ;;  %v17637_v16 = vld [vmem:[#allocation94_spill] sm:$0xff]  ;;  %v17644_v41 = vand.u32 4294901760, %v13561_v1 }
 0x326   :  { %7127 = vmatprep.subr.msk.mxu1 %vm441_vm10, %v16313_v53  ;;  %4852 = vmatmul.mubr.f32.vlgmr.msra.gmra.mxu0 %v17635_v12  ;;  %v13749_v35 = vsub.f32 %v13534_v52, %v17636_v11  ;;  %vm16212_vm10 = vcmp.eq.s32.totalorder %v17637_v16, %v11223_v56  ;;  %vm16169_vm0 = vcmp.eq.s32.totalorder %v17637_v16, %v11232_v22 }
 0x327   :  { %17634 = vst [vmem:[#allocation47_spill] sm:$0xff] %v13735_v48  ;;  %7128 = vmatpush2.msk.msra.mxu1 %vm440_vm4, %v16313_v53  ;;  %v3164_v28 = vadd.f32 %v3163_v39, %v2961_v62  ;;  %v3166_v2 = vadd.f32 %v3165_v4, %v2963_v37  ;;  %7137 = vmatprep.subr.msk.mxu0 %vm16168_vm11, %v16313_v53  ;;  %v3571_v39 = vpop.f32.mrf.mxu0  ;;  %v17643_v37 = vand.u32 4294901760, %v13550_v5 }
 0x328   :  { %vm17638_vm4 = vcmp.eq.s32.totalorder %v17300_v51, %v11223_v56  ;;  %v13765_v11 = vsub.f32 %v6448_v31, %v6448_v31  ;;  %vm17640_vm12 = vcmp.eq.s32.totalorder %v17488_v20, %v11232_v22  ;;  %vm17641_vm7 = vcmp.eq.s32.totalorder %v17300_v51, %v11232_v22  ;;  %4987 = vmatprep.mubr.f32.mxu1 %v17632_v0 }
 0x329   :  { %7129 = vmatprep.subr.msk.mxu1 %vm17638_vm4, %v16313_v53  ;;  %7138 = vmatpush1.msk.msra.mxu0 %vm17640_vm12, %v16313_v53  ;;  %v13776_v62 = vsub.f32 %v6447_v34, %v6447_v34  ;;  %v13781_v31 = vsub.f32 %v13550_v5, %v17643_v37  ;;  %v13786_v3 = vsub.f32 %v13561_v1, %v17644_v41  ;;  %v6444_v51 = vsel %vm16212_vm10, 1.0, %v17497_v25  ;;  %v17650_v41 = vld [vmem:[#allocation95_spill] sm:$0xff] }
 0x32a   :  { %17639 = vst [vmem:[#allocation50_spill] sm:$0xff] %v13765_v11  ;;  %7130 = vmatpush2.msk.msra.mxu1 %vm17641_vm7, %v16313_v53  ;;  %v3305_v52 = vadd.f32 %v3304_v50, %v3164_v28  ;;  %v3307_v27 = vadd.f32 %v3306_v15, %v3166_v2  ;;  %vm17645_vm7 = vcmp.eq.s32.totalorder %v17501_v14, %v11223_v56  ;;  %v6443_v34 = vsel %vm16169_vm0, 1.0, %v17497_v25  ;;  %v3706_v50 = vpop.f32.mrf.mxu1 }
 0x32b   :  { %17642 = vst [vmem:[#allocation52_spill] sm:$0xff] %v13776_v62  ;;  %7139 = vmatprep.subr.msk.mxu0 %vm17645_vm7, %v16313_v53  ;;  %vm17646_vm4 = vcmp.eq.s32.totalorder %v17435_v8, %v11223_v56  ;;  %vm17647_vm12 = vcmp.eq.s32.totalorder %v17501_v14, %v11232_v22  ;;  %vm17648_vm7 = vcmp.eq.s32.totalorder %v17435_v8, %v11232_v22  ;;  %v17649_v2 = vand.u32 4294901760, %v13606_v19 }
 0x32c   :  { %7131 = vmatprep.subr.msk.mxu1 %vm17646_vm4, %v16313_v53  ;;  %7140 = vmatpush1.msk.msra.mxu0 %vm17647_vm12, %v16313_v53  ;;  %vm16211_vm4 = vcmp.eq.s32.totalorder %v17650_v41, %v11223_v56  ;;  %v16171_v37 = vand.u32 4294901760, %v13642_v46  ;;  %v3570_v4 = vadd.f32 %v3569_v32, %v3305_v52  ;;  %v3572_v1 = vadd.f32 %v3571_v39, %v3307_v27  ;;  %v3708_v52 = vpop.f32.mrf.mxu1 }
 0x32d   :  { %7132 = vmatpush2.msk.msra.mxu1 %vm17648_vm7, %v16313_v53  ;;  %v13816_v28 = vsub.f32 %v13606_v19, %v17649_v2  ;;  %vm17651_vm12 = vcmp.eq.s32.totalorder %v17509_v38, %v11223_v56  ;;  %vm17652_vm7 = vcmp.eq.s32.totalorder %v17438_v60, %v11223_v56  ;;  %vm16209_vm11 = vcmp.eq.s32.totalorder %v17650_v41, %v11232_v22 }
 0x32e   :  { %7141 = vmatprep.subr.msk.mxu0 %vm17651_vm12, %v16313_v53  ;;  %7133 = vmatprep.subr.msk.mxu1 %vm17652_vm7, %v16313_v53  ;;  %v16172_v8 = vand.u32 4294901760, %v13670_v54  ;;  %vm17653_vm0 = vcmp.eq.s32.totalorder %v17438_v60, %v11232_v22  ;;  %v13841_v32 = vsub.f32 %v6444_v51, %v6444_v51  ;;  %v13844_v2 = vsub.f32 %v6443_v34, %v6443_v34  ;;  %v17658_v34 = vld [vmem:[#allocation96_spill] sm:$0xff] }
 0x32f   :  { %7142 = vmatpush1.msk.msra.mxu0 %vm16170_vm6, %v16313_v53  ;;  %7134 = vmatpush2.msk.msra.mxu1 %vm17653_vm0, %v16313_v53  ;;  %vm17656_vm12 = vcmp.eq.s32.totalorder %v17520_v63, %v11223_v56  ;;  %vm17657_vm7 = vcmp.eq.s32.totalorder %v17442_v6, %v11223_v56  ;;  %v3707_v60 = vadd.f32 %v3706_v50, %v3570_v4  ;;  %v6440_v51 = vsel %vm16211_vm4, 1.0, %v17497_v25  ;;  %v1141_v4 = vld [vmem:[#allocation5] sm:$0xff] }
 0x330   :  { %17654 = vst [vmem:[#allocation16_spill] sm:$0xff] %v13841_v32  ;;  %17655 = vst [vmem:[#allocation53_spill] sm:$0xff] %v13844_v2  ;;  %7143 = vmatprep.subr.msk.mxu0 %vm17656_vm12, %v16313_v53  ;;  %7135 = vmatprep.subr.msk.mxu1 %vm17657_vm7, %v16313_v53  ;;  %v3709_v15 = vadd.f32 %v3708_v52, %v3572_v1  ;;  %vm16210_vm0 = vcmp.eq.s32.totalorder %v17658_v34, %v11223_v56  ;;  %v6439_v50 = vsel %vm16209_vm11, 1.0, %v17497_v25 }
 0x331   :  { %vm17659_vm6 = vcmp.eq.s32.totalorder %v17520_v63, %v11232_v22  ;;  %vm17660_vm12 = vcmp.eq.s32.totalorder %v17442_v6, %v11232_v22  ;;  %v13871_v1 = vsub.f32 %v13642_v46, %v16171_v37  ;;  %v13888_v27 = vsub.f32 %v13670_v54, %v16172_v8 }
 0x332   :  { %7144 = vmatpush1.msk.msra.mxu0 %vm17659_vm6, %v16313_v53  ;;  %7136 = vmatpush2.msk.msra.mxu1 %vm17660_vm12, %v16313_v53  ;;  %v6283_v6 = vcombine.low %v3707_v60, %v3709_v15  ;;  %vm16213_vm6 = vcmp.eq.s32.totalorder %v17658_v34, %v11232_v22  ;;  %vm17661_vm7 = vcmp.eq.s32.totalorder %v17526_v59, %v11232_v22  ;;  %v6436_v15 = vsel %vm16210_vm0, 1.0, %v17497_v25  ;;  %v17663_v60 = vld [vmem:[#allocation97_spill] sm:$0xff] }
 0x333   :  { %7145 = vmatprep.subr.msk.mxu0 %vm16173_vm1, %v16313_v53  ;;  %4989 = vmatmul.mubr.f32.vlgmr.msra.gmra.mxu1 %v17635_v12  ;;  %v13897_v0 = vsub.f32 %v6440_v51, %v6440_v51  ;;  %vm16180_vm12 = vcmp.eq.s32.totalorder %v17663_v60, %v11223_v56  ;;  %v16175_v8 = vand.u32 4294901760, %v13735_v48  ;;  %v17664_v37 = vand.u32 4294901760, %v13329_v43 }
 0x334   :  { %7146 = vmatpush1.msk.msra.mxu0 %vm17661_vm7, %v16313_v53  ;;  %v6287_v12 = vadd.f32 %v6283_v6, %v1141_v4  ;;  %v13912_v51 = vsub.f32 %v6439_v50, %v6439_v50  ;;  %vm16179_vm7 = vcmp.eq.s32.totalorder %v17663_v60, %v11232_v22  ;;  %v17665_v52 = vand.u32 4294901760, %v13381_v49 }
 0x335   :  { %17662 = vst [vmem:[#allocation56_spill] sm:$0xff] %v13897_v0  ;;  %5145 = vmatprep.subr.mxu1 %v17664_v37  ;;  %7147 = vmatprep.subr.msk.mxu0 %vm16174_vm2, %v16313_v53  ;;  %vm17666_vm1 = vcmp.eq.s32.totalorder %v17538_v61, %v11232_v22  ;;  %v17667_v37 = vand.u32 4294901760, %v13672_v58  ;;  %v6435_v50 = vsel %vm16213_vm6, 1.0, %v17497_v25  ;;  %v17668_v49 = vand.u32 4294901760, %v13691_v30 }
 0x336   :  { %5151 = vmatpush1.msra.mxu1 %v17665_v52  ;;  %7148 = vmatpush1.msk.msra.mxu0 %vm17666_vm1, %v16313_v53  ;;  %6289 = vst [vmem:[#allocation5] sm:$0xff] %v6287_v12  ;;  %v17669_v6 = vand.u32 4294901760, %v13395_v40  ;;  %vm17670_vm1 = vcmp.eq.s32.totalorder %v17557_v42, %v11223_v56  ;;  %v13945_v43 = vsub.f32 %v6436_v15, %v6436_v15  ;;  %v6560_v39 = vsel %vm16180_vm12, 1.0, %v17497_v25 }
 0x337   :  { %v13927_v4 = vsub.f32 %v13672_v58, %v17667_v37  ;;  %v13936_v52 = vsub.f32 %v13691_v30, %v17668_v49  ;;  %7149 = vmatprep.subr.msk.mxu0 %vm17670_vm1, %v16313_v53  ;;  %v17672_v49 = vld [vmem:[#allocation98_spill] sm:$0xff]  ;;  %v17673_v40 = vand.u32 4294901760, %v13417_v57  ;;  %v13962_v15 = vsub.f32 %v13735_v48, %v16175_v8 }
 0x338   :  { %5157 = vmatprep.subr.mxu1 %v17669_v6  ;;  %17671 = vst [vmem:[#allocation19_spill] sm:$0xff] %v13945_v43  ;;  %vm16183_vm2 = vcmp.eq.s32.totalorder %v17672_v49, %v11223_v56  ;;  %7150 = vmatpush1.msk.msra.mxu0 %vm16178_vm8, %v16313_v53  ;;  %v6559_v12 = vsel %vm16179_vm7, 1.0, %v17497_v25  ;;  %vm17675_vm1 = vcmp.eq.s32.totalorder %v17569_v17, %v11223_v56  ;;  %v17677_v8 = vand.u32 4294901760, %v13765_v11  ;;  %v17680_v6 = vld [vmem:[#allocation99_spill] sm:$0xff] }
 0x339   :  { %5163 = vmatpush1.msra.mxu1 %v17673_v40  ;;  %v17674_v40 = vand.u32 4294901760, %v13433_v55  ;;  %7151 = vmatprep.subr.msk.mxu0 %vm17675_vm1, %v16313_v53  ;;  %v13976_v37 = vsub.f32 %v6435_v50, %v6435_v50  ;;  %vm608_vm8 = vcmp.eq.s32.totalorder %v17672_v49, %v11232_v22  ;;  %v17678_v55 = vand.u32 4294901760, %v13465_v47 }
 0x33a   :  { %v13981_v48 = vsub.f32 %v13765_v11, %v17677_v8  ;;  %vm17679_vm7 = vcmp.eq.s32.totalorder %v17569_v17, %v11232_v22  ;;  %v6556_v8 = vsel %vm16183_vm2, 1.0, %v17497_v25  ;;  %vm605_vm1 = vcmp.eq.s32.totalorder %v17680_v6, %v11223_v56 }
 0x33b   :  { %5169 = vmatprep.subr.mxu1 %v17674_v40  ;;  %17676 = vst [vmem:[#allocation58_spill] sm:$0xff] %v13976_v37  ;;  %7152 = vmatpush1.msk.msra.mxu0 %vm17679_vm7, %v16313_v53  ;;  %v17681_v47 = vand.u32 4294901760, %v13489_v7  ;;  %v14006_v57 = vsub.f32 %v6560_v39, %v6560_v39  ;;  %v14008_v50 = vsub.f32 %v6559_v12, %v6559_v12  ;;  %v17686_v11 = vand.u32 4294901760, %v13516_v18 }
 0x33c   :  { %5175 = vmatpush1.msra.mxu1 %v17678_v55  ;;  %v17682_v55 = vld [vmem:[#allocation90_spill] sm:$0xff]  ;;  %vm16221_vm7 = vcmp.eq.s32.totalorder %v17680_v6, %v11232_v22  ;;  %v17688_v39 = vand.u32 4294901760, %v13776_v62  ;;  %v17689_v18 = vand.u32 4294901760, %v13841_v32  ;;  %v17690_v40 = vand.u32 4294901760, %v13539_v33 }
 0x33d   :  { %5181 = vmatprep.subr.mxu1 %v17681_v47  ;;  %vm17683_vm12 = vcmp.eq.s32.totalorder %v17682_v55, %v11223_v56  ;;  %17684 = vst [vmem:[#allocation59_spill] sm:$0xff] %v14006_v57  ;;  %17685 = vst [vmem:[#allocation61_spill] sm:$0xff] %v14008_v50  ;;  %vm17687_vm2 = vcmp.eq.s32.totalorder %v17682_v55, %v11232_v22  ;;  %v6555_v47 = vsel %vm608_vm8, 1.0, %v17497_v25  ;;  %v6552_v55 = vsel %vm605_vm1, 1.0, %v17497_v25 }
 0x33e   :  { %7153 = vmatprep.subr.msk.mxu0 %vm17683_vm12, %v16313_v53  ;;  %5187 = vmatpush1.msra.mxu1 %v17686_v11  ;;  %v14023_v12 = vsub.f32 %v13776_v62, %v17688_v39  ;;  %v14032_v11 = vsub.f32 %v13841_v32, %v17689_v18  ;;  %v14041_v7 = vsub.f32 %v6556_v8, %v6556_v8  ;;  %v17693_v18 = vand.u32 4294901760, %v13844_v2  ;;  %v17695_v8 = vld [vmem:[#allocation100_spill] sm:$0xff] }
 0x33f   :  { %7154 = vmatpush1.msk.msra.mxu0 %vm17687_vm2, %v16313_v53  ;;  %5193 = vmatprep.subr.mxu1 %v17690_v40  ;;  %vm17691_vm2 = vcmp.eq.s32.totalorder %v17585_v13, %v11223_v56  ;;  %v17694_v33 = vand.u32 4294901760, %v13580_v24  ;;  %v6551_v40 = vsel %vm16221_vm7, 1.0, %v17497_v25  ;;  %vm16224_vm12 = vcmp.eq.s32.totalorder %v17695_v8, %v11223_v56 }
 0x340   :  { %7155 = vmatprep.subr.msk.mxu0 %vm17691_vm2, %v16313_v53  ;;  %17692 = vst [vmem:[#allocation105_spill] sm:$0xff] %v14041_v7  ;;  %v14050_v32 = vsub.f32 %v13844_v2, %v17693_v18  ;;  %v17696_v24 = vand.u32 4294901760, %v13611_v23  ;;  %v14072_v13 = vsub.f32 %v6555_v47, %v6555_v47  ;;  %v17699_v2 = vand.u32 4294901760, %v13897_v0 }
 0x341   :  { %5199 = vmatpush1.msra.mxu1 %v17694_v33  ;;  %7156 = vmatpush1.msk.msra.mxu0 %vm16204_vm15, %v16313_v53  ;;  %v17697_v33 = vld [vmem:[#allocation92_spill] sm:$0xff]  ;;  %vm16223_vm2 = vcmp.eq.s32.totalorder %v17695_v8, %v11232_v22  ;;  %v16199_v18 = vand.u32 4294901760, %v13976_v37  ;;  %v17700_v23 = vand.u32 4294901760, %v13629_v21  ;;  %v14090_v39 = vsub.f32 %v6552_v55, %v6552_v55 }
 0x342   :  { %5205 = vmatprep.subr.mxu1 %v17696_v24  ;;  %7157 = vmatprep.subr.msk.mxu0 %vm16192_vm14, %v16313_v53  ;;  %17698 = vst [vmem:[#allocation62_spill] sm:$0xff] %v14072_v13  ;;  %v14077_v62 = vsub.f32 %v13897_v0, %v17699_v2  ;;  %v17702_v2 = vld [vmem:[#allocation101_spill] sm:$0xff]  ;;  %v17703_v0 = vand.u32 4294901760, %v13647_v45  ;;  %v14100_v21 = vsub.f32 %v6551_v40, %v6551_v40  ;;  %v17704_v45 = vand.u32 4294901760, %v13711_v10 }
 0x343   :  { %5211 = vmatpush1.msra.mxu1 %v17700_v23  ;;  %7158 = vmatpush1.msk.msra.mxu0 %vm16195_vm5, %v16313_v53  ;;  %17701 = vst [vmem:[#allocation24_spill] sm:$0xff] %v14090_v39  ;;  %vm16225_vm14 = vcmp.eq.s32.totalorder %v17702_v2, %v11223_v56  ;;  %v6548_v23 = vsel %vm16224_vm12, 1.0, %v17497_v25  ;;  %vm16227_vm5 = vcmp.eq.s32.totalorder %v17702_v2, %v11232_v22  ;;  %v17705_v40 = vand.u32 4294901760, %v13912_v51 }
 0x344   :  { %5217 = vmatprep.subr.mxu1 %v17703_v0  ;;  %7159 = vmatprep.subr.msk.mxu0 %vm16200_vm13, %v16313_v53  ;;  %v6547_v47 = vsel %vm16223_vm2, 1.0, %v17497_v25  ;;  %v17706_v10 = vand.u32 4294901760, %v13945_v43  ;;  %v17707_v55 = vand.u32 4294901760, %v13722_v9  ;;  %v6544_v0 = vsel %vm16225_vm14, 1.0, %v17497_v25  ;;  %v17708_v9 = vld [vmem:[#allocation102_spill] sm:$0xff] }
 0x345   :  { %5223 = vmatpush1.msra.mxu1 %v17704_v45  ;;  %7160 = vmatpush1.msk.msra.mxu0 %vm16196_vm9, %v16313_v53  ;;  %v14119_v24 = vsub.f32 %v13912_v51, %v17705_v40  ;;  %vm593_vm9 = vcmp.eq.s32.totalorder %v17708_v9, %v11223_v56  ;;  %v14154_v40 = vsub.f32 %v6548_v23, %v6548_v23  ;;  %v6543_v26 = vsel %vm16227_vm5, 1.0, %v17497_v25 }
 0x346   :  { %v14128_v45 = vsub.f32 %v13945_v43, %v17706_v10  ;;  %5229 = vmatprep.subr.mxu1 %v17707_v55  ;;  %7161 = vmatprep.subr.msk.mxu0 %vm16197_vm3, %v16313_v53  ;;  %v14144_v10 = vsub.f32 %v13976_v37, %v16199_v18  ;;  %v17709_v55 = vand.u32 4294901760, %v13749_v35  ;;  %vm17710_vm3 = vcmp.eq.s32.totalorder %v17622_v44, %v11232_v22  ;;  %v17715_v37 = vld [vmem:[#allocation103_spill] sm:$0xff] }
 0x347   :  { %7162 = vmatpush1.msk.msra.mxu0 %vm17710_vm3, %v16313_v53  ;;  %17711 = vst [vmem:[#allocation84_spill] sm:$0xff] %v14154_v40  ;;  %vm592_vm13 = vcmp.eq.s32.totalorder %v17708_v9, %v11232_v22  ;;  %v17712_v35 = vand.u32 4294901760, %v13781_v31  ;;  %v14169_v23 = vsub.f32 %v6547_v47, %v6547_v47  ;;  %vm16229_vm3 = vcmp.eq.s32.totalorder %v17715_v37, %v11223_v56 }
 0x348   :  { %5235 = vmatpush1.msra.mxu1 %v17709_v55  ;;  %7163 = vmatprep.subr.msk.mxu0 %vm16212_vm10, %v16313_v53  ;;  %v17714_v55 = vand.u32 4294901760, %v14006_v57  ;;  %v17716_v31 = vand.u32 4294901760, %v13786_v3  ;;  %vm17717_vm15 = vcmp.eq.s32.totalorder %v17637_v16, %v11232_v22  ;;  %v14187_v43 = vsub.f32 %v6544_v0, %v6544_v0  ;;  %v17726_v16 = vld [vmem:[#allocation40_spill] sm:$0xff] }
 0x349   :  { %5241 = vmatprep.subr.mxu1 %v17712_v35  ;;  %17713 = vst [vmem:[#allocation27_spill] sm:$0xff] %v14169_v23  ;;  %7164 = vmatpush1.msk.msra.mxu0 %vm17717_vm15, %v16313_v53  ;;  %v17719_v18 = vand.u32 4294901760, %v13816_v28  ;;  %v6539_v0 = vsel %vm592_vm13, 1.0, %v17497_v25  ;;  %v17721_v47 = vand.u32 4294901760, %v13871_v1  ;;  %v17722_v28 = vand.u32 4294901760, %v14008_v50 }
 0x34a   :  { %v14174_v44 = vsub.f32 %v14006_v57, %v17714_v55  ;;  %5247 = vmatpush1.msra.mxu1 %v17716_v31  ;;  %17718 = vst [vmem:[#allocation28_spill] sm:$0xff] %v14187_v43  ;;  %v6540_v55 = vsel %vm593_vm9, 1.0, %v17497_v25  ;;  %7165 = vmatprep.subr.msk.mxu0 %vm16211_vm4, %v16313_v53  ;;  %v14200_v31 = vsub.f32 %v6543_v26, %v6543_v26  ;;  %v17725_v35 = vand.u32 4294901760, %v14041_v7 }
 0x34b   :  { %5253 = vmatprep.subr.mxu1 %v17719_v18  ;;  %7166 = vmatpush1.msk.msra.mxu0 %vm16209_vm11, %v16313_v53  ;;  %v14216_v26 = vsub.f32 %v14008_v50, %v17722_v28  ;;  %v6536_v18 = vsel %vm16229_vm3, 1.0, %v17497_v25  ;;  %vm588_vm15 = vcmp.eq.s32.totalorder %v17715_v37, %v11232_v22  ;;  %v14232_v3 = vsub.f32 %v6540_v55, %v6540_v55 }
 0x34c   :  { %17720 = vst [vmem:[#allocation29_spill] sm:$0xff] %v14200_v31  ;;  %5259 = vmatpush1.msra.mxu1 %v17721_v47  ;;  %v17723_v47 = vand.u32 4294901760, %v13888_v27  ;;  %7167 = vmatprep.subr.msk.mxu0 %vm16210_vm0, %v16313_v53  ;;  %v14237_v41 = vsub.f32 %v14041_v7, %v17725_v35  ;;  %vm16238_vm11 = vcmp.eq.s32.totalorder %v17726_v16, %v11223_v56  ;;  %v17727_v27 = vand.u32 4294901760, %v13927_v4  ;;  %v17728_v35 = vld [vmem:[#allocation46_spill] sm:$0xff] }
 0x34d   :  { %17724 = vst [vmem:[#allocation30_spill] sm:$0xff] %v14232_v3  ;;  %7168 = vmatpush1.msk.msra.mxu0 %vm16213_vm6, %v16313_v53  ;;  %vm16239_vm0 = vcmp.eq.s32.totalorder %v17726_v16, %v11232_v22  ;;  %vm16240_vm4 = vcmp.eq.s32.totalorder %v17728_v35, %v11223_v56  ;;  %v17729_v28 = vand.u32 4294901760, %v13936_v52  ;;  %vm17730_vm10 = vcmp.eq.s32.totalorder %v17663_v60, %v11223_v56  ;;  %v17779_v16 = vld [vmem:[#allocation126_spill] sm:$0xff] }
 0x34e   :  { %5265 = vmatprep.subr.mxu1 %v17723_v47  ;;  %7169 = vmatprep.subr.msk.mxu0 %vm17730_vm10, %v16313_v53  ;;  %v14259_v4 = vsub.f32 %v6539_v0, %v6539_v0  ;;  %v17733_v47 = vand.u32 4294901760, %v14072_v13  ;;  %v6535_v52 = vsel %vm588_vm15, 1.0, %v17497_v25  ;;  %vm17735_vm10 = vcmp.eq.s32.totalorder %v17663_v60, %v11232_v22 }
 0x34f   :  { %5271 = vmatpush1.msra.mxu1 %v17727_v27  ;;  %v14261_v27 = vsub.f32 %v6536_v18, %v6536_v18  ;;  %7170 = vmatpush2.msk.msra.mxu0 %vm17735_vm10, %v16313_v53  ;;  %v5342_v0 = vand.u32 4294901760, %v14216_v26  ;;  %v17736_v18 = vand.u32 4294901760, %v14090_v39  ;;  %v6532_v55 = vsel %vm16238_vm11, 1.0, %v17497_v25 }
 0x350   :  { %5277 = vmatprep.subr.mxu1 %v17729_v28  ;;  %17731 = vst [vmem:[#allocation31_spill] sm:$0xff] %v14259_v4  ;;  %v14266_v1 = vsub.f32 %v14072_v13, %v17733_v47  ;;  %v17734_v28 = vand.u32 4294901760, %v13962_v15  ;;  %vm16241_vm6 = vcmp.eq.s32.totalorder %v17728_v35, %v11232_v22  ;;  %v17737_v15 = vand.u32 4294901760, %v13981_v48 }
 0x351   :  { %17732 = vst [vmem:[#allocation32_spill] sm:$0xff] %v14261_v27  ;;  %v14282_v47 = vsub.f32 %v14090_v39, %v17736_v18  ;;  %vm17738_vm10 = vcmp.eq.s32.totalorder %v17672_v49, %v11223_v56  ;;  %v6531_v26 = vsel %vm16239_vm0, 1.0, %v17497_v25  ;;  %v5348_v60 = vand.u32 4294901760, %v14237_v41 }
 0x352   :  { %5283 = vmatpush1.msra.mxu1 %v17734_v28  ;;  %7171 = vmatprep.subr.msk.mxu0 %vm17738_vm10, %v16313_v53  ;;  %v6528_v28 = vsel %vm16240_vm4, 1.0, %v17497_v25  ;;  %v14313_v34 = vsub.f32 %v6535_v52, %v6535_v52  ;;  %v17741_v39 = vand.u32 4294901760, %v14100_v21  ;;  %v17742_v18 = vand.u32 4294901760, %v14154_v40 }
 0x353   :  { %5289 = vmatprep.subr.mxu1 %v17737_v15  ;;  %v17739_v15 = vand.u32 4294901760, %v14023_v12  ;;  %7172 = vmatpush2.msk.msra.mxu0 %vm608_vm8, %v16313_v53  ;;  %v17743_v12 = vand.u32 4294901760, %v14032_v11  ;;  %v5354_v41 = vand.u32 4294901760, %v14266_v1  ;;  %v14332_v52 = vsub.f32 %v6532_v55, %v6532_v55 }
 0x354   :  { %17740 = vst [vmem:[#allocation36_spill] sm:$0xff] %v14313_v34  ;;  %v14318_v13 = vsub.f32 %v14100_v21, %v17741_v39  ;;  %v14323_v48 = vsub.f32 %v14154_v40, %v17742_v18  ;;  %7173 = vmatprep.subr.msk.mxu0 %vm605_vm1, %v16313_v53  ;;  %v6527_v39 = vsel %vm16241_vm6, 1.0, %v17497_v25  ;;  %v5360_v11 = vand.u32 4294901760, %v14282_v47 }
 0x355   :  { %5295 = vmatpush1.msra.mxu1 %v17739_v15  ;;  %17744 = vst [vmem:[#allocation39_spill] sm:$0xff] %v14332_v52  ;;  %v17745_v15 = vand.u32 4294901760, %v14050_v32  ;;  %7174 = vmatpush2.msk.msra.mxu0 %vm16221_vm7, %v16313_v53  ;;  %v14346_v1 = vsub.f32 %v6531_v26, %v6531_v26  ;;  %v14348_v55 = vsub.f32 %v6528_v28, %v6528_v28  ;;  %v17748_v49 = vand.u32 4294901760, %v14077_v62 }
 0x356   :  { %5301 = vmatprep.subr.mxu1 %v17743_v12  ;;  %v17747_v12 = vld [vmem:[#allocation49_spill] sm:$0xff]  ;;  %7175 = vmatprep.subr.msk.mxu0 %vm16224_vm12, %v16313_v53  ;;  %v17749_v32 = vand.u32 4294901760, %v14169_v23  ;;  %v17750_v47 = vand.u32 4294901760, %v14187_v43  ;;  %v5366_v28 = vand.u32 4294901760, %v14318_v13  ;;  %v14379_v18 = vsub.f32 %v6527_v39, %v6527_v39  ;;  %v17754_v39 = vld [vmem:[#allocation55_spill] sm:$0xff] }
 0x357   :  { %5307 = vmatpush1.msra.mxu1 %v17745_v15  ;;  %17746 = vst [vmem:[#allocation115_spill] sm:$0xff] %v14348_v55  ;;  %vm577_vm10 = vcmp.eq.s32.totalorder %v17747_v12, %v11223_v56  ;;  %vm16243_vm7 = vcmp.eq.s32.totalorder %v17747_v12, %v11232_v22  ;;  %7176 = vmatpush2.msk.msra.mxu0 %vm16223_vm2, %v16313_v53  ;;  %v17752_v6 = vand.u32 4294901760, %v14128_v45  ;;  %v17753_v13 = vand.u32 4294901760, %v14200_v31 }
 0x358   :  { %5313 = vmatprep.subr.mxu1 %v17748_v49  ;;  %v14361_v15 = vsub.f32 %v14169_v23, %v17749_v32  ;;  %v14366_v26 = vsub.f32 %v14187_v43, %v17750_v47  ;;  %v17751_v49 = vand.u32 4294901760, %v14119_v24  ;;  %v5372_v32 = vand.u32 4294901760, %v14323_v48  ;;  %7177 = vmatprep.subr.msk.mxu0 %vm16225_vm14, %v16313_v53 }
 0x359   :  { %v6524_v24 = vsel %vm577_vm10, 1.0, %v17497_v25  ;;  %v14395_v48 = vsub.f32 %v14200_v31, %v17753_v13  ;;  %vm573_vm2 = vcmp.eq.s32.totalorder %v17754_v39, %v11223_v56  ;;  %vm572_vm12 = vcmp.eq.s32.totalorder %v17754_v39, %v11232_v22  ;;  %7178 = vmatpush2.msk.msra.mxu0 %vm16227_vm5, %v16313_v53  ;;  %v17756_v13 = vld [vmem:[#allocation104_spill] sm:$0xff] }
 0x35a   :  { %5319 = vmatpush1.msra.mxu1 %v17751_v49  ;;  %v6523_v45 = vsel %vm16243_vm7, 1.0, %v17497_v25  ;;  %vm569_vm14 = vcmp.eq.s32.totalorder %v17756_v13, %v11223_v56  ;;  %7179 = vmatprep.subr.msk.mxu0 %vm593_vm9, %v16313_v53  ;;  %v5384_v62 = vand.u32 4294901760, %v14366_v26  ;;  %v17758_v2 = vand.u32 4294901760, %v14232_v3 }
 0x35b   :  { %5325 = vmatprep.subr.mxu1 %v17752_v6  ;;  %v17755_v6 = vand.u32 4294901760, %v14144_v10  ;;  %v17757_v10 = vand.u32 4294901760, %v14174_v44  ;;  %vm568_vm5 = vcmp.eq.s32.totalorder %v17756_v13, %v11232_v22  ;;  %7180 = vmatpush2.msk.msra.mxu0 %vm592_vm13, %v16313_v53  ;;  %v6520_v44 = vsel %vm573_vm2, 1.0, %v17497_v25 }
 0x35c   :  { %v5395_v49 = vsub.f32 %v14232_v3, %v17758_v2  ;;  %v6519_v2 = vsel %vm572_vm12, 1.0, %v17497_v25  ;;  %7181 = vmatprep.subr.msk.mxu0 %vm16229_vm3, %v16313_v53  ;;  %v5390_v47 = vand.u32 4294901760, %v14395_v48  ;;  %v14451_v9 = vsub.f32 %v6523_v45, %v6523_v45 }
 0x35d   :  { %5331 = vmatpush1.msra.mxu1 %v17755_v6  ;;  %v5378_v6 = vand.u32 4294901760, %v14361_v15  ;;  %v17759_v15 = vand.u32 4294901760, %v14259_v4  ;;  %7182 = vmatpush2.msk.msra.mxu0 %vm588_vm15, %v16313_v53  ;;  %v6515_v45 = vsel %vm568_vm5, 1.0, %v17497_v25  ;;  %v14479_v8 = vsub.f32 %v6519_v2, %v6519_v2 }
 0x35e   :  { %5337 = vmatprep.subr.mxu1 %v17757_v10  ;;  %v14448_v10 = vsub.f32 %v6524_v24, %v6524_v24  ;;  %7183 = vmatprep.subr.msk.mxu0 %vm16238_vm11, %v16313_v53  ;;  %v5396_v37 = vand.u32 4294901760, %v5395_v49  ;;  %v17776_v12 = vand.u32 4294901760, %v14451_v9 }
 0x35f   :  { %5343 = vmatpush2.msra.mxu1 %v5342_v0  ;;  %v5401_v26 = vsub.f32 %v14259_v4, %v17759_v15  ;;  %v6516_v15 = vsel %vm569_vm14, 1.0, %v17497_v25  ;;  %v17762_v0 = vand.u32 4294901760, %v14313_v34  ;;  %7184 = vmatpush2.msk.msra.mxu0 %vm16239_vm0, %v16313_v53 }
 0x360   :  { %5349 = vmatprep.subr.mxu1 %v5348_v60  ;;  %17760 = vst [vmem:[#allocation42_spill] sm:$0xff] %v14448_v10  ;;  %v17761_v60 = vand.u32 4294901760, %v14261_v27  ;;  %7185 = vmatprep.subr.msk.mxu0 %vm16240_vm4, %v16313_v53  ;;  %v17774_v39 = vand.u32 4294901760, %v14448_v10 }
 0x361   :  { %5355 = vmatpush2.msra.mxu1 %v5354_v41  ;;  %v5413_v48 = vsub.f32 %v14313_v34, %v17762_v0  ;;  %v17763_v41 = vld [vmem:[#allocation64_spill] sm:$0xff]  ;;  %v16242_v0 = vand.u32 4294901760, %v14346_v1  ;;  %v5402_v34 = vand.u32 4294901760, %v5401_v26  ;;  %7186 = vmatpush2.msk.msra.mxu0 %vm16241_vm6, %v16313_v53 }
 0x362   :  { %v5407_v24 = vsub.f32 %v14261_v27, %v17761_v60  ;;  %vm565_vm3 = vcmp.eq.s32.totalorder %v17763_v41, %v11223_v56  ;;  %5361 = vmatprep.subr.mxu1 %v5360_v11  ;;  %v14477_v60 = vsub.f32 %v6520_v44, %v6520_v44  ;;  %v14486_v11 = vsub.f32 %v6516_v15, %v6516_v15 }
 0x363   :  { %5367 = vmatpush2.msra.mxu1 %v5366_v28  ;;  %v17766_v27 = vand.u32 4294901760, %v14332_v52  ;;  %vm564_vm11 = vcmp.eq.s32.totalorder %v17763_v41, %v11232_v22  ;;  %v14497_v28 = vsub.f32 %v6515_v45, %v6515_v45  ;;  %v6512_v49 = vsel %vm565_vm3, 1.0, %v17497_v25  ;;  %7187 = vmatprep.subr.msk.mxu0 %vm577_vm10, %v16313_v53  ;;  %v17784_v41 = vld [vmem:[#allocation139_spill] sm:$0xff] }
 0x364   :  { %17764 = vst [vmem:[#allocation45_spill] sm:$0xff] %v14477_v60  ;;  %17765 = vst [vmem:[#allocation48_spill] sm:$0xff] %v14486_v11  ;;  %5373 = vmatprep.subr.mxu1 %v5372_v32  ;;  %v16244_v44 = vand.u32 4294901760, %v14348_v55  ;;  %v5408_v32 = vand.u32 4294901760, %v5407_v24  ;;  %v5414_v26 = vand.u32 4294901760, %v5413_v48  ;;  %v6511_v15 = vsel %vm564_vm11, 1.0, %v17497_v25  ;;  %7188 = vmatpush2.msk.msra.mxu0 %vm16243_vm7, %v16313_v53 }
 0x365   :  { %v5419_v4 = vsub.f32 %v14332_v52, %v17766_v27  ;;  %17767 = vst [vmem:[#allocation51_spill] sm:$0xff] %v14497_v28  ;;  %v17768_v27 = vld [vmem:[#allocation67_spill] sm:$0xff]  ;;  %5379 = vmatpush2.msra.mxu1 %v5378_v6  ;;  %v5425_v6 = vsub.f32 %v14346_v1, %v16242_v0  ;;  %v17769_v48 = vld [vmem:[#allocation72_spill] sm:$0xff]  ;;  %v14531_v45 = vsub.f32 %v6512_v49, %v6512_v49  ;;  %v17771_v24 = vld [vmem:[#allocation106_spill] sm:$0xff]  ;;  %v17778_v35 = vand.u32 4294901760, %v14477_v60 }
 0x366   :  { %vm561_vm0 = vcmp.eq.s32.totalorder %v17768_v27, %v11223_v56  ;;  %vm16251_vm4 = vcmp.eq.s32.totalorder %v17768_v27, %v11232_v22  ;;  %5385 = vmatprep.subr.mxu1 %v5384_v62  ;;  %vm16259_vm6 = vcmp.eq.s32.totalorder %v17769_v48, %v11223_v56  ;;  %7189 = vmatprep.subr.msk.mxu0 %vm573_vm2, %v16313_v53 }
 0x367   :  { %5391 = vmatpush2.msra.mxu1 %v5390_v47  ;;  %v5420_v62 = vand.u32 4294901760, %v5419_v4  ;;  %17770 = vst [vmem:[#allocation54_spill] sm:$0xff] %v14531_v45  ;;  %v6508_v0 = vsel %vm561_vm0, 1.0, %v17497_v25  ;;  %v5431_v47 = vsub.f32 %v14348_v55, %v16244_v44  ;;  %v6507_v4 = vsel %vm16251_vm4, 1.0, %v17497_v25  ;;  %7190 = vmatpush2.msk.msra.mxu0 %vm572_vm12, %v16313_v53 }
 0x368   :  { %5397 = vmatprep.subr.mxu1 %v5396_v37  ;;  %vm16258_vm7 = vcmp.eq.s32.totalorder %v17771_v24, %v11223_v56  ;;  %v14556_v37 = vsub.f32 %v6511_v15, %v6511_v15  ;;  %v17772_v44 = vand.u32 4294901760, %v14379_v18  ;;  %v6504_v49 = vsel %vm16259_vm6, 1.0, %v17497_v25  ;;  %7191 = vmatprep.subr.msk.mxu0 %vm569_vm14, %v16313_v53 }
 0x369   :  { %5403 = vmatpush2.msra.mxu1 %v5402_v34  ;;  %v5426_v34 = vand.u32 4294901760, %v5425_v6  ;;  %v14570_v15 = vsub.f32 %v6508_v0, %v6508_v0  ;;  %7192 = vmatpush2.msk.msra.mxu0 %vm568_vm5, %v16313_v53  ;;  %v5449_v6 = vsub.f32 %v14451_v9, %v17776_v12  ;;  %v6500_v0 = vsel %vm16258_vm7, 1.0, %v17497_v25 }
 0x36a   :  { %v5437_v2 = vsub.f32 %v14379_v18, %v17772_v44  ;;  %5409 = vmatprep.subr.mxu1 %v5408_v32  ;;  %v5443_v44 = vsub.f32 %v14448_v10, %v17774_v39  ;;  %v14580_v32 = vsub.f32 %v6507_v4, %v6507_v4  ;;  %7193 = vmatprep.subr.msk.mxu0 %vm565_vm3, %v16313_v53 }
 0x36b   :  { %17773 = vst [vmem:[#allocation57_spill] sm:$0xff] %v14570_v15  ;;  %5415 = vmatpush2.msra.mxu1 %v5414_v26  ;;  %v5432_v26 = vand.u32 4294901760, %v5431_v47  ;;  %v14594_v4 = vsub.f32 %v6504_v49, %v6504_v49  ;;  %v5455_v12 = vsub.f32 %v14477_v60, %v17778_v35  ;;  %v14602_v25 = vsub.f32 %v17779_v16, %v17779_v16 }
 0x36c   :  { %17775 = vst [vmem:[#allocation60_spill] sm:$0xff] %v14580_v32  ;;  %5421 = vmatprep.subr.mxu1 %v5420_v62  ;;  %7194 = vmatpush2.msk.msra.mxu0 %vm564_vm11, %v16313_v53  ;;  %v5438_v62 = vand.u32 4294901760, %v5437_v2  ;;  %v17781_v47 = vand.u32 4294901760, %v14479_v8  ;;  %v5444_v16 = vand.u32 4294901760, %v5443_v44  ;;  %v14616_v35 = vsub.f32 %v6500_v0, %v6500_v0  ;;  %v17794_v2 = vld [vmem:[#allocation141_spill] sm:$0xff] }
 0x36d   :  { %17777 = vst [vmem:[#allocation66_spill] sm:$0xff] %v14594_v4  ;;  %17780 = vst [vmem:[#allocation10_spill] sm:$0xff] %v14602_v25  ;;  %5427 = vmatpush2.msra.mxu1 %v5426_v34  ;;  %7195 = vmatprep.subr.msk.mxu0 %vm561_vm0, %v16313_v53  ;;  %v17783_v34 = vand.u32 4294901760, %v14486_v11  ;;  %v17785_v44 = vand.u32 4294901760, %v14497_v28 }
 0x36e   :  { %v5461_v49 = vsub.f32 %v14479_v8, %v17781_v47  ;;  %5433 = vmatprep.subr.mxu1 %v5432_v26  ;;  %17782 = vst [vmem:[#allocation14_spill] sm:$0xff] %v14616_v35  ;;  %v14624_v47 = vsub.f32 %v17784_v41, %v17784_v41  ;;  %7196 = vmatpush2.msk.msra.mxu0 %vm16251_vm4, %v16313_v53  ;;  %v5450_v26 = vand.u32 4294901760, %v5449_v6  ;;  %v5456_v41 = vand.u32 4294901760, %v5455_v12 }
 0x36f   :  { %v5467_v13 = vsub.f32 %v14486_v11, %v17783_v34  ;;  %5439 = vmatpush2.msra.mxu1 %v5438_v62  ;;  %v5473_v0 = vsub.f32 %v14497_v28, %v17785_v44  ;;  %7197 = vmatprep.subr.msk.mxu0 %vm16259_vm6, %v16313_v53  ;;  %v17786_v62 = vand.u32 4294901760, %v14531_v45  ;;  %vm17787_vm4 = vcmp.eq.s32.totalorder %v17769_v48, %v11232_v22 }
 0x370   :  { %5445 = vmatprep.subr.mxu1 %v5444_v16  ;;  %7198 = vmatpush2.msk.msra.mxu0 %vm17787_vm4, %v16313_v53  ;;  %v5462_v6 = vand.u32 4294901760, %v5461_v49  ;;  %v17788_v16 = vand.u32 4294901760, %v14556_v37  ;;  %vm17790_vm4 = vcmp.eq.s32.totalorder %v17771_v24, %v11232_v22  ;;  %v16257_v39 = vand.u32 4294901760, %v14624_v47 }
 0x371   :  { %v5479_v34 = vsub.f32 %v14531_v45, %v17786_v62  ;;  %5451 = vmatpush2.msra.mxu1 %v5450_v26  ;;  %7199 = vmatprep.subr.msk.mxu0 %vm16258_vm7, %v16313_v53  ;;  %v5468_v12 = vand.u32 4294901760, %v5467_v13  ;;  %v17789_v26 = vand.u32 4294901760, %v14570_v15  ;;  %v5474_v49 = vand.u32 4294901760, %v5473_v0  ;;  %v17792_v13 = vld [vmem:[#allocation82_spill] sm:$0xff] }
 0x372   :  { %v5485_v44 = vsub.f32 %v14556_v37, %v17788_v16  ;;  %5457 = vmatprep.subr.mxu1 %v5456_v41  ;;  %7200 = vmatpush2.msk.msra.mxu0 %vm17790_vm4, %v16313_v53  ;;  %v17791_v41 = vand.u32 4294901760, %v14580_v32  ;;  %v17795_v0 = vand.u32 4294901760, %v14602_v25  ;;  %vm17809_vm4 = vcmp.eq.s32.totalorder %v17488_v20, %v11223_v56 }
 0x373   :  { %v5491_v62 = vsub.f32 %v14570_v15, %v17789_v26  ;;  %5463 = vmatpush2.msra.mxu1 %v5462_v6  ;;  %5128 = vmatprep.mubr.f32.mxu0 %v17792_v13  ;;  %v5480_v48 = vand.u32 4294901760, %v5479_v34  ;;  %v17793_v26 = vand.u32 4294901760, %v14594_v4  ;;  %v17796_v15 = vld [vmem:[#allocation124_spill] sm:$0xff]  ;;  %v17797_v13 = vand.u32 4294901760, %v14616_v35 }
 0x374   :  { %v5497_v16 = vsub.f32 %v14580_v32, %v17791_v41  ;;  %5469 = vmatprep.subr.mxu1 %v5468_v12  ;;  %5134 = vmatmul.mubr.f32.vlgmr.msra.gmra.mxu0 %v17794_v2  ;;  %v5486_v24 = vand.u32 4294901760, %v5485_v44  ;;  %v5509_v27 = vsub.f32 %v14602_v25, %v17795_v0  ;;  %v17798_v12 = vld [vmem:[#allocation125_spill] sm:$0xff]  ;;  %v5521_v2 = vsub.f32 %v14624_v47, %v16257_v39  ;;  %v17799_v44 = vld [vmem:[#allocation127_spill] sm:$0xff]  ;;  %v17800_v0 = vld [vmem:[#allocation26_spill] sm:$0xff] }
 0x375   :  { %v5503_v6 = vsub.f32 %v14594_v4, %v17793_v26  ;;  %5475 = vmatpush2.msra.mxu1 %v5474_v49  ;;  %5535 = vmatprep.subr.mxu0 %v17796_v15  ;;  %v5492_v41 = vand.u32 4294901760, %v5491_v62  ;;  %v5515_v34 = vsub.f32 %v14616_v35, %v17797_v13  ;;  %v17801_v62 = vld [vmem:[#allocation129_spill] sm:$0xff]  ;;  %v17802_v15 = vld [vmem:[#allocation8_spill] sm:$0xff]  ;;  %v17804_v39 = vld [vmem:[#allocation134_spill] sm:$0xff]  ;;  %vm17811_vm7 = vcmp.eq.s32.totalorder %v17488_v20, %v11232_v22 }
 0x376   :  { %5481 = vmatprep.subr.mxu1 %v5480_v48  ;;  %5538 = vmatpush1.msra.mxu0 %v17798_v12  ;;  %v5498_v26 = vand.u32 4294901760, %v5497_v16  ;;  %v5510_v48 = vand.u32 4294901760, %v5509_v27  ;;  %v17803_v16 = vld [vmem:[#allocation132_spill] sm:$0xff]  ;;  %v17808_v27 = vld [vmem:[#allocation83_spill] sm:$0xff]  ;;  %vm17813_vm6 = vcmp.eq.s32.totalorder %v17501_v14, %v11223_v56 }
 0x377   :  { %5487 = vmatpush2.msra.mxu1 %v5486_v24  ;;  %5541 = vmatprep.subr.mxu0 %v17799_v44  ;;  %v5504_v49 = vand.u32 4294901760, %v5503_v6  ;;  %v5516_v13 = vand.u32 4294901760, %v5515_v34  ;;  %v5522_v24 = vand.u32 4294901760, %v5521_v2  ;;  %v17806_v6 = vld [vmem:[#allocation138_spill] sm:$0xff]  ;;  %v17810_v34 = vld [vmem:[#allocation140_spill] sm:$0xff]  ;;  %v17812_v2 = vld [vmem:[#allocation71_spill] sm:$0xff] }
 0x378   :  { %5493 = vmatprep.subr.mxu1 %v5492_v41  ;;  %5544 = vmatpush1.msra.mxu0 %v17800_v0  ;;  %v17805_v41 = vld [vmem:[#allocation130_spill] sm:$0xff] }
 0x379   :  { %5499 = vmatpush2.msra.mxu1 %v5498_v26  ;;  %5547 = vmatprep.subr.mxu0 %v17801_v62  ;;  %v17807_v26 = vld [vmem:[#allocation131_spill] sm:$0xff] }
 0x37a   :  { %5505 = vmatprep.subr.mxu1 %v5504_v49  ;;  %5550 = vmatpush1.msra.mxu0 %v17802_v15  ;;  %v17816_v49 = vld [vmem:[#allocation12_spill] sm:$0xff] }
 0x37b   :  { %5511 = vmatpush2.msra.mxu1 %v5510_v48  ;;  %5553 = vmatprep.subr.mxu0 %v17803_v16  ;;  %v17818_v48 = vld [vmem:[#allocation18_spill] sm:$0xff] }
 0x37c   :  { %5517 = vmatprep.subr.mxu1 %v5516_v13  ;;  %5556 = vmatpush1.msra.mxu0 %v17804_v39  ;;  %v17821_v13 = vld [vmem:[#allocation43_spill] sm:$0xff] }
 0x37d   :  { %5523 = vmatpush2.msra.mxu1 %v5522_v24  ;;  %5525 = vmatprep.mubr.f32.mxu1 %v17805_v41  ;;  %v17828_v24 = vld [vmem:[#allocation47_spill] sm:$0xff]  ;;  %v17832_v41 = vld [vmem:[#allocation52_spill] sm:$0xff] }
 0x37e   :  { %5559 = vmatprep.subr.mxu0 %v17806_v6  ;;  %5527 = vmatmul.mubr.f32.vlgmr.msra.gmra.mxu1 %v17807_v26  ;;  %v17830_v26 = vld [vmem:[#allocation50_spill] sm:$0xff] }
 0x37f   :  { %5562 = vmatpush1.msra.mxu0 %v17808_v27  ;;  %7201 = vmatprep.subr.msk.mxu1 %vm17809_vm4, %v16313_v53  ;;  %vm17814_vm4 = vcmp.eq.s32.totalorder %v17501_v14, %v11232_v22 }
 0x380   :  { %5565 = vmatprep.subr.mxu0 %v17810_v34  ;;  %7202 = vmatpush1.msk.msra.mxu1 %vm17811_vm7, %v16313_v53  ;;  %vm17815_vm7 = vcmp.eq.s32.totalorder %v17509_v38, %v11223_v56 }
 0x381   :  { %5568 = vmatpush1.msra.mxu0 %v17812_v2  ;;  %7203 = vmatprep.subr.msk.mxu1 %vm17813_vm6, %v16313_v53  ;;  %vm17817_vm6 = vcmp.eq.s32.totalorder %v17509_v38, %v11232_v22 }
 0x382   :  { %5571 = vmatprep.subr.mxu0 %v13476_v29  ;;  %7204 = vmatpush1.msk.msra.mxu1 %vm17814_vm4, %v16313_v53  ;;  %vm17819_vm4 = vcmp.eq.s32.totalorder %v17520_v63, %v11223_v56 }
 0x383   :  { %5574 = vmatpush1.msra.mxu0 %v13498_v36  ;;  %7205 = vmatprep.subr.msk.mxu1 %vm17815_vm7, %v16313_v53  ;;  %vm17820_vm7 = vcmp.eq.s32.totalorder %v17520_v63, %v11232_v22 }
 0x384   :  { %5577 = vmatprep.subr.mxu0 %v17816_v49  ;;  %7206 = vmatpush1.msk.msra.mxu1 %vm17817_vm6, %v16313_v53  ;;  %vm17822_vm6 = vcmp.eq.s32.totalorder %v17526_v59, %v11223_v56 }
 0x385   :  { %5580 = vmatpush1.msra.mxu0 %v17818_v48  ;;  %7207 = vmatprep.subr.msk.mxu1 %vm17819_vm4, %v16313_v53  ;;  %vm17823_vm4 = vcmp.eq.s32.totalorder %v17526_v59, %v11232_v22 }
 0x386   :  { %5583 = vmatprep.subr.mxu0 %v13550_v5  ;;  %7208 = vmatpush1.msk.msra.mxu1 %vm17820_vm7, %v16313_v53  ;;  %vm17824_vm7 = vcmp.eq.s32.totalorder %v17538_v61, %v11223_v56 }
 0x387   :  { %5586 = vmatpush1.msra.mxu0 %v17821_v13  ;;  %7209 = vmatprep.subr.msk.mxu1 %vm17822_vm6, %v16313_v53  ;;  %vm17825_vm6 = vcmp.eq.s32.totalorder %v17538_v61, %v11232_v22 }
 0x388   :  { %5589 = vmatprep.subr.mxu0 %v13606_v19  ;;  %7210 = vmatpush1.msk.msra.mxu1 %vm17823_vm4, %v16313_v53  ;;  %vm17826_vm4 = vcmp.eq.s32.totalorder %v17557_v42, %v11223_v56 }
 0x389   :  { %5592 = vmatpush1.msra.mxu0 %v13642_v46  ;;  %7211 = vmatprep.subr.msk.mxu1 %vm17824_vm7, %v16313_v53  ;;  %vm17827_vm7 = vcmp.eq.s32.totalorder %v17557_v42, %v11232_v22  ;;  %v17838_v42 = vld [vmem:[#allocation91_spill] sm:$0xff] }
 0x38a   :  { %5595 = vmatprep.subr.mxu0 %v13670_v54  ;;  %7212 = vmatpush1.msk.msra.mxu1 %vm17825_vm6, %v16313_v53  ;;  %vm17829_vm6 = vcmp.eq.s32.totalorder %v17569_v17, %v11223_v56 }
 0x38b   :  { %5598 = vmatpush1.msra.mxu0 %v13672_v58  ;;  %7213 = vmatprep.subr.msk.mxu1 %vm17826_vm4, %v16313_v53  ;;  %vm17831_vm4 = vcmp.eq.s32.totalorder %v17569_v17, %v11232_v22 }
 0x38c   :  { %5601 = vmatprep.subr.mxu0 %v13691_v30  ;;  %7214 = vmatpush1.msk.msra.mxu1 %vm17827_vm7, %v16313_v53  ;;  %v17833_v30 = vld [vmem:[#allocation90_spill] sm:$0xff] }
 0x38d   :  { %5604 = vmatpush1.msra.mxu0 %v17828_v24  ;;  %7215 = vmatprep.subr.msk.mxu1 %vm17829_vm6, %v16313_v53  ;;  %vm17834_vm7 = vcmp.eq.s32.totalorder %v17833_v30, %v11223_v56  ;;  %v17835_v24 = vld [vmem:[#allocation16_spill] sm:$0xff]  ;;  %vm17836_vm6 = vcmp.eq.s32.totalorder %v17833_v30, %v11232_v22 }
 0x38e   :  { %5607 = vmatprep.subr.mxu0 %v17830_v26  ;;  %7216 = vmatpush1.msk.msra.mxu1 %vm17831_vm4, %v16313_v53  ;;  %v17837_v26 = vld [vmem:[#allocation53_spill] sm:$0xff]  ;;  %vm17839_vm4 = vcmp.eq.s32.totalorder %v17838_v42, %v11223_v56 }
 0x38f   :  { %5610 = vmatpush1.msra.mxu0 %v17832_v41  ;;  %7217 = vmatprep.subr.msk.mxu1 %vm17834_vm7, %v16313_v53  ;;  %v17840_v41 = vld [vmem:[#allocation56_spill] sm:$0xff]  ;;  %vm17841_vm7 = vcmp.eq.s32.totalorder %v17838_v42, %v11232_v22 }
 0x390   :  { %5613 = vmatprep.subr.mxu0 %v17835_v24  ;;  %7218 = vmatpush1.msk.msra.mxu1 %vm17836_vm6, %v16313_v53  ;;  %vm17842_vm6 = vcmp.eq.s32.totalorder %v17697_v33, %v11223_v56  ;;  %v17846_v24 = vld [vmem:[#allocation93_spill] sm:$0xff] }
 0x391   :  { %5616 = vmatpush1.msra.mxu0 %v17837_v26  ;;  %7219 = vmatprep.subr.msk.mxu1 %vm17839_vm4, %v16313_v53  ;;  %v17843_v26 = vld [vmem:[#allocation19_spill] sm:$0xff]  ;;  %vm17844_vm4 = vcmp.eq.s32.totalorder %v17697_v33, %v11232_v22 }
 0x392   :  { %5619 = vmatprep.subr.mxu0 %v17840_v41  ;;  %7220 = vmatpush1.msk.msra.mxu1 %vm17841_vm7, %v16313_v53  ;;  %v17845_v41 = vld [vmem:[#allocation58_spill] sm:$0xff]  ;;  %vm17847_vm7 = vcmp.eq.s32.totalorder %v17846_v24, %v11223_v56 }
 0x393   :  { %5622 = vmatpush1.msra.mxu0 %v13912_v51  ;;  %7221 = vmatprep.subr.msk.mxu1 %vm17842_vm6, %v16313_v53  ;;  %vm17848_vm6 = vcmp.eq.s32.totalorder %v17846_v24, %v11232_v22 }
 0x394   :  { %5625 = vmatprep.subr.mxu0 %v17843_v26  ;;  %7222 = vmatpush1.msk.msra.mxu1 %vm17844_vm4, %v16313_v53  ;;  %v17849_v26 = vld [vmem:[#allocation21_spill] sm:$0xff] }
 0x395   :  { %5628 = vmatpush1.msra.mxu0 %v17845_v41  ;;  %7223 = vmatprep.subr.msk.mxu1 %vm17847_vm7, %v16313_v53  ;;  %vm17850_vm4 = vcmp.eq.s32.totalorder %v17849_v26, %v11223_v56  ;;  %vm17851_vm7 = vcmp.eq.s32.totalorder %v17849_v26, %v11232_v22  ;;  %v17853_v41 = vld [vmem:[#allocation94_spill] sm:$0xff] }
 0x396   :  { %5631 = vmatprep.subr.mxu0 %v14006_v57  ;;  %7224 = vmatpush1.msk.msra.mxu1 %vm17848_vm6, %v16313_v53  ;;  %v17852_v57 = vld [vmem:[#allocation62_spill] sm:$0xff]  ;;  %vm17854_vm6 = vcmp.eq.s32.totalorder %v17853_v41, %v11223_v56 }
 0x397   :  { %5634 = vmatpush2.msra.mxu0 %v14008_v50  ;;  %7225 = vmatprep.subr.msk.mxu1 %vm17850_vm4, %v16313_v53  ;;  %v17855_v50 = vld [vmem:[#allocation24_spill] sm:$0xff]  ;;  %vm17856_vm4 = vcmp.eq.s32.totalorder %v17853_v41, %v11232_v22 }
 0x398   :  { %5637 = vmatprep.subr.mxu0 %v14041_v7  ;;  %7226 = vmatpush1.msk.msra.mxu1 %vm17851_vm7, %v16313_v53  ;;  %v17857_v7 = vld [vmem:[#allocation95_spill] sm:$0xff] }
 0x399   :  { %5640 = vmatpush2.msra.mxu0 %v17852_v57  ;;  %7227 = vmatprep.subr.msk.mxu1 %vm17854_vm6, %v16313_v53  ;;  %vm17858_vm7 = vcmp.eq.s32.totalorder %v17857_v7, %v11223_v56  ;;  %vm17859_vm6 = vcmp.eq.s32.totalorder %v17857_v7, %v11232_v22 }
 0x39a   :  { %5643 = vmatprep.subr.mxu0 %v17855_v50  ;;  %7228 = vmatpush1.msk.msra.mxu1 %vm17856_vm4, %v16313_v53  ;;  %v17860_v50 = vld [vmem:[#allocation96_spill] sm:$0xff] }
 0x39b   :  { %5646 = vmatpush2.msra.mxu0 %v14100_v21  ;;  %7229 = vmatprep.subr.msk.mxu1 %vm17858_vm7, %v16313_v53  ;;  %vm17861_vm4 = vcmp.eq.s32.totalorder %v17860_v50, %v11223_v56  ;;  %vm17862_vm7 = vcmp.eq.s32.totalorder %v17860_v50, %v11232_v22  ;;  %v17871_v50 = vld [vmem:[#allocation99_spill] sm:$0xff] }
 0x39c   :  { %5649 = vmatprep.subr.mxu0 %v14154_v40  ;;  %7230 = vmatpush1.msk.msra.mxu1 %vm17859_vm6, %v16313_v53  ;;  %v17863_v40 = vld [vmem:[#allocation97_spill] sm:$0xff] }
 0x39d   :  { %5652 = vmatpush2.msra.mxu0 %v14169_v23  ;;  %7231 = vmatprep.subr.msk.mxu1 %vm17861_vm4, %v16313_v53  ;;  %vm17864_vm6 = vcmp.eq.s32.totalorder %v17863_v40, %v11223_v56  ;;  %vm17865_vm4 = vcmp.eq.s32.totalorder %v17863_v40, %v11232_v22  ;;  %v17867_v23 = vld [vmem:[#allocation98_spill] sm:$0xff] }
 0x39e   :  { %5655 = vmatprep.subr.mxu0 %v14187_v43  ;;  %7232 = vmatpush1.msk.msra.mxu1 %vm17862_vm7, %v16313_v53  ;;  %v17866_v43 = vld [vmem:[#allocation31_spill] sm:$0xff]  ;;  %vm17868_vm7 = vcmp.eq.s32.totalorder %v17867_v23, %v11223_v56 }
 0x39f   :  { %5658 = vmatpush2.msra.mxu0 %v14200_v31  ;;  %7233 = vmatprep.subr.msk.mxu1 %vm17864_vm6, %v16313_v53  ;;  %v17869_v31 = vld [vmem:[#allocation32_spill] sm:$0xff]  ;;  %vm17872_vm6 = vcmp.eq.s32.totalorder %v17871_v50, %v11232_v22 }
 0x3a0   :  { %5661 = vmatprep.subr.mxu0 %v14232_v3  ;;  %7234 = vmatpush2.msk.msra.mxu1 %vm17865_vm4, %v16313_v53  ;;  %v17870_v3 = vld [vmem:[#allocation36_spill] sm:$0xff] }
 0x3a1   :  { %5664 = vmatpush2.msra.mxu0 %v17866_v43  ;;  %7235 = vmatprep.subr.msk.mxu1 %vm17868_vm7, %v16313_v53 }
 0x3a2   :  { %5667 = vmatprep.subr.mxu0 %v17869_v31  ;;  %7236 = vmatpush2.msk.msra.mxu1 %vm608_vm8, %v16313_v53  ;;  %v17873_v31 = vld [vmem:[#allocation100_spill] sm:$0xff] }
 0x3a3   :  { %5670 = vmatpush2.msra.mxu0 %v17870_v3  ;;  %7237 = vmatprep.subr.msk.mxu1 %vm605_vm1, %v16313_v53  ;;  %vm17874_vm4 = vcmp.eq.s32.totalorder %v17873_v31, %v11223_v56  ;;  %vm17875_vm7 = vcmp.eq.s32.totalorder %v17873_v31, %v11232_v22 }
 0x3a4   :  { %5673 = vmatprep.subr.mxu0 %v14332_v52  ;;  %7238 = vmatpush2.msk.msra.mxu1 %vm17872_vm6, %v16313_v53  ;;  %v17876_v52 = vld [vmem:[#allocation101_spill] sm:$0xff] }
 0x3a5   :  { %5676 = vmatpush2.msra.mxu0 %v14346_v1  ;;  %7239 = vmatprep.subr.msk.mxu1 %vm17874_vm4, %v16313_v53  ;;  %vm17877_vm6 = vcmp.eq.s32.totalorder %v17876_v52, %v11223_v56  ;;  %vm17878_vm4 = vcmp.eq.s32.totalorder %v17876_v52, %v11232_v22 }
 0x3a6   :  { %5679 = vmatprep.subr.mxu0 %v14348_v55  ;;  %7240 = vmatpush2.msk.msra.mxu1 %vm17875_vm7, %v16313_v53 }
 0x3a7   :  { %5682 = vmatpush2.msra.mxu0 %v14379_v18  ;;  %7241 = vmatprep.subr.msk.mxu1 %vm17877_vm6, %v16313_v53 }
 0x3a8   :  { %5685 = vmatprep.subr.mxu0 %v14448_v10  ;;  %7242 = vmatpush2.msk.msra.mxu1 %vm17878_vm4, %v16313_v53  ;;  %v17880_v10 = vld [vmem:[#allocation103_spill] sm:$0xff] }
 0x3a9   :  { %5688 = vmatpush2.msra.mxu0 %v14451_v9  ;;  %7243 = vmatprep.subr.msk.mxu1 %vm593_vm9, %v16313_v53  ;;  %vm17881_vm7 = vcmp.eq.s32.totalorder %v17880_v10, %v11223_v56 }
 0x3aa   :  { %5691 = vmatprep.subr.mxu0 %v14477_v60  ;;  %7244 = vmatpush2.msk.msra.mxu1 %vm592_vm13, %v16313_v53  ;;  %v17882_v60 = vld [vmem:[#allocation40_spill] sm:$0xff] }
 0x3ab   :  { %5694 = vmatpush2.msra.mxu0 %v14479_v8  ;;  %7245 = vmatprep.subr.msk.mxu1 %vm17881_vm7, %v16313_v53  ;;  %vm17883_vm6 = vcmp.eq.s32.totalorder %v17882_v60, %v11223_v56  ;;  %vm17884_vm4 = vcmp.eq.s32.totalorder %v17882_v60, %v11232_v22 }
 0x3ac   :  { %5697 = vmatprep.subr.mxu0 %v14486_v11  ;;  %7246 = vmatpush2.msk.msra.mxu1 %vm588_vm15, %v16313_v53  ;;  %v17885_v11 = vld [vmem:[#allocation46_spill] sm:$0xff] }
 0x3ad   :  { %5700 = vmatpush2.msra.mxu0 %v14497_v28  ;;  %7247 = vmatprep.subr.msk.mxu1 %vm17883_vm6, %v16313_v53  ;;  %vm17886_vm7 = vcmp.eq.s32.totalorder %v17885_v11, %v11223_v56  ;;  %v17887_v28 = vld [vmem:[#allocation57_spill] sm:$0xff]  ;;  %vm17888_vm6 = vcmp.eq.s32.totalorder %v17885_v11, %v11232_v22 }
 0x3ae   :  { %5703 = vmatprep.subr.mxu0 %v14531_v45  ;;  %7248 = vmatpush2.msk.msra.mxu1 %vm17884_vm4, %v16313_v53  ;;  %v17889_v45 = vld [vmem:[#allocation49_spill] sm:$0xff] }
 0x3af   :  { %5706 = vmatpush2.msra.mxu0 %v14556_v37  ;;  %7249 = vmatprep.subr.msk.mxu1 %vm17886_vm7, %v16313_v53  ;;  %vm17890_vm4 = vcmp.eq.s32.totalorder %v17889_v45, %v11232_v22  ;;  %v17900_v45 = vld [vmem:[#allocation67_spill] sm:$0xff] }
 0x3b0   :  { %5709 = vmatprep.subr.mxu0 %v17887_v28  ;;  %7250 = vmatpush2.msk.msra.mxu1 %vm17888_vm6, %v16313_v53  ;;  %vm17902_vm7 = vcmp.eq.s32.totalorder %v17900_v45, %v11232_v22  ;;  %v3851_v28 = vpop.f32.mrf.mxu0 }
 0x3b1   :  { %5712 = vmatpush2.msra.mxu0 %v14580_v32  ;;  %7251 = vmatprep.subr.msk.mxu1 %vm577_vm10, %v16313_v53 }
 0x3b2   :  { %5715 = vmatprep.subr.mxu0 %v14594_v4  ;;  %7252 = vmatpush2.msk.msra.mxu1 %vm17890_vm4, %v16313_v53  ;;  %v17892_v4 = vld [vmem:[#allocation133_spill] sm:$0xff] }
 0x3b3   :  { %5718 = vmatpush2.msra.mxu0 %v14602_v25  ;;  %7253 = vmatprep.subr.msk.mxu1 %vm573_vm2, %v16313_v53  ;;  %v17894_v25 = vld [vmem:[#allocation135_spill] sm:$0xff] }
 0x3b4   :  { %5721 = vmatprep.subr.mxu0 %v14616_v35  ;;  %7254 = vmatpush2.msk.msra.mxu1 %vm572_vm12, %v16313_v53  ;;  %v17895_v35 = vld [vmem:[#allocation124_spill] sm:$0xff] }
 0x3b5   :  { %5724 = vmatpush2.msra.mxu0 %v14624_v47  ;;  %5727 = vmatprep.mubr.f32.mxu0 %v17892_v4  ;;  %v17896_v32 = vand.u32 4294901760, %v17895_v35  ;;  %v17898_v4 = vand.u32 4294901760, %v17798_v12  ;;  %v17903_v35 = vand.u32 4294901760, %v17801_v62  ;;  %v17904_v12 = vld [vmem:[#allocation72_spill] sm:$0xff]  ;;  %v17911_v62 = vand.u32 4294901760, %v17804_v39 }
 0x3b6   :  { %7255 = vmatprep.subr.msk.mxu1 %vm569_vm14, %v16313_v53  ;;  %5730 = vmatmul.mubr.f32.vlgmr.msra.gmra.mxu0 %v17894_v25  ;;  %v17899_v25 = vand.u32 4294901760, %v17799_v44  ;;  %vm17905_vm6 = vcmp.eq.s32.totalorder %v17904_v12, %v11223_v56  ;;  %v17906_v44 = vand.u32 4294901760, %v17802_v15  ;;  %vm17907_vm4 = vcmp.eq.s32.totalorder %v17904_v12, %v11232_v22  ;;  %v17913_v15 = vld [vmem:[#allocation136_spill] sm:$0xff] }
 0x3b7   :  { %7256 = vmatpush2.msk.msra.mxu1 %vm568_vm5, %v16313_v53  ;;  %5880 = vmatprep.subr.mxu0 %v17896_v32  ;;  %v17901_v32 = vand.u32 4294901760, %v17800_v0  ;;  %v17908_v0 = vand.u32 4294901760, %v17803_v16  ;;  %v17915_v16 = vld [vmem:[#allocation137_spill] sm:$0xff]  ;;  %v17918_v39 = vand.u32 4294901760, %v17810_v34  ;;  %v17924_v34 = vand.u32 4294901760, %v13498_v36 }
 0x3b8   :  { %7257 = vmatprep.subr.msk.mxu1 %vm565_vm3, %v16313_v53  ;;  %5884 = vmatpush1.msra.mxu0 %v17898_v4  ;;  %v17909_v4 = vld [vmem:[#allocation106_spill] sm:$0xff]  ;;  %v17932_v36 = vand.u32 4294901760, %v17821_v13 }
 0x3b9   :  { %7258 = vmatpush2.msk.msra.mxu1 %vm564_vm11, %v16313_v53  ;;  %5888 = vmatprep.subr.mxu0 %v17899_v25  ;;  %v17914_v25 = vand.u32 4294901760, %v17806_v6  ;;  %v17920_v6 = vand.u32 4294901760, %v17812_v2 }
 0x3ba   :  { %7259 = vmatprep.subr.msk.mxu1 %vm561_vm0, %v16313_v53  ;;  %5892 = vmatpush1.msra.mxu0 %v17901_v32  ;;  %v17916_v32 = vand.u32 4294901760, %v17808_v27  ;;  %v17922_v27 = vand.u32 4294901760, %v13476_v29  ;;  %v17928_v29 = vand.u32 4294901760, %v17818_v48  ;;  %v17952_v48 = vld [vmem:[#allocation52_spill] sm:$0xff] }
 0x3bb   :  { %7260 = vmatpush2.msk.msra.mxu1 %vm17902_vm7, %v16313_v53  ;;  %5896 = vmatprep.subr.mxu0 %v17903_v35  ;;  %vm17910_vm7 = vcmp.eq.s32.totalorder %v17909_v4, %v11223_v56  ;;  %v17953_v13 = vand.u32 4294901760, %v17952_v48  ;;  %v17955_v35 = vld [vmem:[#allocation16_spill] sm:$0xff]  ;;  %v18022_v48 = vand.u32 4294901760, %v14451_v9 }
 0x3bc   :  { %7261 = vmatprep.subr.msk.mxu1 %vm17905_vm6, %v16313_v53  ;;  %5900 = vmatpush1.msra.mxu0 %v17906_v44  ;;  %vm17912_vm6 = vcmp.eq.s32.totalorder %v17909_v4, %v11232_v22  ;;  %v17956_v44 = vand.u32 4294901760, %v17955_v35  ;;  %v18027_v9 = vld [vmem:[#allocation48_spill] sm:$0xff]  ;;  %v18029_v35 = vld [vmem:[#allocation51_spill] sm:$0xff] }
 0x3bd   :  { %7262 = vmatpush2.msk.msra.mxu1 %vm17907_vm4, %v16313_v53  ;;  %5904 = vmatprep.subr.mxu0 %v17908_v0  ;;  %vm17917_vm4 = vcmp.eq.s32.totalorder %v17488_v20, %v11223_v56  ;;  %v17958_v0 = vld [vmem:[#allocation53_spill] sm:$0xff] }
 0x3be   :  { %7263 = vmatprep.subr.msk.mxu1 %vm17910_vm7, %v16313_v53  ;;  %5908 = vmatpush1.msra.mxu0 %v17911_v62  ;;  %vm17919_vm7 = vcmp.eq.s32.totalorder %v17488_v20, %v11232_v22  ;;  %v17926_v20 = vand.u32 4294901760, %v17816_v49  ;;  %v17959_v62 = vand.u32 4294901760, %v17958_v0  ;;  %v18035_v0 = vand.u32 4294901760, %v14556_v37  ;;  %v18043_v37 = vld [vmem:[#allocation66_spill] sm:$0xff] }
 0x3bf   :  { %7264 = vmatpush2.msk.msra.mxu1 %vm17912_vm6, %v16313_v53  ;;  %5867 = vmatprep.mubr.f32.mxu1 %v17913_v15  ;;  %vm17921_vm6 = vcmp.eq.s32.totalorder %v17501_v14, %v11223_v56 }
 0x3c0   :  { %5912 = vmatprep.subr.mxu0 %v17914_v25  ;;  %5871 = vmatmul.mubr.f32.vlgmr.msra.gmra.mxu1 %v17915_v16  ;;  %v17964_v25 = vand.u32 4294901760, %v13912_v51 }
 0x3c1   :  { %5916 = vmatpush1.msra.mxu0 %v17916_v32  ;;  %7265 = vmatprep.subr.msk.mxu1 %vm17917_vm4, %v16313_v53  ;;  %vm17923_vm4 = vcmp.eq.s32.totalorder %v17501_v14, %v11232_v22  ;;  %v17930_v14 = vand.u32 4294901760, %v13550_v5  ;;  %v17936_v5 = vand.u32 4294901760, %v13642_v46  ;;  %v17943_v46 = vld [vmem:[#allocation44_spill] sm:$0xff]  ;;  %v17969_v32 = vld [vmem:[#allocation58_spill] sm:$0xff] }
 0x3c2   :  { %5920 = vmatprep.subr.mxu0 %v17918_v39  ;;  %7266 = vmatpush1.msk.msra.mxu1 %vm17919_vm7, %v16313_v53  ;;  %vm17925_vm7 = vcmp.eq.s32.totalorder %v17509_v38, %v11223_v56  ;;  %v17944_v2 = vand.u32 4294901760, %v17943_v46  ;;  %v17970_v39 = vand.u32 4294901760, %v17969_v32  ;;  %v18004_v46 = vand.u32 4294901760, %v17866_v43  ;;  %v18009_v43 = vld [vmem:[#allocation39_spill] sm:$0xff]  ;;  %v18049_v32 = vld [vmem:[#allocation14_spill] sm:$0xff] }
 0x3c3   :  { %5924 = vmatpush1.msra.mxu0 %v17920_v6  ;;  %7267 = vmatprep.subr.msk.mxu1 %vm17921_vm6, %v16313_v53  ;;  %vm17927_vm6 = vcmp.eq.s32.totalorder %v17509_v38, %v11232_v22  ;;  %v17934_v38 = vand.u32 4294901760, %v13606_v19  ;;  %v17940_v19 = vand.u32 4294901760, %v13672_v58  ;;  %v17975_v6 = vld [vmem:[#allocation61_spill] sm:$0xff] }
 0x3c4   :  { %5928 = vmatprep.subr.mxu0 %v17922_v27  ;;  %7268 = vmatpush1.msk.msra.mxu1 %vm17923_vm4, %v16313_v53  ;;  %vm17929_vm4 = vcmp.eq.s32.totalorder %v17520_v63, %v11223_v56  ;;  %v17976_v27 = vand.u32 4294901760, %v17975_v6 }
 0x3c5   :  { %5932 = vmatpush1.msra.mxu0 %v17924_v34  ;;  %7269 = vmatprep.subr.msk.mxu1 %vm17925_vm7, %v16313_v53  ;;  %vm17931_vm7 = vcmp.eq.s32.totalorder %v17520_v63, %v11232_v22  ;;  %v17938_v63 = vand.u32 4294901760, %v13670_v54  ;;  %v17946_v54 = vld [vmem:[#allocation47_spill] sm:$0xff] }
 0x3c6   :  { %5936 = vmatprep.subr.mxu0 %v17926_v20  ;;  %7270 = vmatpush1.msk.msra.mxu1 %vm17927_vm6, %v16313_v53  ;;  %vm17933_vm6 = vcmp.eq.s32.totalorder %v17526_v59, %v11223_v56  ;;  %v17947_v49 = vand.u32 4294901760, %v17946_v54  ;;  %v17981_v20 = vand.u32 4294901760, %v17852_v57  ;;  %v17988_v57 = vld [vmem:[#allocation84_spill] sm:$0xff] }
 0x3c7   :  { %5940 = vmatpush1.msra.mxu0 %v17928_v29  ;;  %7271 = vmatprep.subr.msk.mxu1 %vm17929_vm4, %v16313_v53  ;;  %vm17935_vm4 = vcmp.eq.s32.totalorder %v17526_v59, %v11232_v22  ;;  %v17941_v59 = vld [vmem:[#allocation88_spill] sm:$0xff] }
 0x3c8   :  { %5944 = vmatprep.subr.mxu0 %v17930_v14  ;;  %7272 = vmatpush1.msk.msra.mxu1 %vm17931_vm7, %v16313_v53  ;;  %vm17937_vm7 = vcmp.eq.s32.totalorder %v17538_v61, %v11223_v56  ;;  %v17986_v14 = vand.u32 4294901760, %v14100_v21  ;;  %v17995_v21 = vld [vmem:[#allocation28_spill] sm:$0xff] }
 0x3c9   :  { %5948 = vmatpush1.msra.mxu0 %v17932_v36  ;;  %7273 = vmatprep.subr.msk.mxu1 %vm17933_vm6, %v16313_v53  ;;  %vm17939_vm6 = vcmp.eq.s32.totalorder %v17538_v61, %v11232_v22  ;;  %v17949_v61 = vld [vmem:[#allocation50_spill] sm:$0xff]  ;;  %v17991_v36 = vld [vmem:[#allocation27_spill] sm:$0xff] }
 0x3ca   :  { %5952 = vmatprep.subr.mxu0 %v17934_v38  ;;  %7274 = vmatpush1.msk.msra.mxu1 %vm17935_vm4, %v16313_v53  ;;  %vm17942_vm4 = vcmp.eq.s32.totalorder %v17941_v59, %v11223_v56  ;;  %v17950_v58 = vand.u32 4294901760, %v17949_v61  ;;  %v17992_v38 = vand.u32 4294901760, %v17991_v36  ;;  %v18012_v61 = vand.u32 4294901760, %v14346_v1 }
 0x3cb   :  { %5956 = vmatpush1.msra.mxu0 %v17936_v5  ;;  %7275 = vmatprep.subr.msk.mxu1 %vm17937_vm7, %v16313_v53  ;;  %vm17945_vm7 = vcmp.eq.s32.totalorder %v17941_v59, %v11232_v22  ;;  %v17996_v5 = vand.u32 4294901760, %v17995_v21 }
 0x3cc   :  { %5960 = vmatprep.subr.mxu0 %v17938_v63  ;;  %7276 = vmatpush1.msk.msra.mxu1 %vm17939_vm6, %v16313_v53  ;;  %vm17948_vm6 = vcmp.eq.s32.totalorder %v17569_v17, %v11223_v56  ;;  %v17998_v63 = vld [vmem:[#allocation29_spill] sm:$0xff] }
 0x3cd   :  { %5964 = vmatpush1.msra.mxu0 %v17940_v19  ;;  %7277 = vmatprep.subr.msk.mxu1 %vm17942_vm4, %v16313_v53  ;;  %vm17951_vm4 = vcmp.eq.s32.totalorder %v17569_v17, %v11232_v22  ;;  %v17961_v17 = vld [vmem:[#allocation56_spill] sm:$0xff]  ;;  %v17999_v19 = vand.u32 4294901760, %v17998_v63 }
 0x3ce   :  { %5968 = vmatprep.subr.mxu0 %v17944_v2  ;;  %7278 = vmatpush1.msk.msra.mxu1 %vm17945_vm7, %v16313_v53  ;;  %vm17954_vm7 = vcmp.eq.s32.totalorder %v17833_v30, %v11223_v56  ;;  %v17962_v15 = vand.u32 4294901760, %v17961_v17  ;;  %v18006_v2 = vld [vmem:[#allocation32_spill] sm:$0xff] }
 0x3cf   :  { %5972 = vmatpush1.msra.mxu0 %v17947_v49  ;;  %7279 = vmatprep.subr.msk.mxu1 %vm17948_vm6, %v16313_v53  ;;  %vm17957_vm6 = vcmp.eq.s32.totalorder %v17833_v30, %v11232_v22  ;;  %v17966_v30 = vld [vmem:[#allocation19_spill] sm:$0xff]  ;;  %v18007_v54 = vand.u32 4294901760, %v18006_v2  ;;  %v18008_v49 = vand.u32 4294901760, %v17870_v3  ;;  %v18040_v17 = vld [vmem:[#allocation60_spill] sm:$0xff] }
 0x3d0   :  { %5976 = vmatprep.subr.mxu0 %v17950_v58  ;;  %7280 = vmatpush1.msk.msra.mxu1 %vm17951_vm4, %v16313_v53  ;;  %vm17960_vm4 = vcmp.eq.s32.totalorder %v17838_v42, %v11223_v56  ;;  %v17967_v16 = vand.u32 4294901760, %v17966_v30  ;;  %v18017_v58 = vand.u32 4294901760, %v14379_v18  ;;  %v18046_v30 = vld [vmem:[#allocation10_spill] sm:$0xff] }
 0x3d1   :  { %5980 = vmatpush1.msra.mxu0 %v17953_v13  ;;  %7281 = vmatprep.subr.msk.mxu1 %vm17954_vm7, %v16313_v53  ;;  %vm17963_vm7 = vcmp.eq.s32.totalorder %v17838_v42, %v11232_v22  ;;  %v17972_v42 = vld [vmem:[#allocation59_spill] sm:$0xff]  ;;  %v18025_v13 = vand.u32 4294901760, %v14479_v8  ;;  %v18032_v8 = vld [vmem:[#allocation54_spill] sm:$0xff] }
 0x3d2   :  { %5984 = vmatprep.subr.mxu0 %v17956_v44  ;;  %7282 = vmatpush1.msk.msra.mxu1 %vm17957_vm6, %v16313_v53  ;;  %vm17965_vm6 = vcmp.eq.s32.totalorder %v17697_v33, %v11223_v56  ;;  %v17973_v51 = vand.u32 4294901760, %v17972_v42  ;;  %v18030_v44 = vand.u32 4294901760, %v18029_v35  ;;  %v18033_v55 = vand.u32 4294901760, %v18032_v8 }
 0x3d3   :  { %5988 = vmatpush1.msra.mxu0 %v17959_v62  ;;  %7283 = vmatprep.subr.msk.mxu1 %vm17960_vm4, %v16313_v53  ;;  %vm17968_vm4 = vcmp.eq.s32.totalorder %v17697_v33, %v11232_v22  ;;  %v17978_v33 = vld [vmem:[#allocation105_spill] sm:$0xff]  ;;  %v18051_v42 = vand.u32 4294901760, %v14624_v47  ;;  %v4244_v47 = vpop.f32.mrf.mxu1 }
 0x3d4   :  { %5992 = vmatprep.subr.mxu0 %v17962_v15  ;;  %7284 = vmatpush1.msk.msra.mxu1 %vm17963_vm7, %v16313_v53  ;;  %vm17971_vm7 = vcmp.eq.s32.totalorder %v17846_v24, %v11223_v56  ;;  %v17979_v34 = vand.u32 4294901760, %v17978_v33  ;;  %v18041_v15 = vand.u32 4294901760, %v18040_v17 }
 0x3d5   :  { %5996 = vmatpush1.msra.mxu0 %v17964_v25  ;;  %7285 = vmatprep.subr.msk.mxu1 %vm17965_vm6, %v16313_v53  ;;  %vm17974_vm6 = vcmp.eq.s32.totalorder %v17846_v24, %v11232_v22  ;;  %v17983_v24 = vld [vmem:[#allocation24_spill] sm:$0xff]  ;;  %v18044_v25 = vand.u32 4294901760, %v18043_v37 }
 0x3d6   :  { %6000 = vmatprep.subr.mxu0 %v17967_v16  ;;  %7286 = vmatpush1.msk.msra.mxu1 %vm17968_vm4, %v16313_v53  ;;  %vm17977_vm4 = vcmp.eq.s32.totalorder %v17849_v26, %v11223_v56  ;;  %v17984_v29 = vand.u32 4294901760, %v17983_v24  ;;  %v18047_v16 = vand.u32 4294901760, %v18046_v30 }
 0x3d7   :  { %6004 = vmatpush1.msra.mxu0 %v17970_v39  ;;  %7287 = vmatprep.subr.msk.mxu1 %vm17971_vm7, %v16313_v53  ;;  %vm17980_vm7 = vcmp.eq.s32.totalorder %v17849_v26, %v11232_v22  ;;  %v17989_v26 = vand.u32 4294901760, %v17988_v57  ;;  %v18050_v39 = vand.u32 4294901760, %v18049_v32 }
 0x3d8   :  { %6008 = vmatprep.subr.mxu0 %v17973_v51  ;;  %7288 = vmatpush1.msk.msra.mxu1 %vm17974_vm6, %v16313_v53  ;;  %vm17982_vm6 = vcmp.eq.s32.totalorder %v17853_v41, %v11223_v56  ;;  %v18052_v51 = vld [vmem:[#allocation130_spill] sm:$0xff] }
 0x3d9   :  { %6012 = vmatpush2.msra.mxu0 %v17976_v27  ;;  %7289 = vmatprep.subr.msk.mxu1 %vm17977_vm4, %v16313_v53  ;;  %vm17985_vm4 = vcmp.eq.s32.totalorder %v17853_v41, %v11232_v22  ;;  %v17993_v41 = vld [vmem:[#allocation96_spill] sm:$0xff]  ;;  %v18054_v27 = vld [vmem:[#allocation131_spill] sm:$0xff] }
 0x3da   :  { %6016 = vmatprep.subr.mxu0 %v17979_v34  ;;  %7290 = vmatpush1.msk.msra.mxu1 %vm17980_vm7, %v16313_v53  ;;  %vm17987_vm7 = vcmp.eq.s32.totalorder %v17857_v7, %v11223_v56  ;;  %v4246_v34 = vpop.f32.mrf.mxu1 }
 0x3db   :  { %6020 = vmatpush2.msra.mxu0 %v17981_v20  ;;  %7291 = vmatprep.subr.msk.mxu1 %vm17982_vm6, %v16313_v53  ;;  %vm17990_vm6 = vcmp.eq.s32.totalorder %v17857_v7, %v11232_v22  ;;  %v18001_v7 = vld [vmem:[#allocation30_spill] sm:$0xff] }
 0x3dc   :  { %6024 = vmatprep.subr.mxu0 %v17984_v29  ;;  %7292 = vmatpush1.msk.msra.mxu1 %vm17985_vm4, %v16313_v53  ;;  %vm17994_vm4 = vcmp.eq.s32.totalorder %v17993_v41, %v11223_v56  ;;  %v18002_v59 = vand.u32 4294901760, %v18001_v7 }
 0x3dd   :  { %6028 = vmatpush2.msra.mxu0 %v17986_v14  ;;  %7293 = vmatprep.subr.msk.mxu1 %vm17987_vm7, %v16313_v53  ;;  %vm17997_vm7 = vcmp.eq.s32.totalorder %v17993_v41, %v11232_v22 }
 0x3de   :  { %6032 = vmatprep.subr.mxu0 %v17989_v26  ;;  %7294 = vmatpush1.msk.msra.mxu1 %vm17990_vm6, %v16313_v53  ;;  %vm18000_vm6 = vcmp.eq.s32.totalorder %v17863_v40, %v11223_v56  ;;  %v4245_v26 = vadd.f32 %v4244_v47, %v3851_v28 }
 0x3df   :  { %6036 = vmatpush2.msra.mxu0 %v17992_v38  ;;  %7295 = vmatprep.subr.msk.mxu1 %vm17994_vm4, %v16313_v53  ;;  %vm18003_vm4 = vcmp.eq.s32.totalorder %v17863_v40, %v11232_v22  ;;  %v18010_v40 = vand.u32 4294901760, %v18009_v43 }
 0x3e0   :  { %6040 = vmatprep.subr.mxu0 %v17996_v5  ;;  %7296 = vmatpush1.msk.msra.mxu1 %vm17997_vm7, %v16313_v53  ;;  %vm18005_vm7 = vcmp.eq.s32.totalorder %v17867_v23, %v11223_v56  ;;  %v18014_v23 = vld [vmem:[#allocation115_spill] sm:$0xff] }
 0x3e1   :  { %6044 = vmatpush2.msra.mxu0 %v17999_v19  ;;  %7297 = vmatprep.subr.msk.mxu1 %vm18000_vm6, %v16313_v53  ;;  %vm18011_vm6 = vcmp.eq.s32.totalorder %v17871_v50, %v11232_v22  ;;  %v18015_v3 = vand.u32 4294901760, %v18014_v23  ;;  %v18019_v50 = vld [vmem:[#allocation42_spill] sm:$0xff] }
 0x3e2   :  { %6048 = vmatprep.subr.mxu0 %v18002_v59  ;;  %7298 = vmatpush2.msk.msra.mxu1 %vm18003_vm4, %v16313_v53  ;;  %vm18018_vm4 = vcmp.eq.s32.totalorder %v17876_v52, %v11223_v56  ;;  %v18020_v1 = vand.u32 4294901760, %v18019_v50 }
 0x3e3   :  { %6052 = vmatpush2.msra.mxu0 %v18004_v46  ;;  %7299 = vmatprep.subr.msk.mxu1 %vm18005_vm7, %v16313_v53  ;;  %vm18021_vm7 = vcmp.eq.s32.totalorder %v17876_v52, %v11232_v22  ;;  %v18028_v52 = vand.u32 4294901760, %v18027_v9 }
 0x3e4   :  { %6056 = vmatprep.subr.mxu0 %v18007_v54  ;;  %7300 = vmatpush2.msk.msra.mxu1 %vm608_vm8, %v16313_v53  ;;  %vm18013_vm8 = vcmp.eq.s32.totalorder %v17873_v31, %v11223_v56 }
 0x3e5   :  { %6060 = vmatpush2.msra.mxu0 %v18008_v49  ;;  %7301 = vmatprep.subr.msk.mxu1 %vm605_vm1, %v16313_v53  ;;  %vm18016_vm1 = vcmp.eq.s32.totalorder %v17873_v31, %v11232_v22  ;;  %v18023_v31 = vld [vmem:[#allocation45_spill] sm:$0xff] }
 0x3e6   :  { %6064 = vmatprep.subr.mxu0 %v18010_v40  ;;  %7302 = vmatpush2.msk.msra.mxu1 %vm18011_vm6, %v16313_v53  ;;  %v18024_v18 = vand.u32 4294901760, %v18023_v31  ;;  %vm18026_vm6 = vcmp.eq.s32.totalorder %v17880_v10, %v11223_v56  ;;  %v18037_v10 = vld [vmem:[#allocation57_spill] sm:$0xff] }
 0x3e7   :  { %6068 = vmatpush2.msra.mxu0 %v18012_v61  ;;  %7303 = vmatprep.subr.msk.mxu1 %vm18013_vm8, %v16313_v53  ;;  %v18038_v62 = vand.u32 4294901760, %v18037_v10  ;;  %vm18039_vm8 = vcmp.eq.s32.totalorder %v17885_v11, %v11232_v22 }
 0x3e8   :  { %6072 = vmatprep.subr.mxu0 %v18015_v3  ;;  %7304 = vmatpush2.msk.msra.mxu1 %vm18016_vm1, %v16313_v53 }
 0x3e9   :  { %6076 = vmatpush2.msra.mxu0 %v18017_v58  ;;  %7305 = vmatprep.subr.msk.mxu1 %vm18018_vm4, %v16313_v53 }
 0x3ea   :  { %6080 = vmatprep.subr.mxu0 %v18020_v1  ;;  %7306 = vmatpush2.msk.msra.mxu1 %vm18021_vm7, %v16313_v53 }
 0x3eb   :  { %6084 = vmatpush2.msra.mxu0 %v18022_v48  ;;  %7307 = vmatprep.subr.msk.mxu1 %vm593_vm9, %v16313_v53  ;;  %vm18034_vm9 = vcmp.eq.s32.totalorder %v17882_v60, %v11232_v22 }
 0x3ec   :  { %6088 = vmatprep.subr.mxu0 %v18024_v18  ;;  %7308 = vmatpush2.msk.msra.mxu1 %vm592_vm13, %v16313_v53  ;;  %vm18031_vm13 = vcmp.eq.s32.totalorder %v17882_v60, %v11223_v56  ;;  %v18042_v60 = vld [vmem:[#allocation49_spill] sm:$0xff] }
 0x3ed   :  { %6092 = vmatpush2.msra.mxu0 %v18025_v13  ;;  %7309 = vmatprep.subr.msk.mxu1 %vm18026_vm6, %v16313_v53  ;;  %vm18045_vm1 = vcmp.eq.s32.totalorder %v18042_v60, %v11232_v22 }
 0x3ee   :  { %6096 = vmatprep.subr.mxu0 %v18028_v52  ;;  %7310 = vmatpush2.msk.msra.mxu1 %vm588_vm15, %v16313_v53  ;;  %vm18036_vm15 = vcmp.eq.s32.totalorder %v17885_v11, %v11223_v56 }
 0x3ef   :  { %6100 = vmatpush2.msra.mxu0 %v18030_v44  ;;  %7311 = vmatprep.subr.msk.mxu1 %vm18031_vm13, %v16313_v53 }
 0x3f0   :  { %6104 = vmatprep.subr.mxu0 %v18033_v55  ;;  %7312 = vmatpush2.msk.msra.mxu1 %vm18034_vm9, %v16313_v53  ;;  %v1142_v55 = vld [vmem:[#allocation5 + $0x8] sm:$0xff] }
 0x3f1   :  { %6108 = vmatpush2.msra.mxu0 %v18035_v0  ;;  %7313 = vmatprep.subr.msk.mxu1 %vm18036_vm15, %v16313_v53 }
 0x3f2   :  { %6112 = vmatprep.subr.mxu0 %v18038_v62  ;;  %7314 = vmatpush2.msk.msra.mxu1 %vm18039_vm8, %v16313_v53 }
 0x3f3   :  { %6116 = vmatpush2.msra.mxu0 %v18041_v15  ;;  %7315 = vmatprep.subr.msk.mxu1 %vm577_vm10, %v16313_v53 }
 0x3f4   :  { %6120 = vmatprep.subr.mxu0 %v18044_v25  ;;  %7316 = vmatpush2.msk.msra.mxu1 %vm18045_vm1, %v16313_v53 }
 0x3f5   :  { %6124 = vmatpush2.msra.mxu0 %v18047_v16  ;;  %7317 = vmatprep.subr.msk.mxu1 %vm573_vm2, %v16313_v53 }
 0x3f6   :  { %6128 = vmatprep.subr.mxu0 %v18050_v39  ;;  %7318 = vmatpush2.msk.msra.mxu1 %vm572_vm12, %v16313_v53  ;;  %vm18057_vm12 = vcmp.eq.s32.totalorder %v17904_v12, %v11232_v22 }
 0x3f7   :  { %6132 = vmatpush2.msra.mxu0 %v18051_v42  ;;  %6134 = vmatprep.mubr.f32.mxu0 %v18052_v51 }
 0x3f8   :  { %7319 = vmatprep.subr.msk.mxu1 %vm569_vm14, %v16313_v53  ;;  %6136 = vmatmul.mubr.f32.vlgmr.msra.gmra.mxu0 %v18054_v27  ;;  %vm18056_vm14 = vcmp.eq.s32.totalorder %v17904_v12, %v11223_v56  ;;  %v4588_v12 = vpop.f32.mrf.mxu1 }
 0x3f9   :  { %7320 = vmatpush2.msk.msra.mxu1 %vm568_vm5, %v16313_v53  ;;  %6271 = vmatprep.mubr.f32.mxu1 %v18052_v51  ;;  %vm18055_vm5 = vcmp.eq.s32.totalorder %v17900_v45, %v11232_v22  ;;  %v3853_v45 = vpop.f32.mrf.mxu0 }
 0x3fa   :  { %7321 = vmatprep.subr.msk.mxu1 %vm565_vm3, %v16313_v53  ;;  %v4590_v29 = vpop.f32.mrf.mxu1  ;;  %v4247_v36 = vadd.f32 %v4246_v34, %v3853_v45 }
 0x3fb   :  { %7322 = vmatpush2.msk.msra.mxu1 %vm564_vm11, %v16313_v53  ;;  %vm18058_vm11 = vcmp.eq.s32.totalorder %v17909_v4, %v11223_v56  ;;  %v4447_v33 = vpop.f32.mrf.mxu0 }
 0x3fc   :  { %7323 = vmatprep.subr.msk.mxu1 %vm561_vm0, %v16313_v53  ;;  %vm18059_vm0 = vcmp.eq.s32.totalorder %v17909_v4, %v11232_v22  ;;  %v4990_v57 = vpop.f32.mrf.mxu1  ;;  %v4448_v41 = vadd.f32 %v4447_v33, %v4245_v26 }
 0x3fd   :  { %7324 = vmatpush2.msk.msra.mxu1 %vm18055_vm5, %v16313_v53  ;;  %v4449_v20 = vpop.f32.mrf.mxu0 }
 0x3fe   :  { %7325 = vmatprep.subr.msk.mxu1 %vm18056_vm14, %v16313_v53  ;;  %v4992_v38 = vpop.f32.mrf.mxu1  ;;  %v4450_v22 = vadd.f32 %v4449_v20, %v4247_v36  ;;  %v4589_v21 = vadd.f32 %v4588_v12, %v4448_v41 }
 0x3ff   :  { %7326 = vmatpush2.msk.msra.mxu1 %vm18057_vm12, %v16313_v53  ;;  %v4853_v24 = vpop.f32.mrf.mxu0 }
 0x400   :  { %7327 = vmatprep.subr.msk.mxu1 %vm18058_vm11, %v16313_v53  ;;  %v4591_v5 = vadd.f32 %v4590_v29, %v4450_v22  ;;  %v4854_v19 = vadd.f32 %v4853_v24, %v4589_v21 }
 0x401   :  { %7328 = vmatpush2.msk.msra.mxu1 %vm18059_vm0, %v16313_v53  ;;  %v4855_v14 = vpop.f32.mrf.mxu0 }
 0x402   :  { %6273 = vmatmul.mubr.f32.vlgmr.msra.gmra.mxu1 %v18054_v27  ;;  %v4856_v7 = vadd.f32 %v4855_v14, %v4591_v5  ;;  %v4991_v46 = vadd.f32 %v4990_v57, %v4854_v19 }
 0x404   :  { %v4993_v2 = vadd.f32 %v4992_v38, %v4856_v7 }
 0x434   :  { %v5135_v56 = vpop.f32.mrf.mxu0 }
 0x435   :  { %v5136_v43 = vadd.f32 %v5135_v56, %v4991_v46 }
 0x436   :  { %v5137_v53 = vpop.f32.mrf.mxu0 }
 0x437   :  { %v5138_v40 = vadd.f32 %v5137_v53, %v4993_v2 }
 0x43e   :  { %v5528_v4 = vpop.f32.mrf.mxu1 }
 0x43f   :  { %v5529_v23 = vadd.f32 %v5528_v4, %v5136_v43 }
 0x440   :  { %v5530_v59 = vpop.f32.mrf.mxu1 }
 0x441   :  { %v5531_v3 = vadd.f32 %v5530_v59, %v5138_v40 }
 0x476   :  { %v5731_v63 = vpop.f32.mrf.mxu0 }
 0x477   :  { %v5732_v50 = vadd.f32 %v5731_v63, %v5529_v23 }
 0x478   :  { %v5733_v54 = vpop.f32.mrf.mxu0 }
 0x479   :  { %v5734_v1 = vadd.f32 %v5733_v54, %v5531_v3 }
 0x480   :  { %v5872_v49 = vpop.f32.mrf.mxu1 }
 0x481   :  { %v5873_v31 = vadd.f32 %v5872_v49, %v5732_v50 }
 0x482   :  { %v5874_v58 = vpop.f32.mrf.mxu1 }
 0x483   :  { %v5875_v18 = vadd.f32 %v5874_v58, %v5734_v1 }
 0x4b8   :  { %v6137_v61 = vpop.f32.mrf.mxu0 }
 0x4b9   :  { %v6138_v9 = vadd.f32 %v6137_v61, %v5873_v31 }
 0x4ba   :  { %v6139_v48 = vpop.f32.mrf.mxu0 }
 0x4bb   :  { %v6140_v52 = vadd.f32 %v6139_v48, %v5875_v18 }
 0x4c2   :  { %v6274_v13 = vpop.f32.mrf.mxu1 }
 0x4c3   :  { %v6275_v44 = vadd.f32 %v6274_v13, %v6138_v9 }
 0x4c4   :  { %v6276_v35 = vpop.f32.mrf.mxu1 }
 0x4c5   :  { %v6277_v8 = vadd.f32 %v6276_v35, %v6140_v52 }
 0x4c7   :  { %v6284_v0 = vcombine.low %v6275_v44, %v6277_v8 }
 0x4c9   :  { %v6288_v10 = vadd.f32 %v6284_v0, %v1142_v55 }
 0x4cb   :  { %6290 = vst [vmem:[#allocation5 + $0x8] sm:$0xff] %v6288_v10 }
 0x4cc PF:  { %s7364_s3 = smov [#allocation5]  }
 0x4cd   :  { %s6297_s10 = sshll.u32 %s7364_s3, 4  ;;  %s6298_s10 = int_to_ptr.vmem [resolvable:$true] %s6297_s10 }
 0x4ce   :  { %s7338_s11 = scalar_lea.vmem %s6298_s10, 256  ;;  %p7343_p4 = scmp.lt.s32.totalorder %s6298_s10, %s6298_s10 }
 0x4cf   :  { %p7339_p3 = scmp.ne.s32.totalorder %s6298_s10, %s7338_s11  ;;  %p7344_p5 = scmp.lt.s32.totalorder %s7338_s11, %s7338_s11 }
 0x4d1   :  { %p7345_p6 = por %p7344_p5, %p7343_p4 }
 0x4d3   :  { %p7346_p7 = pnand %p7345_p6, %p7339_p3 }
 0x4d5   :  { %7349 = shalt.err (!%p7346_p7)
}
 0x4d6   :  { %6300 = dma.vmem_to_hbm [thread:$0]  %s6298_s10, 256, %s15401_s4, [#allocation6]  }
 0x4d7   :  { %7358 = dma.done.wait [#allocation6], 256  }
 0x4d8   :  { %7359 = vsyncadd [#allocation6], 4294967040 }
 0x4d9   :  { %6304 = vsyncpa [#allocation6], 1 }

</bundles_post_ra>
